<compile_context>
chip_gen: v7x
topology: tpu7x:2x2x1
jax: 0.10.0
libtpu: 0.0.40
codegen_flags: <defaults>
</compile_context>

<pallas_src>
import functools

import jax
import jax.numpy as jnp
import numpy as np
from jax.experimental import pallas as pl
from jax.experimental.pallas import tpu as pltpu


# Fixed module geometry: Conv2d 5x5, stride 1, padding 2; channels 3->20->50->50.
K = 5
PAD = 2
C_IN, C1, C2, C3 = 3, 20, 50, 50            # logical channel counts
C_INP, C1P, C2P, C3P = 8, 24, 56, 56        # sublane-padded (multiples of 8)


def _lane_shift(v, s, n):
    """Exact circular shift along the last axis: out[..., i] = v[..., (i + s) % n]."""
    s = s % n
    if s == 0:
        return v
    return jnp.concatenate([v[..., s:], v[..., :s]], axis=-1)


def _make_fused_kernel(H, W):
    npix = H * W

    def kernel(x_ref, m_ref, w1_ref, b1_ref, w2_ref, b2_ref, w3_ref, b3_ref,
               o_ref, p_ref):
        f32 = jnp.float32

        def build_slab(h, cp):
            # h: (cp, npix) activation; write im2col rows (tap-major, channel-minor).
            for t in range(K * K):
                dh = t // K - PAD
                dw = t % K - PAD
                shifted = _lane_shift(h, dh * W + dw, npix)      # (cp, npix)
                mask = m_ref[t]                                  # (1, npix)
                p_ref[t * cp:(t + 1) * cp, :] = shifted * mask

        def conv(h, cp, w_ref, b_ref):
            build_slab(h, cp)
            kc = K * K * cp
            z = jnp.dot(w_ref[...], p_ref[:kc, :],
                        preferred_element_type=f32)              # (coutp, npix)
            return z + b_ref[...]

        # Channel-pad the 3-channel input to 8 sublanes with explicit zeros
        # (keeps every slab store finite; padded weight columns are zero).
        h0 = jnp.concatenate(
            [x_ref[...], jnp.zeros((C_INP - C_IN, npix), f32)], axis=0)

        # conv1 + fused (transpose . -10 . relu . transpose . +1) == relu(z-10)+1
        h1 = jnp.maximum(conv(h0, C_INP, w1_ref, b1_ref) - 10.0, 0.0) + 1.0
        # conv2 + fused (-11 . relu)
        h2 = jnp.maximum(conv(h1, C1P, w2_ref, b2_ref) - 11.0, 0.0)
        # conv3 + fused (+1 . relu)
        h3 = jnp.maximum(conv(h2, C2P, w3_ref, b3_ref) + 1.0, 0.0)

        o_ref[...] = h3[:C3, :]

    return kernel


# ---------------- one-time parameter / constant preprocessing ----------------
def _boundary_masks(H, W):
    yy, xx = np.meshgrid(np.arange(H), np.arange(W), indexing="ij")
    yy = yy.reshape(-1)
    xx = xx.reshape(-1)
    rows = []
    for kh in range(K):
        for kw in range(K):
            dh, dw = kh - PAD, kw - PAD
            ok = ((yy + dh >= 0) & (yy + dh < H) &
                  (xx + dw >= 0) & (xx + dw < W))
            rows.append(ok.astype(np.float32))
    return jnp.asarray(np.stack(rows, 0).reshape(K * K, 1, H * W))


def _prep_weight(w, cin_p, cout_p):
    cout, cin, kh, kw = w.shape
    wt = jnp.transpose(w, (0, 2, 3, 1))                          # (cout, K, K, cin)
    wt = jnp.pad(wt, ((0, cout_p - cout), (0, 0), (0, 0), (0, cin_p - cin)))
    return wt.reshape(cout_p, kh * kw * cin_p).astype(jnp.float32)


def _prep_bias(b, cout_p):
    return jnp.pad(b, (0, cout_p - b.shape[0])).reshape(cout_p, 1).astype(jnp.float32)


def prepare_params(params, H, W):
    return dict(
        masks=_boundary_masks(H, W),
        w1=_prep_weight(params["w1"], C_INP, C1P), b1=_prep_bias(params["b1"], C1P),
        w2=_prep_weight(params["w2"], C1P, C2P),   b2=_prep_bias(params["b2"], C2P),
        w3=_prep_weight(params["w3"], C2P, C3P),   b3=_prep_bias(params["b3"], C3P),
    )


# ------------------------------- forward path --------------------------------
@functools.partial(jax.jit, static_argnames=("H", "W"))
def _fused_forward(x2d, prepped, *, H, W):
    npix = H * W
    vmem = pl.BlockSpec(memory_space=pltpu.MemorySpace.VMEM)
    slab_rows = K * K * C3P                       # 1400: reused by all three convs
    return pl.pallas_call(
        _make_fused_kernel(H, W),
        out_shape=jax.ShapeDtypeStruct((C3, npix), jnp.float32),
        in_specs=[vmem] * 8,
        out_specs=vmem,
        scratch_shapes=[pltpu.VMEM((slab_rows, npix), jnp.float32)],
    )(x2d, prepped["masks"], prepped["w1"], prepped["b1"],
      prepped["w2"], prepped["b2"], prepped["w3"], prepped["b3"])


def model_forward(x_nchw, prepped):
    assert x_nchw.shape[0] == 1, "kernel wrapper assumes batch=1 (as in the module)"
    _, c, H, W = x_nchw.shape
    assert c == C_IN
    assert (H * W) % 128 == 0, "H*W must be a multiple of 128 (lane-dense layout)"
    x2d = x_nchw[0].reshape(C_IN, H * W).astype(jnp.float32)     # free reshape
    out2d = _fused_forward(x2d, prepped, H=H, W=W)               # (50, H*W)
    return out2d.reshape(1, C3, H, W)                            # already NCHW


# ---------------- pure-JAX reference (matches the PyTorch forward) ----------------
def _conv_ref(x_nchw, w, b):
    y = jax.lax.conv_general_dilated(
        x_nchw, w, window_strides=(1, 1), padding=[(PAD, PAD), (PAD, PAD)],
        dimension_numbers=("NCHW", "OIHW", "NCHW"))
    return y + b.reshape(1, -1, 1, 1)


def model_forward_ref(x, p):
    v1 = _conv_ref(x, p["w1"], p["b1"])
    v2 = jnp.swapaxes(v1, -1, -2)
    v3 = v2 - 10.0
    v4 = jax.nn.relu(v3)
    v5 = jnp.swapaxes(v4, -1, -2)
    v6 = v5 + 1.0
    v7 = _conv_ref(v6, p["w2"], p["b2"])
    v8 = v7 - 11.0
    v9 = jax.nn.relu(v8)
    v10 = _conv_ref(v9, p["w3"], p["b3"])     # TODO(synk): stand-in for 2nd conv2 call
    v11 = v10 + 1.0
    return jax.nn.relu(v11)


if __name__ == "__main__":
    key = jax.random.PRNGKey(0)
    k_x, k1, k2, k3, kb1, kb2, kb3 = jax.random.split(key, 7)

    # Small shapes consistent with the module: batch=1, 3 input channels, 16x16 spatial.
    H = W = 16
    x = jax.random.normal(k_x, (1, 3, H, W), dtype=jnp.float32)

    params = {
        "w1": 0.1 * jax.random.normal(k1, (20, 3, 5, 5), dtype=jnp.float32),
        "b1": 0.05 * jax.random.normal(kb1, (20,), dtype=jnp.float32),
        "w2": 0.1 * jax.random.normal(k2, (50, 20, 5, 5), dtype=jnp.float32),
        "b2": 0.05 * jax.random.normal(kb2, (50,), dtype=jnp.float32),
        # TODO(synk): stand-in for the shape-inconsistent second conv2 application.
        "w3": 0.1 * jax.random.normal(k3, (50, 50, 5, 5), dtype=jnp.float32),
        "b3": 0.05 * jax.random.normal(kb3, (50,), dtype=jnp.float32),
    }

    prepped = prepare_params(params, H, W)          # one-time weight/mask re-layout
    out = jax.block_until_ready(model_forward(x, prepped))
    ref = jax.block_until_ready(model_forward_ref(x, params))

    assert out.shape == (1, 50, H, W), out.shape
    max_err = float(jnp.max(jnp.abs(out - ref)))
    assert jnp.allclose(out, ref, atol=1e-4, rtol=1e-4), max_err

    print("KERNEL_OK")
</pallas_src>

<mosaic_0001>
module attributes {stable_mosaic.version = 11 : i64} {
  func.func @kernel(%arg0: memref<3x256xf32, #tpu.memory_space<vmem>>, %arg1: memref<25x1x256xf32, #tpu.memory_space<vmem>>, %arg2: memref<24x200xf32, #tpu.memory_space<vmem>>, %arg3: memref<24x1xf32, #tpu.memory_space<vmem>>, %arg4: memref<56x600xf32, #tpu.memory_space<vmem>>, %arg5: memref<56x1xf32, #tpu.memory_space<vmem>>, %arg6: memref<56x1400xf32, #tpu.memory_space<vmem>>, %arg7: memref<56x1xf32, #tpu.memory_space<vmem>>, %arg8: memref<50x256xf32, #tpu.memory_space<vmem>>, %arg9: memref<1400x256xf32, #tpu.memory_space<vmem>>) attributes {dimension_semantics = [], scalar_prefetch = 0 : i64, scratch_operands = 1 : i64, tpu.core_type = #tpu.core_type<tc>} {
    %c0 = arith.constant 0 : index
    %c0_0 = arith.constant 0 : index
    %0 = vector.load %arg0[%c0, %c0_0] : memref<3x256xf32, #tpu.memory_space<vmem>>, vector<3x256xf32>
    %cst = arith.constant 0.000000e+00 : f32
    %1 = vector.broadcast %cst : f32 to vector<5x256xf32>
    %2 = tpu.concatenate %0, %1 in 0 : vector<3x256xf32>, vector<5x256xf32> -> vector<8x256xf32>
    %3 = vector.extract_strided_slice %2 {offsets = [0, 222], sizes = [8, 34], strides = [1, 1]} : vector<8x256xf32> to vector<8x34xf32>
    %4 = vector.extract_strided_slice %2 {offsets = [0, 0], sizes = [8, 222], strides = [1, 1]} : vector<8x256xf32> to vector<8x222xf32>
    %5 = tpu.concatenate %3, %4 in 1 : vector<8x34xf32>, vector<8x222xf32> -> vector<8x256xf32>
    %c0_1 = arith.constant 0 : index
    %c0_2 = arith.constant 0 : index
    %c0_3 = arith.constant 0 : index
    %6 = vector.load %arg1[%c0_1, %c0_2, %c0_3] : memref<25x1x256xf32, #tpu.memory_space<vmem>>, vector<1x1x256xf32>
    %7 = vector.shape_cast %6 : vector<1x1x256xf32> to vector<1x256xf32>
    %8 = vector.broadcast %7 : vector<1x256xf32> to vector<8x256xf32>
    %9 = arith.mulf %5, %8 : vector<8x256xf32>
    %c0_4 = arith.constant 0 : index
    %c0_5 = arith.constant 0 : index
    %10 = vector.load %arg9[%c0_4, %c0_5] : memref<1400x256xf32, #tpu.memory_space<vmem>>, vector<8x256xf32>
    tpu.vector_store %arg9[%c0_4, %c0_5], %9 {strides = array<i32>} : memref<1400x256xf32, #tpu.memory_space<vmem>>, vector<8x256xf32>,
    %11 = vector.extract_strided_slice %2 {offsets = [0, 223], sizes = [8, 33], strides = [1, 1]} : vector<8x256xf32> to vector<8x33xf32>
    %12 = vector.extract_strided_slice %2 {offsets = [0, 0], sizes = [8, 223], strides = [1, 1]} : vector<8x256xf32> to vector<8x223xf32>
    %13 = tpu.concatenate %11, %12 in 1 : vector<8x33xf32>, vector<8x223xf32> -> vector<8x256xf32>
    %c1 = arith.constant 1 : index
    %c0_6 = arith.constant 0 : index
    %c0_7 = arith.constant 0 : index
    %14 = vector.load %arg1[%c1, %c0_6, %c0_7] : memref<25x1x256xf32, #tpu.memory_space<vmem>>, vector<1x1x256xf32>
    %15 = vector.shape_cast %14 : vector<1x1x256xf32> to vector<1x256xf32>
    %16 = vector.broadcast %15 : vector<1x256xf32> to vector<8x256xf32>
    %17 = arith.mulf %13, %16 : vector<8x256xf32>
    %c8 = arith.constant 8 : index
    %c0_8 = arith.constant 0 : index
    %18 = vector.load %arg9[%c8, %c0_8] : memref<1400x256xf32, #tpu.memory_space<vmem>>, vector<8x256xf32>
    tpu.vector_store %arg9[%c8, %c0_8], %17 {strides = array<i32>} : memref<1400x256xf32, #tpu.memory_space<vmem>>, vector<8x256xf32>,
    %19 = vector.extract_strided_slice %2 {offsets = [0, 224], sizes = [8, 32], strides = [1, 1]} : vector<8x256xf32> to vector<8x32xf32>
    %20 = vector.extract_strided_slice %2 {offsets = [0, 0], sizes = [8, 224], strides = [1, 1]} : vector<8x256xf32> to vector<8x224xf32>
    %21 = tpu.concatenate %19, %20 in 1 : vector<8x32xf32>, vector<8x224xf32> -> vector<8x256xf32>
    %c2 = arith.constant 2 : index
    %c0_9 = arith.constant 0 : index
    %c0_10 = arith.constant 0 : index
    %22 = vector.load %arg1[%c2, %c0_9, %c0_10] : memref<25x1x256xf32, #tpu.memory_space<vmem>>, vector<1x1x256xf32>
    %23 = vector.shape_cast %22 : vector<1x1x256xf32> to vector<1x256xf32>
    %24 = vector.broadcast %23 : vector<1x256xf32> to vector<8x256xf32>
    %25 = arith.mulf %21, %24 : vector<8x256xf32>
    %c16 = arith.constant 16 : index
    %c0_11 = arith.constant 0 : index
    %26 = vector.load %arg9[%c16, %c0_11] : memref<1400x256xf32, #tpu.memory_space<vmem>>, vector<8x256xf32>
    tpu.vector_store %arg9[%c16, %c0_11], %25 {strides = array<i32>} : memref<1400x256xf32, #tpu.memory_space<vmem>>, vector<8x256xf32>,
    %27 = vector.extract_strided_slice %2 {offsets = [0, 225], sizes = [8, 31], strides = [1, 1]} : vector<8x256xf32> to vector<8x31xf32>
    %28 = vector.extract_strided_slice %2 {offsets = [0, 0], sizes = [8, 225], strides = [1, 1]} : vector<8x256xf32> to vector<8x225xf32>
    %29 = tpu.concatenate %27, %28 in 1 : vector<8x31xf32>, vector<8x225xf32> -> vector<8x256xf32>
    %c3 = arith.constant 3 : index
    %c0_12 = arith.constant 0 : index
    %c0_13 = arith.constant 0 : index
    %30 = vector.load %arg1[%c3, %c0_12, %c0_13] : memref<25x1x256xf32, #tpu.memory_space<vmem>>, vector<1x1x256xf32>
    %31 = vector.shape_cast %30 : vector<1x1x256xf32> to vector<1x256xf32>
    %32 = vector.broadcast %31 : vector<1x256xf32> to vector<8x256xf32>
    %33 = arith.mulf %29, %32 : vector<8x256xf32>
    %c24 = arith.constant 24 : index
    %c0_14 = arith.constant 0 : index
    %34 = vector.load %arg9[%c24, %c0_14] : memref<1400x256xf32, #tpu.memory_space<vmem>>, vector<8x256xf32>
    tpu.vector_store %arg9[%c24, %c0_14], %33 {strides = array<i32>} : memref<1400x256xf32, #tpu.memory_space<vmem>>, vector<8x256xf32>,
    %35 = vector.extract_strided_slice %2 {offsets = [0, 226], sizes = [8, 30], strides = [1, 1]} : vector<8x256xf32> to vector<8x30xf32>
    %36 = vector.extract_strided_slice %2 {offsets = [0, 0], sizes = [8, 226], strides = [1, 1]} : vector<8x256xf32> to vector<8x226xf32>
    %37 = tpu.concatenate %35, %36 in 1 : vector<8x30xf32>, vector<8x226xf32> -> vector<8x256xf32>
    %c4 = arith.constant 4 : index
    %c0_15 = arith.constant 0 : index
    %c0_16 = arith.constant 0 : index
    %38 = vector.load %arg1[%c4, %c0_15, %c0_16] : memref<25x1x256xf32, #tpu.memory_space<vmem>>, vector<1x1x256xf32>
    %39 = vector.shape_cast %38 : vector<1x1x256xf32> to vector<1x256xf32>
    %40 = vector.broadcast %39 : vector<1x256xf32> to vector<8x256xf32>
    %41 = arith.mulf %37, %40 : vector<8x256xf32>
    %c32 = arith.constant 32 : index
    %c0_17 = arith.constant 0 : index
    %42 = vector.load %arg9[%c32, %c0_17] : memref<1400x256xf32, #tpu.memory_space<vmem>>, vector<8x256xf32>
    tpu.vector_store %arg9[%c32, %c0_17], %41 {strides = array<i32>} : memref<1400x256xf32, #tpu.memory_space<vmem>>, vector<8x256xf32>,
    %43 = vector.extract_strided_slice %2 {offsets = [0, 238], sizes = [8, 18], strides = [1, 1]} : vector<8x256xf32> to vector<8x18xf32>
    %44 = vector.extract_strided_slice %2 {offsets = [0, 0], sizes = [8, 238], strides = [1, 1]} : vector<8x256xf32> to vector<8x238xf32>
    %45 = tpu.concatenate %43, %44 in 1 : vector<8x18xf32>, vector<8x238xf32> -> vector<8x256xf32>
    %c5 = arith.constant 5 : index
    %c0_18 = arith.constant 0 : index
    %c0_19 = arith.constant 0 : index
    %46 = vector.load %arg1[%c5, %c0_18, %c0_19] : memref<25x1x256xf32, #tpu.memory_space<vmem>>, vector<1x1x256xf32>
    %47 = vector.shape_cast %46 : vector<1x1x256xf32> to vector<1x256xf32>
    %48 = vector.broadcast %47 : vector<1x256xf32> to vector<8x256xf32>
    %49 = arith.mulf %45, %48 : vector<8x256xf32>
    %c40 = arith.constant 40 : index
    %c0_20 = arith.constant 0 : index
    %50 = vector.load %arg9[%c40, %c0_20] : memref<1400x256xf32, #tpu.memory_space<vmem>>, vector<8x256xf32>
    tpu.vector_store %arg9[%c40, %c0_20], %49 {strides = array<i32>} : memref<1400x256xf32, #tpu.memory_space<vmem>>, vector<8x256xf32>,
    %51 = vector.extract_strided_slice %2 {offsets = [0, 239], sizes = [8, 17], strides = [1, 1]} : vector<8x256xf32> to vector<8x17xf32>
    %52 = vector.extract_strided_slice %2 {offsets = [0, 0], sizes = [8, 239], strides = [1, 1]} : vector<8x256xf32> to vector<8x239xf32>
    %53 = tpu.concatenate %51, %52 in 1 : vector<8x17xf32>, vector<8x239xf32> -> vector<8x256xf32>
    %c6 = arith.constant 6 : index
    %c0_21 = arith.constant 0 : index
    %c0_22 = arith.constant 0 : index
    %54 = vector.load %arg1[%c6, %c0_21, %c0_22] : memref<25x1x256xf32, #tpu.memory_space<vmem>>, vector<1x1x256xf32>
    %55 = vector.shape_cast %54 : vector<1x1x256xf32> to vector<1x256xf32>
    %56 = vector.broadcast %55 : vector<1x256xf32> to vector<8x256xf32>
    %57 = arith.mulf %53, %56 : vector<8x256xf32>
    %c48 = arith.constant 48 : index
    %c0_23 = arith.constant 0 : index
    %58 = vector.load %arg9[%c48, %c0_23] : memref<1400x256xf32, #tpu.memory_space<vmem>>, vector<8x256xf32>
    tpu.vector_store %arg9[%c48, %c0_23], %57 {strides = array<i32>} : memref<1400x256xf32, #tpu.memory_space<vmem>>, vector<8x256xf32>,
    %59 = vector.extract_strided_slice %2 {offsets = [0, 240], sizes = [8, 16], strides = [1, 1]} : vector<8x256xf32> to vector<8x16xf32>
    %60 = vector.extract_strided_slice %2 {offsets = [0, 0], sizes = [8, 240], strides = [1, 1]} : vector<8x256xf32> to vector<8x240xf32>
    %61 = tpu.concatenate %59, %60 in 1 : vector<8x16xf32>, vector<8x240xf32> -> vector<8x256xf32>
    %c7 = arith.constant 7 : index
    %c0_24 = arith.constant 0 : index
    %c0_25 = arith.constant 0 : index
    %62 = vector.load %arg1[%c7, %c0_24, %c0_25] : memref<25x1x256xf32, #tpu.memory_space<vmem>>, vector<1x1x256xf32>
    %63 = vector.shape_cast %62 : vector<1x1x256xf32> to vector<1x256xf32>
    %64 = vector.broadcast %63 : vector<1x256xf32> to vector<8x256xf32>
    %65 = arith.mulf %61, %64 : vector<8x256xf32>
    %c56 = arith.constant 56 : index
    %c0_26 = arith.constant 0 : index
    %66 = vector.load %arg9[%c56, %c0_26] : memref<1400x256xf32, #tpu.memory_space<vmem>>, vector<8x256xf32>
    tpu.vector_store %arg9[%c56, %c0_26], %65 {strides = array<i32>} : memref<1400x256xf32, #tpu.memory_space<vmem>>, vector<8x256xf32>,
    %67 = vector.extract_strided_slice %2 {offsets = [0, 241], sizes = [8, 15], strides = [1, 1]} : vector<8x256xf32> to vector<8x15xf32>
    %68 = vector.extract_strided_slice %2 {offsets = [0, 0], sizes = [8, 241], strides = [1, 1]} : vector<8x256xf32> to vector<8x241xf32>
    %69 = tpu.concatenate %67, %68 in 1 : vector<8x15xf32>, vector<8x241xf32> -> vector<8x256xf32>
    %c8_27 = arith.constant 8 : index
    %c0_28 = arith.constant 0 : index
    %c0_29 = arith.constant 0 : index
    %70 = vector.load %arg1[%c8_27, %c0_28, %c0_29] : memref<25x1x256xf32, #tpu.memory_space<vmem>>, vector<1x1x256xf32>
    %71 = vector.shape_cast %70 : vector<1x1x256xf32> to vector<1x256xf32>
    %72 = vector.broadcast %71 : vector<1x256xf32> to vector<8x256xf32>
    %73 = arith.mulf %69, %72 : vector<8x256xf32>
    %c64 = arith.constant 64 : index
    %c0_30 = arith.constant 0 : index
    %74 = vector.load %arg9[%c64, %c0_30] : memref<1400x256xf32, #tpu.memory_space<vmem>>, vector<8x256xf32>
    tpu.vector_store %arg9[%c64, %c0_30], %73 {strides = array<i32>} : memref<1400x256xf32, #tpu.memory_space<vmem>>, vector<8x256xf32>,
    %75 = vector.extract_strided_slice %2 {offsets = [0, 242], sizes = [8, 14], strides = [1, 1]} : vector<8x256xf32> to vector<8x14xf32>
    %76 = vector.extract_strided_slice %2 {offsets = [0, 0], sizes = [8, 242], strides = [1, 1]} : vector<8x256xf32> to vector<8x242xf32>
    %77 = tpu.concatenate %75, %76 in 1 : vector<8x14xf32>, vector<8x242xf32> -> vector<8x256xf32>
    %c9 = arith.constant 9 : index
    %c0_31 = arith.constant 0 : index
    %c0_32 = arith.constant 0 : index
    %78 = vector.load %arg1[%c9, %c0_31, %c0_32] : memref<25x1x256xf32, #tpu.memory_space<vmem>>, vector<1x1x256xf32>
    %79 = vector.shape_cast %78 : vector<1x1x256xf32> to vector<1x256xf32>
    %80 = vector.broadcast %79 : vector<1x256xf32> to vector<8x256xf32>
    %81 = arith.mulf %77, %80 : vector<8x256xf32>
    %c72 = arith.constant 72 : index
    %c0_33 = arith.constant 0 : index
    %82 = vector.load %arg9[%c72, %c0_33] : memref<1400x256xf32, #tpu.memory_space<vmem>>, vector<8x256xf32>
    tpu.vector_store %arg9[%c72, %c0_33], %81 {strides = array<i32>} : memref<1400x256xf32, #tpu.memory_space<vmem>>, vector<8x256xf32>,
    %83 = vector.extract_strided_slice %2 {offsets = [0, 254], sizes = [8, 2], strides = [1, 1]} : vector<8x256xf32> to vector<8x2xf32>
    %84 = vector.extract_strided_slice %2 {offsets = [0, 0], sizes = [8, 254], strides = [1, 1]} : vector<8x256xf32> to vector<8x254xf32>
    %85 = tpu.concatenate %83, %84 in 1 : vector<8x2xf32>, vector<8x254xf32> -> vector<8x256xf32>
    %c10 = arith.constant 10 : index
    %c0_34 = arith.constant 0 : index
    %c0_35 = arith.constant 0 : index
    %86 = vector.load %arg1[%c10, %c0_34, %c0_35] : memref<25x1x256xf32, #tpu.memory_space<vmem>>, vector<1x1x256xf32>
    %87 = vector.shape_cast %86 : vector<1x1x256xf32> to vector<1x256xf32>
    %88 = vector.broadcast %87 : vector<1x256xf32> to vector<8x256xf32>
    %89 = arith.mulf %85, %88 : vector<8x256xf32>
    %c80 = arith.constant 80 : index
    %c0_36 = arith.constant 0 : index
    %90 = vector.load %arg9[%c80, %c0_36] : memref<1400x256xf32, #tpu.memory_space<vmem>>, vector<8x256xf32>
    tpu.vector_store %arg9[%c80, %c0_36], %89 {strides = array<i32>} : memref<1400x256xf32, #tpu.memory_space<vmem>>, vector<8x256xf32>,
    %91 = vector.extract_strided_slice %2 {offsets = [0, 255], sizes = [8, 1], strides = [1, 1]} : vector<8x256xf32> to vector<8x1xf32>
    %92 = vector.extract_strided_slice %2 {offsets = [0, 0], sizes = [8, 255], strides = [1, 1]} : vector<8x256xf32> to vector<8x255xf32>
    %93 = tpu.concatenate %91, %92 in 1 : vector<8x1xf32>, vector<8x255xf32> -> vector<8x256xf32>
    %c11 = arith.constant 11 : index
    %c0_37 = arith.constant 0 : index
    %c0_38 = arith.constant 0 : index
    %94 = vector.load %arg1[%c11, %c0_37, %c0_38] : memref<25x1x256xf32, #tpu.memory_space<vmem>>, vector<1x1x256xf32>
    %95 = vector.shape_cast %94 : vector<1x1x256xf32> to vector<1x256xf32>
    %96 = vector.broadcast %95 : vector<1x256xf32> to vector<8x256xf32>
    %97 = arith.mulf %93, %96 : vector<8x256xf32>
    %c88 = arith.constant 88 : index
    %c0_39 = arith.constant 0 : index
    %98 = vector.load %arg9[%c88, %c0_39] : memref<1400x256xf32, #tpu.memory_space<vmem>>, vector<8x256xf32>
    tpu.vector_store %arg9[%c88, %c0_39], %97 {strides = array<i32>} : memref<1400x256xf32, #tpu.memory_space<vmem>>, vector<8x256xf32>,
    %c12 = arith.constant 12 : index
    %c0_40 = arith.constant 0 : index
    %c0_41 = arith.constant 0 : index
    %99 = vector.load %arg1[%c12, %c0_40, %c0_41] : memref<25x1x256xf32, #tpu.memory_space<vmem>>, vector<1x1x256xf32>
    %100 = vector.shape_cast %99 : vector<1x1x256xf32> to vector<1x256xf32>
    %101 = vector.broadcast %100 : vector<1x256xf32> to vector<8x256xf32>
    %102 = arith.mulf %2, %101 : vector<8x256xf32>
    %c96 = arith.constant 96 : index
    %c0_42 = arith.constant 0 : index
    %103 = vector.load %arg9[%c96, %c0_42] : memref<1400x256xf32, #tpu.memory_space<vmem>>, vector<8x256xf32>
    tpu.vector_store %arg9[%c96, %c0_42], %102 {strides = array<i32>} : memref<1400x256xf32, #tpu.memory_space<vmem>>, vector<8x256xf32>,
    %104 = vector.extract_strided_slice %2 {offsets = [0, 1], sizes = [8, 255], strides = [1, 1]} : vector<8x256xf32> to vector<8x255xf32>
    %105 = vector.extract_strided_slice %2 {offsets = [0, 0], sizes = [8, 1], strides = [1, 1]} : vector<8x256xf32> to vector<8x1xf32>
    %106 = tpu.concatenate %104, %105 in 1 : vector<8x255xf32>, vector<8x1xf32> -> vector<8x256xf32>
    %c13 = arith.constant 13 : index
    %c0_43 = arith.constant 0 : index
    %c0_44 = arith.constant 0 : index
    %107 = vector.load %arg1[%c13, %c0_43, %c0_44] : memref<25x1x256xf32, #tpu.memory_space<vmem>>, vector<1x1x256xf32>
    %108 = vector.shape_cast %107 : vector<1x1x256xf32> to vector<1x256xf32>
    %109 = vector.broadcast %108 : vector<1x256xf32> to vector<8x256xf32>
    %110 = arith.mulf %106, %109 : vector<8x256xf32>
    %c104 = arith.constant 104 : index
    %c0_45 = arith.constant 0 : index
    %111 = vector.load %arg9[%c104, %c0_45] : memref<1400x256xf32, #tpu.memory_space<vmem>>, vector<8x256xf32>
    tpu.vector_store %arg9[%c104, %c0_45], %110 {strides = array<i32>} : memref<1400x256xf32, #tpu.memory_space<vmem>>, vector<8x256xf32>,
    %112 = vector.extract_strided_slice %2 {offsets = [0, 2], sizes = [8, 254], strides = [1, 1]} : vector<8x256xf32> to vector<8x254xf32>
    %113 = vector.extract_strided_slice %2 {offsets = [0, 0], sizes = [8, 2], strides = [1, 1]} : vector<8x256xf32> to vector<8x2xf32>
    %114 = tpu.concatenate %112, %113 in 1 : vector<8x254xf32>, vector<8x2xf32> -> vector<8x256xf32>
    %c14 = arith.constant 14 : index
    %c0_46 = arith.constant 0 : index
    %c0_47 = arith.constant 0 : index
    %115 = vector.load %arg1[%c14, %c0_46, %c0_47] : memref<25x1x256xf32, #tpu.memory_space<vmem>>, vector<1x1x256xf32>
    %116 = vector.shape_cast %115 : vector<1x1x256xf32> to vector<1x256xf32>
    %117 = vector.broadcast %116 : vector<1x256xf32> to vector<8x256xf32>
    %118 = arith.mulf %114, %117 : vector<8x256xf32>
    %c112 = arith.constant 112 : index
    %c0_48 = arith.constant 0 : index
    %119 = vector.load %arg9[%c112, %c0_48] : memref<1400x256xf32, #tpu.memory_space<vmem>>, vector<8x256xf32>
    tpu.vector_store %arg9[%c112, %c0_48], %118 {strides = array<i32>} : memref<1400x256xf32, #tpu.memory_space<vmem>>, vector<8x256xf32>,
    %120 = vector.extract_strided_slice %2 {offsets = [0, 14], sizes = [8, 242], strides = [1, 1]} : vector<8x256xf32> to vector<8x242xf32>
    %121 = vector.extract_strided_slice %2 {offsets = [0, 0], sizes = [8, 14], strides = [1, 1]} : vector<8x256xf32> to vector<8x14xf32>
    %122 = tpu.concatenate %120, %121 in 1 : vector<8x242xf32>, vector<8x14xf32> -> vector<8x256xf32>
    %c15 = arith.constant 15 : index
    %c0_49 = arith.constant 0 : index
    %c0_50 = arith.constant 0 : index
    %123 = vector.load %arg1[%c15, %c0_49, %c0_50] : memref<25x1x256xf32, #tpu.memory_space<vmem>>, vector<1x1x256xf32>
    %124 = vector.shape_cast %123 : vector<1x1x256xf32> to vector<1x256xf32>
    %125 = vector.broadcast %124 : vector<1x256xf32> to vector<8x256xf32>
    %126 = arith.mulf %122, %125 : vector<8x256xf32>
    %c120 = arith.constant 120 : index
    %c0_51 = arith.constant 0 : index
    %127 = vector.load %arg9[%c120, %c0_51] : memref<1400x256xf32, #tpu.memory_space<vmem>>, vector<8x256xf32>
    tpu.vector_store %arg9[%c120, %c0_51], %126 {strides = array<i32>} : memref<1400x256xf32, #tpu.memory_space<vmem>>, vector<8x256xf32>,
    %128 = vector.extract_strided_slice %2 {offsets = [0, 15], sizes = [8, 241], strides = [1, 1]} : vector<8x256xf32> to vector<8x241xf32>
    %129 = vector.extract_strided_slice %2 {offsets = [0, 0], sizes = [8, 15], strides = [1, 1]} : vector<8x256xf32> to vector<8x15xf32>
    %130 = tpu.concatenate %128, %129 in 1 : vector<8x241xf32>, vector<8x15xf32> -> vector<8x256xf32>
    %c16_52 = arith.constant 16 : index
    %c0_53 = arith.constant 0 : index
    %c0_54 = arith.constant 0 : index
    %131 = vector.load %arg1[%c16_52, %c0_53, %c0_54] : memref<25x1x256xf32, #tpu.memory_space<vmem>>, vector<1x1x256xf32>
    %132 = vector.shape_cast %131 : vector<1x1x256xf32> to vector<1x256xf32>
    %133 = vector.broadcast %132 : vector<1x256xf32> to vector<8x256xf32>
    %134 = arith.mulf %130, %133 : vector<8x256xf32>
    %c128 = arith.constant 128 : index
    %c0_55 = arith.constant 0 : index
    %135 = vector.load %arg9[%c128, %c0_55] : memref<1400x256xf32, #tpu.memory_space<vmem>>, vector<8x256xf32>
    tpu.vector_store %arg9[%c128, %c0_55], %134 {strides = array<i32>} : memref<1400x256xf32, #tpu.memory_space<vmem>>, vector<8x256xf32>,
    %136 = vector.extract_strided_slice %2 {offsets = [0, 16], sizes = [8, 240], strides = [1, 1]} : vector<8x256xf32> to vector<8x240xf32>
    %137 = vector.extract_strided_slice %2 {offsets = [0, 0], sizes = [8, 16], strides = [1, 1]} : vector<8x256xf32> to vector<8x16xf32>
    %138 = tpu.concatenate %136, %137 in 1 : vector<8x240xf32>, vector<8x16xf32> -> vector<8x256xf32>
    %c17 = arith.constant 17 : index
    %c0_56 = arith.constant 0 : index
    %c0_57 = arith.constant 0 : index
    %139 = vector.load %arg1[%c17, %c0_56, %c0_57] : memref<25x1x256xf32, #tpu.memory_space<vmem>>, vector<1x1x256xf32>
    %140 = vector.shape_cast %139 : vector<1x1x256xf32> to vector<1x256xf32>
    %141 = vector.broadcast %140 : vector<1x256xf32> to vector<8x256xf32>
    %142 = arith.mulf %138, %141 : vector<8x256xf32>
    %c136 = arith.constant 136 : index
    %c0_58 = arith.constant 0 : index
    %143 = vector.load %arg9[%c136, %c0_58] : memref<1400x256xf32, #tpu.memory_space<vmem>>, vector<8x256xf32>
    tpu.vector_store %arg9[%c136, %c0_58], %142 {strides = array<i32>} : memref<1400x256xf32, #tpu.memory_space<vmem>>, vector<8x256xf32>,
    %144 = vector.extract_strided_slice %2 {offsets = [0, 17], sizes = [8, 239], strides = [1, 1]} : vector<8x256xf32> to vector<8x239xf32>
    %145 = vector.extract_strided_slice %2 {offsets = [0, 0], sizes = [8, 17], strides = [1, 1]} : vector<8x256xf32> to vector<8x17xf32>
    %146 = tpu.concatenate %144, %145 in 1 : vector<8x239xf32>, vector<8x17xf32> -> vector<8x256xf32>
    %c18 = arith.constant 18 : index
    %c0_59 = arith.constant 0 : index
    %c0_60 = arith.constant 0 : index
    %147 = vector.load %arg1[%c18, %c0_59, %c0_60] : memref<25x1x256xf32, #tpu.memory_space<vmem>>, vector<1x1x256xf32>
    %148 = vector.shape_cast %147 : vector<1x1x256xf32> to vector<1x256xf32>
    %149 = vector.broadcast %148 : vector<1x256xf32> to vector<8x256xf32>
    %150 = arith.mulf %146, %149 : vector<8x256xf32>
    %c144 = arith.constant 144 : index
    %c0_61 = arith.constant 0 : index
    %151 = vector.load %arg9[%c144, %c0_61] : memref<1400x256xf32, #tpu.memory_space<vmem>>, vector<8x256xf32>
    tpu.vector_store %arg9[%c144, %c0_61], %150 {strides = array<i32>} : memref<1400x256xf32, #tpu.memory_space<vmem>>, vector<8x256xf32>,
    %152 = vector.extract_strided_slice %2 {offsets = [0, 18], sizes = [8, 238], strides = [1, 1]} : vector<8x256xf32> to vector<8x238xf32>
    %153 = vector.extract_strided_slice %2 {offsets = [0, 0], sizes = [8, 18], strides = [1, 1]} : vector<8x256xf32> to vector<8x18xf32>
    %154 = tpu.concatenate %152, %153 in 1 : vector<8x238xf32>, vector<8x18xf32> -> vector<8x256xf32>
    %c19 = arith.constant 19 : index
    %c0_62 = arith.constant 0 : index
    %c0_63 = arith.constant 0 : index
    %155 = vector.load %arg1[%c19, %c0_62, %c0_63] : memref<25x1x256xf32, #tpu.memory_space<vmem>>, vector<1x1x256xf32>
    %156 = vector.shape_cast %155 : vector<1x1x256xf32> to vector<1x256xf32>
    %157 = vector.broadcast %156 : vector<1x256xf32> to vector<8x256xf32>
    %158 = arith.mulf %154, %157 : vector<8x256xf32>
    %c152 = arith.constant 152 : index
    %c0_64 = arith.constant 0 : index
    %159 = vector.load %arg9[%c152, %c0_64] : memref<1400x256xf32, #tpu.memory_space<vmem>>, vector<8x256xf32>
    tpu.vector_store %arg9[%c152, %c0_64], %158 {strides = array<i32>} : memref<1400x256xf32, #tpu.memory_space<vmem>>, vector<8x256xf32>,
    %160 = vector.extract_strided_slice %2 {offsets = [0, 30], sizes = [8, 226], strides = [1, 1]} : vector<8x256xf32> to vector<8x226xf32>
    %161 = vector.extract_strided_slice %2 {offsets = [0, 0], sizes = [8, 30], strides = [1, 1]} : vector<8x256xf32> to vector<8x30xf32>
    %162 = tpu.concatenate %160, %161 in 1 : vector<8x226xf32>, vector<8x30xf32> -> vector<8x256xf32>
    %c20 = arith.constant 20 : index
    %c0_65 = arith.constant 0 : index
    %c0_66 = arith.constant 0 : index
    %163 = vector.load %arg1[%c20, %c0_65, %c0_66] : memref<25x1x256xf32, #tpu.memory_space<vmem>>, vector<1x1x256xf32>
    %164 = vector.shape_cast %163 : vector<1x1x256xf32> to vector<1x256xf32>
    %165 = vector.broadcast %164 : vector<1x256xf32> to vector<8x256xf32>
    %166 = arith.mulf %162, %165 : vector<8x256xf32>
    %c160 = arith.constant 160 : index
    %c0_67 = arith.constant 0 : index
    %167 = vector.load %arg9[%c160, %c0_67] : memref<1400x256xf32, #tpu.memory_space<vmem>>, vector<8x256xf32>
    tpu.vector_store %arg9[%c160, %c0_67], %166 {strides = array<i32>} : memref<1400x256xf32, #tpu.memory_space<vmem>>, vector<8x256xf32>,
    %168 = vector.extract_strided_slice %2 {offsets = [0, 31], sizes = [8, 225], strides = [1, 1]} : vector<8x256xf32> to vector<8x225xf32>
    %169 = vector.extract_strided_slice %2 {offsets = [0, 0], sizes = [8, 31], strides = [1, 1]} : vector<8x256xf32> to vector<8x31xf32>
    %170 = tpu.concatenate %168, %169 in 1 : vector<8x225xf32>, vector<8x31xf32> -> vector<8x256xf32>
    %c21 = arith.constant 21 : index
    %c0_68 = arith.constant 0 : index
    %c0_69 = arith.constant 0 : index
    %171 = vector.load %arg1[%c21, %c0_68, %c0_69] : memref<25x1x256xf32, #tpu.memory_space<vmem>>, vector<1x1x256xf32>
    %172 = vector.shape_cast %171 : vector<1x1x256xf32> to vector<1x256xf32>
    %173 = vector.broadcast %172 : vector<1x256xf32> to vector<8x256xf32>
    %174 = arith.mulf %170, %173 : vector<8x256xf32>
    %c168 = arith.constant 168 : index
    %c0_70 = arith.constant 0 : index
    %175 = vector.load %arg9[%c168, %c0_70] : memref<1400x256xf32, #tpu.memory_space<vmem>>, vector<8x256xf32>
    tpu.vector_store %arg9[%c168, %c0_70], %174 {strides = array<i32>} : memref<1400x256xf32, #tpu.memory_space<vmem>>, vector<8x256xf32>,
    %176 = vector.extract_strided_slice %2 {offsets = [0, 32], sizes = [8, 224], strides = [1, 1]} : vector<8x256xf32> to vector<8x224xf32>
    %177 = vector.extract_strided_slice %2 {offsets = [0, 0], sizes = [8, 32], strides = [1, 1]} : vector<8x256xf32> to vector<8x32xf32>
    %178 = tpu.concatenate %176, %177 in 1 : vector<8x224xf32>, vector<8x32xf32> -> vector<8x256xf32>
    %c22 = arith.constant 22 : index
    %c0_71 = arith.constant 0 : index
    %c0_72 = arith.constant 0 : index
    %179 = vector.load %arg1[%c22, %c0_71, %c0_72] : memref<25x1x256xf32, #tpu.memory_space<vmem>>, vector<1x1x256xf32>
    %180 = vector.shape_cast %179 : vector<1x1x256xf32> to vector<1x256xf32>
    %181 = vector.broadcast %180 : vector<1x256xf32> to vector<8x256xf32>
    %182 = arith.mulf %178, %181 : vector<8x256xf32>
    %c176 = arith.constant 176 : index
    %c0_73 = arith.constant 0 : index
    %183 = vector.load %arg9[%c176, %c0_73] : memref<1400x256xf32, #tpu.memory_space<vmem>>, vector<8x256xf32>
    tpu.vector_store %arg9[%c176, %c0_73], %182 {strides = array<i32>} : memref<1400x256xf32, #tpu.memory_space<vmem>>, vector<8x256xf32>,
    %184 = vector.extract_strided_slice %2 {offsets = [0, 33], sizes = [8, 223], strides = [1, 1]} : vector<8x256xf32> to vector<8x223xf32>
    %185 = vector.extract_strided_slice %2 {offsets = [0, 0], sizes = [8, 33], strides = [1, 1]} : vector<8x256xf32> to vector<8x33xf32>
    %186 = tpu.concatenate %184, %185 in 1 : vector<8x223xf32>, vector<8x33xf32> -> vector<8x256xf32>
    %c23 = arith.constant 23 : index
    %c0_74 = arith.constant 0 : index
    %c0_75 = arith.constant 0 : index
    %187 = vector.load %arg1[%c23, %c0_74, %c0_75] : memref<25x1x256xf32, #tpu.memory_space<vmem>>, vector<1x1x256xf32>
    %188 = vector.shape_cast %187 : vector<1x1x256xf32> to vector<1x256xf32>
    %189 = vector.broadcast %188 : vector<1x256xf32> to vector<8x256xf32>
    %190 = arith.mulf %186, %189 : vector<8x256xf32>
    %c184 = arith.constant 184 : index
    %c0_76 = arith.constant 0 : index
    %191 = vector.load %arg9[%c184, %c0_76] : memref<1400x256xf32, #tpu.memory_space<vmem>>, vector<8x256xf32>
    tpu.vector_store %arg9[%c184, %c0_76], %190 {strides = array<i32>} : memref<1400x256xf32, #tpu.memory_space<vmem>>, vector<8x256xf32>,
    %192 = vector.extract_strided_slice %2 {offsets = [0, 34], sizes = [8, 222], strides = [1, 1]} : vector<8x256xf32> to vector<8x222xf32>
    %193 = vector.extract_strided_slice %2 {offsets = [0, 0], sizes = [8, 34], strides = [1, 1]} : vector<8x256xf32> to vector<8x34xf32>
    %194 = tpu.concatenate %192, %193 in 1 : vector<8x222xf32>, vector<8x34xf32> -> vector<8x256xf32>
    %c24_77 = arith.constant 24 : index
    %c0_78 = arith.constant 0 : index
    %c0_79 = arith.constant 0 : index
    %195 = vector.load %arg1[%c24_77, %c0_78, %c0_79] : memref<25x1x256xf32, #tpu.memory_space<vmem>>, vector<1x1x256xf32>
    %196 = vector.shape_cast %195 : vector<1x1x256xf32> to vector<1x256xf32>
    %197 = vector.broadcast %196 : vector<1x256xf32> to vector<8x256xf32>
    %198 = arith.mulf %194, %197 : vector<8x256xf32>
    %c192 = arith.constant 192 : index
    %c0_80 = arith.constant 0 : index
    %199 = vector.load %arg9[%c192, %c0_80] : memref<1400x256xf32, #tpu.memory_space<vmem>>, vector<8x256xf32>
    tpu.vector_store %arg9[%c192, %c0_80], %198 {strides = array<i32>} : memref<1400x256xf32, #tpu.memory_space<vmem>>, vector<8x256xf32>,
    %c0_81 = arith.constant 0 : index
    %c0_82 = arith.constant 0 : index
    %200 = vector.load %arg2[%c0_81, %c0_82] : memref<24x200xf32, #tpu.memory_space<vmem>>, vector<24x200xf32>
    %c0_83 = arith.constant 0 : index
    %c0_84 = arith.constant 0 : index
    %201 = vector.load %arg9[%c0_83, %c0_84] : memref<1400x256xf32, #tpu.memory_space<vmem>>, vector<200x256xf32>
    %cst_85 = arith.constant dense<0.000000e+00> : vector<24x256xf32>
    %202 = tpu.matmul %200, %201, %cst_85 {dimension_numbers = #tpu.dot_dimension_numbers<[1], [0], [0], [1], [0, 0, 1, 1], [], []>} : vector<24x200xf32>, vector<200x256xf32>, vector<24x256xf32> -> vector<24x256xf32>
    %c0_86 = arith.constant 0 : index
    %c0_87 = arith.constant 0 : index
    %203 = vector.load %arg3[%c0_86, %c0_87] : memref<24x1xf32, #tpu.memory_space<vmem>>, vector<24x1xf32>
    %204 = vector.broadcast %203 : vector<24x1xf32> to vector<24x256xf32>
    %205 = arith.addf %202, %204 : vector<24x256xf32>
    %cst_88 = arith.constant 1.000000e+01 : f32
    %206 = vector.broadcast %cst_88 : f32 to vector<24x256xf32>
    %207 = arith.subf %205, %206 : vector<24x256xf32>
    %cst_89 = arith.constant 0.000000e+00 : f32
    %208 = vector.broadcast %cst_89 : f32 to vector<24x256xf32>
    %209 = arith.maximumf %207, %208 : vector<24x256xf32>
    %cst_90 = arith.constant 1.000000e+00 : f32
    %210 = vector.broadcast %cst_90 : f32 to vector<24x256xf32>
    %211 = arith.addf %209, %210 : vector<24x256xf32>
    %212 = vector.extract_strided_slice %211 {offsets = [0, 222], sizes = [24, 34], strides = [1, 1]} : vector<24x256xf32> to vector<24x34xf32>
    %213 = vector.extract_strided_slice %211 {offsets = [0, 0], sizes = [24, 222], strides = [1, 1]} : vector<24x256xf32> to vector<24x222xf32>
    %214 = tpu.concatenate %212, %213 in 1 : vector<24x34xf32>, vector<24x222xf32> -> vector<24x256xf32>
    %c0_91 = arith.constant 0 : index
    %c0_92 = arith.constant 0 : index
    %c0_93 = arith.constant 0 : index
    %215 = vector.load %arg1[%c0_91, %c0_92, %c0_93] : memref<25x1x256xf32, #tpu.memory_space<vmem>>, vector<1x1x256xf32>
    %216 = vector.shape_cast %215 : vector<1x1x256xf32> to vector<1x256xf32>
    %217 = vector.broadcast %216 : vector<1x256xf32> to vector<24x256xf32>
    %218 = arith.mulf %214, %217 : vector<24x256xf32>
    %c0_94 = arith.constant 0 : index
    %c0_95 = arith.constant 0 : index
    %219 = vector.load %arg9[%c0_94, %c0_95] : memref<1400x256xf32, #tpu.memory_space<vmem>>, vector<24x256xf32>
    tpu.vector_store %arg9[%c0_94, %c0_95], %218 {strides = array<i32>} : memref<1400x256xf32, #tpu.memory_space<vmem>>, vector<24x256xf32>,
    %220 = vector.extract_strided_slice %211 {offsets = [0, 223], sizes = [24, 33], strides = [1, 1]} : vector<24x256xf32> to vector<24x33xf32>
    %221 = vector.extract_strided_slice %211 {offsets = [0, 0], sizes = [24, 223], strides = [1, 1]} : vector<24x256xf32> to vector<24x223xf32>
    %222 = tpu.concatenate %220, %221 in 1 : vector<24x33xf32>, vector<24x223xf32> -> vector<24x256xf32>
    %c1_96 = arith.constant 1 : index
    %c0_97 = arith.constant 0 : index
    %c0_98 = arith.constant 0 : index
    %223 = vector.load %arg1[%c1_96, %c0_97, %c0_98] : memref<25x1x256xf32, #tpu.memory_space<vmem>>, vector<1x1x256xf32>
    %224 = vector.shape_cast %223 : vector<1x1x256xf32> to vector<1x256xf32>
    %225 = vector.broadcast %224 : vector<1x256xf32> to vector<24x256xf32>
    %226 = arith.mulf %222, %225 : vector<24x256xf32>
    %c24_99 = arith.constant 24 : index
    %c0_100 = arith.constant 0 : index
    %227 = vector.load %arg9[%c24_99, %c0_100] : memref<1400x256xf32, #tpu.memory_space<vmem>>, vector<24x256xf32>
    tpu.vector_store %arg9[%c24_99, %c0_100], %226 {strides = array<i32>} : memref<1400x256xf32, #tpu.memory_space<vmem>>, vector<24x256xf32>,
    %228 = vector.extract_strided_slice %211 {offsets = [0, 224], sizes = [24, 32], strides = [1, 1]} : vector<24x256xf32> to vector<24x32xf32>
    %229 = vector.extract_strided_slice %211 {offsets = [0, 0], sizes = [24, 224], strides = [1, 1]} : vector<24x256xf32> to vector<24x224xf32>
    %230 = tpu.concatenate %228, %229 in 1 : vector<24x32xf32>, vector<24x224xf32> -> vector<24x256xf32>
    %c2_101 = arith.constant 2 : index
    %c0_102 = arith.constant 0 : index
    %c0_103 = arith.constant 0 : index
    %231 = vector.load %arg1[%c2_101, %c0_102, %c0_103] : memref<25x1x256xf32, #tpu.memory_space<vmem>>, vector<1x1x256xf32>
    %232 = vector.shape_cast %231 : vector<1x1x256xf32> to vector<1x256xf32>
    %233 = vector.broadcast %232 : vector<1x256xf32> to vector<24x256xf32>
    %234 = arith.mulf %230, %233 : vector<24x256xf32>
    %c48_104 = arith.constant 48 : index
    %c0_105 = arith.constant 0 : index
    %235 = vector.load %arg9[%c48_104, %c0_105] : memref<1400x256xf32, #tpu.memory_space<vmem>>, vector<24x256xf32>
    tpu.vector_store %arg9[%c48_104, %c0_105], %234 {strides = array<i32>} : memref<1400x256xf32, #tpu.memory_space<vmem>>, vector<24x256xf32>,
    %236 = vector.extract_strided_slice %211 {offsets = [0, 225], sizes = [24, 31], strides = [1, 1]} : vector<24x256xf32> to vector<24x31xf32>
    %237 = vector.extract_strided_slice %211 {offsets = [0, 0], sizes = [24, 225], strides = [1, 1]} : vector<24x256xf32> to vector<24x225xf32>
    %238 = tpu.concatenate %236, %237 in 1 : vector<24x31xf32>, vector<24x225xf32> -> vector<24x256xf32>
    %c3_106 = arith.constant 3 : index
    %c0_107 = arith.constant 0 : index
    %c0_108 = arith.constant 0 : index
    %239 = vector.load %arg1[%c3_106, %c0_107, %c0_108] : memref<25x1x256xf32, #tpu.memory_space<vmem>>, vector<1x1x256xf32>
    %240 = vector.shape_cast %239 : vector<1x1x256xf32> to vector<1x256xf32>
    %241 = vector.broadcast %240 : vector<1x256xf32> to vector<24x256xf32>
    %242 = arith.mulf %238, %241 : vector<24x256xf32>
    %c72_109 = arith.constant 72 : index
    %c0_110 = arith.constant 0 : index
    %243 = vector.load %arg9[%c72_109, %c0_110] : memref<1400x256xf32, #tpu.memory_space<vmem>>, vector<24x256xf32>
    tpu.vector_store %arg9[%c72_109, %c0_110], %242 {strides = array<i32>} : memref<1400x256xf32, #tpu.memory_space<vmem>>, vector<24x256xf32>,
    %244 = vector.extract_strided_slice %211 {offsets = [0, 226], sizes = [24, 30], strides = [1, 1]} : vector<24x256xf32> to vector<24x30xf32>
    %245 = vector.extract_strided_slice %211 {offsets = [0, 0], sizes = [24, 226], strides = [1, 1]} : vector<24x256xf32> to vector<24x226xf32>
    %246 = tpu.concatenate %244, %245 in 1 : vector<24x30xf32>, vector<24x226xf32> -> vector<24x256xf32>
    %c4_111 = arith.constant 4 : index
    %c0_112 = arith.constant 0 : index
    %c0_113 = arith.constant 0 : index
    %247 = vector.load %arg1[%c4_111, %c0_112, %c0_113] : memref<25x1x256xf32, #tpu.memory_space<vmem>>, vector<1x1x256xf32>
    %248 = vector.shape_cast %247 : vector<1x1x256xf32> to vector<1x256xf32>
    %249 = vector.broadcast %248 : vector<1x256xf32> to vector<24x256xf32>
    %250 = arith.mulf %246, %249 : vector<24x256xf32>
    %c96_114 = arith.constant 96 : index
    %c0_115 = arith.constant 0 : index
    %251 = vector.load %arg9[%c96_114, %c0_115] : memref<1400x256xf32, #tpu.memory_space<vmem>>, vector<24x256xf32>
    tpu.vector_store %arg9[%c96_114, %c0_115], %250 {strides = array<i32>} : memref<1400x256xf32, #tpu.memory_space<vmem>>, vector<24x256xf32>,
    %252 = vector.extract_strided_slice %211 {offsets = [0, 238], sizes = [24, 18], strides = [1, 1]} : vector<24x256xf32> to vector<24x18xf32>
    %253 = vector.extract_strided_slice %211 {offsets = [0, 0], sizes = [24, 238], strides = [1, 1]} : vector<24x256xf32> to vector<24x238xf32>
    %254 = tpu.concatenate %252, %253 in 1 : vector<24x18xf32>, vector<24x238xf32> -> vector<24x256xf32>
    %c5_116 = arith.constant 5 : index
    %c0_117 = arith.constant 0 : index
    %c0_118 = arith.constant 0 : index
    %255 = vector.load %arg1[%c5_116, %c0_117, %c0_118] : memref<25x1x256xf32, #tpu.memory_space<vmem>>, vector<1x1x256xf32>
    %256 = vector.shape_cast %255 : vector<1x1x256xf32> to vector<1x256xf32>
    %257 = vector.broadcast %256 : vector<1x256xf32> to vector<24x256xf32>
    %258 = arith.mulf %254, %257 : vector<24x256xf32>
    %c120_119 = arith.constant 120 : index
    %c0_120 = arith.constant 0 : index
    %259 = vector.load %arg9[%c120_119, %c0_120] : memref<1400x256xf32, #tpu.memory_space<vmem>>, vector<24x256xf32>
    tpu.vector_store %arg9[%c120_119, %c0_120], %258 {strides = array<i32>} : memref<1400x256xf32, #tpu.memory_space<vmem>>, vector<24x256xf32>,
    %260 = vector.extract_strided_slice %211 {offsets = [0, 239], sizes = [24, 17], strides = [1, 1]} : vector<24x256xf32> to vector<24x17xf32>
    %261 = vector.extract_strided_slice %211 {offsets = [0, 0], sizes = [24, 239], strides = [1, 1]} : vector<24x256xf32> to vector<24x239xf32>
    %262 = tpu.concatenate %260, %261 in 1 : vector<24x17xf32>, vector<24x239xf32> -> vector<24x256xf32>
    %c6_121 = arith.constant 6 : index
    %c0_122 = arith.constant 0 : index
    %c0_123 = arith.constant 0 : index
    %263 = vector.load %arg1[%c6_121, %c0_122, %c0_123] : memref<25x1x256xf32, #tpu.memory_space<vmem>>, vector<1x1x256xf32>
    %264 = vector.shape_cast %263 : vector<1x1x256xf32> to vector<1x256xf32>
    %265 = vector.broadcast %264 : vector<1x256xf32> to vector<24x256xf32>
    %266 = arith.mulf %262, %265 : vector<24x256xf32>
    %c144_124 = arith.constant 144 : index
    %c0_125 = arith.constant 0 : index
    %267 = vector.load %arg9[%c144_124, %c0_125] : memref<1400x256xf32, #tpu.memory_space<vmem>>, vector<24x256xf32>
    tpu.vector_store %arg9[%c144_124, %c0_125], %266 {strides = array<i32>} : memref<1400x256xf32, #tpu.memory_space<vmem>>, vector<24x256xf32>,
    %268 = vector.extract_strided_slice %211 {offsets = [0, 240], sizes = [24, 16], strides = [1, 1]} : vector<24x256xf32> to vector<24x16xf32>
    %269 = vector.extract_strided_slice %211 {offsets = [0, 0], sizes = [24, 240], strides = [1, 1]} : vector<24x256xf32> to vector<24x240xf32>
    %270 = tpu.concatenate %268, %269 in 1 : vector<24x16xf32>, vector<24x240xf32> -> vector<24x256xf32>
    %c7_126 = arith.constant 7 : index
    %c0_127 = arith.constant 0 : index
    %c0_128 = arith.constant 0 : index
    %271 = vector.load %arg1[%c7_126, %c0_127, %c0_128] : memref<25x1x256xf32, #tpu.memory_space<vmem>>, vector<1x1x256xf32>
    %272 = vector.shape_cast %271 : vector<1x1x256xf32> to vector<1x256xf32>
    %273 = vector.broadcast %272 : vector<1x256xf32> to vector<24x256xf32>
    %274 = arith.mulf %270, %273 : vector<24x256xf32>
    %c168_129 = arith.constant 168 : index
    %c0_130 = arith.constant 0 : index
    %275 = vector.load %arg9[%c168_129, %c0_130] : memref<1400x256xf32, #tpu.memory_space<vmem>>, vector<24x256xf32>
    tpu.vector_store %arg9[%c168_129, %c0_130], %274 {strides = array<i32>} : memref<1400x256xf32, #tpu.memory_space<vmem>>, vector<24x256xf32>,
    %276 = vector.extract_strided_slice %211 {offsets = [0, 241], sizes = [24, 15], strides = [1, 1]} : vector<24x256xf32> to vector<24x15xf32>
    %277 = vector.extract_strided_slice %211 {offsets = [0, 0], sizes = [24, 241], strides = [1, 1]} : vector<24x256xf32> to vector<24x241xf32>
    %278 = tpu.concatenate %276, %277 in 1 : vector<24x15xf32>, vector<24x241xf32> -> vector<24x256xf32>
    %c8_131 = arith.constant 8 : index
    %c0_132 = arith.constant 0 : index
    %c0_133 = arith.constant 0 : index
    %279 = vector.load %arg1[%c8_131, %c0_132, %c0_133] : memref<25x1x256xf32, #tpu.memory_space<vmem>>, vector<1x1x256xf32>
    %280 = vector.shape_cast %279 : vector<1x1x256xf32> to vector<1x256xf32>
    %281 = vector.broadcast %280 : vector<1x256xf32> to vector<24x256xf32>
    %282 = arith.mulf %278, %281 : vector<24x256xf32>
    %c192_134 = arith.constant 192 : index
    %c0_135 = arith.constant 0 : index
    %283 = vector.load %arg9[%c192_134, %c0_135] : memref<1400x256xf32, #tpu.memory_space<vmem>>, vector<24x256xf32>
    tpu.vector_store %arg9[%c192_134, %c0_135], %282 {strides = array<i32>} : memref<1400x256xf32, #tpu.memory_space<vmem>>, vector<24x256xf32>,
    %284 = vector.extract_strided_slice %211 {offsets = [0, 242], sizes = [24, 14], strides = [1, 1]} : vector<24x256xf32> to vector<24x14xf32>
    %285 = vector.extract_strided_slice %211 {offsets = [0, 0], sizes = [24, 242], strides = [1, 1]} : vector<24x256xf32> to vector<24x242xf32>
    %286 = tpu.concatenate %284, %285 in 1 : vector<24x14xf32>, vector<24x242xf32> -> vector<24x256xf32>
    %c9_136 = arith.constant 9 : index
    %c0_137 = arith.constant 0 : index
    %c0_138 = arith.constant 0 : index
    %287 = vector.load %arg1[%c9_136, %c0_137, %c0_138] : memref<25x1x256xf32, #tpu.memory_space<vmem>>, vector<1x1x256xf32>
    %288 = vector.shape_cast %287 : vector<1x1x256xf32> to vector<1x256xf32>
    %289 = vector.broadcast %288 : vector<1x256xf32> to vector<24x256xf32>
    %290 = arith.mulf %286, %289 : vector<24x256xf32>
    %c216 = arith.constant 216 : index
    %c0_139 = arith.constant 0 : index
    %291 = vector.load %arg9[%c216, %c0_139] : memref<1400x256xf32, #tpu.memory_space<vmem>>, vector<24x256xf32>
    tpu.vector_store %arg9[%c216, %c0_139], %290 {strides = array<i32>} : memref<1400x256xf32, #tpu.memory_space<vmem>>, vector<24x256xf32>,
    %292 = vector.extract_strided_slice %211 {offsets = [0, 254], sizes = [24, 2], strides = [1, 1]} : vector<24x256xf32> to vector<24x2xf32>
    %293 = vector.extract_strided_slice %211 {offsets = [0, 0], sizes = [24, 254], strides = [1, 1]} : vector<24x256xf32> to vector<24x254xf32>
    %294 = tpu.concatenate %292, %293 in 1 : vector<24x2xf32>, vector<24x254xf32> -> vector<24x256xf32>
    %c10_140 = arith.constant 10 : index
    %c0_141 = arith.constant 0 : index
    %c0_142 = arith.constant 0 : index
    %295 = vector.load %arg1[%c10_140, %c0_141, %c0_142] : memref<25x1x256xf32, #tpu.memory_space<vmem>>, vector<1x1x256xf32>
    %296 = vector.shape_cast %295 : vector<1x1x256xf32> to vector<1x256xf32>
    %297 = vector.broadcast %296 : vector<1x256xf32> to vector<24x256xf32>
    %298 = arith.mulf %294, %297 : vector<24x256xf32>
    %c240 = arith.constant 240 : index
    %c0_143 = arith.constant 0 : index
    %299 = vector.load %arg9[%c240, %c0_143] : memref<1400x256xf32, #tpu.memory_space<vmem>>, vector<24x256xf32>
    tpu.vector_store %arg9[%c240, %c0_143], %298 {strides = array<i32>} : memref<1400x256xf32, #tpu.memory_space<vmem>>, vector<24x256xf32>,
    %300 = vector.extract_strided_slice %211 {offsets = [0, 255], sizes = [24, 1], strides = [1, 1]} : vector<24x256xf32> to vector<24x1xf32>
    %301 = vector.extract_strided_slice %211 {offsets = [0, 0], sizes = [24, 255], strides = [1, 1]} : vector<24x256xf32> to vector<24x255xf32>
    %302 = tpu.concatenate %300, %301 in 1 : vector<24x1xf32>, vector<24x255xf32> -> vector<24x256xf32>
    %c11_144 = arith.constant 11 : index
    %c0_145 = arith.constant 0 : index
    %c0_146 = arith.constant 0 : index
    %303 = vector.load %arg1[%c11_144, %c0_145, %c0_146] : memref<25x1x256xf32, #tpu.memory_space<vmem>>, vector<1x1x256xf32>
    %304 = vector.shape_cast %303 : vector<1x1x256xf32> to vector<1x256xf32>
    %305 = vector.broadcast %304 : vector<1x256xf32> to vector<24x256xf32>
    %306 = arith.mulf %302, %305 : vector<24x256xf32>
    %c264 = arith.constant 264 : index
    %c0_147 = arith.constant 0 : index
    %307 = vector.load %arg9[%c264, %c0_147] : memref<1400x256xf32, #tpu.memory_space<vmem>>, vector<24x256xf32>
    tpu.vector_store %arg9[%c264, %c0_147], %306 {strides = array<i32>} : memref<1400x256xf32, #tpu.memory_space<vmem>>, vector<24x256xf32>,
    %c12_148 = arith.constant 12 : index
    %c0_149 = arith.constant 0 : index
    %c0_150 = arith.constant 0 : index
    %308 = vector.load %arg1[%c12_148, %c0_149, %c0_150] : memref<25x1x256xf32, #tpu.memory_space<vmem>>, vector<1x1x256xf32>
    %309 = vector.shape_cast %308 : vector<1x1x256xf32> to vector<1x256xf32>
    %310 = vector.broadcast %309 : vector<1x256xf32> to vector<24x256xf32>
    %311 = arith.mulf %211, %310 : vector<24x256xf32>
    %c288 = arith.constant 288 : index
    %c0_151 = arith.constant 0 : index
    %312 = vector.load %arg9[%c288, %c0_151] : memref<1400x256xf32, #tpu.memory_space<vmem>>, vector<24x256xf32>
    tpu.vector_store %arg9[%c288, %c0_151], %311 {strides = array<i32>} : memref<1400x256xf32, #tpu.memory_space<vmem>>, vector<24x256xf32>,
    %313 = vector.extract_strided_slice %211 {offsets = [0, 1], sizes = [24, 255], strides = [1, 1]} : vector<24x256xf32> to vector<24x255xf32>
    %314 = vector.extract_strided_slice %211 {offsets = [0, 0], sizes = [24, 1], strides = [1, 1]} : vector<24x256xf32> to vector<24x1xf32>
    %315 = tpu.concatenate %313, %314 in 1 : vector<24x255xf32>, vector<24x1xf32> -> vector<24x256xf32>
    %c13_152 = arith.constant 13 : index
    %c0_153 = arith.constant 0 : index
    %c0_154 = arith.constant 0 : index
    %316 = vector.load %arg1[%c13_152, %c0_153, %c0_154] : memref<25x1x256xf32, #tpu.memory_space<vmem>>, vector<1x1x256xf32>
    %317 = vector.shape_cast %316 : vector<1x1x256xf32> to vector<1x256xf32>
    %318 = vector.broadcast %317 : vector<1x256xf32> to vector<24x256xf32>
    %319 = arith.mulf %315, %318 : vector<24x256xf32>
    %c312 = arith.constant 312 : index
    %c0_155 = arith.constant 0 : index
    %320 = vector.load %arg9[%c312, %c0_155] : memref<1400x256xf32, #tpu.memory_space<vmem>>, vector<24x256xf32>
    tpu.vector_store %arg9[%c312, %c0_155], %319 {strides = array<i32>} : memref<1400x256xf32, #tpu.memory_space<vmem>>, vector<24x256xf32>,
    %321 = vector.extract_strided_slice %211 {offsets = [0, 2], sizes = [24, 254], strides = [1, 1]} : vector<24x256xf32> to vector<24x254xf32>
    %322 = vector.extract_strided_slice %211 {offsets = [0, 0], sizes = [24, 2], strides = [1, 1]} : vector<24x256xf32> to vector<24x2xf32>
    %323 = tpu.concatenate %321, %322 in 1 : vector<24x254xf32>, vector<24x2xf32> -> vector<24x256xf32>
    %c14_156 = arith.constant 14 : index
    %c0_157 = arith.constant 0 : index
    %c0_158 = arith.constant 0 : index
    %324 = vector.load %arg1[%c14_156, %c0_157, %c0_158] : memref<25x1x256xf32, #tpu.memory_space<vmem>>, vector<1x1x256xf32>
    %325 = vector.shape_cast %324 : vector<1x1x256xf32> to vector<1x256xf32>
    %326 = vector.broadcast %325 : vector<1x256xf32> to vector<24x256xf32>
    %327 = arith.mulf %323, %326 : vector<24x256xf32>
    %c336 = arith.constant 336 : index
    %c0_159 = arith.constant 0 : index
    %328 = vector.load %arg9[%c336, %c0_159] : memref<1400x256xf32, #tpu.memory_space<vmem>>, vector<24x256xf32>
    tpu.vector_store %arg9[%c336, %c0_159], %327 {strides = array<i32>} : memref<1400x256xf32, #tpu.memory_space<vmem>>, vector<24x256xf32>,
    %329 = vector.extract_strided_slice %211 {offsets = [0, 14], sizes = [24, 242], strides = [1, 1]} : vector<24x256xf32> to vector<24x242xf32>
    %330 = vector.extract_strided_slice %211 {offsets = [0, 0], sizes = [24, 14], strides = [1, 1]} : vector<24x256xf32> to vector<24x14xf32>
    %331 = tpu.concatenate %329, %330 in 1 : vector<24x242xf32>, vector<24x14xf32> -> vector<24x256xf32>
    %c15_160 = arith.constant 15 : index
    %c0_161 = arith.constant 0 : index
    %c0_162 = arith.constant 0 : index
    %332 = vector.load %arg1[%c15_160, %c0_161, %c0_162] : memref<25x1x256xf32, #tpu.memory_space<vmem>>, vector<1x1x256xf32>
    %333 = vector.shape_cast %332 : vector<1x1x256xf32> to vector<1x256xf32>
    %334 = vector.broadcast %333 : vector<1x256xf32> to vector<24x256xf32>
    %335 = arith.mulf %331, %334 : vector<24x256xf32>
    %c360 = arith.constant 360 : index
    %c0_163 = arith.constant 0 : index
    %336 = vector.load %arg9[%c360, %c0_163] : memref<1400x256xf32, #tpu.memory_space<vmem>>, vector<24x256xf32>
    tpu.vector_store %arg9[%c360, %c0_163], %335 {strides = array<i32>} : memref<1400x256xf32, #tpu.memory_space<vmem>>, vector<24x256xf32>,
    %337 = vector.extract_strided_slice %211 {offsets = [0, 15], sizes = [24, 241], strides = [1, 1]} : vector<24x256xf32> to vector<24x241xf32>
    %338 = vector.extract_strided_slice %211 {offsets = [0, 0], sizes = [24, 15], strides = [1, 1]} : vector<24x256xf32> to vector<24x15xf32>
    %339 = tpu.concatenate %337, %338 in 1 : vector<24x241xf32>, vector<24x15xf32> -> vector<24x256xf32>
    %c16_164 = arith.constant 16 : index
    %c0_165 = arith.constant 0 : index
    %c0_166 = arith.constant 0 : index
    %340 = vector.load %arg1[%c16_164, %c0_165, %c0_166] : memref<25x1x256xf32, #tpu.memory_space<vmem>>, vector<1x1x256xf32>
    %341 = vector.shape_cast %340 : vector<1x1x256xf32> to vector<1x256xf32>
    %342 = vector.broadcast %341 : vector<1x256xf32> to vector<24x256xf32>
    %343 = arith.mulf %339, %342 : vector<24x256xf32>
    %c384 = arith.constant 384 : index
    %c0_167 = arith.constant 0 : index
    %344 = vector.load %arg9[%c384, %c0_167] : memref<1400x256xf32, #tpu.memory_space<vmem>>, vector<24x256xf32>
    tpu.vector_store %arg9[%c384, %c0_167], %343 {strides = array<i32>} : memref<1400x256xf32, #tpu.memory_space<vmem>>, vector<24x256xf32>,
    %345 = vector.extract_strided_slice %211 {offsets = [0, 16], sizes = [24, 240], strides = [1, 1]} : vector<24x256xf32> to vector<24x240xf32>
    %346 = vector.extract_strided_slice %211 {offsets = [0, 0], sizes = [24, 16], strides = [1, 1]} : vector<24x256xf32> to vector<24x16xf32>
    %347 = tpu.concatenate %345, %346 in 1 : vector<24x240xf32>, vector<24x16xf32> -> vector<24x256xf32>
    %c17_168 = arith.constant 17 : index
    %c0_169 = arith.constant 0 : index
    %c0_170 = arith.constant 0 : index
    %348 = vector.load %arg1[%c17_168, %c0_169, %c0_170] : memref<25x1x256xf32, #tpu.memory_space<vmem>>, vector<1x1x256xf32>
    %349 = vector.shape_cast %348 : vector<1x1x256xf32> to vector<1x256xf32>
    %350 = vector.broadcast %349 : vector<1x256xf32> to vector<24x256xf32>
    %351 = arith.mulf %347, %350 : vector<24x256xf32>
    %c408 = arith.constant 408 : index
    %c0_171 = arith.constant 0 : index
    %352 = vector.load %arg9[%c408, %c0_171] : memref<1400x256xf32, #tpu.memory_space<vmem>>, vector<24x256xf32>
    tpu.vector_store %arg9[%c408, %c0_171], %351 {strides = array<i32>} : memref<1400x256xf32, #tpu.memory_space<vmem>>, vector<24x256xf32>,
    %353 = vector.extract_strided_slice %211 {offsets = [0, 17], sizes = [24, 239], strides = [1, 1]} : vector<24x256xf32> to vector<24x239xf32>
    %354 = vector.extract_strided_slice %211 {offsets = [0, 0], sizes = [24, 17], strides = [1, 1]} : vector<24x256xf32> to vector<24x17xf32>
    %355 = tpu.concatenate %353, %354 in 1 : vector<24x239xf32>, vector<24x17xf32> -> vector<24x256xf32>
    %c18_172 = arith.constant 18 : index
    %c0_173 = arith.constant 0 : index
    %c0_174 = arith.constant 0 : index
    %356 = vector.load %arg1[%c18_172, %c0_173, %c0_174] : memref<25x1x256xf32, #tpu.memory_space<vmem>>, vector<1x1x256xf32>
    %357 = vector.shape_cast %356 : vector<1x1x256xf32> to vector<1x256xf32>
    %358 = vector.broadcast %357 : vector<1x256xf32> to vector<24x256xf32>
    %359 = arith.mulf %355, %358 : vector<24x256xf32>
    %c432 = arith.constant 432 : index
    %c0_175 = arith.constant 0 : index
    %360 = vector.load %arg9[%c432, %c0_175] : memref<1400x256xf32, #tpu.memory_space<vmem>>, vector<24x256xf32>
    tpu.vector_store %arg9[%c432, %c0_175], %359 {strides = array<i32>} : memref<1400x256xf32, #tpu.memory_space<vmem>>, vector<24x256xf32>,
    %361 = vector.extract_strided_slice %211 {offsets = [0, 18], sizes = [24, 238], strides = [1, 1]} : vector<24x256xf32> to vector<24x238xf32>
    %362 = vector.extract_strided_slice %211 {offsets = [0, 0], sizes = [24, 18], strides = [1, 1]} : vector<24x256xf32> to vector<24x18xf32>
    %363 = tpu.concatenate %361, %362 in 1 : vector<24x238xf32>, vector<24x18xf32> -> vector<24x256xf32>
    %c19_176 = arith.constant 19 : index
    %c0_177 = arith.constant 0 : index
    %c0_178 = arith.constant 0 : index
    %364 = vector.load %arg1[%c19_176, %c0_177, %c0_178] : memref<25x1x256xf32, #tpu.memory_space<vmem>>, vector<1x1x256xf32>
    %365 = vector.shape_cast %364 : vector<1x1x256xf32> to vector<1x256xf32>
    %366 = vector.broadcast %365 : vector<1x256xf32> to vector<24x256xf32>
    %367 = arith.mulf %363, %366 : vector<24x256xf32>
    %c456 = arith.constant 456 : index
    %c0_179 = arith.constant 0 : index
    %368 = vector.load %arg9[%c456, %c0_179] : memref<1400x256xf32, #tpu.memory_space<vmem>>, vector<24x256xf32>
    tpu.vector_store %arg9[%c456, %c0_179], %367 {strides = array<i32>} : memref<1400x256xf32, #tpu.memory_space<vmem>>, vector<24x256xf32>,
    %369 = vector.extract_strided_slice %211 {offsets = [0, 30], sizes = [24, 226], strides = [1, 1]} : vector<24x256xf32> to vector<24x226xf32>
    %370 = vector.extract_strided_slice %211 {offsets = [0, 0], sizes = [24, 30], strides = [1, 1]} : vector<24x256xf32> to vector<24x30xf32>
    %371 = tpu.concatenate %369, %370 in 1 : vector<24x226xf32>, vector<24x30xf32> -> vector<24x256xf32>
    %c20_180 = arith.constant 20 : index
    %c0_181 = arith.constant 0 : index
    %c0_182 = arith.constant 0 : index
    %372 = vector.load %arg1[%c20_180, %c0_181, %c0_182] : memref<25x1x256xf32, #tpu.memory_space<vmem>>, vector<1x1x256xf32>
    %373 = vector.shape_cast %372 : vector<1x1x256xf32> to vector<1x256xf32>
    %374 = vector.broadcast %373 : vector<1x256xf32> to vector<24x256xf32>
    %375 = arith.mulf %371, %374 : vector<24x256xf32>
    %c480 = arith.constant 480 : index
    %c0_183 = arith.constant 0 : index
    %376 = vector.load %arg9[%c480, %c0_183] : memref<1400x256xf32, #tpu.memory_space<vmem>>, vector<24x256xf32>
    tpu.vector_store %arg9[%c480, %c0_183], %375 {strides = array<i32>} : memref<1400x256xf32, #tpu.memory_space<vmem>>, vector<24x256xf32>,
    %377 = vector.extract_strided_slice %211 {offsets = [0, 31], sizes = [24, 225], strides = [1, 1]} : vector<24x256xf32> to vector<24x225xf32>
    %378 = vector.extract_strided_slice %211 {offsets = [0, 0], sizes = [24, 31], strides = [1, 1]} : vector<24x256xf32> to vector<24x31xf32>
    %379 = tpu.concatenate %377, %378 in 1 : vector<24x225xf32>, vector<24x31xf32> -> vector<24x256xf32>
    %c21_184 = arith.constant 21 : index
    %c0_185 = arith.constant 0 : index
    %c0_186 = arith.constant 0 : index
    %380 = vector.load %arg1[%c21_184, %c0_185, %c0_186] : memref<25x1x256xf32, #tpu.memory_space<vmem>>, vector<1x1x256xf32>
    %381 = vector.shape_cast %380 : vector<1x1x256xf32> to vector<1x256xf32>
    %382 = vector.broadcast %381 : vector<1x256xf32> to vector<24x256xf32>
    %383 = arith.mulf %379, %382 : vector<24x256xf32>
    %c504 = arith.constant 504 : index
    %c0_187 = arith.constant 0 : index
    %384 = vector.load %arg9[%c504, %c0_187] : memref<1400x256xf32, #tpu.memory_space<vmem>>, vector<24x256xf32>
    tpu.vector_store %arg9[%c504, %c0_187], %383 {strides = array<i32>} : memref<1400x256xf32, #tpu.memory_space<vmem>>, vector<24x256xf32>,
    %385 = vector.extract_strided_slice %211 {offsets = [0, 32], sizes = [24, 224], strides = [1, 1]} : vector<24x256xf32> to vector<24x224xf32>
    %386 = vector.extract_strided_slice %211 {offsets = [0, 0], sizes = [24, 32], strides = [1, 1]} : vector<24x256xf32> to vector<24x32xf32>
    %387 = tpu.concatenate %385, %386 in 1 : vector<24x224xf32>, vector<24x32xf32> -> vector<24x256xf32>
    %c22_188 = arith.constant 22 : index
    %c0_189 = arith.constant 0 : index
    %c0_190 = arith.constant 0 : index
    %388 = vector.load %arg1[%c22_188, %c0_189, %c0_190] : memref<25x1x256xf32, #tpu.memory_space<vmem>>, vector<1x1x256xf32>
    %389 = vector.shape_cast %388 : vector<1x1x256xf32> to vector<1x256xf32>
    %390 = vector.broadcast %389 : vector<1x256xf32> to vector<24x256xf32>
    %391 = arith.mulf %387, %390 : vector<24x256xf32>
    %c528 = arith.constant 528 : index
    %c0_191 = arith.constant 0 : index
    %392 = vector.load %arg9[%c528, %c0_191] : memref<1400x256xf32, #tpu.memory_space<vmem>>, vector<24x256xf32>
    tpu.vector_store %arg9[%c528, %c0_191], %391 {strides = array<i32>} : memref<1400x256xf32, #tpu.memory_space<vmem>>, vector<24x256xf32>,
    %393 = vector.extract_strided_slice %211 {offsets = [0, 33], sizes = [24, 223], strides = [1, 1]} : vector<24x256xf32> to vector<24x223xf32>
    %394 = vector.extract_strided_slice %211 {offsets = [0, 0], sizes = [24, 33], strides = [1, 1]} : vector<24x256xf32> to vector<24x33xf32>
    %395 = tpu.concatenate %393, %394 in 1 : vector<24x223xf32>, vector<24x33xf32> -> vector<24x256xf32>
    %c23_192 = arith.constant 23 : index
    %c0_193 = arith.constant 0 : index
    %c0_194 = arith.constant 0 : index
    %396 = vector.load %arg1[%c23_192, %c0_193, %c0_194] : memref<25x1x256xf32, #tpu.memory_space<vmem>>, vector<1x1x256xf32>
    %397 = vector.shape_cast %396 : vector<1x1x256xf32> to vector<1x256xf32>
    %398 = vector.broadcast %397 : vector<1x256xf32> to vector<24x256xf32>
    %399 = arith.mulf %395, %398 : vector<24x256xf32>
    %c552 = arith.constant 552 : index
    %c0_195 = arith.constant 0 : index
    %400 = vector.load %arg9[%c552, %c0_195] : memref<1400x256xf32, #tpu.memory_space<vmem>>, vector<24x256xf32>
    tpu.vector_store %arg9[%c552, %c0_195], %399 {strides = array<i32>} : memref<1400x256xf32, #tpu.memory_space<vmem>>, vector<24x256xf32>,
    %401 = vector.extract_strided_slice %211 {offsets = [0, 34], sizes = [24, 222], strides = [1, 1]} : vector<24x256xf32> to vector<24x222xf32>
    %402 = vector.extract_strided_slice %211 {offsets = [0, 0], sizes = [24, 34], strides = [1, 1]} : vector<24x256xf32> to vector<24x34xf32>
    %403 = tpu.concatenate %401, %402 in 1 : vector<24x222xf32>, vector<24x34xf32> -> vector<24x256xf32>
    %c24_196 = arith.constant 24 : index
    %c0_197 = arith.constant 0 : index
    %c0_198 = arith.constant 0 : index
    %404 = vector.load %arg1[%c24_196, %c0_197, %c0_198] : memref<25x1x256xf32, #tpu.memory_space<vmem>>, vector<1x1x256xf32>
    %405 = vector.shape_cast %404 : vector<1x1x256xf32> to vector<1x256xf32>
    %406 = vector.broadcast %405 : vector<1x256xf32> to vector<24x256xf32>
    %407 = arith.mulf %403, %406 : vector<24x256xf32>
    %c576 = arith.constant 576 : index
    %c0_199 = arith.constant 0 : index
    %408 = vector.load %arg9[%c576, %c0_199] : memref<1400x256xf32, #tpu.memory_space<vmem>>, vector<24x256xf32>
    tpu.vector_store %arg9[%c576, %c0_199], %407 {strides = array<i32>} : memref<1400x256xf32, #tpu.memory_space<vmem>>, vector<24x256xf32>,
    %c0_200 = arith.constant 0 : index
    %c0_201 = arith.constant 0 : index
    %409 = vector.load %arg4[%c0_200, %c0_201] : memref<56x600xf32, #tpu.memory_space<vmem>>, vector<56x600xf32>
    %c0_202 = arith.constant 0 : index
    %c0_203 = arith.constant 0 : index
    %410 = vector.load %arg9[%c0_202, %c0_203] : memref<1400x256xf32, #tpu.memory_space<vmem>>, vector<600x256xf32>
    %cst_204 = arith.constant dense<0.000000e+00> : vector<56x256xf32>
    %411 = tpu.matmul %409, %410, %cst_204 {dimension_numbers = #tpu.dot_dimension_numbers<[1], [0], [0], [1], [0, 0, 1, 1], [], []>} : vector<56x600xf32>, vector<600x256xf32>, vector<56x256xf32> -> vector<56x256xf32>
    %c0_205 = arith.constant 0 : index
    %c0_206 = arith.constant 0 : index
    %412 = vector.load %arg5[%c0_205, %c0_206] : memref<56x1xf32, #tpu.memory_space<vmem>>, vector<56x1xf32>
    %413 = vector.broadcast %412 : vector<56x1xf32> to vector<56x256xf32>
    %414 = arith.addf %411, %413 : vector<56x256xf32>
    %cst_207 = arith.constant 1.100000e+01 : f32
    %415 = vector.broadcast %cst_207 : f32 to vector<56x256xf32>
    %416 = arith.subf %414, %415 : vector<56x256xf32>
    %cst_208 = arith.constant 0.000000e+00 : f32
    %417 = vector.broadcast %cst_208 : f32 to vector<56x256xf32>
    %418 = arith.maximumf %416, %417 : vector<56x256xf32>
    %419 = vector.extract_strided_slice %418 {offsets = [0, 222], sizes = [56, 34], strides = [1, 1]} : vector<56x256xf32> to vector<56x34xf32>
    %420 = vector.extract_strided_slice %418 {offsets = [0, 0], sizes = [56, 222], strides = [1, 1]} : vector<56x256xf32> to vector<56x222xf32>
    %421 = tpu.concatenate %419, %420 in 1 : vector<56x34xf32>, vector<56x222xf32> -> vector<56x256xf32>
    %c0_209 = arith.constant 0 : index
    %c0_210 = arith.constant 0 : index
    %c0_211 = arith.constant 0 : index
    %422 = vector.load %arg1[%c0_209, %c0_210, %c0_211] : memref<25x1x256xf32, #tpu.memory_space<vmem>>, vector<1x1x256xf32>
    %423 = vector.shape_cast %422 : vector<1x1x256xf32> to vector<1x256xf32>
    %424 = vector.broadcast %423 : vector<1x256xf32> to vector<56x256xf32>
    %425 = arith.mulf %421, %424 : vector<56x256xf32>
    %c0_212 = arith.constant 0 : index
    %c0_213 = arith.constant 0 : index
    %426 = vector.load %arg9[%c0_212, %c0_213] : memref<1400x256xf32, #tpu.memory_space<vmem>>, vector<56x256xf32>
    tpu.vector_store %arg9[%c0_212, %c0_213], %425 {strides = array<i32>} : memref<1400x256xf32, #tpu.memory_space<vmem>>, vector<56x256xf32>,
    %427 = vector.extract_strided_slice %418 {offsets = [0, 223], sizes = [56, 33], strides = [1, 1]} : vector<56x256xf32> to vector<56x33xf32>
    %428 = vector.extract_strided_slice %418 {offsets = [0, 0], sizes = [56, 223], strides = [1, 1]} : vector<56x256xf32> to vector<56x223xf32>
    %429 = tpu.concatenate %427, %428 in 1 : vector<56x33xf32>, vector<56x223xf32> -> vector<56x256xf32>
    %c1_214 = arith.constant 1 : index
    %c0_215 = arith.constant 0 : index
    %c0_216 = arith.constant 0 : index
    %430 = vector.load %arg1[%c1_214, %c0_215, %c0_216] : memref<25x1x256xf32, #tpu.memory_space<vmem>>, vector<1x1x256xf32>
    %431 = vector.shape_cast %430 : vector<1x1x256xf32> to vector<1x256xf32>
    %432 = vector.broadcast %431 : vector<1x256xf32> to vector<56x256xf32>
    %433 = arith.mulf %429, %432 : vector<56x256xf32>
    %c56_217 = arith.constant 56 : index
    %c0_218 = arith.constant 0 : index
    %434 = vector.load %arg9[%c56_217, %c0_218] : memref<1400x256xf32, #tpu.memory_space<vmem>>, vector<56x256xf32>
    tpu.vector_store %arg9[%c56_217, %c0_218], %433 {strides = array<i32>} : memref<1400x256xf32, #tpu.memory_space<vmem>>, vector<56x256xf32>,
    %435 = vector.extract_strided_slice %418 {offsets = [0, 224], sizes = [56, 32], strides = [1, 1]} : vector<56x256xf32> to vector<56x32xf32>
    %436 = vector.extract_strided_slice %418 {offsets = [0, 0], sizes = [56, 224], strides = [1, 1]} : vector<56x256xf32> to vector<56x224xf32>
    %437 = tpu.concatenate %435, %436 in 1 : vector<56x32xf32>, vector<56x224xf32> -> vector<56x256xf32>
    %c2_219 = arith.constant 2 : index
    %c0_220 = arith.constant 0 : index
    %c0_221 = arith.constant 0 : index
    %438 = vector.load %arg1[%c2_219, %c0_220, %c0_221] : memref<25x1x256xf32, #tpu.memory_space<vmem>>, vector<1x1x256xf32>
    %439 = vector.shape_cast %438 : vector<1x1x256xf32> to vector<1x256xf32>
    %440 = vector.broadcast %439 : vector<1x256xf32> to vector<56x256xf32>
    %441 = arith.mulf %437, %440 : vector<56x256xf32>
    %c112_222 = arith.constant 112 : index
    %c0_223 = arith.constant 0 : index
    %442 = vector.load %arg9[%c112_222, %c0_223] : memref<1400x256xf32, #tpu.memory_space<vmem>>, vector<56x256xf32>
    tpu.vector_store %arg9[%c112_222, %c0_223], %441 {strides = array<i32>} : memref<1400x256xf32, #tpu.memory_space<vmem>>, vector<56x256xf32>,
    %443 = vector.extract_strided_slice %418 {offsets = [0, 225], sizes = [56, 31], strides = [1, 1]} : vector<56x256xf32> to vector<56x31xf32>
    %444 = vector.extract_strided_slice %418 {offsets = [0, 0], sizes = [56, 225], strides = [1, 1]} : vector<56x256xf32> to vector<56x225xf32>
    %445 = tpu.concatenate %443, %444 in 1 : vector<56x31xf32>, vector<56x225xf32> -> vector<56x256xf32>
    %c3_224 = arith.constant 3 : index
    %c0_225 = arith.constant 0 : index
    %c0_226 = arith.constant 0 : index
    %446 = vector.load %arg1[%c3_224, %c0_225, %c0_226] : memref<25x1x256xf32, #tpu.memory_space<vmem>>, vector<1x1x256xf32>
    %447 = vector.shape_cast %446 : vector<1x1x256xf32> to vector<1x256xf32>
    %448 = vector.broadcast %447 : vector<1x256xf32> to vector<56x256xf32>
    %449 = arith.mulf %445, %448 : vector<56x256xf32>
    %c168_227 = arith.constant 168 : index
    %c0_228 = arith.constant 0 : index
    %450 = vector.load %arg9[%c168_227, %c0_228] : memref<1400x256xf32, #tpu.memory_space<vmem>>, vector<56x256xf32>
    tpu.vector_store %arg9[%c168_227, %c0_228], %449 {strides = array<i32>} : memref<1400x256xf32, #tpu.memory_space<vmem>>, vector<56x256xf32>,
    %451 = vector.extract_strided_slice %418 {offsets = [0, 226], sizes = [56, 30], strides = [1, 1]} : vector<56x256xf32> to vector<56x30xf32>
    %452 = vector.extract_strided_slice %418 {offsets = [0, 0], sizes = [56, 226], strides = [1, 1]} : vector<56x256xf32> to vector<56x226xf32>
    %453 = tpu.concatenate %451, %452 in 1 : vector<56x30xf32>, vector<56x226xf32> -> vector<56x256xf32>
    %c4_229 = arith.constant 4 : index
    %c0_230 = arith.constant 0 : index
    %c0_231 = arith.constant 0 : index
    %454 = vector.load %arg1[%c4_229, %c0_230, %c0_231] : memref<25x1x256xf32, #tpu.memory_space<vmem>>, vector<1x1x256xf32>
    %455 = vector.shape_cast %454 : vector<1x1x256xf32> to vector<1x256xf32>
    %456 = vector.broadcast %455 : vector<1x256xf32> to vector<56x256xf32>
    %457 = arith.mulf %453, %456 : vector<56x256xf32>
    %c224 = arith.constant 224 : index
    %c0_232 = arith.constant 0 : index
    %458 = vector.load %arg9[%c224, %c0_232] : memref<1400x256xf32, #tpu.memory_space<vmem>>, vector<56x256xf32>
    tpu.vector_store %arg9[%c224, %c0_232], %457 {strides = array<i32>} : memref<1400x256xf32, #tpu.memory_space<vmem>>, vector<56x256xf32>,
    %459 = vector.extract_strided_slice %418 {offsets = [0, 238], sizes = [56, 18], strides = [1, 1]} : vector<56x256xf32> to vector<56x18xf32>
    %460 = vector.extract_strided_slice %418 {offsets = [0, 0], sizes = [56, 238], strides = [1, 1]} : vector<56x256xf32> to vector<56x238xf32>
    %461 = tpu.concatenate %459, %460 in 1 : vector<56x18xf32>, vector<56x238xf32> -> vector<56x256xf32>
    %c5_233 = arith.constant 5 : index
    %c0_234 = arith.constant 0 : index
    %c0_235 = arith.constant 0 : index
    %462 = vector.load %arg1[%c5_233, %c0_234, %c0_235] : memref<25x1x256xf32, #tpu.memory_space<vmem>>, vector<1x1x256xf32>
    %463 = vector.shape_cast %462 : vector<1x1x256xf32> to vector<1x256xf32>
    %464 = vector.broadcast %463 : vector<1x256xf32> to vector<56x256xf32>
    %465 = arith.mulf %461, %464 : vector<56x256xf32>
    %c280 = arith.constant 280 : index
    %c0_236 = arith.constant 0 : index
    %466 = vector.load %arg9[%c280, %c0_236] : memref<1400x256xf32, #tpu.memory_space<vmem>>, vector<56x256xf32>
    tpu.vector_store %arg9[%c280, %c0_236], %465 {strides = array<i32>} : memref<1400x256xf32, #tpu.memory_space<vmem>>, vector<56x256xf32>,
    %467 = vector.extract_strided_slice %418 {offsets = [0, 239], sizes = [56, 17], strides = [1, 1]} : vector<56x256xf32> to vector<56x17xf32>
    %468 = vector.extract_strided_slice %418 {offsets = [0, 0], sizes = [56, 239], strides = [1, 1]} : vector<56x256xf32> to vector<56x239xf32>
    %469 = tpu.concatenate %467, %468 in 1 : vector<56x17xf32>, vector<56x239xf32> -> vector<56x256xf32>
    %c6_237 = arith.constant 6 : index
    %c0_238 = arith.constant 0 : index
    %c0_239 = arith.constant 0 : index
    %470 = vector.load %arg1[%c6_237, %c0_238, %c0_239] : memref<25x1x256xf32, #tpu.memory_space<vmem>>, vector<1x1x256xf32>
    %471 = vector.shape_cast %470 : vector<1x1x256xf32> to vector<1x256xf32>
    %472 = vector.broadcast %471 : vector<1x256xf32> to vector<56x256xf32>
    %473 = arith.mulf %469, %472 : vector<56x256xf32>
    %c336_240 = arith.constant 336 : index
    %c0_241 = arith.constant 0 : index
    %474 = vector.load %arg9[%c336_240, %c0_241] : memref<1400x256xf32, #tpu.memory_space<vmem>>, vector<56x256xf32>
    tpu.vector_store %arg9[%c336_240, %c0_241], %473 {strides = array<i32>} : memref<1400x256xf32, #tpu.memory_space<vmem>>, vector<56x256xf32>,
    %475 = vector.extract_strided_slice %418 {offsets = [0, 240], sizes = [56, 16], strides = [1, 1]} : vector<56x256xf32> to vector<56x16xf32>
    %476 = vector.extract_strided_slice %418 {offsets = [0, 0], sizes = [56, 240], strides = [1, 1]} : vector<56x256xf32> to vector<56x240xf32>
    %477 = tpu.concatenate %475, %476 in 1 : vector<56x16xf32>, vector<56x240xf32> -> vector<56x256xf32>
    %c7_242 = arith.constant 7 : index
    %c0_243 = arith.constant 0 : index
    %c0_244 = arith.constant 0 : index
    %478 = vector.load %arg1[%c7_242, %c0_243, %c0_244] : memref<25x1x256xf32, #tpu.memory_space<vmem>>, vector<1x1x256xf32>
    %479 = vector.shape_cast %478 : vector<1x1x256xf32> to vector<1x256xf32>
    %480 = vector.broadcast %479 : vector<1x256xf32> to vector<56x256xf32>
    %481 = arith.mulf %477, %480 : vector<56x256xf32>
    %c392 = arith.constant 392 : index
    %c0_245 = arith.constant 0 : index
    %482 = vector.load %arg9[%c392, %c0_245] : memref<1400x256xf32, #tpu.memory_space<vmem>>, vector<56x256xf32>
    tpu.vector_store %arg9[%c392, %c0_245], %481 {strides = array<i32>} : memref<1400x256xf32, #tpu.memory_space<vmem>>, vector<56x256xf32>,
    %483 = vector.extract_strided_slice %418 {offsets = [0, 241], sizes = [56, 15], strides = [1, 1]} : vector<56x256xf32> to vector<56x15xf32>
    %484 = vector.extract_strided_slice %418 {offsets = [0, 0], sizes = [56, 241], strides = [1, 1]} : vector<56x256xf32> to vector<56x241xf32>
    %485 = tpu.concatenate %483, %484 in 1 : vector<56x15xf32>, vector<56x241xf32> -> vector<56x256xf32>
    %c8_246 = arith.constant 8 : index
    %c0_247 = arith.constant 0 : index
    %c0_248 = arith.constant 0 : index
    %486 = vector.load %arg1[%c8_246, %c0_247, %c0_248] : memref<25x1x256xf32, #tpu.memory_space<vmem>>, vector<1x1x256xf32>
    %487 = vector.shape_cast %486 : vector<1x1x256xf32> to vector<1x256xf32>
    %488 = vector.broadcast %487 : vector<1x256xf32> to vector<56x256xf32>
    %489 = arith.mulf %485, %488 : vector<56x256xf32>
    %c448 = arith.constant 448 : index
    %c0_249 = arith.constant 0 : index
    %490 = vector.load %arg9[%c448, %c0_249] : memref<1400x256xf32, #tpu.memory_space<vmem>>, vector<56x256xf32>
    tpu.vector_store %arg9[%c448, %c0_249], %489 {strides = array<i32>} : memref<1400x256xf32, #tpu.memory_space<vmem>>, vector<56x256xf32>,
    %491 = vector.extract_strided_slice %418 {offsets = [0, 242], sizes = [56, 14], strides = [1, 1]} : vector<56x256xf32> to vector<56x14xf32>
    %492 = vector.extract_strided_slice %418 {offsets = [0, 0], sizes = [56, 242], strides = [1, 1]} : vector<56x256xf32> to vector<56x242xf32>
    %493 = tpu.concatenate %491, %492 in 1 : vector<56x14xf32>, vector<56x242xf32> -> vector<56x256xf32>
    %c9_250 = arith.constant 9 : index
    %c0_251 = arith.constant 0 : index
    %c0_252 = arith.constant 0 : index
    %494 = vector.load %arg1[%c9_250, %c0_251, %c0_252] : memref<25x1x256xf32, #tpu.memory_space<vmem>>, vector<1x1x256xf32>
    %495 = vector.shape_cast %494 : vector<1x1x256xf32> to vector<1x256xf32>
    %496 = vector.broadcast %495 : vector<1x256xf32> to vector<56x256xf32>
    %497 = arith.mulf %493, %496 : vector<56x256xf32>
    %c504_253 = arith.constant 504 : index
    %c0_254 = arith.constant 0 : index
    %498 = vector.load %arg9[%c504_253, %c0_254] : memref<1400x256xf32, #tpu.memory_space<vmem>>, vector<56x256xf32>
    tpu.vector_store %arg9[%c504_253, %c0_254], %497 {strides = array<i32>} : memref<1400x256xf32, #tpu.memory_space<vmem>>, vector<56x256xf32>,
    %499 = vector.extract_strided_slice %418 {offsets = [0, 254], sizes = [56, 2], strides = [1, 1]} : vector<56x256xf32> to vector<56x2xf32>
    %500 = vector.extract_strided_slice %418 {offsets = [0, 0], sizes = [56, 254], strides = [1, 1]} : vector<56x256xf32> to vector<56x254xf32>
    %501 = tpu.concatenate %499, %500 in 1 : vector<56x2xf32>, vector<56x254xf32> -> vector<56x256xf32>
    %c10_255 = arith.constant 10 : index
    %c0_256 = arith.constant 0 : index
    %c0_257 = arith.constant 0 : index
    %502 = vector.load %arg1[%c10_255, %c0_256, %c0_257] : memref<25x1x256xf32, #tpu.memory_space<vmem>>, vector<1x1x256xf32>
    %503 = vector.shape_cast %502 : vector<1x1x256xf32> to vector<1x256xf32>
    %504 = vector.broadcast %503 : vector<1x256xf32> to vector<56x256xf32>
    %505 = arith.mulf %501, %504 : vector<56x256xf32>
    %c560 = arith.constant 560 : index
    %c0_258 = arith.constant 0 : index
    %506 = vector.load %arg9[%c560, %c0_258] : memref<1400x256xf32, #tpu.memory_space<vmem>>, vector<56x256xf32>
    tpu.vector_store %arg9[%c560, %c0_258], %505 {strides = array<i32>} : memref<1400x256xf32, #tpu.memory_space<vmem>>, vector<56x256xf32>,
    %507 = vector.extract_strided_slice %418 {offsets = [0, 255], sizes = [56, 1], strides = [1, 1]} : vector<56x256xf32> to vector<56x1xf32>
    %508 = vector.extract_strided_slice %418 {offsets = [0, 0], sizes = [56, 255], strides = [1, 1]} : vector<56x256xf32> to vector<56x255xf32>
    %509 = tpu.concatenate %507, %508 in 1 : vector<56x1xf32>, vector<56x255xf32> -> vector<56x256xf32>
    %c11_259 = arith.constant 11 : index
    %c0_260 = arith.constant 0 : index
    %c0_261 = arith.constant 0 : index
    %510 = vector.load %arg1[%c11_259, %c0_260, %c0_261] : memref<25x1x256xf32, #tpu.memory_space<vmem>>, vector<1x1x256xf32>
    %511 = vector.shape_cast %510 : vector<1x1x256xf32> to vector<1x256xf32>
    %512 = vector.broadcast %511 : vector<1x256xf32> to vector<56x256xf32>
    %513 = arith.mulf %509, %512 : vector<56x256xf32>
    %c616 = arith.constant 616 : index
    %c0_262 = arith.constant 0 : index
    %514 = vector.load %arg9[%c616, %c0_262] : memref<1400x256xf32, #tpu.memory_space<vmem>>, vector<56x256xf32>
    tpu.vector_store %arg9[%c616, %c0_262], %513 {strides = array<i32>} : memref<1400x256xf32, #tpu.memory_space<vmem>>, vector<56x256xf32>,
    %c12_263 = arith.constant 12 : index
    %c0_264 = arith.constant 0 : index
    %c0_265 = arith.constant 0 : index
    %515 = vector.load %arg1[%c12_263, %c0_264, %c0_265] : memref<25x1x256xf32, #tpu.memory_space<vmem>>, vector<1x1x256xf32>
    %516 = vector.shape_cast %515 : vector<1x1x256xf32> to vector<1x256xf32>
    %517 = vector.broadcast %516 : vector<1x256xf32> to vector<56x256xf32>
    %518 = arith.mulf %418, %517 : vector<56x256xf32>
    %c672 = arith.constant 672 : index
    %c0_266 = arith.constant 0 : index
    %519 = vector.load %arg9[%c672, %c0_266] : memref<1400x256xf32, #tpu.memory_space<vmem>>, vector<56x256xf32>
    tpu.vector_store %arg9[%c672, %c0_266], %518 {strides = array<i32>} : memref<1400x256xf32, #tpu.memory_space<vmem>>, vector<56x256xf32>,
    %520 = vector.extract_strided_slice %418 {offsets = [0, 1], sizes = [56, 255], strides = [1, 1]} : vector<56x256xf32> to vector<56x255xf32>
    %521 = vector.extract_strided_slice %418 {offsets = [0, 0], sizes = [56, 1], strides = [1, 1]} : vector<56x256xf32> to vector<56x1xf32>
    %522 = tpu.concatenate %520, %521 in 1 : vector<56x255xf32>, vector<56x1xf32> -> vector<56x256xf32>
    %c13_267 = arith.constant 13 : index
    %c0_268 = arith.constant 0 : index
    %c0_269 = arith.constant 0 : index
    %523 = vector.load %arg1[%c13_267, %c0_268, %c0_269] : memref<25x1x256xf32, #tpu.memory_space<vmem>>, vector<1x1x256xf32>
    %524 = vector.shape_cast %523 : vector<1x1x256xf32> to vector<1x256xf32>
    %525 = vector.broadcast %524 : vector<1x256xf32> to vector<56x256xf32>
    %526 = arith.mulf %522, %525 : vector<56x256xf32>
    %c728 = arith.constant 728 : index
    %c0_270 = arith.constant 0 : index
    %527 = vector.load %arg9[%c728, %c0_270] : memref<1400x256xf32, #tpu.memory_space<vmem>>, vector<56x256xf32>
    tpu.vector_store %arg9[%c728, %c0_270], %526 {strides = array<i32>} : memref<1400x256xf32, #tpu.memory_space<vmem>>, vector<56x256xf32>,
    %528 = vector.extract_strided_slice %418 {offsets = [0, 2], sizes = [56, 254], strides = [1, 1]} : vector<56x256xf32> to vector<56x254xf32>
    %529 = vector.extract_strided_slice %418 {offsets = [0, 0], sizes = [56, 2], strides = [1, 1]} : vector<56x256xf32> to vector<56x2xf32>
    %530 = tpu.concatenate %528, %529 in 1 : vector<56x254xf32>, vector<56x2xf32> -> vector<56x256xf32>
    %c14_271 = arith.constant 14 : index
    %c0_272 = arith.constant 0 : index
    %c0_273 = arith.constant 0 : index
    %531 = vector.load %arg1[%c14_271, %c0_272, %c0_273] : memref<25x1x256xf32, #tpu.memory_space<vmem>>, vector<1x1x256xf32>
    %532 = vector.shape_cast %531 : vector<1x1x256xf32> to vector<1x256xf32>
    %533 = vector.broadcast %532 : vector<1x256xf32> to vector<56x256xf32>
    %534 = arith.mulf %530, %533 : vector<56x256xf32>
    %c784 = arith.constant 784 : index
    %c0_274 = arith.constant 0 : index
    %535 = vector.load %arg9[%c784, %c0_274] : memref<1400x256xf32, #tpu.memory_space<vmem>>, vector<56x256xf32>
    tpu.vector_store %arg9[%c784, %c0_274], %534 {strides = array<i32>} : memref<1400x256xf32, #tpu.memory_space<vmem>>, vector<56x256xf32>,
    %536 = vector.extract_strided_slice %418 {offsets = [0, 14], sizes = [56, 242], strides = [1, 1]} : vector<56x256xf32> to vector<56x242xf32>
    %537 = vector.extract_strided_slice %418 {offsets = [0, 0], sizes = [56, 14], strides = [1, 1]} : vector<56x256xf32> to vector<56x14xf32>
    %538 = tpu.concatenate %536, %537 in 1 : vector<56x242xf32>, vector<56x14xf32> -> vector<56x256xf32>
    %c15_275 = arith.constant 15 : index
    %c0_276 = arith.constant 0 : index
    %c0_277 = arith.constant 0 : index
    %539 = vector.load %arg1[%c15_275, %c0_276, %c0_277] : memref<25x1x256xf32, #tpu.memory_space<vmem>>, vector<1x1x256xf32>
    %540 = vector.shape_cast %539 : vector<1x1x256xf32> to vector<1x256xf32>
    %541 = vector.broadcast %540 : vector<1x256xf32> to vector<56x256xf32>
    %542 = arith.mulf %538, %541 : vector<56x256xf32>
    %c840 = arith.constant 840 : index
    %c0_278 = arith.constant 0 : index
    %543 = vector.load %arg9[%c840, %c0_278] : memref<1400x256xf32, #tpu.memory_space<vmem>>, vector<56x256xf32>
    tpu.vector_store %arg9[%c840, %c0_278], %542 {strides = array<i32>} : memref<1400x256xf32, #tpu.memory_space<vmem>>, vector<56x256xf32>,
    %544 = vector.extract_strided_slice %418 {offsets = [0, 15], sizes = [56, 241], strides = [1, 1]} : vector<56x256xf32> to vector<56x241xf32>
    %545 = vector.extract_strided_slice %418 {offsets = [0, 0], sizes = [56, 15], strides = [1, 1]} : vector<56x256xf32> to vector<56x15xf32>
    %546 = tpu.concatenate %544, %545 in 1 : vector<56x241xf32>, vector<56x15xf32> -> vector<56x256xf32>
    %c16_279 = arith.constant 16 : index
    %c0_280 = arith.constant 0 : index
    %c0_281 = arith.constant 0 : index
    %547 = vector.load %arg1[%c16_279, %c0_280, %c0_281] : memref<25x1x256xf32, #tpu.memory_space<vmem>>, vector<1x1x256xf32>
    %548 = vector.shape_cast %547 : vector<1x1x256xf32> to vector<1x256xf32>
    %549 = vector.broadcast %548 : vector<1x256xf32> to vector<56x256xf32>
    %550 = arith.mulf %546, %549 : vector<56x256xf32>
    %c896 = arith.constant 896 : index
    %c0_282 = arith.constant 0 : index
    %551 = vector.load %arg9[%c896, %c0_282] : memref<1400x256xf32, #tpu.memory_space<vmem>>, vector<56x256xf32>
    tpu.vector_store %arg9[%c896, %c0_282], %550 {strides = array<i32>} : memref<1400x256xf32, #tpu.memory_space<vmem>>, vector<56x256xf32>,
    %552 = vector.extract_strided_slice %418 {offsets = [0, 16], sizes = [56, 240], strides = [1, 1]} : vector<56x256xf32> to vector<56x240xf32>
    %553 = vector.extract_strided_slice %418 {offsets = [0, 0], sizes = [56, 16], strides = [1, 1]} : vector<56x256xf32> to vector<56x16xf32>
    %554 = tpu.concatenate %552, %553 in 1 : vector<56x240xf32>, vector<56x16xf32> -> vector<56x256xf32>
    %c17_283 = arith.constant 17 : index
    %c0_284 = arith.constant 0 : index
    %c0_285 = arith.constant 0 : index
    %555 = vector.load %arg1[%c17_283, %c0_284, %c0_285] : memref<25x1x256xf32, #tpu.memory_space<vmem>>, vector<1x1x256xf32>
    %556 = vector.shape_cast %555 : vector<1x1x256xf32> to vector<1x256xf32>
    %557 = vector.broadcast %556 : vector<1x256xf32> to vector<56x256xf32>
    %558 = arith.mulf %554, %557 : vector<56x256xf32>
    %c952 = arith.constant 952 : index
    %c0_286 = arith.constant 0 : index
    %559 = vector.load %arg9[%c952, %c0_286] : memref<1400x256xf32, #tpu.memory_space<vmem>>, vector<56x256xf32>
    tpu.vector_store %arg9[%c952, %c0_286], %558 {strides = array<i32>} : memref<1400x256xf32, #tpu.memory_space<vmem>>, vector<56x256xf32>,
    %560 = vector.extract_strided_slice %418 {offsets = [0, 17], sizes = [56, 239], strides = [1, 1]} : vector<56x256xf32> to vector<56x239xf32>
    %561 = vector.extract_strided_slice %418 {offsets = [0, 0], sizes = [56, 17], strides = [1, 1]} : vector<56x256xf32> to vector<56x17xf32>
    %562 = tpu.concatenate %560, %561 in 1 : vector<56x239xf32>, vector<56x17xf32> -> vector<56x256xf32>
    %c18_287 = arith.constant 18 : index
    %c0_288 = arith.constant 0 : index
    %c0_289 = arith.constant 0 : index
    %563 = vector.load %arg1[%c18_287, %c0_288, %c0_289] : memref<25x1x256xf32, #tpu.memory_space<vmem>>, vector<1x1x256xf32>
    %564 = vector.shape_cast %563 : vector<1x1x256xf32> to vector<1x256xf32>
    %565 = vector.broadcast %564 : vector<1x256xf32> to vector<56x256xf32>
    %566 = arith.mulf %562, %565 : vector<56x256xf32>
    %c1008 = arith.constant 1008 : index
    %c0_290 = arith.constant 0 : index
    %567 = vector.load %arg9[%c1008, %c0_290] : memref<1400x256xf32, #tpu.memory_space<vmem>>, vector<56x256xf32>
    tpu.vector_store %arg9[%c1008, %c0_290], %566 {strides = array<i32>} : memref<1400x256xf32, #tpu.memory_space<vmem>>, vector<56x256xf32>,
    %568 = vector.extract_strided_slice %418 {offsets = [0, 18], sizes = [56, 238], strides = [1, 1]} : vector<56x256xf32> to vector<56x238xf32>
    %569 = vector.extract_strided_slice %418 {offsets = [0, 0], sizes = [56, 18], strides = [1, 1]} : vector<56x256xf32> to vector<56x18xf32>
    %570 = tpu.concatenate %568, %569 in 1 : vector<56x238xf32>, vector<56x18xf32> -> vector<56x256xf32>
    %c19_291 = arith.constant 19 : index
    %c0_292 = arith.constant 0 : index
    %c0_293 = arith.constant 0 : index
    %571 = vector.load %arg1[%c19_291, %c0_292, %c0_293] : memref<25x1x256xf32, #tpu.memory_space<vmem>>, vector<1x1x256xf32>
    %572 = vector.shape_cast %571 : vector<1x1x256xf32> to vector<1x256xf32>
    %573 = vector.broadcast %572 : vector<1x256xf32> to vector<56x256xf32>
    %574 = arith.mulf %570, %573 : vector<56x256xf32>
    %c1064 = arith.constant 1064 : index
    %c0_294 = arith.constant 0 : index
    %575 = vector.load %arg9[%c1064, %c0_294] : memref<1400x256xf32, #tpu.memory_space<vmem>>, vector<56x256xf32>
    tpu.vector_store %arg9[%c1064, %c0_294], %574 {strides = array<i32>} : memref<1400x256xf32, #tpu.memory_space<vmem>>, vector<56x256xf32>,
    %576 = vector.extract_strided_slice %418 {offsets = [0, 30], sizes = [56, 226], strides = [1, 1]} : vector<56x256xf32> to vector<56x226xf32>
    %577 = vector.extract_strided_slice %418 {offsets = [0, 0], sizes = [56, 30], strides = [1, 1]} : vector<56x256xf32> to vector<56x30xf32>
    %578 = tpu.concatenate %576, %577 in 1 : vector<56x226xf32>, vector<56x30xf32> -> vector<56x256xf32>
    %c20_295 = arith.constant 20 : index
    %c0_296 = arith.constant 0 : index
    %c0_297 = arith.constant 0 : index
    %579 = vector.load %arg1[%c20_295, %c0_296, %c0_297] : memref<25x1x256xf32, #tpu.memory_space<vmem>>, vector<1x1x256xf32>
    %580 = vector.shape_cast %579 : vector<1x1x256xf32> to vector<1x256xf32>
    %581 = vector.broadcast %580 : vector<1x256xf32> to vector<56x256xf32>
    %582 = arith.mulf %578, %581 : vector<56x256xf32>
    %c1120 = arith.constant 1120 : index
    %c0_298 = arith.constant 0 : index
    %583 = vector.load %arg9[%c1120, %c0_298] : memref<1400x256xf32, #tpu.memory_space<vmem>>, vector<56x256xf32>
    tpu.vector_store %arg9[%c1120, %c0_298], %582 {strides = array<i32>} : memref<1400x256xf32, #tpu.memory_space<vmem>>, vector<56x256xf32>,
    %584 = vector.extract_strided_slice %418 {offsets = [0, 31], sizes = [56, 225], strides = [1, 1]} : vector<56x256xf32> to vector<56x225xf32>
    %585 = vector.extract_strided_slice %418 {offsets = [0, 0], sizes = [56, 31], strides = [1, 1]} : vector<56x256xf32> to vector<56x31xf32>
    %586 = tpu.concatenate %584, %585 in 1 : vector<56x225xf32>, vector<56x31xf32> -> vector<56x256xf32>
    %c21_299 = arith.constant 21 : index
    %c0_300 = arith.constant 0 : index
    %c0_301 = arith.constant 0 : index
    %587 = vector.load %arg1[%c21_299, %c0_300, %c0_301] : memref<25x1x256xf32, #tpu.memory_space<vmem>>, vector<1x1x256xf32>
    %588 = vector.shape_cast %587 : vector<1x1x256xf32> to vector<1x256xf32>
    %589 = vector.broadcast %588 : vector<1x256xf32> to vector<56x256xf32>
    %590 = arith.mulf %586, %589 : vector<56x256xf32>
    %c1176 = arith.constant 1176 : index
    %c0_302 = arith.constant 0 : index
    %591 = vector.load %arg9[%c1176, %c0_302] : memref<1400x256xf32, #tpu.memory_space<vmem>>, vector<56x256xf32>
    tpu.vector_store %arg9[%c1176, %c0_302], %590 {strides = array<i32>} : memref<1400x256xf32, #tpu.memory_space<vmem>>, vector<56x256xf32>,
    %592 = vector.extract_strided_slice %418 {offsets = [0, 32], sizes = [56, 224], strides = [1, 1]} : vector<56x256xf32> to vector<56x224xf32>
    %593 = vector.extract_strided_slice %418 {offsets = [0, 0], sizes = [56, 32], strides = [1, 1]} : vector<56x256xf32> to vector<56x32xf32>
    %594 = tpu.concatenate %592, %593 in 1 : vector<56x224xf32>, vector<56x32xf32> -> vector<56x256xf32>
    %c22_303 = arith.constant 22 : index
    %c0_304 = arith.constant 0 : index
    %c0_305 = arith.constant 0 : index
    %595 = vector.load %arg1[%c22_303, %c0_304, %c0_305] : memref<25x1x256xf32, #tpu.memory_space<vmem>>, vector<1x1x256xf32>
    %596 = vector.shape_cast %595 : vector<1x1x256xf32> to vector<1x256xf32>
    %597 = vector.broadcast %596 : vector<1x256xf32> to vector<56x256xf32>
    %598 = arith.mulf %594, %597 : vector<56x256xf32>
    %c1232 = arith.constant 1232 : index
    %c0_306 = arith.constant 0 : index
    %599 = vector.load %arg9[%c1232, %c0_306] : memref<1400x256xf32, #tpu.memory_space<vmem>>, vector<56x256xf32>
    tpu.vector_store %arg9[%c1232, %c0_306], %598 {strides = array<i32>} : memref<1400x256xf32, #tpu.memory_space<vmem>>, vector<56x256xf32>,
    %600 = vector.extract_strided_slice %418 {offsets = [0, 33], sizes = [56, 223], strides = [1, 1]} : vector<56x256xf32> to vector<56x223xf32>
    %601 = vector.extract_strided_slice %418 {offsets = [0, 0], sizes = [56, 33], strides = [1, 1]} : vector<56x256xf32> to vector<56x33xf32>
    %602 = tpu.concatenate %600, %601 in 1 : vector<56x223xf32>, vector<56x33xf32> -> vector<56x256xf32>
    %c23_307 = arith.constant 23 : index
    %c0_308 = arith.constant 0 : index
    %c0_309 = arith.constant 0 : index
    %603 = vector.load %arg1[%c23_307, %c0_308, %c0_309] : memref<25x1x256xf32, #tpu.memory_space<vmem>>, vector<1x1x256xf32>
    %604 = vector.shape_cast %603 : vector<1x1x256xf32> to vector<1x256xf32>
    %605 = vector.broadcast %604 : vector<1x256xf32> to vector<56x256xf32>
    %606 = arith.mulf %602, %605 : vector<56x256xf32>
    %c1288 = arith.constant 1288 : index
    %c0_310 = arith.constant 0 : index
    %607 = vector.load %arg9[%c1288, %c0_310] : memref<1400x256xf32, #tpu.memory_space<vmem>>, vector<56x256xf32>
    tpu.vector_store %arg9[%c1288, %c0_310], %606 {strides = array<i32>} : memref<1400x256xf32, #tpu.memory_space<vmem>>, vector<56x256xf32>,
    %608 = vector.extract_strided_slice %418 {offsets = [0, 34], sizes = [56, 222], strides = [1, 1]} : vector<56x256xf32> to vector<56x222xf32>
    %609 = vector.extract_strided_slice %418 {offsets = [0, 0], sizes = [56, 34], strides = [1, 1]} : vector<56x256xf32> to vector<56x34xf32>
    %610 = tpu.concatenate %608, %609 in 1 : vector<56x222xf32>, vector<56x34xf32> -> vector<56x256xf32>
    %c24_311 = arith.constant 24 : index
    %c0_312 = arith.constant 0 : index
    %c0_313 = arith.constant 0 : index
    %611 = vector.load %arg1[%c24_311, %c0_312, %c0_313] : memref<25x1x256xf32, #tpu.memory_space<vmem>>, vector<1x1x256xf32>
    %612 = vector.shape_cast %611 : vector<1x1x256xf32> to vector<1x256xf32>
    %613 = vector.broadcast %612 : vector<1x256xf32> to vector<56x256xf32>
    %614 = arith.mulf %610, %613 : vector<56x256xf32>
    %c1344 = arith.constant 1344 : index
    %c0_314 = arith.constant 0 : index
    %615 = vector.load %arg9[%c1344, %c0_314] : memref<1400x256xf32, #tpu.memory_space<vmem>>, vector<56x256xf32>
    tpu.vector_store %arg9[%c1344, %c0_314], %614 {strides = array<i32>} : memref<1400x256xf32, #tpu.memory_space<vmem>>, vector<56x256xf32>,
    %c0_315 = arith.constant 0 : index
    %c0_316 = arith.constant 0 : index
    %616 = vector.load %arg6[%c0_315, %c0_316] : memref<56x1400xf32, #tpu.memory_space<vmem>>, vector<56x1400xf32>
    %c0_317 = arith.constant 0 : index
    %c0_318 = arith.constant 0 : index
    %617 = vector.load %arg9[%c0_317, %c0_318] : memref<1400x256xf32, #tpu.memory_space<vmem>>, vector<1400x256xf32>
    %cst_319 = arith.constant dense<0.000000e+00> : vector<56x256xf32>
    %618 = tpu.matmul %616, %617, %cst_319 {dimension_numbers = #tpu.dot_dimension_numbers<[1], [0], [0], [1], [0, 0, 1, 1], [], []>} : vector<56x1400xf32>, vector<1400x256xf32>, vector<56x256xf32> -> vector<56x256xf32>
    %c0_320 = arith.constant 0 : index
    %c0_321 = arith.constant 0 : index
    %619 = vector.load %arg7[%c0_320, %c0_321] : memref<56x1xf32, #tpu.memory_space<vmem>>, vector<56x1xf32>
    %620 = vector.broadcast %619 : vector<56x1xf32> to vector<56x256xf32>
    %621 = arith.addf %618, %620 : vector<56x256xf32>
    %cst_322 = arith.constant 1.000000e+00 : f32
    %622 = vector.broadcast %cst_322 : f32 to vector<56x256xf32>
    %623 = arith.addf %621, %622 : vector<56x256xf32>
    %cst_323 = arith.constant 0.000000e+00 : f32
    %624 = vector.broadcast %cst_323 : f32 to vector<56x256xf32>
    %625 = arith.maximumf %623, %624 : vector<56x256xf32>
    %626 = vector.extract_strided_slice %625 {offsets = [0, 0], sizes = [50, 256], strides = [1, 1]} : vector<56x256xf32> to vector<50x256xf32>
    %c0_324 = arith.constant 0 : index
    %c0_325 = arith.constant 0 : index
    %627 = vector.load %arg8[%c0_324, %c0_325] : memref<50x256xf32, #tpu.memory_space<vmem>>, vector<50x256xf32>
    tpu.vector_store %arg8[%c0_324, %c0_325], %626 {strides = array<i32>} : memref<50x256xf32, #tpu.memory_space<vmem>>, vector<50x256xf32>,
    return
  }
}

</mosaic_0001>

<bundles_post_ra>
// kernel: _fused_forward.1
= control target key start
LH: loop header
LB: loop body
LE: loop exit
PB: predicated region body
PF: predicated region fallthrough
CT: control target
= control target key end

     0   :  { %13 = vsyncpa [#allocation4], 0  ;;  %s12107_s0 = inlined_call_operand.vmem [shape: f32[3,256], index: 0, kind: input, shape index: {}]   ;;  %s12108_s1 = inlined_call_operand.vmem [shape: f32[25,1,256], index: 1, kind: input, shape index: {}]   ;;  %s12109_s2 = inlined_call_operand.vmem [shape: f32[24,200], index: 2, kind: input, shape index: {}]   ;;  %s12110_s3 = inlined_call_operand.vmem [shape: f32[24,1], index: 3, kind: input, shape index: {}]   ;;  %s12111_s4 = inlined_call_operand.hbm [shape: f32[56,600], index: 4, kind: input, shape index: {}]   ;;  %s12112_s5 = inlined_call_operand.vmem [shape: f32[56,1], index: 5, kind: input, shape index: {}]   ;;  %s12113_s6 = inlined_call_operand.hbm [shape: f32[56,1400], index: 6, kind: input, shape index: {}]   ;;  %s12114_s7 = inlined_call_operand.vmem [shape: f32[56,1], index: 7, kind: input, shape index: {}]   ;;  %s12115_s8 = inlined_call_operand.hbm [shape: f32[50,256], index: 8, kind: output, shape index: {}]  }
   0x1   :  { %14 = vsyncpa [#allocation7], 0 }
   0x2   :  { %15 = vsyncpa [#allocation5], 0  ;;  %s7375_s27 = smov [#allocation3]   ;;  %s7303_s9 = scalar_lea.hbm %s12111_s4, 4480 }
   0x3   :  { %s29_s28 = sshll.u32 %s7375_s27, 4  ;;  %p7304_p0 = scmp.ne.s32.totalorder %s12111_s4, %s7303_s9  ;;  %s30_s28 = int_to_ptr.vmem [resolvable:$true] %s29_s28 }
   0x4   :  { %p7307_p1 = scmp.lt.u32.totalorder %s7303_s9, %s12111_s4 }
   0x6   :  { %p7309_p2 = pnand %p7307_p1, %p7304_p0 }
   0x8   :  { %7312 = shalt.err (!%p7309_p2)
}
   0x9   :  { %s7313_s14 = scalar_lea.vmem %s30_s28, 4480  ;;  %p7318_p4 = scmp.lt.s32.totalorder %s30_s28, %s30_s28 }
   0xa   :  { %p7314_p3 = scmp.ne.s32.totalorder %s30_s28, %s7313_s14  ;;  %p7319_p5 = scmp.lt.s32.totalorder %s7313_s14, %s7313_s14 }
   0xc   :  { %p7320_p6 = por %p7319_p5, %p7318_p4 }
   0xe   :  { %p7321_p7 = pnand %p7320_p6, %p7314_p3 }
  0x10   :  { %7324 = shalt.err (!%p7321_p7)
}
  0x11   :  { %s7376_s15 = smov 640   ;;  %s7377_s16 = smov 40  }
  0x12   :  { %35 = dma.hbm_to_vmem [thread:$0]  %s12111_s4, 4480, %s30_s28, [#allocation4], %s7376_s15, %s7376_s15, %s7377_s16  }
  0x13   :  { %s7378_s19 = smov [#allocation6]   ;;  %s7325_s23 = scalar_lea.hbm %s12113_s6, 9856 }
  0x14   :  { %s43_s20 = sshll.u32 %s7378_s19, 4  ;;  %p7326_p8 = scmp.ne.s32.totalorder %s12113_s6, %s7325_s23  ;;  %s44_s20 = int_to_ptr.vmem [resolvable:$true] %s43_s20 }
  0x15   :  { %p7329_p9 = scmp.lt.u32.totalorder %s7325_s23, %s12113_s6 }
  0x17   :  { %p7331_p10 = pnand %p7329_p9, %p7326_p8 }
  0x19   :  { %7334 = shalt.err (!%p7331_p10)
}
  0x1a   :  { %s7335_s29 = scalar_lea.vmem %s44_s20, 9856  ;;  %p7340_p12 = scmp.lt.s32.totalorder %s44_s20, %s44_s20 }
  0x1b   :  { %p7336_p11 = scmp.ne.s32.totalorder %s44_s20, %s7335_s29  ;;  %p7341_p13 = scmp.lt.s32.totalorder %s7335_s29, %s7335_s29 }
  0x1d   :  { %p7342_p0 = por %p7341_p13, %p7340_p12 }
  0x1f   :  { %p7343_p1 = pnand %p7342_p0, %p7336_p11 }
  0x21   :  { %7346 = shalt.err (!%p7343_p1)
}
  0x22   :  { %s7379_s4 = smov 1408   ;;  %s7380_s28 = smov 88  }
  0x23   :  { %49 = dma.hbm_to_vmem [thread:$0]  %s12113_s6, 9856, %s44_s20, [#allocation7], %s7379_s4, %s7379_s4, %s7380_s28  }
  0x24   :  { %7369 = dma.done.wait [#allocation4], 4480  }
  0x25   :  { %7370 = vsyncadd [#allocation4], 4294962816 }
  0x26   :  { %7371 = dma.done.wait [#allocation7], 9856  }
  0x27   :  { %7372 = vsyncadd [#allocation7], 4294957440  ;;  %vm62_vm0 = vcmask 1042432   ;;  %v58_v0 = vld [vmem:[%s12107_s0] sm:$0x77]  ;;  %s7381_s12 = smov 33   ;;  %v79_v14 = vlaneseq }
  0x28   :  { %v7481_v1 = vsel %vm62_vm0, %v58_v0, 0.0  ;;  %v60_v2 = vcombine.high %v58_v0, %v58_v0  ;;  %s7382_s13 = smov 34   ;;  %s7383_s6 = smov 32   ;;  %v732_v4 = vld [vmem:[%s12109_s2 + $0x8] sm:$0xff]  ;;  %vm805_vm1 = vcmask 588800   ;;  %v7404_v5 = vmov 0  }
  0x29   :  { %96 = vrot.lane.b32.xlu1 %v7481_v1, %s7381_s12  ;;  %70 = vrot.lane.b32.xlu0 %v7481_v1, %s7382_s13  ;;  %s7384_s0 = smov 31   ;;  %s7385_s14 = smov 30   ;;  %v787_v6 = vld [vmem:[%s12110_s3] sm:$0xff]  ;;  %v788_v7 = vld [vmem:[%s12110_s3 + $0x8] sm:$0xff]  ;;  %v80_v17 = vshrl.u32 %v79_v14, 7  ;;  %vm72_vm2 = vcmask 277504  }
  0x2a   :  { %v7487_v3 = vsel %vm62_vm0, %v60_v2, 0.0  ;;  %s7386_s15 = smov 18   ;;  %s7387_s16 = smov 17   ;;  %6511 = vmatprep.mubr.msk.f32.mxu0 %vm805_vm1, %v732_v4  ;;  %7300 = vset.pattern.permute.xlu0 %v7404_v5  ;;  %v2355_v8 = vld [vmem:[%s12112_s5] sm:$0xff]  ;;  %v789_v9 = vld [vmem:[%s12110_s3 + $0x10] sm:$0xff]  ;;  %v2356_v11 = vld [vmem:[%s12112_s5 + $0x8] sm:$0xff] }
  0x2b   :  { %s7388_s17 = smov 16   ;;  %s7389_s18 = smov 15   ;;  %7301 = vset.pattern.permute.xlu1 %v7404_v5  ;;  %v2357_v10 = vld [vmem:[%s12112_s5 + $0x10] sm:$0xff]  ;;  %v2359_v12 = vld [vmem:[%s12112_s5 + $0x20] sm:$0xff]  ;;  %v2358_v13 = vld [vmem:[%s12112_s5 + $0x18] sm:$0xff]  ;;  %v7615_v20 = vsub.s32 0, %v80_v17 }
  0x2c   :  { %s12132_s19 = smov 14   ;;  %s7391_s20 = smov 2   ;;  %v2361_v15 = vld [vmem:[%s12112_s5 + $0x30] sm:$0xff]  ;;  %v2360_v16 = vld [vmem:[%s12112_s5 + $0x28] sm:$0xff]  ;;  %v7617_v21 = vsub.s32 1, %v80_v17  ;;  %vm98_vm3 = vcmask 269312  }
  0x2d   :  { %123 = vrot.lane.b32.xlu1 %v7481_v1, %s7383_s6  ;;  %66 = vrot.lane.b32.xlu0 %v7487_v3, %s7382_s13  ;;  %s12126_s21 = smov 1   ;;  %s7393_s22 = smov 127   ;;  %12543 = vst [vmem:[#allocation12_spill] sm:$0xff] %v7615_v20  ;;  %v77_v22 = vld [vmem:[%s12108_s1] sm:$0x3]  ;;  %vm125_vm4 = vcmask 261120  }
  0x2e   :  { %s7394_s23 = smov 126   ;;  %s7395_s24 = smov 114   ;;  %12544 = vst [vmem:[#allocation13_spill] sm:$0xff] %v7617_v21  ;;  %v6487_v23 = vld [vmem:[%s12108_s1 + $0x2] sm:$0x3]  ;;  %v86_v28 = vrot.slane %v77_v22, %v7617_v21  ;;  %v82_v30 = vrot.slane %v77_v22, %v7615_v20  ;;  %vm152_vm5 = vcmask 252928  }
  0x2f   :  { %s7396_s25 = smov 113   ;;  %s7397_s26 = smov 112   ;;  %v6488_v26 = vld [vmem:[%s12108_s1 + $0x4] sm:$0x3]  ;;  %v6489_v27 = vld [vmem:[%s12108_s1 + $0x6] sm:$0x3]  ;;  %v113_v29 = vrot.slane %v6487_v23, %v7617_v21  ;;  %v109_v31 = vrot.slane %v6487_v23, %v7615_v20 }
  0x30   :  { %s12128_s27 = smov 111   ;;  %s12124_s29 = smov 110   ;;  %v136_v35 = vrot.slane %v6488_v26, %v7615_v20  ;;  %v140_v36 = vrot.slane %v6488_v26, %v7617_v21  ;;  %v163_v39 = vrot.slane %v6489_v27, %v7615_v20  ;;  %v167_v40 = vrot.slane %v6489_v27, %v7617_v21  ;;  %v6490_v58 = vld [vmem:[%s12108_s1 + $0x8] sm:$0x3]  ;;  %v6491_v59 = vld [vmem:[%s12108_s1 + $0xa] sm:$0x3] }
  0x31   :  { %93 = vrot.lane.b32.xlu1 %v7487_v3, %s7381_s12  ;;  %120 = vrot.lane.b32.xlu0 %v7487_v3, %s7383_s6  ;;  %s12120_s4 = smov 98   ;;  %s12116_s28 = smov 97   ;;  %vm179_vm6 = vcmask 244736   ;;  %v190_v0 = vrot.slane %v6490_v58, %v7615_v20  ;;  %v194_v2 = vrot.slane %v6490_v58, %v7617_v21  ;;  %vm206_vm7 = vcmask 146432   ;;  %v6493_v17 = vld [vmem:[%s12108_s1 + $0xe] sm:$0x3] }
  0x32   :  { %s12118_s30 = smov 96   ;;  %s12122_s11 = smov 95   ;;  %v217_v4 = vrot.slane %v6491_v59, %v7615_v20  ;;  %v221_v5 = vrot.slane %v6491_v59, %v7617_v21  ;;  %vm12231_vm8 = vcmask 138240   ;;  %vm12230_vm9 = vcmask 130048   ;;  %v6496_v58 = vld [vmem:[%s12108_s1 + $0x14] sm:$0x3] }
  0x33   :  { %v271_v26 = vrot.slane %v6493_v17, %v7615_v20  ;;  %v275_v27 = vrot.slane %v6493_v17, %v7617_v21  ;;  %vm12229_vm10 = vcmask 121856   ;;  %vm314_vm11 = vcmask 113664   ;;  %v6497_v59 = vld [vmem:[%s12108_s1 + $0x16] sm:$0x3]  ;;  %s12548_s9 = smov 1   ;;  %s12550_s10 = smov 110  }
  0x34   :  { %vm341_vm12 = vcmask 15360   ;;  %vm368_vm13 = vcmask 7168   ;;  %vm12142_vm14 = vcmask 1039360   ;;  %vm12134_vm15 = vcmask 1031168   ;;  %s12552_s5 = smov 97  }
  0x35   :  { %150 = vrot.lane.b32.xlu1 %v7481_v1, %s7384_s0  ;;  %147 = vrot.lane.b32.xlu0 %v7487_v3, %s7384_s0  ;;  %vm12135_vm0 = vcmask 932864  }
  0x39   :  { %177 = vrot.lane.b32.xlu1 %v7481_v1, %s7385_s14  ;;  %174 = vrot.lane.b32.xlu0 %v7487_v3, %s7385_s14 }
  0x3d   :  { %204 = vrot.lane.b32.xlu1 %v7481_v1, %s7386_s15  ;;  %201 = vrot.lane.b32.xlu0 %v7487_v3, %s7386_s15 }
  0x41   :  { %231 = vrot.lane.b32.xlu1 %v7481_v1, %s7387_s16  ;;  %228 = vrot.lane.b32.xlu0 %v7487_v3, %s7387_s16 }
  0x45   :  { %258 = vrot.lane.b32.xlu1 %v7481_v1, %s7388_s17  ;;  %255 = vrot.lane.b32.xlu0 %v7487_v3, %s7388_s17 }
  0x49   :  { %285 = vrot.lane.b32.xlu1 %v7481_v1, %s7389_s18  ;;  %282 = vrot.lane.b32.xlu0 %v7487_v3, %s7389_s18 }
  0x4d   :  { %312 = vrot.lane.b32.xlu1 %v7481_v1, %s12132_s19  ;;  %309 = vrot.lane.b32.xlu0 %v7487_v3, %s12132_s19 }
  0x51   :  { %339 = vrot.lane.b32.xlu1 %v7481_v1, %s7391_s20  ;;  %336 = vrot.lane.b32.xlu0 %v7487_v3, %s7391_s20 }
  0x55   :  { %366 = vrot.lane.b32.xlu1 %v7481_v1, %s12126_s21  ;;  %363 = vrot.lane.b32.xlu0 %v7487_v3, %s12126_s21 }
  0x59   :  { %409 = vrot.lane.b32.xlu1 %v7487_v3, %s7393_s22  ;;  %407 = vrot.lane.b32.xlu0 %v7481_v1, %s7393_s22 }
  0x5d   :  { %436 = vrot.lane.b32.xlu1 %v7487_v3, %s7394_s23  ;;  %434 = vrot.lane.b32.xlu0 %v7481_v1, %s7394_s23 }
  0x61   :  { %463 = vrot.lane.b32.xlu1 %v7487_v3, %s7395_s24  ;;  %461 = vrot.lane.b32.xlu0 %v7481_v1, %s7395_s24 }
  0x65   :  { %490 = vrot.lane.b32.xlu1 %v7487_v3, %s7396_s25  ;;  %488 = vrot.lane.b32.xlu0 %v7481_v1, %s7396_s25 }
  0x69   :  { %517 = vrot.lane.b32.xlu1 %v7487_v3, %s7397_s26  ;;  %515 = vrot.lane.b32.xlu0 %v7481_v1, %s7397_s26 }
  0x6d   :  { %544 = vrot.lane.b32.xlu1 %v7487_v3, %s12128_s27  ;;  %542 = vrot.lane.b32.xlu0 %v7481_v1, %s12128_s27 }
  0x71   :  { %571 = vrot.lane.b32.xlu1 %v7487_v3, %s12124_s29  ;;  %569 = vrot.lane.b32.xlu0 %v7481_v1, %s12124_s29  ;;  %s12554_s29 = smov 95  }
  0x75   :  { %598 = vrot.lane.b32.xlu1 %v7487_v3, %s12120_s4  ;;  %596 = vrot.lane.b32.xlu0 %v7481_v1, %s12120_s4  ;;  %s12551_s4 = smov 98  }
  0x79   :  { %625 = vrot.lane.b32.xlu1 %v7487_v3, %s12116_s28  ;;  %623 = vrot.lane.b32.xlu0 %v7481_v1, %s12116_s28  ;;  %s12130_s28 = smov 94  }
  0x7d   :  { %652 = vrot.lane.b32.xlu1 %v7487_v3, %s12118_s30  ;;  %650 = vrot.lane.b32.xlu0 %v7481_v1, %s12118_s30  ;;  %s12553_s30 = smov 96  }
  0x81   :  { %679 = vrot.lane.b32.xlu1 %v7487_v3, %s12122_s11  ;;  %677 = vrot.lane.b32.xlu0 %v7481_v1, %s12122_s11  ;;  %s12555_s11 = smov 94  }
  0x85   :  { %706 = vrot.lane.b32.xlu1 %v7487_v3, %s12130_s28  ;;  %704 = vrot.lane.b32.xlu0 %v7481_v1, %s12130_s28  ;;  %s12547_s28 = smov 111  }
  0x89   :  { %792 = vperm.xlu0 %7300, %v787_v6   ;;  %797 = vperm.xlu1 %7301, %v788_v7  }
  0x8d   :  { %2364 = vperm.xlu0 %7300, %v2355_v8   ;;  %802 = vperm.xlu1 %7301, %v789_v9  }
  0x91   :  { %2374 = vperm.xlu0 %7300, %v2357_v10   ;;  %2369 = vperm.xlu1 %7301, %v2356_v11  }
  0x95   :  { %2384 = vperm.xlu0 %7300, %v2359_v12   ;;  %2379 = vperm.xlu1 %7301, %v2358_v13  }
  0x99   :  { %2394 = vperm.xlu0 %7300, %v2361_v15   ;;  %2389 = vperm.xlu1 %7301, %v2360_v16   ;;  %v6492_v16 = vld [vmem:[%s12108_s1 + $0xc] sm:$0x3] }
  0x9b   :  { %v97_v18 = vpop.permute.xlu1 %96  ;;  %v71_v19 = vpop.permute.xlu0 %70 }
  0x9f   :  { %v124_v24 = vpop.permute.xlu1 %123  ;;  %v67_v25 = vpop.permute.xlu0 %66 }
  0xa0   :  { %v76_v32 = vsel %vm72_vm2, %v67_v25, %v71_v19  ;;  %v73_v33 = vsel %vm72_vm2, %v71_v19, %v67_v25  ;;  %v248_v25 = vrot.slane %v6492_v16, %v7617_v21 }
  0xa1   :  { %v90_v42 = vmul.f32 %v86_v28, %v73_v33  ;;  %v89_v44 = vmul.f32 %v82_v30, %v76_v32 }
  0xa3   :  { %v94_v34 = vpop.permute.xlu1 %93  ;;  %v121_v37 = vpop.permute.xlu0 %120 }
  0xa4   :  { %v102_v38 = vsel %vm98_vm3, %v94_v34, %v97_v18  ;;  %v99_v41 = vsel %vm98_vm3, %v97_v18, %v94_v34  ;;  %v126_v46 = vsel %vm125_vm4, %v124_v24, %v121_v37  ;;  %v129_v47 = vsel %vm125_vm4, %v121_v37, %v124_v24 }
  0xa5   :  { %v117_v43 = vmul.f32 %v113_v29, %v99_v41  ;;  %v116_v45 = vmul.f32 %v109_v31, %v102_v38  ;;  %v143_v54 = vmul.f32 %v136_v35, %v129_v47  ;;  %v144_v55 = vmul.f32 %v140_v36, %v126_v46  ;;  %v6494_v38 = vld [vmem:[%s12108_s1 + $0x10] sm:$0x3] }
  0xa6   :  { %v244_v24 = vrot.slane %v6492_v16, %v7615_v20 }
  0xa7   :  { %v151_v48 = vpop.permute.xlu1 %150  ;;  %v148_v49 = vpop.permute.xlu0 %147  ;;  %v6596_v50 = vpack.c.bf16 %v117_v43, %v90_v42  ;;  %v6598_v51 = vpack.c.bf16 %v116_v45, %v89_v44  ;;  %v298_v44 = vrot.slane %v6494_v38, %v7615_v20  ;;  %v302_v45 = vrot.slane %v6494_v38, %v7617_v21 }
  0xa8   :  { %v153_v52 = vsel %vm152_vm5, %v151_v48, %v148_v49  ;;  %v156_v53 = vsel %vm152_vm5, %v148_v49, %v151_v48 }
  0xa9   :  { %v170_v56 = vmul.f32 %v163_v39, %v156_v53  ;;  %v171_v57 = vmul.f32 %v167_v40, %v153_v52  ;;  %6597 = vmatprep.subr.bf16.mxu0 %v6596_v50  ;;  %v6495_v39 = vld [vmem:[%s12108_s1 + $0x12] sm:$0x3] }
  0xaa   :  { %6599 = vmatpush1.bf16.msra.mxu0 %v6598_v51  ;;  %v325_v46 = vrot.slane %v6495_v39, %v7615_v20  ;;  %v329_v47 = vrot.slane %v6495_v39, %v7617_v21 }
  0xab   :  { %v178_v60 = vpop.permute.xlu1 %177  ;;  %v175_v61 = vpop.permute.xlu0 %174  ;;  %v6600_v62 = vpack.c.bf16 %v171_v57, %v144_v55  ;;  %v6602_v63 = vpack.c.bf16 %v170_v56, %v143_v54 }
  0xac   :  { %v180_v6 = vsel %vm179_vm6, %v178_v60, %v175_v61  ;;  %v183_v7 = vsel %vm179_vm6, %v175_v61, %v178_v60 }
  0xad   :  { %6601 = vmatprep.subr.bf16.mxu0 %v6600_v62  ;;  %v197_v12 = vmul.f32 %v190_v0, %v183_v7  ;;  %v198_v13 = vmul.f32 %v194_v2, %v180_v6  ;;  %v352_v0 = vrot.slane %v6496_v58, %v7615_v20  ;;  %v6498_v2 = vld [vmem:[%s12108_s1 + $0x18] sm:$0x3]  ;;  %v383_v6 = vrot.slane %v6497_v59, %v7617_v21  ;;  %v6499_v7 = vld [vmem:[%s12108_s1 + $0x1a] sm:$0x3] }
  0xae   :  { %6603 = vmatpush1.bf16.msra.mxu0 %v6602_v63  ;;  %v423_v16 = vrot.slane %v6499_v7, %v7615_v20  ;;  %v427_v17 = vrot.slane %v6499_v7, %v7617_v21 }
  0xaf   :  { %v205_v8 = vpop.permute.xlu1 %204  ;;  %v202_v9 = vpop.permute.xlu0 %201 }
  0xb0   :  { %v207_v10 = vsel %vm206_vm7, %v205_v8, %v202_v9  ;;  %v210_v11 = vsel %vm206_vm7, %v202_v9, %v205_v8 }
  0xb1   :  { %v224_v14 = vmul.f32 %v217_v4, %v210_v11  ;;  %v225_v15 = vmul.f32 %v221_v5, %v207_v10  ;;  %v356_v4 = vrot.slane %v6496_v58, %v7617_v21  ;;  %v379_v5 = vrot.slane %v6497_v59, %v7615_v20 }
  0xb3   :  { %v232_v18 = vpop.permute.xlu1 %231  ;;  %v229_v19 = vpop.permute.xlu0 %228  ;;  %v6604_v22 = vpack.c.bf16 %v225_v15, %v198_v13  ;;  %v6606_v23 = vpack.c.bf16 %v224_v14, %v197_v12  ;;  %v400_v12 = vrot.slane %v6498_v2, %v7617_v21  ;;  %v396_v13 = vrot.slane %v6498_v2, %v7615_v20 }
  0xb4   :  { %v234_v28 = vsel %vm12231_vm8, %v232_v18, %v229_v19  ;;  %v237_v29 = vsel %vm12231_vm8, %v229_v19, %v232_v18 }
  0xb5   :  { %6605 = vmatprep.subr.bf16.mxu0 %v6604_v22  ;;  %v251_v34 = vmul.f32 %v244_v24, %v237_v29  ;;  %v252_v35 = vmul.f32 %v248_v25, %v234_v28  ;;  %v404_v28 = vmul.f32 %v400_v12, %v7487_v3  ;;  %v403_v29 = vmul.f32 %v396_v13, %v7481_v1 }
  0xb6   :  { %6607 = vmatpush1.bf16.msra.mxu0 %v6606_v23 }
  0xb7   :  { %v259_v30 = vpop.permute.xlu1 %258  ;;  %v256_v31 = vpop.permute.xlu0 %255 }
  0xb8   :  { %v261_v32 = vsel %vm12230_vm9, %v259_v30, %v256_v31  ;;  %v264_v33 = vsel %vm12230_vm9, %v256_v31, %v259_v30 }
  0xb9   :  { %v278_v36 = vmul.f32 %v271_v26, %v264_v33  ;;  %v279_v37 = vmul.f32 %v275_v27, %v261_v32 }
  0xbb   :  { %v286_v40 = vpop.permute.xlu1 %285  ;;  %v283_v41 = vpop.permute.xlu0 %282  ;;  %v6608_v42 = vpack.c.bf16 %v279_v37, %v252_v35  ;;  %v6610_v43 = vpack.c.bf16 %v278_v36, %v251_v34  ;;  %v6500_v34 = vld [vmem:[%s12108_s1 + $0x1c] sm:$0x3]  ;;  %v6501_v35 = vld [vmem:[%s12108_s1 + $0x1e] sm:$0x3] }
  0xbc   :  { %v288_v48 = vsel %vm12229_vm10, %v286_v40, %v283_v41  ;;  %v291_v49 = vsel %vm12229_vm10, %v283_v41, %v286_v40  ;;  %v450_v38 = vrot.slane %v6500_v34, %v7615_v20  ;;  %v454_v39 = vrot.slane %v6500_v34, %v7617_v21 }
  0xbd   :  { %6609 = vmatprep.subr.bf16.mxu0 %v6608_v42  ;;  %v305_v54 = vmul.f32 %v298_v44, %v291_v49  ;;  %v306_v55 = vmul.f32 %v302_v45, %v288_v48  ;;  %v477_v40 = vrot.slane %v6501_v35, %v7615_v20  ;;  %v481_v41 = vrot.slane %v6501_v35, %v7617_v21 }
  0xbe   :  { %6611 = vmatpush1.bf16.msra.mxu0 %v6610_v43 }
  0xbf   :  { %v313_v50 = vpop.permute.xlu1 %312  ;;  %v310_v51 = vpop.permute.xlu0 %309 }
  0xc0   :  { %v315_v52 = vsel %vm314_vm11, %v313_v50, %v310_v51  ;;  %v318_v53 = vsel %vm314_vm11, %v310_v51, %v313_v50 }
  0xc1   :  { %v332_v56 = vmul.f32 %v325_v46, %v318_v53  ;;  %v333_v57 = vmul.f32 %v329_v47, %v315_v52  ;;  %v6502_v52 = vld [vmem:[%s12108_s1 + $0x20] sm:$0x3]  ;;  %v6503_v53 = vld [vmem:[%s12108_s1 + $0x22] sm:$0x3] }
  0xc2   :  { %v504_v58 = vrot.slane %v6502_v52, %v7615_v20  ;;  %v508_v59 = vrot.slane %v6502_v52, %v7617_v21 }
  0xc3   :  { %v340_v60 = vpop.permute.xlu1 %339  ;;  %v337_v61 = vpop.permute.xlu0 %336  ;;  %v6612_v62 = vpack.c.bf16 %v333_v57, %v306_v55  ;;  %v6614_v63 = vpack.c.bf16 %v332_v56, %v305_v54 }
  0xc4   :  { %v342_v8 = vsel %vm341_vm12, %v340_v60, %v337_v61  ;;  %v345_v9 = vsel %vm341_vm12, %v337_v61, %v340_v60  ;;  %v531_v60 = vrot.slane %v6503_v53, %v7615_v20  ;;  %v535_v61 = vrot.slane %v6503_v53, %v7617_v21 }
  0xc5   :  { %6613 = vmatprep.subr.bf16.mxu0 %v6612_v62  ;;  %v359_v18 = vmul.f32 %v352_v0, %v345_v9  ;;  %v360_v19 = vmul.f32 %v356_v4, %v342_v8 }
  0xc6   :  { %6615 = vmatpush1.bf16.msra.mxu0 %v6614_v63 }
  0xc7   :  { %v367_v10 = vpop.permute.xlu1 %366  ;;  %v364_v11 = vpop.permute.xlu0 %363 }
  0xc8   :  { %v369_v14 = vsel %vm368_vm13, %v367_v10, %v364_v11  ;;  %v372_v15 = vsel %vm368_vm13, %v364_v11, %v367_v10  ;;  %v6504_v10 = vld [vmem:[%s12108_s1 + $0x24] sm:$0x3]  ;;  %v6505_v11 = vld [vmem:[%s12108_s1 + $0x26] sm:$0x3] }
  0xc9   :  { %v386_v22 = vmul.f32 %v379_v5, %v372_v15  ;;  %v387_v23 = vmul.f32 %v383_v6, %v369_v14 }
  0xcb   :  { %v410_v24 = vpop.permute.xlu1 %409  ;;  %v408_v25 = vpop.permute.xlu0 %407  ;;  %v6616_v26 = vpack.c.bf16 %v387_v23, %v360_v19  ;;  %v6618_v27 = vpack.c.bf16 %v386_v22, %v359_v18  ;;  %v585_v18 = vrot.slane %v6505_v11, %v7615_v20  ;;  %v589_v19 = vrot.slane %v6505_v11, %v7617_v21 }
  0xcc   :  { %v412_v30 = vsel %vm12142_vm14, %v408_v25, %v410_v24  ;;  %v416_v31 = vsel %vm12142_vm14, %v410_v24, %v408_v25  ;;  %vm708_vm14 = vcmask 769024  }
  0xcd   :  { %v430_v32 = vmul.f32 %v423_v16, %v412_v30  ;;  %v431_v33 = vmul.f32 %v427_v17, %v416_v31  ;;  %6617 = vmatprep.subr.bf16.mxu0 %v6616_v26  ;;  %v558_v16 = vrot.slane %v6504_v10, %v7615_v20  ;;  %v562_v17 = vrot.slane %v6504_v10, %v7617_v21 }
  0xce   :  { %6619 = vmatpush1.bf16.msra.mxu0 %v6618_v27 }
  0xcf   :  { %v437_v36 = vpop.permute.xlu1 %436  ;;  %v435_v3 = vpop.permute.xlu0 %434  ;;  %v6620_v1 = vpack.c.bf16 %v431_v33, %v404_v28  ;;  %v6622_v37 = vpack.c.bf16 %v430_v32, %v403_v29  ;;  %v6506_v32 = vld [vmem:[%s12108_s1 + $0x28] sm:$0x3]  ;;  %v6507_v33 = vld [vmem:[%s12108_s1 + $0x2a] sm:$0x3] }
  0xd0   :  { %v439_v42 = vsel %vm12134_vm15, %v435_v3, %v437_v36  ;;  %v443_v43 = vsel %vm12134_vm15, %v437_v36, %v435_v3  ;;  %vm12136_vm15 = vcmask 924672  }
  0xd1   :  { %6621 = vmatprep.subr.bf16.mxu0 %v6620_v1  ;;  %v457_v48 = vmul.f32 %v450_v38, %v439_v42  ;;  %v458_v49 = vmul.f32 %v454_v39, %v443_v43  ;;  %v612_v1 = vrot.slane %v6506_v32, %v7615_v20  ;;  %v639_v38 = vrot.slane %v6507_v33, %v7615_v20 }
  0xd2   :  { %6623 = vmatpush1.bf16.msra.mxu0 %v6622_v37  ;;  %v616_v37 = vrot.slane %v6506_v32, %v7617_v21  ;;  %v643_v39 = vrot.slane %v6507_v33, %v7617_v21 }
  0xd3   :  { %v464_v44 = vpop.permute.xlu1 %463  ;;  %v462_v45 = vpop.permute.xlu0 %461 }
  0xd4   :  { %v466_v46 = vsel %vm12135_vm0, %v462_v45, %v464_v44  ;;  %v470_v47 = vsel %vm12135_vm0, %v464_v44, %v462_v45  ;;  %vm12137_vm0 = vcmask 916480  }
  0xd5   :  { %v484_v50 = vmul.f32 %v477_v40, %v466_v46  ;;  %v485_v51 = vmul.f32 %v481_v41, %v470_v47 }
  0xd7   :  { %v491_v54 = vpop.permute.xlu1 %490  ;;  %v489_v55 = vpop.permute.xlu0 %488  ;;  %v6624_v56 = vpack.c.bf16 %v485_v51, %v458_v49  ;;  %v6626_v57 = vpack.c.bf16 %v484_v50, %v457_v48  ;;  %v6508_v50 = vld [vmem:[%s12108_s1 + $0x2c] sm:$0x3]  ;;  %v6509_v51 = vld [vmem:[%s12108_s1 + $0x2e] sm:$0x3] }
  0xd8   :  { %v493_v62 = vsel %vm12136_vm15, %v489_v55, %v491_v54  ;;  %v497_v63 = vsel %vm12136_vm15, %v491_v54, %v489_v55  ;;  %vm12138_vm15 = vcmask 908288  }
  0xd9   :  { %6625 = vmatprep.subr.bf16.mxu0 %v6624_v56  ;;  %v511_v6 = vmul.f32 %v504_v58, %v493_v62  ;;  %v512_v7 = vmul.f32 %v508_v59, %v497_v63  ;;  %v666_v56 = vrot.slane %v6508_v50, %v7615_v20  ;;  %v693_v58 = vrot.slane %v6509_v51, %v7615_v20 }
  0xda   :  { %6627 = vmatpush1.bf16.msra.mxu0 %v6626_v57  ;;  %v670_v57 = vrot.slane %v6508_v50, %v7617_v21  ;;  %v697_v59 = vrot.slane %v6509_v51, %v7617_v21 }
  0xdb   :  { %v518_v0 = vpop.permute.xlu1 %517  ;;  %v516_v2 = vpop.permute.xlu0 %515 }
  0xdc   :  { %v520_v4 = vsel %vm12137_vm0, %v516_v2, %v518_v0  ;;  %v524_v5 = vsel %vm12137_vm0, %v518_v0, %v516_v2  ;;  %vm12139_vm0 = vcmask 900096  }
  0xdd   :  { %v538_v8 = vmul.f32 %v531_v60, %v520_v4  ;;  %v539_v9 = vmul.f32 %v535_v61, %v524_v5  ;;  %v6510_v60 = vld [vmem:[%s12108_s1 + $0x30] sm:$0x3] }
  0xde   :  { %v724_v5 = vrot.slane %v6510_v60, %v7617_v21  ;;  %v720_v10 = vrot.slane %v6510_v60, %v7615_v20 }
  0xdf   :  { %v545_v12 = vpop.permute.xlu1 %544  ;;  %v543_v13 = vpop.permute.xlu0 %542  ;;  %v6628_v14 = vpack.c.bf16 %v539_v9, %v512_v7  ;;  %v6630_v15 = vpack.c.bf16 %v538_v8, %v511_v6 }
  0xe0   :  { %v547_v22 = vsel %vm12138_vm15, %v543_v13, %v545_v12  ;;  %v551_v23 = vsel %vm12138_vm15, %v545_v12, %v543_v13  ;;  %vm12140_vm15 = vcmask 801792  }
  0xe1   :  { %6629 = vmatprep.subr.bf16.mxu0 %v6628_v14  ;;  %v565_v28 = vmul.f32 %v558_v16, %v547_v22  ;;  %v566_v29 = vmul.f32 %v562_v17, %v551_v23  ;;  %v734_v22 = vld [vmem:[%s12109_s2 + $0x18] sm:$0xff]  ;;  %v733_v23 = vld [vmem:[%s12109_s2 + $0x10] sm:$0xff] }
  0xe2   :  { %6631 = vmatpush1.bf16.msra.mxu0 %v6630_v15 }
  0xe3   :  { %v572_v24 = vpop.permute.xlu1 %571  ;;  %v570_v25 = vpop.permute.xlu0 %569 }
  0xe4   :  { %v574_v26 = vsel %vm12139_vm0, %v570_v25, %v572_v24  ;;  %v578_v27 = vsel %vm12139_vm0, %v572_v24, %v570_v25  ;;  %vm12141_vm0 = vcmask 793600   ;;  %v736_v24 = vld [vmem:[%s12109_s2 + $0x28] sm:$0xff]  ;;  %v735_v25 = vld [vmem:[%s12109_s2 + $0x20] sm:$0xff] }
  0xe5   :  { %v592_v30 = vmul.f32 %v585_v18, %v574_v26  ;;  %v593_v31 = vmul.f32 %v589_v19, %v578_v27  ;;  %v731_v19 = vld [vmem:[%s12109_s2] sm:$0xff]  ;;  %s12546_s2 = smov 14  }
  0xe7   :  { %v599_v34 = vpop.permute.xlu1 %598  ;;  %v597_v35 = vpop.permute.xlu0 %596  ;;  %v6632_v36 = vpack.c.bf16 %v593_v31, %v566_v29  ;;  %v6634_v3 = vpack.c.bf16 %v592_v30, %v565_v28 }
  0xe8   :  { %v601_v40 = vsel %vm12140_vm15, %v597_v35, %v599_v34  ;;  %v605_v41 = vsel %vm12140_vm15, %v599_v34, %v597_v35  ;;  %vm654_vm15 = vcmask 785408  }
  0xe9   :  { %6633 = vmatprep.subr.bf16.mxu0 %v6632_v36  ;;  %v619_v46 = vmul.f32 %v612_v1, %v601_v40  ;;  %v620_v47 = vmul.f32 %v616_v37, %v605_v41 }
  0xea   :  { %6635 = vmatpush1.bf16.msra.mxu0 %v6634_v3 }
  0xeb   :  { %v626_v42 = vpop.permute.xlu1 %625  ;;  %v624_v43 = vpop.permute.xlu0 %623 }
  0xec   :  { %v628_v44 = vsel %vm12141_vm0, %v624_v43, %v626_v42  ;;  %v632_v45 = vsel %vm12141_vm0, %v626_v42, %v624_v43  ;;  %vm681_vm0 = vcmask 777216  }
  0xed   :  { %v646_v48 = vmul.f32 %v639_v38, %v628_v44  ;;  %v647_v49 = vmul.f32 %v643_v39, %v632_v45 }
  0xef   :  { %v653_v52 = vpop.permute.xlu1 %652  ;;  %v651_v53 = vpop.permute.xlu0 %650  ;;  %v6636_v54 = vpack.c.bf16 %v647_v49, %v620_v47  ;;  %v6638_v55 = vpack.c.bf16 %v646_v48, %v619_v46 }
  0xf0   :  { %v655_v61 = vsel %vm654_vm15, %v651_v53, %v653_v52  ;;  %v659_v62 = vsel %vm654_vm15, %v653_v52, %v651_v53 }
  0xf1   :  { %6637 = vmatprep.subr.bf16.mxu0 %v6636_v54  ;;  %v673_v6 = vmul.f32 %v666_v56, %v655_v61  ;;  %v674_v7 = vmul.f32 %v670_v57, %v659_v62 }
  0xf2   :  { %6639 = vmatpush1.bf16.msra.mxu0 %v6638_v55 }
  0xf3   :  { %v680_v63 = vpop.permute.xlu1 %679  ;;  %v678_v0 = vpop.permute.xlu0 %677 }
  0xf4   :  { %v682_v2 = vsel %vm681_vm0, %v678_v0, %v680_v63  ;;  %v686_v4 = vsel %vm681_vm0, %v680_v63, %v678_v0 }
  0xf5   :  { %v700_v8 = vmul.f32 %v693_v58, %v682_v2  ;;  %v701_v9 = vmul.f32 %v697_v59, %v686_v4 }
  0xf7   :  { %v707_v11 = vpop.permute.xlu1 %706  ;;  %v705_v12 = vpop.permute.xlu0 %704  ;;  %v6640_v13 = vpack.c.bf16 %v701_v9, %v674_v7  ;;  %v6642_v14 = vpack.c.bf16 %v700_v8, %v673_v6 }
  0xf8   :  { %v709_v15 = vsel %vm708_vm14, %v705_v12, %v707_v11  ;;  %v713_v16 = vsel %vm708_vm14, %v707_v11, %v705_v12 }
  0xf9   :  { %6641 = vmatprep.subr.bf16.mxu0 %v6640_v13  ;;  %v728_v17 = vmul.f32 %v724_v5, %v713_v16  ;;  %v727_v18 = vmul.f32 %v720_v10, %v709_v15 }
  0xfa   :  { %6643 = vmatpush1.bf16.msra.mxu0 %v6642_v14 }
  0xfb   :  { %863 = vmatprep.subr.mxu0 %v728_v17 }
  0xfe   :  { %864 = vmatpush1.msra.mxu0 %v727_v18 }
  0xff   :  { %880 = vmatmul.mubr.f32.vlgmr.msra.gmra.mrb[0].mxu0 %v731_v19 }
 0x100   :  { %6512 = vmatprep.mubr.msk.f32.mxu0 %vm805_vm1, %v734_v22 }
 0x103   :  { %886 = vmatmul.mubr.f32.gmra.mrb[2].mxu0 %v733_v23 }
 0x104   :  { %6513 = vmatprep.mubr.msk.f32.mxu0 %vm805_vm1, %v736_v24  ;;  %vm12656_vm1 = vcmask 1039360  }
 0x107   :  { %892 = vmatmul.mubr.f32.gmra.mrb[4].mxu0 %v735_v25 }
 0x108   :  { %v793_v26 = vpop.permute.xlu0 %792  ;;  %v798_v39 = vpop.permute.xlu1 %797 }
 0x10c   :  { %v7913_v47 = vpop.permute.xlu0 %2364  ;;  %v7915_v48 = vpop.permute.xlu1 %802 }
 0x10d   :  { %12557 = vst [vmem:[#allocation17_spill] sm:$0xff] %v7913_v47 }
 0x110   :  { %v7927_v50 = vpop.permute.xlu0 %2374  ;;  %v7929_v51 = vpop.permute.xlu1 %2369 }
 0x111   :  { %12559 = vst [vmem:[#allocation19_spill] sm:$0xff] %v7927_v50  ;;  %12560 = vst [vmem:[#allocation20_spill] sm:$0xff] %v7929_v51 }
 0x114   :  { %v7935_v52 = vpop.permute.xlu0 %2384  ;;  %v7937_v53 = vpop.permute.xlu1 %2379 }
 0x115   :  { %12561 = vst [vmem:[#allocation21_spill] sm:$0xff] %v7935_v52  ;;  %12562 = vst [vmem:[#allocation22_spill] sm:$0xff] %v7937_v53 }
 0x118   :  { %v7947_v54 = vpop.permute.xlu0 %2394  ;;  %v7949_v55 = vpop.permute.xlu1 %2389 }
 0x119   :  { %12563 = vst [vmem:[#allocation23_spill] sm:$0xff] %v7947_v54  ;;  %12564 = vst [vmem:[#allocation24_spill] sm:$0xff] %v7949_v55 }
 0x1d2   :  { %v881_v27 = vpop.f32.mrb[0].mxu0 }
 0x1d3   :  { %v882_v28 = vadd.f32 %v881_v27, %v793_v26  ;;  %v883_v29 = vpop.f32.mrb[1].mxu0 }
 0x1d4   :  { %v884_v3 = vadd.f32 %v883_v29, %v793_v26 }
 0x1d5   :  { %v6514_v30 = vadd.f32 -10.0, %v882_v28 }
 0x1d6   :  { %v887_v31 = vpop.f32.mrb[2].mxu0  ;;  %v6515_v1 = vadd.f32 -10.0, %v884_v3 }
 0x1d7   :  { %v904_v32 = vmax.f32 %v6514_v30, 0.0  ;;  %v889_v33 = vpop.f32.mrb[3].mxu0  ;;  %v888_v40 = vadd.f32 %v887_v31, %v798_v39 }
 0x1d8   :  { %v905_v37 = vmax.f32 %v6515_v1, 0.0  ;;  %v890_v44 = vadd.f32 %v889_v33, %v798_v39 }
 0x1d9   :  { %v7811_v34 = vadd.f32 1.0, %v904_v32  ;;  %v6516_v41 = vadd.f32 -10.0, %v888_v40 }
 0x1da   :  { %v7813_v35 = vpop.f32.mrb[4].mxu0  ;;  %v7853_v38 = vadd.f32 1.0, %v905_v37  ;;  %v6517_v45 = vadd.f32 -10.0, %v890_v44 }
 0x1db   :  { %12545 = vst [vmem:[#allocation14_spill] sm:$0xff] %v7811_v34  ;;  %1237 = vrot.lane.b32.xlu0 %v7811_v34, %s7387_s16  ;;  %931 = vrot.lane.b32.xlu1 %v7811_v34, %s7382_s13  ;;  %v7819_v36 = vpop.f32.mrb[5].mxu0  ;;  %v906_v42 = vmax.f32 %v6516_v41, 0.0  ;;  %v894_v18 = vadd.f32 %v7813_v35, %v7915_v48 }
 0x1dc   :  { %12549 = vst [vmem:[#allocation15_spill] sm:$0xff] %v7853_v38  ;;  %v907_v46 = vmax.f32 %v6517_v45, 0.0  ;;  %v896_v52 = vadd.f32 %v7819_v36, %v7915_v48  ;;  %v949_v36 = vld [vmem:[%s12108_s1] sm:$0x3] }
 0x1dd   :  { %v7903_v43 = vadd.f32 1.0, %v906_v42  ;;  %v6518_v23 = vadd.f32 -10.0, %v894_v18 }
 0x1de   :  { %v7921_v49 = vadd.f32 1.0, %v907_v46  ;;  %v6519_v51 = vadd.f32 -10.0, %v896_v52  ;;  %v8175_v52 = vrot.slane %v949_v36, %v7617_v21 }
 0x1df   :  { %1339 = vrot.lane.b32.xlu0 %v7811_v34, %s7389_s18  ;;  %982 = vrot.lane.b32.xlu1 %v7811_v34, %s7381_s12  ;;  %12556 = vst [vmem:[#allocation16_spill] sm:$0xff] %v7903_v43  ;;  %v908_v26 = vmax.f32 %v6518_v23, 0.0 }
 0x1e0   :  { %12558 = vst [vmem:[#allocation18_spill] sm:$0xff] %v7921_v49 }
 0x1e1   :  { %v8077_v29 = vadd.f32 1.0, %v908_v26 }
 0x1e3   :  { %1441 = vrot.lane.b32.xlu0 %v7811_v34, %s7391_s20  ;;  %1033 = vrot.lane.b32.xlu1 %v7811_v34, %s7383_s6  ;;  %12586 = vst [vmem:[#allocation46_spill] sm:$0xff] %v8077_v29 }
 0x1e7   :  { %1558 = vrot.lane.b32.xlu0 %v7811_v34, %s7393_s22  ;;  %1084 = vrot.lane.b32.xlu1 %v7811_v34, %s7384_s0 }
 0x1eb   :  { %1609 = vrot.lane.b32.xlu0 %v7811_v34, %s7394_s23  ;;  %1135 = vrot.lane.b32.xlu1 %v7811_v34, %s7385_s14 }
 0x1ef   :  { %1660 = vrot.lane.b32.xlu0 %v7811_v34, %s7395_s24  ;;  %1186 = vrot.lane.b32.xlu1 %v7811_v34, %s7386_s15 }
 0x1f3   :  { %1711 = vrot.lane.b32.xlu0 %v7811_v34, %s7396_s25  ;;  %1288 = vrot.lane.b32.xlu1 %v7811_v34, %s7388_s17 }
 0x1f7   :  { %1762 = vrot.lane.b32.xlu0 %v7811_v34, %s7397_s26  ;;  %1390 = vrot.lane.b32.xlu1 %v7811_v34, %s12546_s2 }
 0x1fb   :  { %1813 = vrot.lane.b32.xlu0 %v7811_v34, %s12547_s28  ;;  %1492 = vrot.lane.b32.xlu1 %v7811_v34, %s12548_s9 }
 0x1ff   :  { %1864 = vrot.lane.b32.xlu0 %v7811_v34, %s12550_s10  ;;  %1560 = vrot.lane.b32.xlu1 %v7853_v38, %s7393_s22 }
 0x203   :  { %1915 = vrot.lane.b32.xlu0 %v7811_v34, %s12551_s4  ;;  %1611 = vrot.lane.b32.xlu1 %v7853_v38, %s7394_s23 }
 0x207   :  { %1966 = vrot.lane.b32.xlu0 %v7811_v34, %s12552_s5  ;;  %1662 = vrot.lane.b32.xlu1 %v7853_v38, %s7395_s24 }
 0x20b   :  { %2017 = vrot.lane.b32.xlu0 %v7811_v34, %s12553_s30  ;;  %1713 = vrot.lane.b32.xlu1 %v7853_v38, %s7396_s25 }
 0x20f   :  { %2068 = vrot.lane.b32.xlu0 %v7811_v34, %s12554_s29  ;;  %1764 = vrot.lane.b32.xlu1 %v7853_v38, %s7397_s26 }
 0x213   :  { %2119 = vrot.lane.b32.xlu0 %v7811_v34, %s12555_s11  ;;  %1815 = vrot.lane.b32.xlu1 %v7853_v38, %s12547_s28 }
 0x217   :  { %919 = vrot.lane.b32.xlu0 %v7853_v38, %s7382_s13  ;;  %1866 = vrot.lane.b32.xlu1 %v7853_v38, %s12550_s10 }
 0x21b   :  { %973 = vrot.lane.b32.xlu0 %v7853_v38, %s7381_s12  ;;  %1917 = vrot.lane.b32.xlu1 %v7853_v38, %s12551_s4 }
 0x21f   :  { %1024 = vrot.lane.b32.xlu0 %v7853_v38, %s7383_s6  ;;  %1968 = vrot.lane.b32.xlu1 %v7853_v38, %s12552_s5 }
 0x223   :  { %1075 = vrot.lane.b32.xlu0 %v7853_v38, %s7384_s0  ;;  %2019 = vrot.lane.b32.xlu1 %v7853_v38, %s12553_s30 }
 0x227   :  { %1126 = vrot.lane.b32.xlu0 %v7853_v38, %s7385_s14  ;;  %2070 = vrot.lane.b32.xlu1 %v7853_v38, %s12554_s29 }
 0x22b   :  { %1177 = vrot.lane.b32.xlu0 %v7853_v38, %s7386_s15  ;;  %2121 = vrot.lane.b32.xlu1 %v7853_v38, %s12555_s11 }
 0x22f   :  { %1228 = vrot.lane.b32.xlu0 %v7853_v38, %s7387_s16  ;;  %1239 = vrot.lane.b32.xlu1 %v7903_v43, %s7387_s16 }
 0x233   :  { %1279 = vrot.lane.b32.xlu0 %v7853_v38, %s7388_s17  ;;  %1341 = vrot.lane.b32.xlu1 %v7903_v43, %s7389_s18 }
 0x237   :  { %1330 = vrot.lane.b32.xlu0 %v7853_v38, %s7389_s18  ;;  %1443 = vrot.lane.b32.xlu1 %v7903_v43, %s7391_s20 }
 0x23b   :  { %1381 = vrot.lane.b32.xlu0 %v7853_v38, %s12546_s2  ;;  %921 = vrot.lane.b32.xlu1 %v7921_v49, %s7382_s13 }
 0x23f   :  { %1432 = vrot.lane.b32.xlu0 %v7853_v38, %s7391_s20  ;;  %975 = vrot.lane.b32.xlu1 %v7921_v49, %s7381_s12 }
 0x243   :  { %1483 = vrot.lane.b32.xlu0 %v7853_v38, %s12548_s9  ;;  %1026 = vrot.lane.b32.xlu1 %v7921_v49, %s7383_s6 }
 0x247   :  { %933 = vrot.lane.b32.xlu0 %v7903_v43, %s7382_s13  ;;  %1077 = vrot.lane.b32.xlu1 %v7921_v49, %s7384_s0 }
 0x24b   :  { %984 = vrot.lane.b32.xlu0 %v7903_v43, %s7381_s12  ;;  %1128 = vrot.lane.b32.xlu1 %v7921_v49, %s7385_s14 }
 0x24d   :  { %v7955_v56 = vpop.permute.xlu0 %1237  ;;  %v7957_v57 = vpop.permute.xlu1 %931 }
 0x24f   :  { %1035 = vrot.lane.b32.xlu0 %v7903_v43, %s7383_s6  ;;  %1230 = vrot.lane.b32.xlu1 %v7921_v49, %s7387_s16 }
 0x251   :  { %v7963_v58 = vpop.permute.xlu0 %1339  ;;  %v7965_v59 = vpop.permute.xlu1 %982 }
 0x253   :  { %1086 = vrot.lane.b32.xlu0 %v7903_v43, %s7384_s0  ;;  %1332 = vrot.lane.b32.xlu1 %v7921_v49, %s7389_s18 }
 0x255   :  { %v7971_v60 = vpop.permute.xlu0 %1441  ;;  %v7973_v61 = vpop.permute.xlu1 %1033 }
 0x256   :  { %12565 = vst [vmem:[#allocation25_spill] sm:$0xff] %v7971_v60 }
 0x257   :  { %1137 = vrot.lane.b32.xlu0 %v7903_v43, %s7385_s14  ;;  %1434 = vrot.lane.b32.xlu1 %v7921_v49, %s7391_s20 }
 0x259   :  { %v7979_v62 = vpop.permute.xlu0 %1558  ;;  %v7981_v63 = vpop.permute.xlu1 %1084 }
 0x25a   :  { %12566 = vst [vmem:[#allocation26_spill] sm:$0xff] %v7979_v62 }
 0x25b   :  { %1188 = vrot.lane.b32.xlu0 %v7903_v43, %s7386_s15  ;;  %1564 = vrot.lane.b32.xlu1 %v7921_v49, %s7393_s22 }
 0x25d   :  { %v7987_v0 = vpop.permute.xlu0 %1609  ;;  %v7989_v2 = vpop.permute.xlu1 %1135 }
 0x25e   :  { %12567 = vst [vmem:[#allocation27_spill] sm:$0xff] %v7987_v0 }
 0x25f   :  { %1290 = vrot.lane.b32.xlu0 %v7903_v43, %s7388_s17  ;;  %1615 = vrot.lane.b32.xlu1 %v7921_v49, %s7394_s23 }
 0x261   :  { %v7995_v4 = vpop.permute.xlu0 %1660  ;;  %v7997_v5 = vpop.permute.xlu1 %1186 }
 0x262   :  { %12568 = vst [vmem:[#allocation28_spill] sm:$0xff] %v7995_v4 }
 0x263   :  { %1392 = vrot.lane.b32.xlu0 %v7903_v43, %s12546_s2  ;;  %1666 = vrot.lane.b32.xlu1 %v7921_v49, %s7395_s24 }
 0x265   :  { %v8003_v6 = vpop.permute.xlu0 %1711  ;;  %v8005_v7 = vpop.permute.xlu1 %1288 }
 0x266   :  { %12569 = vst [vmem:[#allocation29_spill] sm:$0xff] %v8003_v6 }
 0x267   :  { %1494 = vrot.lane.b32.xlu0 %v7903_v43, %s12548_s9  ;;  %1717 = vrot.lane.b32.xlu1 %v7921_v49, %s7396_s25 }
 0x269   :  { %v8011_v8 = vpop.permute.xlu0 %1762  ;;  %v8013_v9 = vpop.permute.xlu1 %1390 }
 0x26a   :  { %12570 = vst [vmem:[#allocation30_spill] sm:$0xff] %v8011_v8  ;;  %12571 = vst [vmem:[#allocation31_spill] sm:$0xff] %v8013_v9 }
 0x26b   :  { %1562 = vrot.lane.b32.xlu0 %v7903_v43, %s7393_s22  ;;  %1768 = vrot.lane.b32.xlu1 %v7921_v49, %s7397_s26 }
 0x26d   :  { %v8019_v10 = vpop.permute.xlu0 %1813  ;;  %v8021_v11 = vpop.permute.xlu1 %1492 }
 0x26e   :  { %12572 = vst [vmem:[#allocation32_spill] sm:$0xff] %v8019_v10  ;;  %12573 = vst [vmem:[#allocation33_spill] sm:$0xff] %v8021_v11  ;;  %v6521_v11 = vld [vmem:[%s12108_s1 + $0x4] sm:$0x3] }
 0x26f   :  { %1613 = vrot.lane.b32.xlu0 %v7903_v43, %s7394_s23  ;;  %1819 = vrot.lane.b32.xlu1 %v7921_v49, %s12547_s28  ;;  %v1056_v9 = vrot.slane %v6521_v11, %v7615_v20 }
 0x271   :  { %v8027_v12 = vpop.permute.xlu0 %1864  ;;  %v8029_v13 = vpop.permute.xlu1 %1560 }
 0x272   :  { %12574 = vst [vmem:[#allocation34_spill] sm:$0xff] %v8027_v12  ;;  %12575 = vst [vmem:[#allocation35_spill] sm:$0xff] %v8029_v13 }
 0x273   :  { %1664 = vrot.lane.b32.xlu0 %v7903_v43, %s7395_s24  ;;  %1870 = vrot.lane.b32.xlu1 %v7921_v49, %s12550_s10 }
 0x275   :  { %v8035_v14 = vpop.permute.xlu0 %1915  ;;  %v8037_v15 = vpop.permute.xlu1 %1611 }
 0x276   :  { %12576 = vst [vmem:[#allocation36_spill] sm:$0xff] %v8035_v14  ;;  %12577 = vst [vmem:[#allocation37_spill] sm:$0xff] %v8037_v15 }
 0x277   :  { %1715 = vrot.lane.b32.xlu0 %v7903_v43, %s7396_s25  ;;  %1921 = vrot.lane.b32.xlu1 %v7921_v49, %s12551_s4 }
 0x279   :  { %v8043_v16 = vpop.permute.xlu0 %1966  ;;  %v8045_v17 = vpop.permute.xlu1 %1662 }
 0x27a   :  { %12578 = vst [vmem:[#allocation38_spill] sm:$0xff] %v8043_v16  ;;  %12579 = vst [vmem:[#allocation39_spill] sm:$0xff] %v8045_v17 }
 0x27b   :  { %1766 = vrot.lane.b32.xlu0 %v7903_v43, %s7397_s26  ;;  %1972 = vrot.lane.b32.xlu1 %v7921_v49, %s12552_s5 }
 0x27d   :  { %v8053_v19 = vpop.permute.xlu0 %2017  ;;  %v8055_v22 = vpop.permute.xlu1 %1713 }
 0x27e   :  { %12580 = vst [vmem:[#allocation40_spill] sm:$0xff] %v8053_v19  ;;  %12581 = vst [vmem:[#allocation41_spill] sm:$0xff] %v8055_v22 }
 0x27f   :  { %1817 = vrot.lane.b32.xlu0 %v7903_v43, %s12547_s28  ;;  %2023 = vrot.lane.b32.xlu1 %v7921_v49, %s12553_s30 }
 0x281   :  { %v8061_v24 = vpop.permute.xlu0 %2068  ;;  %v8063_v25 = vpop.permute.xlu1 %1764 }
 0x282   :  { %12582 = vst [vmem:[#allocation42_spill] sm:$0xff] %v8061_v24  ;;  %12583 = vst [vmem:[#allocation43_spill] sm:$0xff] %v8063_v25 }
 0x283   :  { %1868 = vrot.lane.b32.xlu0 %v7903_v43, %s12550_s10  ;;  %2074 = vrot.lane.b32.xlu1 %v7921_v49, %s12554_s29 }
 0x285   :  { %v8069_v27 = vpop.permute.xlu0 %2119  ;;  %v8071_v28 = vpop.permute.xlu1 %1815 }
 0x286   :  { %12584 = vst [vmem:[#allocation44_spill] sm:$0xff] %v8069_v27  ;;  %12585 = vst [vmem:[#allocation45_spill] sm:$0xff] %v8071_v28  ;;  %v8178_v27 = vrot.slane %v949_v36, %v7615_v20 }
 0x287   :  { %1919 = vrot.lane.b32.xlu0 %v7903_v43, %s12551_s4  ;;  %2125 = vrot.lane.b32.xlu1 %v7921_v49, %s12555_s11 }
 0x289   :  { %v920_v30 = vpop.permute.xlu0 %919  ;;  %v8079_v31 = vpop.permute.xlu1 %1866 }
 0x28a   :  { %12587 = vst [vmem:[#allocation47_spill] sm:$0xff] %v8079_v31  ;;  %v937_v24 = vsel %vm72_vm2, %v7957_v57, %v920_v30 }
 0x28b   :  { %1970 = vrot.lane.b32.xlu0 %v7903_v43, %s12552_s5  ;;  %935 = vrot.lane.b32.xlu1 %v8077_v29, %s7382_s13  ;;  %v962_v36 = vmul.f32 %v8175_v52, %v937_v24 }
 0x28d   :  { %v8085_v32 = vpop.permute.xlu0 %973  ;;  %v8087_v33 = vpop.permute.xlu1 %1917 }
 0x28e   :  { %12588 = vst [vmem:[#allocation48_spill] sm:$0xff] %v8087_v33 }
 0x28f   :  { %2021 = vrot.lane.b32.xlu0 %v7903_v43, %s12553_s30  ;;  %986 = vrot.lane.b32.xlu1 %v8077_v29, %s7381_s12 }
 0x291   :  { %v8093_v35 = vpop.permute.xlu0 %1024  ;;  %v8095_v3 = vpop.permute.xlu1 %1968 }
 0x292   :  { %12589 = vst [vmem:[#allocation49_spill] sm:$0xff] %v8095_v3 }
 0x293   :  { %2072 = vrot.lane.b32.xlu0 %v7903_v43, %s12554_s29  ;;  %1037 = vrot.lane.b32.xlu1 %v8077_v29, %s7383_s6 }
 0x295   :  { %v8101_v1 = vpop.permute.xlu0 %1075  ;;  %v8103_v37 = vpop.permute.xlu1 %2019 }
 0x296   :  { %12590 = vst [vmem:[#allocation50_spill] sm:$0xff] %v8103_v37 }
 0x297   :  { %2123 = vrot.lane.b32.xlu0 %v7903_v43, %s12555_s11  ;;  %1088 = vrot.lane.b32.xlu1 %v8077_v29, %s7384_s0 }
 0x299   :  { %v8109_v39 = vpop.permute.xlu0 %1126  ;;  %v8111_v40 = vpop.permute.xlu1 %2070 }
 0x29a   :  { %12591 = vst [vmem:[#allocation51_spill] sm:$0xff] %v8111_v40  ;;  %v946_v40 = vsel %vm72_vm2, %v920_v30, %v7957_v57 }
 0x29b   :  { %1179 = vrot.lane.b32.xlu0 %v7921_v49, %s7386_s15  ;;  %1139 = vrot.lane.b32.xlu1 %v8077_v29, %s7385_s14  ;;  %v961_v14 = vmul.f32 %v8178_v27, %v946_v40 }
 0x29d   :  { %v8117_v41 = vpop.permute.xlu0 %1177  ;;  %v8119_v42 = vpop.permute.xlu1 %2121 }
 0x29e   :  { %12592 = vst [vmem:[#allocation52_spill] sm:$0xff] %v8119_v42  ;;  %v909_v42 = vmax.f32 %v6519_v51, 0.0 }
 0x29f   :  { %1281 = vrot.lane.b32.xlu0 %v7921_v49, %s7388_s17  ;;  %1190 = vrot.lane.b32.xlu1 %v8077_v29, %s7386_s15 }
 0x2a0   :  { %v8188_v19 = vadd.f32 1.0, %v909_v42 }
 0x2a1   :  { %v8125_v44 = vpop.permute.xlu0 %1228  ;;  %v8127_v45 = vpop.permute.xlu1 %1239 }
 0x2a2   :  { %12597 = vst [vmem:[#allocation57_spill] sm:$0xff] %v8188_v19 }
 0x2a3   :  { %1383 = vrot.lane.b32.xlu0 %v7921_v49, %s12546_s2  ;;  %1241 = vrot.lane.b32.xlu1 %v8077_v29, %s7387_s16 }
 0x2a5   :  { %v8133_v46 = vpop.permute.xlu0 %1279  ;;  %v8135_v18 = vpop.permute.xlu1 %1341 }
 0x2a7   :  { %1485 = vrot.lane.b32.xlu0 %v7921_v49, %s12548_s9  ;;  %1292 = vrot.lane.b32.xlu1 %v8077_v29, %s7388_s17 }
 0x2a9   :  { %v8141_v23 = vpop.permute.xlu0 %1330  ;;  %v8143_v26 = vpop.permute.xlu1 %1443 }
 0x2aa   :  { %12593 = vst [vmem:[#allocation53_spill] sm:$0xff] %v8143_v26 }
 0x2ab   :  { %1566 = vrot.lane.b32.xlu0 %v8077_v29, %s7393_s22  ;;  %1343 = vrot.lane.b32.xlu1 %v8077_v29, %s7389_s18 }
 0x2ad   :  { %v8149_v54 = vpop.permute.xlu0 %1381  ;;  %v922_v55 = vpop.permute.xlu1 %921 }
 0x2ae   :  { %12594 = vst [vmem:[#allocation54_spill] sm:$0xff] %v8149_v54 }
 0x2af   :  { %1617 = vrot.lane.b32.xlu0 %v8077_v29, %s7394_s23  ;;  %1394 = vrot.lane.b32.xlu1 %v8077_v29, %s12546_s2 }
 0x2b1   :  { %v8157_v53 = vpop.permute.xlu0 %1432  ;;  %v8159_v50 = vpop.permute.xlu1 %975 }
 0x2b2   :  { %12595 = vst [vmem:[#allocation55_spill] sm:$0xff] %v8157_v53 }
 0x2b3   :  { %1668 = vrot.lane.b32.xlu0 %v8077_v29, %s7395_s24  ;;  %1445 = vrot.lane.b32.xlu1 %v8077_v29, %s7391_s20 }
 0x2b5   :  { %v8168_v48 = vpop.permute.xlu0 %1483  ;;  %v8170_v47 = vpop.permute.xlu1 %1026 }
 0x2b6   :  { %12596 = vst [vmem:[#allocation56_spill] sm:$0xff] %v8168_v48 }
 0x2b7   :  { %1719 = vrot.lane.b32.xlu0 %v8077_v29, %s7396_s25  ;;  %1496 = vrot.lane.b32.xlu1 %v8077_v29, %s12548_s9 }
 0x2b9   :  { %v934_v37 = vpop.permute.xlu0 %933  ;;  %v8186_v51 = vpop.permute.xlu1 %1077 }
 0x2ba   :  { %v947_v3 = vsel %vm72_vm2, %v922_v55, %v934_v37  ;;  %v938_v16 = vsel %vm72_vm2, %v934_v37, %v922_v55 }
 0x2bb   :  { %1770 = vrot.lane.b32.xlu0 %v8077_v29, %s7397_s26  ;;  %v964_v33 = vmul.f32 %v8175_v52, %v938_v16  ;;  %v963_v57 = vmul.f32 %v8178_v27, %v947_v3  ;;  %1181 = vrot.lane.b32.xlu1 %v8188_v19, %s7386_s15 }
 0x2bd   :  { %v8200_v30 = vpop.permute.xlu0 %984  ;;  %v8202_v42 = vpop.permute.xlu1 %1128  ;;  %v6644_v31 = vpack.c.bf16 %v964_v33, %v962_v36  ;;  %v6646_v55 = vpack.c.bf16 %v963_v57, %v961_v14 }
 0x2be   :  { %v998_v60 = vsel %vm98_vm3, %v8159_v50, %v8200_v30 }
 0x2bf   :  { %1821 = vrot.lane.b32.xlu0 %v8077_v29, %s12547_s28  ;;  %6645 = vmatprep.subr.bf16.mxu1 %v6644_v31 }
 0x2c0   :  { %1283 = vrot.lane.b32.xlu1 %v8188_v19, %s7388_s17  ;;  %6647 = vmatpush1.bf16.msra.mxu1 %v6646_v55 }
 0x2c1   :  { %v8208_v16 = vpop.permute.xlu0 %1035  ;;  %v8210_v24 = vpop.permute.xlu1 %1230 }
 0x2c3   :  { %1872 = vrot.lane.b32.xlu0 %v8077_v29, %s12550_s10 }
 0x2c4   :  { %1385 = vrot.lane.b32.xlu1 %v8188_v19, %s12546_s2 }
 0x2c5   :  { %v8216_v33 = vpop.permute.xlu0 %1086  ;;  %v8218_v14 = vpop.permute.xlu1 %1332 }
 0x2c7   :  { %1923 = vrot.lane.b32.xlu0 %v8077_v29, %s12551_s4 }
 0x2c8   :  { %1487 = vrot.lane.b32.xlu1 %v8188_v19, %s12548_s9 }
 0x2c9   :  { %v8224_v31 = vpop.permute.xlu0 %1137  ;;  %v8226_v3 = vpop.permute.xlu1 %1434 }
 0x2ca   :  { %12598 = vst [vmem:[#allocation58_spill] sm:$0xff] %v8226_v3  ;;  %v1049_v3 = vsel %vm125_vm4, %v8170_v47, %v8208_v16 }
 0x2cb   :  { %1974 = vrot.lane.b32.xlu0 %v8077_v29, %s12552_s5 }
 0x2cc   :  { %1568 = vrot.lane.b32.xlu1 %v8188_v19, %s7393_s22 }
 0x2cd   :  { %v8232_v37 = vpop.permute.xlu0 %1188  ;;  %v8238_v40 = vpop.permute.xlu1 %1564 }
 0x2ce   :  { %12599 = vst [vmem:[#allocation59_spill] sm:$0xff] %v8238_v40 }
 0x2cf   :  { %2025 = vrot.lane.b32.xlu0 %v8077_v29, %s12553_s30 }
 0x2d0   :  { %1619 = vrot.lane.b32.xlu1 %v8188_v19, %s7394_s23 }
 0x2d1   :  { %v8240_v36 = vpop.permute.xlu0 %1290  ;;  %v8248_v55 = vpop.permute.xlu1 %1615 }
 0x2d2   :  { %12601 = vst [vmem:[#allocation61_spill] sm:$0xff] %v8248_v55 }
 0x2d3   :  { %2076 = vrot.lane.b32.xlu0 %v8077_v29, %s12554_s29 }
 0x2d4   :  { %1670 = vrot.lane.b32.xlu1 %v8188_v19, %s7395_s24 }
 0x2d5   :  { %v8246_v57 = vpop.permute.xlu0 %1392  ;;  %v8260_v28 = vpop.permute.xlu1 %1666 }
 0x2d6   :  { %12600 = vst [vmem:[#allocation60_spill] sm:$0xff] %v8246_v57  ;;  %12603 = vst [vmem:[#allocation63_spill] sm:$0xff] %v8260_v28 }
 0x2d7   :  { %2127 = vrot.lane.b32.xlu0 %v8077_v29, %s12555_s11  ;;  %v2171_v29 = vld [vmem:[#allocation3 + $0x8] sm:$0xff] }
 0x2d8   :  { %1721 = vrot.lane.b32.xlu1 %v8188_v19, %s7396_s25  ;;  %2483 = vmatprep.mubr.f32.mxu1 %v2171_v29 }
 0x2d9   :  { %v8254_v12 = vpop.permute.xlu0 %1494  ;;  %v8270_v8 = vpop.permute.xlu1 %1717 }
 0x2da   :  { %12602 = vst [vmem:[#allocation62_spill] sm:$0xff] %v8254_v12  ;;  %12606 = vst [vmem:[#allocation66_spill] sm:$0xff] %v8270_v8 }
 0x2db   :  { %923 = vrot.lane.b32.xlu0 %v8188_v19, %s7382_s13 }
 0x2dc   :  { %1772 = vrot.lane.b32.xlu1 %v8188_v19, %s7397_s26 }
 0x2dd   :  { %v8262_v10 = vpop.permute.xlu0 %1562  ;;  %v8282_v6 = vpop.permute.xlu1 %1768 }
 0x2de   :  { %12604 = vst [vmem:[#allocation64_spill] sm:$0xff] %v8262_v10  ;;  %12608 = vst [vmem:[#allocation68_spill] sm:$0xff] %v8282_v6 }
 0x2df   :  { %977 = vrot.lane.b32.xlu0 %v8188_v19, %s7381_s12 }
 0x2e0   :  { %1823 = vrot.lane.b32.xlu1 %v8188_v19, %s12547_s28 }
 0x2e1   :  { %v8268_v25 = vpop.permute.xlu0 %1613  ;;  %v8292_v17 = vpop.permute.xlu1 %1819 }
 0x2e2   :  { %12605 = vst [vmem:[#allocation65_spill] sm:$0xff] %v8268_v25  ;;  %12611 = vst [vmem:[#allocation71_spill] sm:$0xff] %v8292_v17 }
 0x2e3   :  { %1028 = vrot.lane.b32.xlu0 %v8188_v19, %s7383_s6 }
 0x2e4   :  { %1874 = vrot.lane.b32.xlu1 %v8188_v19, %s12550_s10 }
 0x2e5   :  { %v8276_v22 = vpop.permute.xlu0 %1664  ;;  %v8304_v6 = vpop.permute.xlu1 %1870 }
 0x2e6   :  { %12607 = vst [vmem:[#allocation67_spill] sm:$0xff] %v8276_v22  ;;  %12613 = vst [vmem:[#allocation73_spill] sm:$0xff] %v8304_v6 }
 0x2e7   :  { %1079 = vrot.lane.b32.xlu0 %v8188_v19, %s7384_s0 }
 0x2e8   :  { %1925 = vrot.lane.b32.xlu1 %v8188_v19, %s12551_s4 }
 0x2e9   :  { %v8284_v28 = vpop.permute.xlu0 %1715 }
 0x2ea   :  { %12609 = vst [vmem:[#allocation69_spill] sm:$0xff] %v8284_v28 }
 0x2eb   :  { %1130 = vrot.lane.b32.xlu0 %v8188_v19, %s7385_s14 }
 0x2ec   :  { %1976 = vrot.lane.b32.xlu1 %v8188_v19, %s12552_s5 }
 0x2ed   :  { %v8290_v8 = vpop.permute.xlu0 %1766 }
 0x2ee   :  { %12610 = vst [vmem:[#allocation70_spill] sm:$0xff] %v8290_v8  ;;  %v8314_v8 = vpop.permute.xlu1 %1921 }
 0x2ef   :  { %1232 = vrot.lane.b32.xlu0 %v8188_v19, %s7387_s16  ;;  %12616 = vst [vmem:[#allocation76_spill] sm:$0xff] %v8314_v8 }
 0x2f0   :  { %2027 = vrot.lane.b32.xlu1 %v8188_v19, %s12553_s30 }
 0x2f1   :  { %v8298_v22 = vpop.permute.xlu0 %1817 }
 0x2f2   :  { %12612 = vst [vmem:[#allocation72_spill] sm:$0xff] %v8298_v22  ;;  %v8318_v4 = vpop.permute.xlu1 %1972 }
 0x2f3   :  { %1334 = vrot.lane.b32.xlu0 %v8188_v19, %s7389_s18  ;;  %12618 = vst [vmem:[#allocation78_spill] sm:$0xff] %v8318_v4 }
 0x2f4   :  { %2078 = vrot.lane.b32.xlu1 %v8188_v19, %s12554_s29 }
 0x2f5   :  { %v8306_v28 = vpop.permute.xlu0 %1868 }
 0x2f6   :  { %12614 = vst [vmem:[#allocation74_spill] sm:$0xff] %v8306_v28  ;;  %v8324_v6 = vpop.permute.xlu1 %2023 }
 0x2f7   :  { %1436 = vrot.lane.b32.xlu0 %v8188_v19, %s7391_s20  ;;  %12621 = vst [vmem:[#allocation81_spill] sm:$0xff] %v8324_v6 }
 0x2f8   :  { %2129 = vrot.lane.b32.xlu1 %v8188_v19, %s12555_s11 }
 0x2f9   :  { %v8312_v17 = vpop.permute.xlu0 %1919 }
 0x2fa   :  { %12615 = vst [vmem:[#allocation75_spill] sm:$0xff] %v8312_v17  ;;  %v8328_v55 = vpop.permute.xlu1 %2074 }
 0x2fb   :  { %12623 = vst [vmem:[#allocation83_spill] sm:$0xff] %v8328_v55 }
 0x2fd   :  { %v8316_v22 = vpop.permute.xlu0 %1970 }
 0x2fe   :  { %12617 = vst [vmem:[#allocation77_spill] sm:$0xff] %v8316_v22  ;;  %v8334_v8 = vpop.permute.xlu1 %2125 }
 0x2ff   :  { %12624 = vst [vmem:[#allocation84_spill] sm:$0xff] %v8334_v8 }
 0x301   :  { %v8320_v15 = vpop.permute.xlu0 %2021 }
 0x302   :  { %12619 = vst [vmem:[#allocation79_spill] sm:$0xff] %v8320_v15  ;;  %v936_v4 = vpop.permute.xlu1 %935 }
 0x305   :  { %v8322_v0 = vpop.permute.xlu0 %2072 }
 0x306   :  { %12620 = vst [vmem:[#allocation80_spill] sm:$0xff] %v8322_v0  ;;  %v987_v6 = vpop.permute.xlu1 %986 }
 0x309   :  { %v8326_v28 = vpop.permute.xlu0 %2123 }
 0x30a   :  { %12622 = vst [vmem:[#allocation82_spill] sm:$0xff] %v8326_v28  ;;  %v1038_v28 = vpop.permute.xlu1 %1037 }
 0x30d   :  { %v8330_v25 = vpop.permute.xlu0 %1179 }
 0x30e   :  { %v8348_v29 = vpop.permute.xlu1 %1088 }
 0x311   :  { %v8332_v17 = vpop.permute.xlu0 %1281 }
 0x312   :  { %v8352_v8 = vpop.permute.xlu1 %1139 }
 0x315   :  { %v8336_v22 = vpop.permute.xlu0 %1383 }
 0x316   :  { %12625 = vst [vmem:[#allocation85_spill] sm:$0xff] %v8336_v22  ;;  %v8358_v38 = vpop.permute.xlu1 %1190 }
 0x319   :  { %v8338_v15 = vpop.permute.xlu0 %1485 }
 0x31a   :  { %12626 = vst [vmem:[#allocation86_spill] sm:$0xff] %v8338_v15 }
 0x31d   :  { %v8340_v0 = vpop.permute.xlu0 %1566 }
 0x31e   :  { %12627 = vst [vmem:[#allocation87_spill] sm:$0xff] %v8340_v0 }
 0x321   :  { %v8342_v40 = vpop.permute.xlu0 %1617 }
 0x322   :  { %12628 = vst [vmem:[#allocation88_spill] sm:$0xff] %v8342_v40  ;;  %v8362_v40 = vpop.permute.xlu1 %1241 }
 0x325   :  { %v8344_v55 = vpop.permute.xlu0 %1668 }
 0x326   :  { %12629 = vst [vmem:[#allocation89_spill] sm:$0xff] %v8344_v55 }
 0x329   :  { %v8346_v10 = vpop.permute.xlu0 %1719 }
 0x32a   :  { %12630 = vst [vmem:[#allocation90_spill] sm:$0xff] %v8346_v10  ;;  %v8368_v10 = vpop.permute.xlu1 %1292 }
 0x32d   :  { %v8350_v19 = vpop.permute.xlu0 %1770 }
 0x32e   :  { %12631 = vst [vmem:[#allocation91_spill] sm:$0xff] %v8350_v19  ;;  %v8375_v19 = vpop.permute.xlu1 %1343 }
 0x331   :  { %v8354_v34 = vpop.permute.xlu0 %1821 }
 0x332   :  { %12632 = vst [vmem:[#allocation92_spill] sm:$0xff] %v8354_v34  ;;  %v6520_v34 = vld [vmem:[%s12108_s1 + $0x2] sm:$0x3] }
 0x333   :  { %v1009_v49 = vrot.slane %v6520_v34, %v7617_v21 }
 0x335   :  { %v8356_v43 = vpop.permute.xlu0 %1872 }
 0x336   :  { %12633 = vst [vmem:[#allocation93_spill] sm:$0xff] %v8356_v43 }
 0x339   :  { %v8360_v0 = vpop.permute.xlu0 %1923 }
 0x33a   :  { %12634 = vst [vmem:[#allocation94_spill] sm:$0xff] %v8360_v0  ;;  %v1005_v0 = vrot.slane %v6520_v34, %v7615_v20  ;;  %v989_v34 = vsel %vm98_vm3, %v8200_v30, %v8159_v50  ;;  %v6522_v50 = vld [vmem:[%s12108_s1 + $0x6] sm:$0x3] }
 0x33b   :  { %v1111_v54 = vrot.slane %v6522_v50, %v7617_v21 }
 0x33d   :  { %v8364_v13 = vpop.permute.xlu0 %1974 }
 0x33e   :  { %12635 = vst [vmem:[#allocation95_spill] sm:$0xff] %v8364_v13 }
 0x341   :  { %v8366_v55 = vpop.permute.xlu0 %2025 }
 0x342   :  { %12636 = vst [vmem:[#allocation96_spill] sm:$0xff] %v8366_v55  ;;  %v988_v55 = vsel %vm98_vm3, %v7965_v59, %v8085_v32 }
 0x343   :  { %v1013_v15 = vmul.f32 %v1009_v49, %v988_v55  ;;  %v1040_v55 = vsel %vm125_vm4, %v8208_v16, %v8170_v47  ;;  %v1090_v47 = vsel %vm152_vm5, %v7981_v63, %v8101_v1 }
 0x345   :  { %v8370_v62 = vpop.permute.xlu0 %2076 }
 0x346   :  { %12637 = vst [vmem:[#allocation97_spill] sm:$0xff] %v8370_v62  ;;  %v997_v62 = vsel %vm98_vm3, %v8085_v32, %v7965_v59  ;;  %v8398_v59 = vpop.permute.xlu1 %1394 }
 0x347   :  { %v1012_v12 = vmul.f32 %v1005_v0, %v997_v62  ;;  %12639 = vst [vmem:[#allocation99_spill] sm:$0xff] %v8398_v59 }
 0x349   :  { %v8377_v43 = vpop.permute.xlu0 %2127 }
 0x34a   :  { %12638 = vst [vmem:[#allocation98_spill] sm:$0xff] %v8377_v43 }
 0x34d   :  { %v924_v13 = vpop.permute.xlu0 %923 }
 0x34e   :  { %v939_v43 = vsel %vm72_vm2, %v936_v4, %v924_v13  ;;  %v948_v48 = vsel %vm72_vm2, %v924_v13, %v936_v4  ;;  %v1060_v4 = vrot.slane %v6521_v11, %v7617_v21  ;;  %v1039_v13 = vsel %vm125_vm4, %v7973_v61, %v8093_v35 }
 0x34f   :  { %v965_v62 = vmul.f32 %v8178_v27, %v948_v48  ;;  %v966_v32 = vmul.f32 %v8175_v52, %v939_v43  ;;  %v1014_v27 = vmul.f32 %v1005_v0, %v998_v60  ;;  %v1015_v48 = vmul.f32 %v1009_v49, %v989_v34 }
 0x350   :  { %v1066_v57 = vmul.f32 %v1060_v4, %v1040_v55  ;;  %v1048_v60 = vsel %vm125_vm4, %v8093_v35, %v7973_v61  ;;  %v1107_v61 = vrot.slane %v6522_v50, %v7615_v20  ;;  %v1115_v35 = vmul.f32 %v1111_v54, %v1090_v47 }
 0x351   :  { %v978_v30 = vpop.permute.xlu0 %977  ;;  %v6648_v53 = vpack.c.bf16 %v1013_v15, %v966_v32  ;;  %v6650_v26 = vpack.c.bf16 %v1012_v12, %v965_v62  ;;  %v1064_v12 = vmul.f32 %v1060_v4, %v1039_v13  ;;  %v8422_v15 = vpop.permute.xlu1 %1445  ;;  %v1063_v16 = vmul.f32 %v1056_v9, %v1048_v60 }
 0x352   :  { %v990_v43 = vsel %vm98_vm3, %v987_v6, %v978_v30  ;;  %v999_v52 = vsel %vm98_vm3, %v978_v30, %v987_v6  ;;  %v1142_v30 = vsel %vm179_vm6, %v8224_v31, %v8202_v42  ;;  %v1150_v47 = vsel %vm179_vm6, %v8109_v39, %v7989_v2 }
 0x353   :  { %v1016_v22 = vmul.f32 %v1005_v0, %v999_v52  ;;  %v1017_v59 = vmul.f32 %v1009_v49, %v990_v43  ;;  %6649 = vmatprep.subr.bf16.mxu1 %v6648_v53  ;;  %v1065_v49 = vmul.f32 %v1056_v9, %v1049_v3  ;;  %v6523_v3 = vld [vmem:[%s12108_s1 + $0x8] sm:$0x3]  ;;  %v6524_v52 = vld [vmem:[%s12108_s1 + $0xa] sm:$0x3] }
 0x354   :  { %6651 = vmatpush1.bf16.msra.mxu1 %v6650_v26  ;;  %v6656_v26 = vpack.c.bf16 %v1066_v57, %v1064_v12 }
 0x355   :  { %v1029_v6 = vpop.permute.xlu0 %1028  ;;  %v6652_v34 = vpack.c.bf16 %v1017_v59, %v1015_v48  ;;  %v6654_v62 = vpack.c.bf16 %v1016_v22, %v1014_v27  ;;  %v1099_v22 = vsel %vm152_vm5, %v8101_v1, %v7981_v63  ;;  %v6658_v55 = vpack.c.bf16 %v1065_v49, %v1063_v16 }
 0x356   :  { %v1041_v53 = vsel %vm125_vm4, %v1038_v28, %v1029_v6  ;;  %v1050_v0 = vsel %vm125_vm4, %v1029_v6, %v1038_v28  ;;  %v1091_v28 = vsel %vm152_vm5, %v8216_v33, %v8186_v51  ;;  %v1114_v50 = vmul.f32 %v1107_v61, %v1099_v22 }
 0x357   :  { %v1068_v11 = vmul.f32 %v1060_v4, %v1041_v53  ;;  %6653 = vmatprep.subr.bf16.mxu1 %v6652_v34  ;;  %v1067_v57 = vmul.f32 %v1056_v9, %v1050_v0  ;;  %v8441_v4 = vpop.permute.xlu1 %1496  ;;  %v1162_v27 = vrot.slane %v6523_v3, %v7617_v21  ;;  %v1100_v9 = vsel %vm152_vm5, %v8186_v51, %v8216_v33 }
 0x358   :  { %6655 = vmatpush1.bf16.msra.mxu1 %v6654_v62  ;;  %v1117_v48 = vmul.f32 %v1111_v54, %v1091_v28  ;;  %v1151_v6 = vsel %vm179_vm6, %v8202_v42, %v8224_v31  ;;  %v1116_v51 = vmul.f32 %v1107_v61, %v1100_v9  ;;  %v1213_v53 = vrot.slane %v6524_v52, %v7617_v21 }
 0x359   :  { %v1080_v59 = vpop.permute.xlu0 %1079  ;;  %6657 = vmatprep.subr.bf16.mxu1 %v6656_v26  ;;  %v6660_v13 = vpack.c.bf16 %v1115_v35, %v1068_v11  ;;  %v6662_v12 = vpack.c.bf16 %v1114_v50, %v1067_v57  ;;  %v1168_v34 = vmul.f32 %v1162_v27, %v1142_v30  ;;  %v1192_v42 = vsel %vm206_vm7, %v7997_v5, %v8117_v41 }
 0x35a   :  { %v1092_v32 = vsel %vm152_vm5, %v8348_v29, %v1080_v59  ;;  %v1101_v63 = vsel %vm152_vm5, %v1080_v59, %v8348_v29  ;;  %v1141_v29 = vsel %vm179_vm6, %v7989_v2, %v8109_v39  ;;  %v1209_v35 = vrot.slane %v6524_v52, %v7615_v20 }
 0x35b   :  { %v1119_v1 = vmul.f32 %v1111_v54, %v1092_v32  ;;  %v1118_v60 = vmul.f32 %v1107_v61, %v1101_v63  ;;  %v1158_v54 = vrot.slane %v6523_v3, %v7615_v20  ;;  %v1166_v49 = vmul.f32 %v1162_v27, %v1141_v29  ;;  %v1182_v0 = vpop.permute.xlu1 %1181  ;;  %v6525_v3 = vld [vmem:[%s12108_s1 + $0xc] sm:$0x3] }
 0x35c   :  { %6659 = vmatpush1.bf16.msra.mxu1 %v6658_v55  ;;  %v1194_v2 = vsel %vm206_vm7, %v8358_v38, %v1182_v0  ;;  %v1201_v39 = vsel %vm206_vm7, %v8117_v41, %v7997_v5  ;;  %v1217_v59 = vmul.f32 %v1213_v53, %v1192_v42  ;;  %v1203_v32 = vsel %vm206_vm7, %v1182_v0, %v8358_v38  ;;  %v6527_v42 = vld [vmem:[%s12108_s1 + $0x10] sm:$0x3] }
 0x35d   :  { %v1131_v43 = vpop.permute.xlu0 %1130  ;;  %6661 = vmatprep.subr.bf16.mxu1 %v6660_v13  ;;  %v6664_v62 = vpack.c.bf16 %v1119_v1, %v1117_v48  ;;  %v1167_v31 = vmul.f32 %v1158_v54, %v1151_v6  ;;  %v6666_v11 = vpack.c.bf16 %v1118_v60, %v1116_v51  ;;  %v6668_v61 = vpack.c.bf16 %v1168_v34, %v1166_v49 }
 0x35e   :  { %v1143_v33 = vsel %vm179_vm6, %v8352_v8, %v1131_v43  ;;  %v1152_v26 = vsel %vm179_vm6, %v1131_v43, %v8352_v8  ;;  %v1165_v22 = vmul.f32 %v1158_v54, %v1150_v47  ;;  %v1193_v8 = vsel %vm206_vm7, %v8232_v37, %v8330_v25 }
 0x35f   :  { %v1170_v16 = vmul.f32 %v1162_v27, %v1143_v33  ;;  %v1169_v28 = vmul.f32 %v1158_v54, %v1152_v26  ;;  %v1221_v55 = vmul.f32 %v1213_v53, %v1194_v2  ;;  %v1216_v1 = vmul.f32 %v1209_v35, %v1201_v39  ;;  %v6526_v27 = vld [vmem:[%s12108_s1 + $0xe] sm:$0x3] }
 0x360   :  { %6663 = vmatpush1.bf16.msra.mxu1 %v6662_v12  ;;  %v6670_v57 = vpack.c.bf16 %v1167_v31, %v1165_v22  ;;  %v1244_v5 = vsel %vm12231_vm8, %v8127_v45, %v8210_v24  ;;  %v1264_v41 = vrot.slane %v6525_v3, %v7617_v21  ;;  %v1202_v13 = vsel %vm206_vm7, %v8330_v25, %v8232_v37 }
 0x361   :  { %6665 = vmatprep.subr.bf16.mxu1 %v6664_v62  ;;  %v6672_v63 = vpack.c.bf16 %v1217_v59, %v1170_v16  ;;  %v1219_v50 = vmul.f32 %v1213_v53, %v1193_v8  ;;  %v1233_v30 = vpop.permute.xlu0 %1232  ;;  %v1243_v38 = vsel %vm12231_vm8, %v7955_v56, %v8125_v44  ;;  %v1220_v9 = vmul.f32 %v1209_v35, %v1203_v32  ;;  %v1284_v62 = vpop.permute.xlu1 %1283  ;;  %v6528_v59 = vld [vmem:[%s12108_s1 + $0x12] sm:$0x3] }
 0x362   :  { %v6674_v48 = vpack.c.bf16 %v1216_v1, %v1169_v28  ;;  %v1253_v43 = vsel %vm12231_vm8, %v8210_v24, %v8127_v45  ;;  %v1270_v29 = vmul.f32 %v1264_v41, %v1244_v5  ;;  %v1260_v25 = vrot.slane %v6525_v3, %v7615_v20 }
 0x363   :  { %v6676_v52 = vpack.c.bf16 %v1221_v55, %v1219_v50  ;;  %v1218_v37 = vmul.f32 %v1209_v35, %v1202_v13  ;;  %v1245_v60 = vsel %vm12231_vm8, %v8362_v40, %v1233_v30  ;;  %v1252_v12 = vsel %vm12231_vm8, %v8125_v44, %v7955_v56  ;;  %v12640_v13 = vld [vmem:[#allocation54_spill] sm:$0xff] }
 0x364   :  { %6667 = vmatpush1.bf16.msra.mxu1 %v6666_v11  ;;  %v1268_v6 = vmul.f32 %v1264_v41, %v1243_v38  ;;  %v1315_v34 = vrot.slane %v6526_v27, %v7617_v21  ;;  %v1294_v45 = vsel %vm12230_vm9, %v8005_v7, %v8133_v46  ;;  %v1269_v24 = vmul.f32 %v1260_v25, %v1253_v43 }
 0x365   :  { %6669 = vmatprep.subr.bf16.mxu1 %v6668_v61  ;;  %v6678_v54 = vpack.c.bf16 %v1220_v9, %v1218_v37  ;;  %v1254_v51 = vsel %vm12231_vm8, %v1233_v30, %v8362_v40  ;;  %v1272_v33 = vmul.f32 %v1264_v41, %v1245_v60  ;;  %v1267_v49 = vmul.f32 %v1260_v25, %v1252_v12  ;;  %v1335_v39 = vpop.permute.xlu0 %1334  ;;  %v1386_v41 = vpop.permute.xlu1 %1385  ;;  %v12644_v37 = vld [vmem:[#allocation60_spill] sm:$0xff] }
 0x366   :  { %v6680_v47 = vpack.c.bf16 %v1270_v29, %v1268_v6  ;;  %v1311_v53 = vrot.slane %v6526_v27, %v7615_v20  ;;  %v1296_v56 = vsel %vm12230_vm9, %v8368_v10, %v1284_v62  ;;  %v1303_v44 = vsel %vm12230_vm9, %v8133_v46, %v8005_v7 }
 0x367   :  { %v1319_v0 = vmul.f32 %v1315_v34, %v1294_v45  ;;  %v1295_v40 = vsel %vm12230_vm9, %v8240_v36, %v8332_v17  ;;  %v1271_v31 = vmul.f32 %v1260_v25, %v1254_v51  ;;  %v6682_v11 = vpack.c.bf16 %v1269_v24, %v1267_v49  ;;  %v6529_v25 = vld [vmem:[%s12108_s1 + $0x14] sm:$0x3]  ;;  %v12646_v51 = vld [vmem:[#allocation53_spill] sm:$0xff] }
 0x368   :  { %6671 = vmatpush1.bf16.msra.mxu1 %v6670_v57  ;;  %v1305_v26 = vsel %vm12230_vm9, %v1284_v62, %v8368_v10  ;;  %v1323_v16 = vmul.f32 %v1315_v34, %v1296_v56  ;;  %v1318_v22 = vmul.f32 %v1311_v53, %v1303_v44  ;;  %v1346_v7 = vsel %vm12229_vm10, %v8135_v18, %v8218_v14  ;;  %v12647_v44 = vld [vmem:[#allocation55_spill] sm:$0xff] }
 0x369   :  { %6673 = vmatprep.subr.bf16.mxu1 %v6672_v63  ;;  %v6684_v61 = vpack.c.bf16 %v1319_v0, %v1272_v33  ;;  %v1366_v46 = vrot.slane %v6527_v42, %v7617_v21  ;;  %v1304_v35 = vsel %vm12230_vm9, %v8332_v17, %v8240_v36  ;;  %v1321_v2 = vmul.f32 %v1315_v34, %v1295_v40  ;;  %v1437_v56 = vpop.permute.xlu0 %1436  ;;  %v12648_v0 = vld [vmem:[#allocation25_spill] sm:$0xff]  ;;  %v6530_v40 = vld [vmem:[%s12108_s1 + $0x16] sm:$0x3] }
 0x36a   :  { %v1345_v10 = vsel %vm12229_vm10, %v7963_v58, %v8141_v23  ;;  %v1322_v3 = vmul.f32 %v1311_v53, %v1305_v26  ;;  %v6686_v8 = vpack.c.bf16 %v1318_v22, %v1271_v31  ;;  %v1355_v28 = vsel %vm12229_vm10, %v8218_v14, %v8135_v18  ;;  %v12641_v18 = vld [vmem:[#allocation31_spill] sm:$0xff] }
 0x36b   :  { %v1372_v57 = vmul.f32 %v1366_v46, %v1346_v7  ;;  %v6688_v32 = vpack.c.bf16 %v1323_v16, %v1321_v2  ;;  %v1362_v17 = vrot.slane %v6527_v42, %v7615_v20  ;;  %v1320_v36 = vmul.f32 %v1311_v53, %v1304_v35 }
 0x36c   :  { %6675 = vmatpush1.bf16.msra.mxu1 %v6674_v48  ;;  %v1347_v55 = vsel %vm12229_vm10, %v8375_v19, %v1335_v39  ;;  %v1354_v63 = vsel %vm12229_vm10, %v8141_v23, %v7963_v58  ;;  %v1370_v1 = vmul.f32 %v1366_v46, %v1345_v10  ;;  %v1417_v5 = vrot.slane %v6528_v59, %v7617_v21  ;;  %v12642_v58 = vld [vmem:[#allocation99_spill] sm:$0xff]  ;;  %v1488_v10 = vpop.permute.xlu1 %1487 }
 0x36d   :  { %6677 = vmatprep.subr.bf16.mxu1 %v6676_v52  ;;  %v1396_v14 = vsel %vm314_vm11, %v12641_v18, %v12640_v13  ;;  %v1371_v50 = vmul.f32 %v1362_v17, %v1355_v28  ;;  %v6690_v30 = vpack.c.bf16 %v1322_v3, %v1320_v36  ;;  %v1356_v38 = vsel %vm12229_vm10, %v1335_v39, %v8375_v19  ;;  %v12643_v19 = vld [vmem:[#allocation85_spill] sm:$0xff]  ;;  %vm12659_vm10 = vmmov %vm12656_vm1 }
 0x36e   :  { %v1374_v27 = vmul.f32 %v1366_v46, %v1347_v55  ;;  %v6692_v9 = vpack.c.bf16 %v1372_v57, %v1370_v1  ;;  %v1369_v48 = vmul.f32 %v1362_v17, %v1354_v63  ;;  %v1413_v43 = vrot.slane %v6528_v59, %v7615_v20  ;;  %v12649_v59 = vld [vmem:[#allocation56_spill] sm:$0xff]  ;;  %v12650_v3 = vld [vmem:[#allocation33_spill] sm:$0xff] }
 0x36f   :  { %v1398_v23 = vsel %vm314_vm11, %v12642_v58, %v1386_v41  ;;  %v1405_v29 = vsel %vm314_vm11, %v12640_v13, %v12641_v18  ;;  %v1421_v52 = vmul.f32 %v1417_v5, %v1396_v14  ;;  %v1397_v60 = vsel %vm314_vm11, %v12644_v37, %v12643_v19  ;;  %v6531_v13 = vld [vmem:[%s12108_s1 + $0x18] sm:$0x3]  ;;  %v12652_v18 = vld [vmem:[#allocation62_spill] sm:$0xff] }
 0x370   :  { %6679 = vmatpush1.bf16.msra.mxu1 %v6678_v54  ;;  %v1373_v12 = vmul.f32 %v1362_v17, %v1356_v38  ;;  %v6694_v6 = vpack.c.bf16 %v1371_v50, %v1369_v48  ;;  %v1407_v34 = vsel %vm314_vm11, %v1386_v41, %v12642_v58  ;;  %v1425_v62 = vmul.f32 %v1417_v5, %v1398_v23  ;;  %v12645_v54 = vld [vmem:[#allocation58_spill] sm:$0xff]  ;;  %v6532_v48 = vld [vmem:[%s12108_s1 + $0x1a] sm:$0x3] }
 0x371   :  { %6681 = vmatprep.subr.bf16.mxu1 %v6680_v47  ;;  %v6696_v45 = vpack.c.bf16 %v1421_v52, %v1374_v27  ;;  %v1420_v24 = vmul.f32 %v1413_v43, %v1405_v29  ;;  %v1448_v33 = vsel %vm341_vm12, %v12646_v51, %v12645_v54  ;;  %v1468_v47 = vrot.slane %v6529_v25, %v7617_v21  ;;  %v2170_v58 = vld [vmem:[#allocation3] sm:$0xff] }
 0x372   :  { %v1406_v49 = vsel %vm314_vm11, %v12643_v19, %v12644_v37  ;;  %v1423_v53 = vmul.f32 %v1417_v5, %v1397_v60  ;;  %v1447_v42 = vsel %vm341_vm12, %v12648_v0, %v12647_v44  ;;  %v1424_v31 = vmul.f32 %v1413_v43, %v1407_v34 }
 0x373   :  { %v1457_v26 = vsel %vm341_vm12, %v12645_v54, %v12646_v51  ;;  %v1474_v16 = vmul.f32 %v1468_v47, %v1448_v33  ;;  %v1464_v22 = vrot.slane %v6529_v25, %v7615_v20  ;;  %v1422_v7 = vmul.f32 %v1413_v43, %v1406_v49  ;;  %v2176_v25 = vld [vmem:[#allocation3 + $0x30] sm:$0xff]  ;;  %v2175_v51 = vld [vmem:[#allocation3 + $0x28] sm:$0xff]  ;;  %v1569_v33 = vpop.permute.xlu1 %1568 }
 0x374   :  { %6683 = vmatpush1.bf16.msra.mxu1 %v6682_v11  ;;  %v6698_v11 = vpack.c.bf16 %v1420_v24, %v1373_v12  ;;  %v1449_v46 = vsel %vm341_vm12, %v8422_v15, %v1437_v56  ;;  %v1456_v35 = vsel %vm341_vm12, %v12647_v44, %v12648_v0  ;;  %v1472_v2 = vmul.f32 %v1468_v47, %v1447_v42  ;;  %v12653_v12 = vld [vmem:[#allocation18_spill] sm:$0xff]  ;;  %v12658_v0 = vld [vmem:[#allocation16_spill] sm:$0xff] }
 0x375   :  { %6685 = vmatprep.subr.bf16.mxu1 %v6684_v61  ;;  %v6700_v61 = vpack.c.bf16 %v1425_v62, %v1423_v53  ;;  %v1519_v39 = vrot.slane %v6530_v40, %v7617_v21  ;;  %v1473_v28 = vmul.f32 %v1464_v22, %v1457_v26  ;;  %v6702_v57 = vpack.c.bf16 %v1424_v31, %v1422_v7  ;;  %v12654_v62 = vld [vmem:[#allocation26_spill] sm:$0xff]  ;;  %v2181_v53 = vld [vmem:[#allocation3 + $0x58] sm:$0xff]  ;;  %v12660_v26 = vld [vmem:[#allocation87_spill] sm:$0xff] }
 0x376   :  { %v1476_v17 = vmul.f32 %v1468_v47, %v1449_v46  ;;  %v6704_v36 = vpack.c.bf16 %v1474_v16, %v1472_v2  ;;  %v1471_v55 = vmul.f32 %v1464_v22, %v1456_v35  ;;  %v1515_v63 = vrot.slane %v6530_v40, %v7615_v20  ;;  %v12657_v47 = vld [vmem:[#allocation15_spill] sm:$0xff]  ;;  %v2180_v7 = vld [vmem:[#allocation3 + $0x50] sm:$0xff]  ;;  %v12662_v46 = vld [vmem:[#allocation57_spill] sm:$0xff] }
 0x377   :  { %v1500_v1 = vsel %vm368_vm13, %v8441_v4, %v1488_v10  ;;  %v1507_v5 = vsel %vm368_vm13, %v12649_v59, %v12650_v3  ;;  %v1509_v38 = vsel %vm368_vm13, %v1488_v10, %v8441_v4  ;;  %v1543_v52 = vrot.slane %v6531_v13, %v7617_v21  ;;  %v2186_v2 = vld [vmem:[#allocation3 + $0x80] sm:$0xff]  ;;  %v6533_v10 = vld [vmem:[%s12108_s1 + $0x1c] sm:$0x3] }
 0x378   :  { %6687 = vmatpush1.bf16.msra.mxu1 %v6686_v8  ;;  %v1498_v8 = vsel %vm368_vm13, %v12650_v3, %v12649_v59  ;;  %v1527_v27 = vmul.f32 %v1519_v39, %v1500_v1  ;;  %v1522_v43 = vmul.f32 %v1515_v63, %v1507_v5  ;;  %v1526_v19 = vmul.f32 %v1515_v63, %v1509_v38  ;;  %v12663_v59 = vld [vmem:[#allocation64_spill] sm:$0xff]  ;;  %v12664_v3 = vld [vmem:[#allocation59_spill] sm:$0xff]  ;;  %v12667_v1 = vld [vmem:[#allocation65_spill] sm:$0xff] }
 0x379   :  { %6689 = vmatprep.subr.bf16.mxu1 %v6688_v32  ;;  %v1458_v32 = vsel %vm341_vm12, %v1437_v56, %v8422_v15  ;;  %v1523_v41 = vmul.f32 %v1519_v39, %v1498_v8  ;;  %v12651_v15 = vld [vmem:[#allocation86_spill] sm:$0xff]  ;;  %v1594_v37 = vrot.slane %v6532_v48, %v7617_v21  ;;  %v1539_v34 = vrot.slane %v6531_v13, %v7615_v20  ;;  %v12668_v5 = vld [vmem:[#allocation61_spill] sm:$0xff]  ;;  %v12671_v38 = vld [vmem:[#allocation27_spill] sm:$0xff] }
 0x37a   :  { %v1499_v14 = vsel %vm368_vm13, %v12652_v18, %v12651_v15  ;;  %v1475_v50 = vmul.f32 %v1464_v22, %v1458_v32  ;;  %v1508_v23 = vsel %vm368_vm13, %v12651_v15, %v12652_v18  ;;  %v1547_v49 = vmul.f32 %v1543_v52, %v12657_v47  ;;  %v2185_v13 = vld [vmem:[#allocation3 + $0x78] sm:$0xff] }
 0x37b   :  { %v1525_v29 = vmul.f32 %v1519_v39, %v1499_v14  ;;  %v1524_v54 = vmul.f32 %v1515_v63, %v1508_v23  ;;  %v1590_v56 = vrot.slane %v6532_v48, %v7615_v20  ;;  %v1548_v42 = vmul.f32 %v1539_v34, %v12658_v0  ;;  %v6534_v48 = vld [vmem:[%s12108_s1 + $0x1e] sm:$0x3] }
 0x37c   :  { %6691 = vmatpush1.bf16.msra.mxu1 %v6690_v30  ;;  %v6706_v30 = vpack.c.bf16 %v1473_v28, %v1471_v55  ;;  %v6710_v4 = vpack.c.bf16 %v1522_v43, %v1475_v50  ;;  %v1584_v16 = vsel %vm12656_vm1, %v1569_v33, %v12660_v26  ;;  %v1551_v35 = vmul.f32 %v1543_v52, %v12662_v46  ;;  %v12666_v55 = vld [vmem:[#allocation46_spill] sm:$0xff]  ;;  %v2191_v50 = vld [vmem:[#allocation3 + $0xa8] sm:$0xff]  ;;  %v12681_v0 = vld [vmem:[#allocation89_spill] sm:$0xff] }
 0x37d   :  { %6693 = vmatprep.subr.bf16.mxu1 %v6692_v9  ;;  %v6708_v9 = vpack.c.bf16 %v1523_v41, %v1476_v17  ;;  %v6712_v60 = vpack.c.bf16 %v1527_v27, %v1525_v29  ;;  %v6714_v44 = vpack.c.bf16 %v1526_v19, %v1524_v54  ;;  %v1602_v32 = vmul.f32 %v1594_v37, %v1584_v16  ;;  %v1620_v17 = vpop.permute.xlu1 %1619  ;;  %v12672_v27 = vld [vmem:[#allocation37_spill] sm:$0xff]  ;;  %v12675_v19 = vld [vmem:[#allocation88_spill] sm:$0xff]  ;;  %v6535_v16 = vld [vmem:[%s12108_s1 + $0x20] sm:$0x3] }
 0x37e   :  { %v1550_v63 = vmul.f32 %v1539_v34, %v12666_v55  ;;  %vm12669_vm9 = vcmask 1031168   ;;  %v1645_v15 = vrot.slane %v6533_v10, %v7617_v21 }
 0x37f   :  { %v1634_v41 = vsel %vm12669_vm9, %v12668_v5, %v12667_v1 }
 0x380   :  { %6695 = vmatpush1.bf16.msra.mxu1 %v6694_v6  ;;  %v1549_v6 = vmul.f32 %v1543_v52, %v12653_v12  ;;  %v1651_v23 = vmul.f32 %v1645_v15, %v1634_v41  ;;  %v1641_v52 = vrot.slane %v6533_v10, %v7615_v20 }
 0x381   :  { %6697 = vmatprep.subr.bf16.mxu1 %v6696_v45  ;;  %v12655_v45 = vld [vmem:[#allocation35_spill] sm:$0xff] }
 0x382   :  { %v1582_v24 = vsel %vm12656_vm1, %v12655_v45, %v12654_v62  ;;  %v1570_v40 = vsel %vm12659_vm10, %v12654_v62, %v12655_v45  ;;  %vm12665_vm10 = vmmov %vm12656_vm1  ;;  %v2196_v62 = vld [vmem:[#allocation3 + $0xd0] sm:$0xff] }
 0x383   :  { %v1598_v31 = vmul.f32 %v1594_v37, %v1582_v24  ;;  %v1597_v39 = vmul.f32 %v1590_v56, %v1570_v40  ;;  %v1583_v8 = vsel %vm12665_vm10, %v12664_v3, %v12663_v59  ;;  %vm12670_vm10 = vmmov %vm12656_vm1  ;;  %v12677_v45 = vld [vmem:[#allocation28_spill] sm:$0xff]  ;;  %v12678_v24 = vld [vmem:[#allocation39_spill] sm:$0xff] }
 0x384   :  { %6699 = vmatpush1.bf16.msra.mxu1 %v6698_v11  ;;  %v6716_v11 = vpack.c.bf16 %v1549_v6, %v1547_v49  ;;  %v1571_v18 = vsel %vm12670_vm10, %v12663_v59, %v12664_v3  ;;  %v1600_v14 = vmul.f32 %v1594_v37, %v1583_v8  ;;  %v2190_v37 = vld [vmem:[#allocation3 + $0xa0] sm:$0xff]  ;;  %v1696_v6 = vrot.slane %v6534_v48, %v7617_v21  ;;  %v2195_v40 = vld [vmem:[#allocation3 + $0xc8] sm:$0xff]  ;;  %v12687_v8 = vld [vmem:[#allocation69_spill] sm:$0xff] }
 0x385   :  { %6701 = vmatprep.subr.bf16.mxu1 %v6700_v61  ;;  %v12661_v61 = vld [vmem:[#allocation14_spill] sm:$0xff] }
 0x386   :  { %v1546_v22 = vmul.f32 %v1539_v34, %v12661_v61  ;;  %v6724_v29 = vpack.c.bf16 %v1602_v32, %v1600_v14  ;;  %v1671_v34 = vpop.permute.xlu1 %1670  ;;  %v2200_v32 = vld [vmem:[#allocation3 + $0xf0] sm:$0xff] }
 0x388   :  { %6703 = vmatpush1.bf16.msra.mxu1 %v6702_v57  ;;  %v6718_v28 = vpack.c.bf16 %v1548_v42, %v1546_v22  ;;  %v1572_v57 = vsel %vm12656_vm1, %v12660_v26, %v1569_v33  ;;  %vm12673_vm1 = vmmov %vm12669_vm9  ;;  %v2201_v26 = vld [vmem:[#allocation3 + $0xf8] sm:$0xff]  ;;  %v12684_v22 = vld [vmem:[#allocation67_spill] sm:$0xff] }
 0x389   :  { %6705 = vmatprep.subr.bf16.mxu1 %v6704_v36  ;;  %v6720_v36 = vpack.c.bf16 %v1598_v31, %v1551_v35  ;;  %v1601_v43 = vmul.f32 %v1590_v56, %v1572_v57  ;;  %vm12674_vm9 = vmmov %vm12673_vm1 }
 0x38a   :  { %vm12676_vm10 = vmmov %vm12673_vm1  ;;  %v1722_v10 = vpop.permute.xlu1 %1721 }
 0x38c   :  { %6707 = vmatpush1.bf16.msra.mxu1 %v6706_v30  ;;  %v6722_v30 = vpack.c.bf16 %v1597_v39, %v1550_v63  ;;  %v2173_v63 = vld [vmem:[#allocation3 + $0x18] sm:$0xff] }
 0x38d   :  { %6709 = vmatprep.subr.bf16.mxu1 %v6708_v9  ;;  %v1633_v9 = vsel %vm12673_vm1, %v12672_v27, %v12671_v38 }
 0x38e   :  { %v1649_v12 = vmul.f32 %v1645_v15, %v1633_v9  ;;  %v12695_v9 = vld [vmem:[#allocation90_spill] sm:$0xff] }
 0x38f   :  { %2484 = vmatmul.mubr.f32.vlgmr.msra.gmra.mrb[0].mxu1 %v2170_v58  ;;  %v1622_v58 = vsel %vm12674_vm9, %v12667_v1, %v12668_v5  ;;  %vm12679_vm9 = vcmask 932864   ;;  %v12691_v1 = vld [vmem:[#allocation29_spill] sm:$0xff] }
 0x390   :  { %6711 = vmatpush1.bf16.msra.mxu1 %v6710_v4  ;;  %2489 = vmatprep.mubr.f32.mxu1 %v2176_v25  ;;  %v1599_v25 = vmul.f32 %v1590_v56, %v1571_v18  ;;  %v1635_v4 = vsel %vm12676_vm10, %v1620_v17, %v12675_v19  ;;  %v1684_v54 = vsel %vm12679_vm9, %v12678_v24, %v12677_v45  ;;  %vm12680_vm10 = vmmov %vm12673_vm1  ;;  %v12692_v5 = vld [vmem:[#allocation41_spill] sm:$0xff] }
 0x391   :  { %6713 = vmatprep.subr.bf16.mxu1 %v6712_v60  ;;  %v1621_v60 = vsel %vm12673_vm1, %v12671_v38, %v12672_v27  ;;  %v1623_v47 = vsel %vm12680_vm10, %v12675_v19, %v1620_v17  ;;  %v1653_v49 = vmul.f32 %v1645_v15, %v1635_v4  ;;  %vm12682_vm1 = vmmov %vm12679_vm9  ;;  %v1747_v17 = vrot.slane %v6535_v16, %v7617_v21 }
 0x392   :  { %v6726_v33 = vpack.c.bf16 %v1601_v43, %v1599_v25  ;;  %v1648_v56 = vmul.f32 %v1641_v52, %v1621_v60  ;;  %v1686_v42 = vsel %vm12682_vm1, %v1671_v34, %v12681_v0  ;;  %vm12683_vm9 = vmmov %vm12682_vm1  ;;  %v1652_v35 = vmul.f32 %v1641_v52, %v1623_v47  ;;  %v12698_v25 = vld [vmem:[#allocation43_spill] sm:$0xff] }
 0x393   :  { %2490 = vmatmul.mubr.f32.gmra.mrb[2].mxu1 %v2175_v51  ;;  %v1650_v51 = vmul.f32 %v1641_v52, %v1622_v58  ;;  %v1672_v31 = vsel %vm12683_vm9, %v12677_v45, %v12678_v24  ;;  %vm12686_vm10 = vmmov %vm12682_vm1  ;;  %v1704_v39 = vmul.f32 %v1696_v6, %v1686_v42  ;;  %vm12689_vm9 = vcmask 924672   ;;  %v12697_v52 = vld [vmem:[#allocation30_spill] sm:$0xff]  ;;  %v12701_v45 = vld [vmem:[#allocation91_spill] sm:$0xff] }
 0x394   :  { %6715 = vmatpush1.bf16.msra.mxu1 %v6714_v44  ;;  %2495 = vmatprep.mubr.f32.mxu1 %v2181_v53  ;;  %v6728_v53 = vpack.c.bf16 %v1651_v23, %v1649_v12  ;;  %v1692_v44 = vrot.slane %v6534_v48, %v7615_v20  ;;  %v1743_v38 = vrot.slane %v6535_v16, %v7615_v20  ;;  %v12709_v16 = vld [vmem:[#allocation71_spill] sm:$0xff] }
 0x395   :  { %6717 = vmatprep.subr.bf16.mxu1 %v6716_v11  ;;  %v1700_v11 = vmul.f32 %v1696_v6, %v1684_v54  ;;  %v6730_v61 = vpack.c.bf16 %v1650_v51, %v1648_v56 }
 0x396   :  { %v1699_v3 = vmul.f32 %v1692_v44, %v1672_v31 }
 0x397   :  { %2496 = vmatmul.mubr.f32.gmra.mrb[4].mxu1 %v2180_v7  ;;  %v12685_v7 = vld [vmem:[#allocation63_spill] sm:$0xff]  ;;  %v6732_v59 = vpack.c.bf16 %v1700_v11, %v1653_v49  ;;  %v12704_v49 = vld [vmem:[#allocation70_spill] sm:$0xff] }
 0x398   :  { %6719 = vmatpush1.bf16.msra.mxu1 %v6718_v28  ;;  %2501 = vmatprep.mubr.f32.mxu1 %v2186_v2  ;;  %v1685_v46 = vsel %vm12686_vm10, %v12685_v7, %v12684_v22  ;;  %v1674_v2 = vsel %vm12682_vm1, %v12681_v0, %v1671_v34  ;;  %v12688_v28 = vld [vmem:[#allocation66_spill] sm:$0xff]  ;;  %vm12690_vm10 = vmmov %vm12682_vm1  ;;  %v6734_v15 = vpack.c.bf16 %v1699_v3, %v1652_v35  ;;  %v12711_v35 = vld [vmem:[#allocation32_spill] sm:$0xff] }
 0x399   :  { %6721 = vmatprep.subr.bf16.mxu1 %v6720_v36  ;;  %v1736_v57 = vsel %vm12689_vm9, %v12688_v28, %v12687_v8  ;;  %v1673_v36 = vsel %vm12690_vm10, %v12684_v22, %v12685_v7  ;;  %v1702_v55 = vmul.f32 %v1696_v6, %v1685_v46  ;;  %vm12693_vm1 = vmmov %vm12689_vm9  ;;  %v1703_v18 = vmul.f32 %v1692_v44, %v1674_v2  ;;  %v12712_v2 = vld [vmem:[#allocation45_spill] sm:$0xff] }
 0x39a   :  { %v1735_v41 = vsel %vm12693_vm1, %v12692_v5, %v12691_v1  ;;  %vm12694_vm9 = vmmov %vm12693_vm1  ;;  %v1701_v27 = vmul.f32 %v1692_v44, %v1673_v36  ;;  %v1723_v43 = vsel %vm12693_vm1, %v12691_v1, %v12692_v5  ;;  %v12715_v36 = vld [vmem:[#allocation92_spill] sm:$0xff] }
 0x39b   :  { %2502 = vmatmul.mubr.f32.gmra.mrb[6].mxu1 %v2185_v13  ;;  %v6536_v13 = vld [vmem:[%s12108_s1 + $0x22] sm:$0x3]  ;;  %v1724_v14 = vsel %vm12694_vm9, %v12687_v8, %v12688_v28  ;;  %vm12696_vm10 = vmmov %vm12693_vm1  ;;  %v1751_v58 = vmul.f32 %v1747_v17, %v1735_v41  ;;  %vm12699_vm9 = vcmask 916480   ;;  %v1750_v34 = vmul.f32 %v1743_v38, %v1723_v43  ;;  %v12722_v43 = vld [vmem:[#allocation93_spill] sm:$0xff] }
 0x39c   :  { %6723 = vmatpush1.bf16.msra.mxu1 %v6722_v30  ;;  %2507 = vmatprep.mubr.f32.mxu1 %v2191_v50  ;;  %v1753_v50 = vmul.f32 %v1747_v17, %v1736_v57  ;;  %v6736_v30 = vpack.c.bf16 %v1704_v39, %v1702_v55  ;;  %v1737_v48 = vsel %vm12696_vm10, %v1722_v10, %v12695_v9  ;;  %vm12700_vm8 = vmmov %vm12693_vm1 }
 0x39d   :  { %6725 = vmatprep.subr.bf16.mxu1 %v6724_v29  ;;  %v1798_v23 = vrot.slane %v6536_v13, %v7617_v21  ;;  %v1773_v29 = vpop.permute.xlu1 %1772  ;;  %v1786_v19 = vsel %vm12699_vm9, %v12698_v25, %v12697_v52  ;;  %v1752_v4 = vmul.f32 %v1743_v38, %v1724_v14  ;;  %v1725_v60 = vsel %vm12700_vm8, %v12695_v9, %v1722_v10  ;;  %vm12702_vm10 = vmmov %vm12699_vm9  ;;  %v6538_v10 = vld [vmem:[%s12108_s1 + $0x26] sm:$0x3] }
 0x39e   :  { %v1755_v12 = vmul.f32 %v1747_v17, %v1737_v48  ;;  %v6740_v6 = vpack.c.bf16 %v1753_v50, %v1751_v58  ;;  %v1788_v24 = vsel %vm12702_vm10, %v1773_v29, %v12701_v45  ;;  %vm12703_vm1 = vmmov %vm12699_vm9  ;;  %v1754_v44 = vmul.f32 %v1743_v38, %v1725_v60 }
 0x39f   :  { %2508 = vmatmul.mubr.f32.gmra.mrb[8].mxu1 %v2190_v37  ;;  %v6738_v37 = vpack.c.bf16 %v1703_v18, %v1701_v27  ;;  %v1774_v54 = vsel %vm12703_vm1, %v12697_v52, %v12698_v25  ;;  %v1802_v51 = vmul.f32 %v1798_v23, %v1786_v19  ;;  %v6742_v47 = vpack.c.bf16 %v1752_v4, %v1750_v34  ;;  %vm12706_vm8 = vmmov %vm12703_vm1  ;;  %v6539_v52 = vld [vmem:[%s12108_s1 + $0x28] sm:$0x3]  ;;  %v12725_v19 = vld [vmem:[#allocation74_spill] sm:$0xff] }
 0x3a0   :  { %6727 = vmatpush1.bf16.msra.mxu1 %v6726_v33  ;;  %2513 = vmatprep.mubr.f32.mxu1 %v2196_v62  ;;  %v1794_v62 = vrot.slane %v6536_v13, %v7615_v20  ;;  %v6537_v33 = vld [vmem:[%s12108_s1 + $0x24] sm:$0x3]  ;;  %vm12707_vm9 = vmmov %vm12703_vm1  ;;  %v1806_v42 = vmul.f32 %v1798_v23, %v1788_v24  ;;  %vm12710_vm10 = vcmask 908288   ;;  %v1900_v5 = vrot.slane %v6538_v10, %v7617_v21  ;;  %v12726_v4 = vld [vmem:[#allocation73_spill] sm:$0xff] }
 0x3a1   :  { %6729 = vmatprep.subr.bf16.mxu1 %v6728_v53  ;;  %v12705_v53 = vld [vmem:[#allocation68_spill] sm:$0xff]  ;;  %v1776_v0 = vsel %vm12707_vm9, %v12701_v45, %v1773_v29  ;;  %v6744_v31 = vpack.c.bf16 %v1802_v51, %v1755_v12  ;;  %v1849_v22 = vrot.slane %v6537_v33, %v7617_v21  ;;  %v12718_v13 = vld [vmem:[#allocation34_spill] sm:$0xff]  ;;  %v1896_v48 = vrot.slane %v6538_v10, %v7615_v20  ;;  %v12729_v24 = vld [vmem:[#allocation75_spill] sm:$0xff] }
 0x3a2   :  { %v1787_v56 = vsel %vm12706_vm8, %v12705_v53, %v12704_v49  ;;  %v1801_v11 = vmul.f32 %v1794_v62, %v1774_v54  ;;  %v1775_v7 = vsel %vm12703_vm1, %v12704_v49, %v12705_v53  ;;  %vm12713_vm8 = vmmov %vm12710_vm10  ;;  %v1805_v3 = vmul.f32 %v1794_v62, %v1776_v0  ;;  %v12730_v54 = vld [vmem:[#allocation76_spill] sm:$0xff]  ;;  %v6540_v0 = vld [vmem:[%s12108_s1 + $0x2a] sm:$0x3] }
 0x3a3   :  { %2514 = vmatmul.mubr.f32.gmra.mrb[10].mxu1 %v2195_v40  ;;  %v1824_v40 = vpop.permute.xlu1 %1823  ;;  %v1804_v46 = vmul.f32 %v1798_v23, %v1787_v56  ;;  %v1837_v39 = vsel %vm12713_vm8, %v12712_v2, %v12711_v35  ;;  %vm12714_vm9 = vmmov %vm12713_vm8  ;;  %v1803_v17 = vmul.f32 %v1794_v62, %v1775_v7  ;;  %v12732_v53 = vld [vmem:[#allocation36_spill] sm:$0xff]  ;;  %v12739_v10 = vld [vmem:[#allocation38_spill] sm:$0xff] }
 0x3a4   :  { %6731 = vmatpush1.bf16.msra.mxu1 %v6730_v61  ;;  %2519 = vmatprep.mubr.f32.mxu1 %v2201_v26  ;;  %v12708_v26 = vld [vmem:[#allocation72_spill] sm:$0xff]  ;;  %vm12717_vm1 = vmmov %vm12713_vm8  ;;  %v1853_v1 = vmul.f32 %v1849_v22, %v1837_v39 }
 0x3a5   :  { %6733 = vmatprep.subr.bf16.mxu1 %v6732_v59  ;;  %v1838_v61 = vsel %vm12710_vm10, %v12709_v16, %v12708_v26  ;;  %v6746_v59 = vpack.c.bf16 %v1801_v11, %v1754_v44  ;;  %v1826_v8 = vsel %vm12714_vm9, %v12708_v26, %v12709_v16  ;;  %v6748_v57 = vpack.c.bf16 %v1806_v42, %v1804_v46  ;;  %vm12716_vm10 = vmmov %vm12713_vm8  ;;  %v12733_v56 = vld [vmem:[#allocation48_spill] sm:$0xff] }
 0x3a6   :  { %v1855_v28 = vmul.f32 %v1849_v22, %v1838_v61  ;;  %v1839_v55 = vsel %vm12716_vm10, %v1824_v40, %v12715_v36  ;;  %vm12720_vm8 = vcmask 900096   ;;  %v6750_v50 = vpack.c.bf16 %v1805_v3, %v1803_v17  ;;  %vm12721_vm9 = vmmov %vm12717_vm1 }
 0x3a7   :  { %2520 = vmatmul.mubr.f32.gmra.mrb[12].mxu1 %v2200_v32  ;;  %v1845_v32 = vrot.slane %v6537_v33, %v7615_v20  ;;  %v1875_v41 = vpop.permute.xlu1 %1874  ;;  %v1857_v38 = vmul.f32 %v1849_v22, %v1839_v55  ;;  %vm12723_vm10 = vmmov %vm12720_vm8  ;;  %v1951_v33 = vrot.slane %v6539_v52, %v7617_v21  ;;  %v1947_v16 = vrot.slane %v6539_v52, %v7615_v20  ;;  %v12736_v22 = vld [vmem:[#allocation94_spill] sm:$0xff] }
 0x3a8   :  { %6735 = vmatpush1.bf16.msra.mxu1 %v6734_v15  ;;  %2590 = vmatprep.mubr.f32.mxu1 %v2173_v63  ;;  %v1825_v63 = vsel %vm12717_vm1, %v12711_v35, %v12712_v2  ;;  %v12719_v15 = vld [vmem:[#allocation47_spill] sm:$0xff]  ;;  %v6752_v27 = vpack.c.bf16 %v1855_v28, %v1853_v1  ;;  %v1890_v58 = vsel %vm12723_vm10, %v1875_v41, %v12722_v43  ;;  %vm12724_vm1 = vmmov %vm12720_vm8  ;;  %vm12731_vm10 = vcmask 801792  }
 0x3a9   :  { %6737 = vmatprep.subr.bf16.mxu1 %v6736_v30  ;;  %v1888_v18 = vsel %vm12720_vm8, %v12719_v15, %v12718_v13  ;;  %v1854_v14 = vmul.f32 %v1845_v32, %v1826_v8  ;;  %v1827_v30 = vsel %vm12721_vm9, %v12715_v36, %v1824_v40  ;;  %v1852_v9 = vmul.f32 %v1845_v32, %v1825_v63  ;;  %vm12727_vm8 = vmmov %vm12724_vm1  ;;  %v12743_v63 = vld [vmem:[#allocation95_spill] sm:$0xff] }
 0x3aa   :  { %v1876_v23 = vsel %vm12724_vm1, %v12718_v13, %v12719_v15  ;;  %v1904_v29 = vmul.f32 %v1900_v5, %v1888_v18  ;;  %v1856_v60 = vmul.f32 %v1845_v32, %v1827_v30  ;;  %vm12728_vm9 = vmmov %vm12724_vm1  ;;  %v1940_v51 = vsel %vm12731_vm10, %v12730_v54, %v12729_v24  ;;  %v6541_v13 = vld [vmem:[%s12108_s1 + $0x2c] sm:$0x3]  ;;  %v12746_v18 = vld [vmem:[#allocation77_spill] sm:$0xff] }
 0x3ab   :  { %v6754_v25 = vpack.c.bf16 %v1854_v14, %v1852_v9  ;;  %v1878_v12 = vsel %vm12728_vm9, %v12722_v43, %v1875_v41  ;;  %v1926_v34 = vpop.permute.xlu1 %1925  ;;  %v1903_v45 = vmul.f32 %v1896_v48, %v1876_v23  ;;  %v1957_v11 = vmul.f32 %v1951_v33, %v1940_v51  ;;  %v12747_v14 = vld [vmem:[#allocation78_spill] sm:$0xff]  ;;  %v12751_v23 = vld [vmem:[#allocation81_spill] sm:$0xff] }
 0x3ac   :  { %6739 = vmatpush1.bf16.msra.mxu1 %v6738_v37  ;;  %v1889_v37 = vsel %vm12727_vm8, %v12726_v4, %v12725_v19  ;;  %v6756_v62 = vpack.c.bf16 %v1904_v29, %v1857_v38  ;;  %vm12734_vm8 = vmmov %vm12731_vm10  ;;  %v1907_v40 = vmul.f32 %v1896_v48, %v1878_v12  ;;  %v2002_v2 = vrot.slane %v6540_v0, %v7617_v21  ;;  %v6542_v12 = vld [vmem:[%s12108_s1 + $0x2e] sm:$0x3] }
 0x3ad   :  { %6741 = vmatprep.subr.bf16.mxu1 %v6740_v6  ;;  %v1908_v6 = vmul.f32 %v1900_v5, %v1890_v58  ;;  %v1906_v49 = vmul.f32 %v1900_v5, %v1889_v37  ;;  %v1939_v44 = vsel %vm12734_vm8, %v12733_v56, %v12732_v53  ;;  %v6758_v42 = vpack.c.bf16 %v1903_v45, %v1856_v60  ;;  %vm12735_vm9 = vmmov %vm12734_vm8  ;;  %v12750_v58 = vld [vmem:[#allocation79_spill] sm:$0xff]  ;;  %v12754_v37 = vld [vmem:[#allocation50_spill] sm:$0xff] }
 0x3ae   :  { %vm12737_vm10 = vmmov %vm12734_vm8  ;;  %v1955_v35 = vmul.f32 %v1951_v33, %v1939_v44  ;;  %v1998_v55 = vrot.slane %v6540_v0, %v7615_v20  ;;  %v2042_v29 = vsel %vm654_vm15, %v12751_v23, %v12750_v58  ;;  %v2053_v52 = vrot.slane %v6541_v13, %v7617_v21 }
 0x3af   :  { %v6760_v26 = vpack.c.bf16 %v1908_v6, %v1906_v49  ;;  %v1941_v7 = vsel %vm12737_vm10, %v1926_v34, %v12736_v22  ;;  %v1977_v39 = vpop.permute.xlu1 %1976  ;;  %v2172_v49 = vld [vmem:[#allocation3 + $0x10] sm:$0xff]  ;;  %v2104_v44 = vrot.slane %v6542_v12, %v7617_v21 }
 0x3b0   :  { %6743 = vmatpush1.bf16.msra.mxu1 %v6742_v47  ;;  %v1877_v47 = vsel %vm12724_vm1, %v12725_v19, %v12726_v4  ;;  %vm12738_vm1 = vmmov %vm12734_vm8  ;;  %vm12741_vm8 = vcmask 793600   ;;  %v1959_v32 = vmul.f32 %v1951_v33, %v1941_v7  ;;  %v6764_v17 = vpack.c.bf16 %v1957_v11, %v1955_v35  ;;  %v12753_v4 = vld [vmem:[#allocation40_spill] sm:$0xff] }
 0x3b1   :  { %6745 = vmatprep.subr.bf16.mxu1 %v6744_v31  ;;  %v1928_v31 = vsel %vm12735_vm9, %v12729_v24, %v12730_v54  ;;  %v1905_v61 = vmul.f32 %v1896_v48, %v1877_v47  ;;  %v1927_v46 = vsel %vm12738_vm1, %v12732_v53, %v12733_v56  ;;  %vm12742_vm9 = vmmov %vm12738_vm1  ;;  %v2041_v60 = vsel %vm654_vm15, %v12754_v37, %v12753_v4  ;;  %v12755_v33 = vld [vmem:[#allocation96_spill] sm:$0xff] }
 0x3b2   :  { %v1956_v8 = vmul.f32 %v1947_v16, %v1928_v31  ;;  %v1954_v36 = vmul.f32 %v1947_v16, %v1927_v46  ;;  %vm12744_vm10 = vmmov %vm12741_vm8  ;;  %v2059_v45 = vmul.f32 %v2053_v52, %v2042_v29  ;;  %v2049_v54 = vrot.slane %v6541_v13, %v7615_v20  ;;  %v12757_v31 = vld [vmem:[#allocation51_spill] sm:$0xff]  ;;  %v12761_v13 = vld [vmem:[#allocation82_spill] sm:$0xff] }
 0x3b3   :  { %v6762_v28 = vpack.c.bf16 %v1907_v40, %v1905_v61  ;;  %v1992_v1 = vsel %vm12744_vm10, %v1977_v39, %v12743_v63  ;;  %vm12745_vm1 = vmmov %vm12741_vm8  ;;  %v2028_v9 = vpop.permute.xlu1 %2027  ;;  %v2029_v53 = vsel %vm654_vm15, %v12753_v4, %v12754_v37  ;;  %v2057_v56 = vmul.f32 %v2053_v52, %v2041_v60  ;;  %v12756_v40 = vld [vmem:[#allocation42_spill] sm:$0xff]  ;;  %v2187_v37 = vld [vmem:[#allocation3 + $0x88] sm:$0xff] }
 0x3b4   :  { %6747 = vmatpush1.bf16.msra.mxu1 %v6746_v59  ;;  %v12740_v59 = vld [vmem:[#allocation49_spill] sm:$0xff]  ;;  %v6766_v15 = vpack.c.bf16 %v1956_v8, %v1954_v36  ;;  %vm12752_vm10 = vmmov %vm12745_vm1  ;;  %v2043_v47 = vsel %vm654_vm15, %v2028_v9, %v12755_v33  ;;  %v2092_v11 = vsel %vm681_vm0, %v12757_v31, %v12756_v40  ;;  %v2031_v61 = vsel %vm654_vm15, %v12755_v33, %v2028_v9  ;;  %v2183_v8 = vld [vmem:[#allocation3 + $0x68] sm:$0xff] }
 0x3b5   :  { %6749 = vmatprep.subr.bf16.mxu1 %v6748_v57  ;;  %v1990_v3 = vsel %vm12741_vm8, %v12740_v59, %v12739_v10  ;;  %v1929_v57 = vsel %vm12742_vm9, %v12736_v22, %v1926_v34  ;;  %v1978_v5 = vsel %vm12745_vm1, %v12739_v10, %v12740_v59  ;;  %vm12748_vm8 = vmmov %vm12745_vm1  ;;  %v2061_v22 = vmul.f32 %v2053_v52, %v2043_v47  ;;  %v2177_v10 = vld [vmem:[#allocation3 + $0x38] sm:$0xff]  ;;  %v12763_v9 = vld [vmem:[#allocation44_spill] sm:$0xff] }
 0x3b6   :  { %v2006_v41 = vmul.f32 %v2002_v2, %v1990_v3  ;;  %v1958_v30 = vmul.f32 %v1947_v16, %v1929_v57  ;;  %vm12749_vm9 = vmmov %vm12745_vm1  ;;  %v2005_v43 = vmul.f32 %v1998_v55, %v1978_v5  ;;  %v6776_v7 = vpack.c.bf16 %v2059_v45, %v2057_v56  ;;  %v2192_v47 = vld [vmem:[#allocation3 + $0xb0] sm:$0xff] }
 0x3b7   :  { %v1980_v38 = vsel %vm12749_vm9, %v12743_v63, %v1977_v39  ;;  %v2079_v0 = vpop.permute.xlu1 %2078  ;;  %v2056_v46 = vmul.f32 %v2049_v54, %v2029_v53  ;;  %v2100_v35 = vrot.slane %v6542_v12, %v7615_v20  ;;  %v2080_v59 = vsel %vm681_vm0, %v12756_v40, %v12757_v31  ;;  %v2202_v31 = vld [vmem:[#allocation3 + $0x100] sm:$0xff] }
 0x3b8   :  { %6751 = vmatpush1.bf16.msra.mxu1 %v6750_v50  ;;  %v1991_v50 = vsel %vm12748_vm8, %v12747_v14, %v12746_v18  ;;  %v6768_v48 = vpack.c.bf16 %v2006_v41, %v1959_v32  ;;  %v6770_v6 = vpack.c.bf16 %v2005_v43, %v1958_v30  ;;  %v2009_v34 = vmul.f32 %v1998_v55, %v1980_v38  ;;  %v12759_v32 = vld [vmem:[#allocation80_spill] sm:$0xff] }
 0x3b9   :  { %6753 = vmatprep.subr.bf16.mxu1 %v6752_v27  ;;  %v2010_v27 = vmul.f32 %v2002_v2, %v1992_v1  ;;  %v2008_v19 = vmul.f32 %v2002_v2, %v1991_v50  ;;  %v12758_v2 = vld [vmem:[#allocation97_spill] sm:$0xff]  ;;  %v2108_v3 = vmul.f32 %v2104_v44, %v2092_v11  ;;  %v2107_v41 = vmul.f32 %v2100_v35, %v2080_v59 }
 0x3ba   :  { %v2094_v39 = vsel %vm681_vm0, %v2079_v0, %v12758_v2  ;;  %v2082_v63 = vsel %vm681_vm0, %v12758_v2, %v2079_v0  ;;  %v2197_v0 = vld [vmem:[#allocation3 + $0xd8] sm:$0xff]  ;;  %v12232_v11 = vmov 0.0   ;;  %vm2397_vm1 = vcmask 719872  }
 0x3bb   :  { %v6772_v24 = vpack.c.bf16 %v2010_v27, %v2008_v19  ;;  %v2112_v1 = vmul.f32 %v2104_v44, %v2094_v39  ;;  %v6780_v5 = vpack.c.bf16 %v2108_v3, %v2061_v22  ;;  %v2188_v27 = vld [vmem:[#allocation3 + $0x90] sm:$0xff]  ;;  %v2189_v22 = vld [vmem:[#allocation3 + $0x98] sm:$0xff]  ;;  %vm12968_vm8 = vcmask 1039360  }
 0x3bc   :  { %6755 = vmatpush1.bf16.msra.mxu1 %v6754_v25  ;;  %v1979_v25 = vsel %vm12752_vm10, %v12746_v18, %v12747_v14  ;;  %v2182_v14 = vld [vmem:[#allocation3 + $0x60] sm:$0xff]  ;;  %v12766_v39 = vld [vmem:[#allocation17_spill] sm:$0xff]  ;;  %vm12971_vm9 = vmmov %vm12968_vm8  ;;  %vm12988_vm10 = vcmask 1031168  }
 0x3bd   :  { %6757 = vmatprep.subr.bf16.mxu1 %v6756_v62  ;;  %v2030_v62 = vsel %vm654_vm15, %v12750_v58, %v12751_v23  ;;  %v2007_v51 = vmul.f32 %v1998_v55, %v1979_v25  ;;  %v2060_v55 = vmul.f32 %v2049_v54, %v2031_v61  ;;  %v2111_v23 = vmul.f32 %v2100_v35, %v2082_v63  ;;  %v2184_v61 = vld [vmem:[#allocation3 + $0x70] sm:$0xff] }
 0x3bf   :  { %v6774_v16 = vpack.c.bf16 %v2009_v34, %v2007_v51  ;;  %v6782_v58 = vpack.c.bf16 %v2107_v41, %v2060_v55  ;;  %v2193_v34 = vld [vmem:[#allocation3 + $0xb8] sm:$0xff]  ;;  %v12765_v51 = vld [vmem:[#allocation98_spill] sm:$0xff] }
 0x3c0   :  { %6759 = vmatpush1.bf16.msra.mxu1 %v6758_v42  ;;  %v2178_v42 = vld [vmem:[#allocation3 + $0x40] sm:$0xff] }
 0x3c1   :  { %6761 = vmatprep.subr.bf16.mxu1 %v6760_v26  ;;  %v2058_v26 = vmul.f32 %v2049_v54, %v2030_v62 }
 0x3c3   :  { %v6778_v57 = vpack.c.bf16 %v2058_v26, %v2056_v46  ;;  %v2174_v26 = vld [vmem:[#allocation3 + $0x20] sm:$0xff]  ;;  %v2199_v46 = vld [vmem:[#allocation3 + $0xe8] sm:$0xff] }
 0x3c4   :  { %6763 = vmatpush1.bf16.msra.mxu1 %v6762_v28  ;;  %v6543_v28 = vld [vmem:[%s12108_s1 + $0x30] sm:$0x3] }
 0x3c5   :  { %6765 = vmatprep.subr.bf16.mxu1 %v6764_v17  ;;  %v12760_v17 = vld [vmem:[#allocation83_spill] sm:$0xff]  ;;  %v2155_v50 = vrot.slane %v6543_v28, %v7617_v21  ;;  %v2151_v19 = vrot.slane %v6543_v28, %v7615_v20 }
 0x3c6   :  { %v2093_v36 = vsel %vm681_vm0, %v12760_v17, %v12759_v32  ;;  %v2081_v30 = vsel %vm681_vm0, %v12759_v32, %v12760_v17 }
 0x3c7   :  { %v2110_v38 = vmul.f32 %v2104_v44, %v2093_v36  ;;  %v2109_v4 = vmul.f32 %v2100_v35, %v2081_v30  ;;  %v2204_v35 = vld [vmem:[#allocation3 + $0x110] sm:$0xff] }
 0x3c8   :  { %6767 = vmatpush1.bf16.msra.mxu1 %v6766_v15  ;;  %v12762_v15 = vld [vmem:[#allocation84_spill] sm:$0xff] }
 0x3c9   :  { %6769 = vmatprep.subr.bf16.mxu1 %v6768_v48  ;;  %v2144_v18 = vsel %vm708_vm14, %v12762_v15, %v12761_v13  ;;  %v12764_v48 = vld [vmem:[#allocation52_spill] sm:$0xff]  ;;  %v2132_v29 = vsel %vm708_vm14, %v12761_v13, %v12762_v15  ;;  %v6784_v25 = vpack.c.bf16 %v2112_v1, %v2110_v38  ;;  %v6786_v45 = vpack.c.bf16 %v2111_v23, %v2109_v4 }
 0x3ca   :  { %v2143_v43 = vsel %vm708_vm14, %v12764_v48, %v12763_v9  ;;  %v2161_v52 = vmul.f32 %v2155_v50, %v2144_v18  ;;  %v2131_v60 = vsel %vm708_vm14, %v12763_v9, %v12764_v48  ;;  %v2160_v62 = vmul.f32 %v2151_v19, %v2132_v29  ;;  %v12769_v30 = vld [vmem:[#allocation20_spill] sm:$0xff] }
 0x3cb   :  { %v2159_v12 = vmul.f32 %v2155_v50, %v2143_v43  ;;  %v2158_v54 = vmul.f32 %v2151_v19, %v2131_v60 }
 0x3cc   :  { %6771 = vmatpush1.bf16.msra.mxu1 %v6770_v6  ;;  %v2130_v6 = vpop.permute.xlu1 %2129 }
 0x3cd   :  { %6773 = vmatprep.subr.bf16.mxu1 %v6772_v24  ;;  %v6788_v24 = vpack.c.bf16 %v2161_v52, %v2159_v12  ;;  %v2145_v33 = vsel %vm708_vm14, %v2130_v6, %v12765_v51  ;;  %v6790_v53 = vpack.c.bf16 %v2160_v62, %v2158_v54  ;;  %v2133_v56 = vsel %vm708_vm14, %v12765_v51, %v2130_v6  ;;  %v12772_v52 = vld [vmem:[#allocation19_spill] sm:$0xff] }
 0x3ce   :  { %v2163_v44 = vmul.f32 %v2155_v50, %v2145_v33  ;;  %v2162_v40 = vmul.f32 %v2151_v19, %v2133_v56 }
 0x3cf   :  { %2591 = vmatmul.mubr.f32.vlgmr.msra.gmra.mrb[0].mxu1 %v2172_v49  ;;  %v2198_v49 = vld [vmem:[#allocation3 + $0xe0] sm:$0xff] }
 0x3d0   :  { %6775 = vmatpush1.bf16.msra.mxu1 %v6774_v16  ;;  %2596 = vmatprep.mubr.f32.mxu1 %v2178_v42  ;;  %v2203_v42 = vld [vmem:[#allocation3 + $0x108] sm:$0xff] }
 0x3d1   :  { %6777 = vmatprep.subr.bf16.mxu1 %v6776_v7  ;;  %v2179_v16 = vld [vmem:[#allocation3 + $0x48] sm:$0xff]  ;;  %v2194_v7 = vld [vmem:[#allocation3 + $0xc0] sm:$0xff] }
 0x3d3   :  { %2597 = vmatmul.mubr.f32.gmra.mrb[2].mxu1 %v2177_v10 }
 0x3d4   :  { %6779 = vmatpush1.bf16.msra.mxu1 %v6778_v57  ;;  %2602 = vmatprep.mubr.f32.mxu1 %v2183_v8 }
 0x3d5   :  { %6781 = vmatprep.subr.bf16.mxu1 %v6780_v5 }
 0x3d7   :  { %2603 = vmatmul.mubr.f32.gmra.mrb[4].mxu1 %v2182_v14 }
 0x3d8   :  { %6783 = vmatpush1.bf16.msra.mxu1 %v6782_v58  ;;  %2608 = vmatprep.mubr.f32.mxu1 %v2188_v27 }
 0x3d9   :  { %6785 = vmatprep.subr.bf16.mxu1 %v6784_v25 }
 0x3db   :  { %2609 = vmatmul.mubr.f32.gmra.mrb[6].mxu1 %v2187_v37 }
 0x3dc   :  { %6787 = vmatpush1.bf16.msra.mxu1 %v6786_v45  ;;  %2614 = vmatprep.mubr.f32.mxu1 %v2193_v34 }
 0x3dd   :  { %6789 = vmatprep.subr.bf16.mxu1 %v6788_v24 }
 0x3df   :  { %2615 = vmatmul.mubr.f32.gmra.mrb[8].mxu1 %v2192_v47 }
 0x3e0   :  { %6791 = vmatpush1.bf16.msra.mxu1 %v6790_v53  ;;  %2620 = vmatprep.mubr.f32.mxu1 %v2198_v49 }
 0x3e1   :  { %2653 = vmatprep.subr.mxu1 %v2163_v44 }
 0x3e3   :  { %2621 = vmatmul.mubr.f32.gmra.mrb[10].mxu1 %v2197_v0 }
 0x3e4   :  { %2654 = vmatpush1.msra.mxu1 %v2162_v40  ;;  %2626 = vmatprep.mubr.f32.mxu1 %v2203_v42 }
 0x3e7   :  { %2627 = vmatmul.mubr.f32.gmra.mrb[12].mxu1 %v2202_v31 }
 0x3e8   :  { %2697 = vmatprep.mubr.f32.mxu1 %v12232_v11 }
 0x3eb   :  { %6544 = vmatmul.mubr.msk.f32.vlgmr.msra.gmra.mrb[0].mxu1 %vm2397_vm1, %v2174_v26 }
 0x3ec   :  { %2703 = vmatprep.mubr.f32.mxu1 %v12232_v11 }
 0x3ef   :  { %6545 = vmatmul.mubr.msk.f32.gmra.mrb[2].mxu1 %vm2397_vm1, %v2179_v16 }
 0x3f0   :  { %2709 = vmatprep.mubr.f32.mxu1 %v12232_v11 }
 0x3f3   :  { %6546 = vmatmul.mubr.msk.f32.gmra.mrb[4].mxu1 %vm2397_vm1, %v2184_v61 }
 0x3f4   :  { %2715 = vmatprep.mubr.f32.mxu1 %v12232_v11 }
 0x3f7   :  { %6547 = vmatmul.mubr.msk.f32.gmra.mrb[6].mxu1 %vm2397_vm1, %v2189_v22 }
 0x3f8   :  { %2721 = vmatprep.mubr.f32.mxu1 %v12232_v11 }
 0x3fb   :  { %6548 = vmatmul.mubr.msk.f32.gmra.mrb[8].mxu1 %vm2397_vm1, %v2194_v7 }
 0x3fc   :  { %2727 = vmatprep.mubr.f32.mxu1 %v12232_v11 }
 0x3ff   :  { %6549 = vmatmul.mubr.msk.f32.gmra.mrb[10].mxu1 %vm2397_vm1, %v2199_v46 }
 0x400   :  { %2733 = vmatprep.mubr.f32.mxu1 %v12232_v11 }
 0x403   :  { %6550 = vmatmul.mubr.msk.f32.gmra.mrb[12].mxu1 %vm2397_vm1, %v2204_v35  ;;  %vm12989_vm1 = vmmov %vm12988_vm10 }
 0x4be   :  { %v2699_v2 = vpop.f32.mrb[0].mxu1 }
 0x4bf   :  { %v7140_v10 = vadd.f32 %v2699_v2, %v12766_v39  ;;  %v2701_v59 = vpop.f32.mrb[1].mxu1 }
 0x4c0   :  { %v7141_v15 = vadd.f32 %v2701_v59, %v12766_v39 }
 0x4c1   :  { %v6551_v3 = vadd.f32 -11.0, %v7140_v10 }
 0x4c2   :  { %v2705_v8 = vpop.f32.mrb[2].mxu1  ;;  %v6552_v14 = vadd.f32 -11.0, %v7141_v15 }
 0x4c3   :  { %v8891_v28 = vmax.f32 %v6551_v3, 0.0  ;;  %v2707_v57 = vpop.f32.mrb[3].mxu1  ;;  %v7142_v38 = vadd.f32 %v2705_v8, %v12769_v30 }
 0x4c4   :  { %v8942_v50 = vmax.f32 %v6552_v14, 0.0  ;;  %v7143_v9 = vadd.f32 %v2707_v57, %v12769_v30 }
 0x4c5   :  { %12767 = vst [vmem:[#allocation54_spill] sm:$0xff] %v8891_v28  ;;  %3833 = vrot.lane.b32.xlu1 %v8891_v28, %s7391_s20  ;;  %2803 = vrot.lane.b32.xlu0 %v8891_v28, %s7382_s13  ;;  %v6553_v27 = vadd.f32 -11.0, %v7142_v38 }
 0x4c6   :  { %v8897_v32 = vpop.f32.mrb[4].mxu1  ;;  %12768 = vst [vmem:[#allocation31_spill] sm:$0xff] %v8942_v50  ;;  %v6554_v43 = vadd.f32 -11.0, %v7143_v9 }
 0x4c7   :  { %v8899_v17 = vpop.f32.mrb[5].mxu1  ;;  %v8978_v48 = vmax.f32 %v6553_v27, 0.0  ;;  %v7144_v25 = vadd.f32 %v8897_v32, %v12772_v52 }
 0x4c8   :  { %v8984_v58 = vmax.f32 %v6554_v43, 0.0  ;;  %v7145_v40 = vadd.f32 %v8899_v17, %v12772_v52  ;;  %v2845_v17 = vld [vmem:[%s12108_s1] sm:$0x3] }
 0x4c9   :  { %4058 = vrot.lane.b32.xlu1 %v8891_v28, %s7393_s22  ;;  %2906 = vrot.lane.b32.xlu0 %v8891_v28, %s7381_s12  ;;  %12770 = vst [vmem:[#allocation99_spill] sm:$0xff] %v8978_v48  ;;  %v6555_v37 = vadd.f32 -11.0, %v7144_v25  ;;  %v9186_v30 = vrot.slane %v2845_v17, %v7615_v20  ;;  %v9189_v38 = vrot.slane %v2845_v17, %v7617_v21 }
 0x4ca   :  { %v8905_v36 = vpop.f32.mrb[6].mxu1  ;;  %12771 = vst [vmem:[#allocation85_spill] sm:$0xff] %v8984_v58  ;;  %v6556_v16 = vadd.f32 -11.0, %v7145_v40 }
 0x4cb   :  { %v8907_v55 = vpop.f32.mrb[7].mxu1  ;;  %v9064_v6 = vmax.f32 %v6555_v37, 0.0  ;;  %12786 = vst [vmem:[#allocation16_spill] sm:$0xff] %v9186_v30  ;;  %12787 = vst [vmem:[#allocation87_spill] sm:$0xff] %v9189_v38 }
 0x4cc   :  { %v9134_v7 = vmax.f32 %v6556_v16, 0.0 }
 0x4cd   :  { %4161 = vrot.lane.b32.xlu1 %v8891_v28, %s7394_s23  ;;  %3009 = vrot.lane.b32.xlu0 %v8891_v28, %s7383_s6  ;;  %12773 = vst [vmem:[#allocation60_spill] sm:$0xff] %v9064_v6 }
 0x4ce   :  { %v8913_v63 = vpop.f32.mrb[8].mxu1  ;;  %12778 = vst [vmem:[#allocation56_spill] sm:$0xff] %v9134_v7 }
 0x4cf   :  { %v8915_v1 = vpop.f32.mrb[9].mxu1 }
 0x4d1   :  { %4264 = vrot.lane.b32.xlu1 %v8891_v28, %s7395_s24  ;;  %3112 = vrot.lane.b32.xlu0 %v8891_v28, %s7384_s0 }
 0x4d2   :  { %v8921_v5 = vpop.f32.mrb[10].mxu1 }
 0x4d3   :  { %v8923_v41 = vpop.f32.mrb[11].mxu1 }
 0x4d5   :  { %4367 = vrot.lane.b32.xlu1 %v8891_v28, %s7396_s25  ;;  %3215 = vrot.lane.b32.xlu0 %v8891_v28, %s7385_s14 }
 0x4d6   :  { %v8929_v13 = vpop.f32.mrb[12].mxu1 }
 0x4d7   :  { %v8932_v18 = vpop.f32.mrb[13].mxu1 }
 0x4d9   :  { %4470 = vrot.lane.b32.xlu1 %v8891_v28, %s7397_s26  ;;  %3318 = vrot.lane.b32.xlu0 %v8891_v28, %s7386_s15 }
 0x4dd   :  { %4573 = vrot.lane.b32.xlu1 %v8891_v28, %s12547_s28  ;;  %3936 = vrot.lane.b32.xlu0 %v8891_v28, %s12548_s9 }
 0x4e1   :  { %4676 = vrot.lane.b32.xlu1 %v8891_v28, %s12550_s10  ;;  %4060 = vrot.lane.b32.xlu0 %v8942_v50, %s7393_s22 }
 0x4e5   :  { %4779 = vrot.lane.b32.xlu1 %v8891_v28, %s12551_s4  ;;  %4163 = vrot.lane.b32.xlu0 %v8942_v50, %s7394_s23 }
 0x4e9   :  { %2775 = vrot.lane.b32.xlu1 %v8942_v50, %s7382_s13  ;;  %4266 = vrot.lane.b32.xlu0 %v8942_v50, %s7395_s24 }
 0x4ed   :  { %2885 = vrot.lane.b32.xlu1 %v8942_v50, %s7381_s12  ;;  %4369 = vrot.lane.b32.xlu0 %v8942_v50, %s7396_s25 }
 0x4f1   :  { %2988 = vrot.lane.b32.xlu1 %v8942_v50, %s7383_s6  ;;  %4472 = vrot.lane.b32.xlu0 %v8942_v50, %s7397_s26 }
 0x4f5   :  { %3091 = vrot.lane.b32.xlu1 %v8942_v50, %s7384_s0  ;;  %4575 = vrot.lane.b32.xlu0 %v8942_v50, %s12547_s28 }
 0x4f9   :  { %3194 = vrot.lane.b32.xlu1 %v8942_v50, %s7385_s14  ;;  %4678 = vrot.lane.b32.xlu0 %v8942_v50, %s12550_s10 }
 0x4fd   :  { %3297 = vrot.lane.b32.xlu1 %v8942_v50, %s7386_s15  ;;  %4781 = vrot.lane.b32.xlu0 %v8942_v50, %s12551_s4 }
 0x501   :  { %3400 = vrot.lane.b32.xlu1 %v8942_v50, %s7387_s16  ;;  %3835 = vrot.lane.b32.xlu0 %v8978_v48, %s7391_s20 }
 0x505   :  { %3812 = vrot.lane.b32.xlu1 %v8942_v50, %s7391_s20  ;;  %2777 = vrot.lane.b32.xlu0 %v8984_v58, %s7382_s13 }
 0x509   :  { %3915 = vrot.lane.b32.xlu1 %v8942_v50, %s12548_s9  ;;  %2887 = vrot.lane.b32.xlu0 %v8984_v58, %s7381_s12 }
 0x50d   :  { %2805 = vrot.lane.b32.xlu1 %v8978_v48, %s7382_s13  ;;  %2990 = vrot.lane.b32.xlu0 %v8984_v58, %s7383_s6 }
 0x511   :  { %2908 = vrot.lane.b32.xlu1 %v8978_v48, %s7381_s12  ;;  %3093 = vrot.lane.b32.xlu0 %v8984_v58, %s7384_s0 }
 0x515   :  { %3011 = vrot.lane.b32.xlu1 %v8978_v48, %s7383_s6  ;;  %3196 = vrot.lane.b32.xlu0 %v8984_v58, %s7385_s14 }
 0x519   :  { %3114 = vrot.lane.b32.xlu1 %v8978_v48, %s7384_s0  ;;  %3299 = vrot.lane.b32.xlu0 %v8984_v58, %s7386_s15 }
 0x51d   :  { %3217 = vrot.lane.b32.xlu1 %v8978_v48, %s7385_s14  ;;  %3402 = vrot.lane.b32.xlu0 %v8984_v58, %s7387_s16 }
 0x521   :  { %3320 = vrot.lane.b32.xlu1 %v8978_v48, %s7386_s15  ;;  %3814 = vrot.lane.b32.xlu0 %v8984_v58, %s7391_s20 }
 0x525   :  { %3732 = vrot.lane.b32.xlu1 %v8978_v48, %s12546_s2  ;;  %4064 = vrot.lane.b32.xlu0 %v8984_v58, %s7393_s22 }
 0x529   :  { %3938 = vrot.lane.b32.xlu1 %v8978_v48, %s12548_s9  ;;  %4167 = vrot.lane.b32.xlu0 %v8984_v58, %s7394_s23 }
 0x52d   :  { %4062 = vrot.lane.b32.xlu1 %v8978_v48, %s7393_s22  ;;  %4270 = vrot.lane.b32.xlu0 %v8984_v58, %s7395_s24 }
 0x531   :  { %4165 = vrot.lane.b32.xlu1 %v8978_v48, %s7394_s23  ;;  %4373 = vrot.lane.b32.xlu0 %v8984_v58, %s7396_s25 }
 0x535   :  { %4268 = vrot.lane.b32.xlu1 %v8978_v48, %s7395_s24  ;;  %4476 = vrot.lane.b32.xlu0 %v8984_v58, %s7397_s26 }
 0x537   :  { %v9038_v23 = vpop.permute.xlu1 %3833  ;;  %v9040_v29 = vpop.permute.xlu0 %2803 }
 0x539   :  { %4371 = vrot.lane.b32.xlu1 %v8978_v48, %s7396_s25  ;;  %4579 = vrot.lane.b32.xlu0 %v8984_v58, %s12547_s28 }
 0x53b   :  { %v9048_v19 = vpop.permute.xlu1 %4058  ;;  %v9050_v4 = vpop.permute.xlu0 %2906 }
 0x53d   :  { %4474 = vrot.lane.b32.xlu1 %v8978_v48, %s7397_s26  ;;  %4682 = vrot.lane.b32.xlu0 %v8984_v58, %s12550_s10 }
 0x53f   :  { %v9056_v60 = vpop.permute.xlu1 %4161  ;;  %v9058_v12 = vpop.permute.xlu0 %3009 }
 0x541   :  { %4577 = vrot.lane.b32.xlu1 %v8978_v48, %s12547_s28  ;;  %4785 = vrot.lane.b32.xlu0 %v8984_v58, %s12551_s4 }
 0x543   :  { %v9066_v34 = vpop.permute.xlu1 %4264  ;;  %v9068_v62 = vpop.permute.xlu0 %3112 }
 0x545   :  { %4680 = vrot.lane.b32.xlu1 %v8978_v48, %s12550_s10  ;;  %2807 = vrot.lane.b32.xlu0 %v9064_v6, %s7382_s13 }
 0x547   :  { %v9074_v45 = vpop.permute.xlu1 %4367  ;;  %v9076_v24 = vpop.permute.xlu0 %3215 }
 0x549   :  { %4783 = vrot.lane.b32.xlu1 %v8978_v48, %s12551_s4  ;;  %2910 = vrot.lane.b32.xlu0 %v9064_v6, %s7381_s12 }
 0x54b   :  { %v9082_v54 = vpop.permute.xlu1 %4470  ;;  %v9084_v51 = vpop.permute.xlu0 %3318 }
 0x54d   :  { %3711 = vrot.lane.b32.xlu1 %v8984_v58, %s12546_s2  ;;  %3013 = vrot.lane.b32.xlu0 %v9064_v6, %s7383_s6 }
 0x54f   :  { %v9090_v33 = vpop.permute.xlu1 %4573  ;;  %v9092_v47 = vpop.permute.xlu0 %3936 }
 0x550   :  { %12774 = vst [vmem:[#allocation58_spill] sm:$0xff] %v9090_v33  ;;  %12775 = vst [vmem:[#allocation53_spill] sm:$0xff] %v9092_v47 }
 0x551   :  { %3917 = vrot.lane.b32.xlu1 %v8984_v58, %s12548_s9  ;;  %3116 = vrot.lane.b32.xlu0 %v9064_v6, %s7384_s0 }
 0x553   :  { %v9098_v49 = vpop.permute.xlu1 %4676  ;;  %v9100_v53 = vpop.permute.xlu0 %4060 }
 0x554   :  { %12776 = vst [vmem:[#allocation55_spill] sm:$0xff] %v9098_v49 }
 0x555   :  { %3837 = vrot.lane.b32.xlu1 %v9064_v6, %s7391_s20  ;;  %3219 = vrot.lane.b32.xlu0 %v9064_v6, %s7385_s14 }
 0x557   :  { %v9106_v56 = vpop.permute.xlu1 %4779  ;;  %v9108_v44 = vpop.permute.xlu0 %4163 }
 0x558   :  { %12777 = vst [vmem:[#allocation25_spill] sm:$0xff] %v9106_v56 }
 0x559   :  { %4066 = vrot.lane.b32.xlu1 %v9064_v6, %s7393_s22  ;;  %3322 = vrot.lane.b32.xlu0 %v9064_v6, %s7386_s15 }
 0x55b   :  { %v2776_v0 = vpop.permute.xlu1 %2775  ;;  %v9114_v42 = vpop.permute.xlu0 %4266 }
 0x55c   :  { %v2817_v27 = vsel %vm72_vm2, %v9040_v29, %v2776_v0  ;;  %v2838_v9 = vsel %vm72_vm2, %v2776_v0, %v9040_v29 }
 0x55d   :  { %4169 = vrot.lane.b32.xlu1 %v9064_v6, %s7394_s23  ;;  %3734 = vrot.lane.b32.xlu0 %v9064_v6, %s12546_s2  ;;  %v2857_v40 = vmul.f32 %v9186_v30, %v2838_v9  ;;  %v2858_v16 = vmul.f32 %v9189_v38, %v2817_v27 }
 0x55f   :  { %v9122_v31 = vpop.permute.xlu1 %2885  ;;  %v9124_v26 = vpop.permute.xlu0 %4369 }
 0x561   :  { %4272 = vrot.lane.b32.xlu1 %v9064_v6, %s7395_s24  ;;  %3940 = vrot.lane.b32.xlu0 %v9064_v6, %s12548_s9 }
 0x563   :  { %v9130_v61 = vpop.permute.xlu1 %2988  ;;  %v9132_v22 = vpop.permute.xlu0 %4472 }
 0x565   :  { %4375 = vrot.lane.b32.xlu1 %v9064_v6, %s7396_s25  ;;  %3713 = vrot.lane.b32.xlu0 %v9134_v7, %s12546_s2 }
 0x567   :  { %v9140_v46 = vpop.permute.xlu1 %3091  ;;  %v9142_v35 = vpop.permute.xlu0 %4575 }
 0x568   :  { %12779 = vst [vmem:[#allocation33_spill] sm:$0xff] %v9142_v35 }
 0x569   :  { %4478 = vrot.lane.b32.xlu1 %v9064_v6, %s7397_s26  ;;  %3919 = vrot.lane.b32.xlu0 %v9134_v7, %s12548_s9 }
 0x56b   :  { %v9148_v2 = vpop.permute.xlu1 %3194  ;;  %v9150_v39 = vpop.permute.xlu0 %4678 }
 0x56c   :  { %12780 = vst [vmem:[#allocation86_spill] sm:$0xff] %v9150_v39 }
 0x56d   :  { %4581 = vrot.lane.b32.xlu1 %v9064_v6, %s12547_s28  ;;  %4068 = vrot.lane.b32.xlu0 %v9134_v7, %s7393_s22 }
 0x56f   :  { %v9156_v10 = vpop.permute.xlu1 %3297  ;;  %v9158_v59 = vpop.permute.xlu0 %4781 }
 0x570   :  { %12781 = vst [vmem:[#allocation62_spill] sm:$0xff] %v9158_v59 }
 0x571   :  { %4684 = vrot.lane.b32.xlu1 %v9064_v6, %s12550_s10  ;;  %4171 = vrot.lane.b32.xlu0 %v9134_v7, %s7394_s23 }
 0x573   :  { %v9164_v3 = vpop.permute.xlu1 %3400  ;;  %v9166_v8 = vpop.permute.xlu0 %3835 }
 0x574   :  { %12782 = vst [vmem:[#allocation18_spill] sm:$0xff] %v9164_v3  ;;  %12783 = vst [vmem:[#allocation26_spill] sm:$0xff] %v9166_v8 }
 0x575   :  { %4787 = vrot.lane.b32.xlu1 %v9064_v6, %s12551_s4  ;;  %4274 = vrot.lane.b32.xlu0 %v9134_v7, %s7395_s24 }
 0x577   :  { %v9172_v57 = vpop.permute.xlu1 %3812  ;;  %v2778_v32 = vpop.permute.xlu0 %2777 }
 0x579   :  { %2779 = vrot.lane.b32.xlu1 %v9134_v7, %s7382_s13  ;;  %4377 = vrot.lane.b32.xlu0 %v9134_v7, %s7396_s25 }
 0x57b   :  { %v9181_v15 = vpop.permute.xlu1 %3915  ;;  %v9183_v14 = vpop.permute.xlu0 %2887 }
 0x57c   :  { %12784 = vst [vmem:[#allocation35_spill] sm:$0xff] %v9181_v15  ;;  %12785 = vst [vmem:[#allocation15_spill] sm:$0xff] %v9183_v14 }
 0x57d   :  { %2889 = vrot.lane.b32.xlu1 %v9134_v7, %s7381_s12  ;;  %4480 = vrot.lane.b32.xlu0 %v9134_v7, %s7397_s26 }
 0x57f   :  { %v2806_v43 = vpop.permute.xlu1 %2805  ;;  %v9199_v52 = vpop.permute.xlu0 %2990 }
 0x580   :  { %v2818_v25 = vsel %vm72_vm2, %v2806_v43, %v2778_v32  ;;  %v2839_v37 = vsel %vm72_vm2, %v2778_v32, %v2806_v43  ;;  %v12790_v43 = vld [vmem:[#allocation22_spill] sm:$0xff] }
 0x581   :  { %v2859_v17 = vmul.f32 %v9186_v30, %v2839_v37  ;;  %v2860_v11 = vmul.f32 %v9189_v38, %v2818_v25  ;;  %2992 = vrot.lane.b32.xlu1 %v9134_v7, %s7383_s6  ;;  %4583 = vrot.lane.b32.xlu0 %v9134_v7, %s12547_s28  ;;  %v7146_v9 = vadd.f32 %v8905_v36, %v12790_v43 }
 0x583   :  { %v6794_v29 = vpack.c.bf16 %v2859_v17, %v2857_v40  ;;  %v9211_v0 = vpop.permute.xlu1 %2908  ;;  %v9213_v59 = vpop.permute.xlu0 %3093  ;;  %v6792_v32 = vpack.c.bf16 %v2860_v11, %v2858_v16  ;;  %v6557_v37 = vadd.f32 -11.0, %v7146_v9  ;;  %v7147_v40 = vadd.f32 %v8907_v55, %v12790_v43 }
 0x584   :  { %12788 = vst [vmem:[#allocation14_spill] sm:$0xff] %v9211_v0  ;;  %12789 = vst [vmem:[#allocation57_spill] sm:$0xff] %v9213_v59 }
 0x585   :  { %3095 = vrot.lane.b32.xlu1 %v9134_v7, %s7384_s0  ;;  %6793 = vmatprep.subr.bf16.mxu1 %v6792_v32  ;;  %v9235_v16 = vmax.f32 %v6557_v37, 0.0  ;;  %v6558_v17 = vadd.f32 -11.0, %v7147_v40 }
 0x586   :  { %4686 = vrot.lane.b32.xlu0 %v9134_v7, %s12550_s10  ;;  %6795 = vmatpush1.bf16.msra.mxu1 %v6794_v29 }
 0x587   :  { %v9221_v27 = vpop.permute.xlu1 %3011  ;;  %v9223_v25 = vpop.permute.xlu0 %3196  ;;  %v9245_v32 = vmax.f32 %v6558_v17, 0.0 }
 0x589   :  { %3198 = vrot.lane.b32.xlu1 %v9134_v7, %s7385_s14  ;;  %12794 = vst [vmem:[#allocation65_spill] sm:$0xff] %v9245_v32 }
 0x58a   :  { %4789 = vrot.lane.b32.xlu0 %v9134_v7, %s12551_s4 }
 0x58b   :  { %v9231_v11 = vpop.permute.xlu1 %3114  ;;  %v9233_v36 = vpop.permute.xlu0 %3299 }
 0x58c   :  { %12791 = vst [vmem:[#allocation64_spill] sm:$0xff] %v9231_v11  ;;  %12792 = vst [vmem:[#allocation59_spill] sm:$0xff] %v9233_v36 }
 0x58d   :  { %3301 = vrot.lane.b32.xlu1 %v9134_v7, %s7386_s15 }
 0x58e   :  { %3839 = vrot.lane.b32.xlu0 %v9235_v16, %s7391_s20 }
 0x58f   :  { %v9241_v55 = vpop.permute.xlu1 %3217  ;;  %v9243_v29 = vpop.permute.xlu0 %3402 }
 0x590   :  { %12793 = vst [vmem:[#allocation46_spill] sm:$0xff] %v9243_v29 }
 0x591   :  { %3816 = vrot.lane.b32.xlu1 %v9134_v7, %s7391_s20 }
 0x592   :  { %2781 = vrot.lane.b32.xlu0 %v9245_v32, %s7382_s13 }
 0x593   :  { %v9251_v43 = vpop.permute.xlu1 %3320  ;;  %v9253_v9 = vpop.permute.xlu0 %3814 }
 0x594   :  { %12795 = vst [vmem:[#allocation61_spill] sm:$0xff] %v9251_v43  ;;  %12796 = vst [vmem:[#allocation27_spill] sm:$0xff] %v9253_v9 }
 0x595   :  { %2809 = vrot.lane.b32.xlu1 %v9235_v16, %s7382_s13 }
 0x596   :  { %2891 = vrot.lane.b32.xlu0 %v9245_v32, %s7381_s12 }
 0x597   :  { %v9259_v37 = vpop.permute.xlu1 %3732  ;;  %v9261_v40 = vpop.permute.xlu0 %4064 }
 0x598   :  { %12797 = vst [vmem:[#allocation37_spill] sm:$0xff] %v9261_v40 }
 0x599   :  { %2912 = vrot.lane.b32.xlu1 %v9235_v16, %s7381_s12 }
 0x59a   :  { %2994 = vrot.lane.b32.xlu0 %v9245_v32, %s7383_s6 }
 0x59b   :  { %v9267_v17 = vpop.permute.xlu1 %3938  ;;  %v9269_v56 = vpop.permute.xlu0 %4167 }
 0x59c   :  { %12798 = vst [vmem:[#allocation88_spill] sm:$0xff] %v9267_v17  ;;  %12799 = vst [vmem:[#allocation28_spill] sm:$0xff] %v9269_v56 }
 0x59d   :  { %3015 = vrot.lane.b32.xlu1 %v9235_v16, %s7383_s6 }
 0x59e   :  { %3097 = vrot.lane.b32.xlu0 %v9245_v32, %s7384_s0 }
 0x59f   :  { %v9275_v39 = vpop.permute.xlu1 %4062  ;;  %v9277_v49 = vpop.permute.xlu0 %4270 }
 0x5a0   :  { %12800 = vst [vmem:[#allocation39_spill] sm:$0xff] %v9275_v39  ;;  %12801 = vst [vmem:[#allocation89_spill] sm:$0xff] %v9277_v49 }
 0x5a1   :  { %3118 = vrot.lane.b32.xlu1 %v9235_v16, %s7384_s0 }
 0x5a2   :  { %3200 = vrot.lane.b32.xlu0 %v9245_v32, %s7385_s14 }
 0x5a3   :  { %v9283_v3 = vpop.permute.xlu1 %4165  ;;  %v9285_v29 = vpop.permute.xlu0 %4373 }
 0x5a4   :  { %12802 = vst [vmem:[#allocation67_spill] sm:$0xff] %v9283_v3  ;;  %12803 = vst [vmem:[#allocation63_spill] sm:$0xff] %v9285_v29 }
 0x5a5   :  { %3221 = vrot.lane.b32.xlu1 %v9235_v16, %s7385_s14 }
 0x5a6   :  { %3303 = vrot.lane.b32.xlu0 %v9245_v32, %s7386_s15 }
 0x5a7   :  { %v9291_v17 = vpop.permute.xlu1 %4268  ;;  %v9293_v39 = vpop.permute.xlu0 %4476 }
 0x5a8   :  { %12804 = vst [vmem:[#allocation69_spill] sm:$0xff] %v9291_v17  ;;  %12805 = vst [vmem:[#allocation66_spill] sm:$0xff] %v9293_v39 }
 0x5a9   :  { %3324 = vrot.lane.b32.xlu1 %v9235_v16, %s7386_s15 }
 0x5aa   :  { %3818 = vrot.lane.b32.xlu0 %v9245_v32, %s7391_s20 }
 0x5ab   :  { %v9299_v49 = vpop.permute.xlu1 %4371  ;;  %v9301_v40 = vpop.permute.xlu0 %4579 }
 0x5ac   :  { %12806 = vst [vmem:[#allocation29_spill] sm:$0xff] %v9299_v49  ;;  %12807 = vst [vmem:[#allocation41_spill] sm:$0xff] %v9301_v40 }
 0x5ad   :  { %3736 = vrot.lane.b32.xlu1 %v9235_v16, %s12546_s2 }
 0x5ae   :  { %4072 = vrot.lane.b32.xlu0 %v9245_v32, %s7393_s22 }
 0x5af   :  { %v9307_v29 = vpop.permute.xlu1 %4474  ;;  %v9309_v17 = vpop.permute.xlu0 %4682 }
 0x5b0   :  { %12808 = vst [vmem:[#allocation90_spill] sm:$0xff] %v9307_v29  ;;  %12809 = vst [vmem:[#allocation30_spill] sm:$0xff] %v9309_v17 }
 0x5b1   :  { %3942 = vrot.lane.b32.xlu1 %v9235_v16, %s12548_s9 }
 0x5b2   :  { %4175 = vrot.lane.b32.xlu0 %v9245_v32, %s7394_s23 }
 0x5b3   :  { %v9315_v39 = vpop.permute.xlu1 %4577  ;;  %v9317_v49 = vpop.permute.xlu0 %4785 }
 0x5b4   :  { %12810 = vst [vmem:[#allocation43_spill] sm:$0xff] %v9315_v39  ;;  %12811 = vst [vmem:[#allocation91_spill] sm:$0xff] %v9317_v49 }
 0x5b5   :  { %4070 = vrot.lane.b32.xlu1 %v9235_v16, %s7393_s22 }
 0x5b6   :  { %4278 = vrot.lane.b32.xlu0 %v9245_v32, %s7395_s24 }
 0x5b7   :  { %v9323_v40 = vpop.permute.xlu1 %4680  ;;  %v9325_v29 = vpop.permute.xlu0 %2807 }
 0x5b8   :  { %12812 = vst [vmem:[#allocation70_spill] sm:$0xff] %v9323_v40 }
 0x5b9   :  { %4173 = vrot.lane.b32.xlu1 %v9235_v16, %s7394_s23 }
 0x5ba   :  { %4381 = vrot.lane.b32.xlu0 %v9245_v32, %s7396_s25 }
 0x5bb   :  { %v9331_v17 = vpop.permute.xlu1 %4783  ;;  %v9333_v39 = vpop.permute.xlu0 %2910 }
 0x5bc   :  { %12813 = vst [vmem:[#allocation68_spill] sm:$0xff] %v9331_v17  ;;  %12814 = vst [vmem:[#allocation72_spill] sm:$0xff] %v9333_v39  ;;  %v12818_v39 = vld [vmem:[#allocation21_spill] sm:$0xff] }
 0x5bd   :  { %4276 = vrot.lane.b32.xlu1 %v9235_v16, %s7395_s24  ;;  %v7148_v56 = vadd.f32 %v8913_v63, %v12818_v39 }
 0x5be   :  { %4484 = vrot.lane.b32.xlu0 %v9245_v32, %s7397_s26 }
 0x5bf   :  { %v3712_v49 = vpop.permute.xlu1 %3711  ;;  %v9339_v40 = vpop.permute.xlu0 %3013  ;;  %v6559_v43 = vadd.f32 -11.0, %v7148_v56 }
 0x5c0   :  { %12815 = vst [vmem:[#allocation71_spill] sm:$0xff] %v9339_v40  ;;  %v3745_v9 = vsel %vm314_vm11, %v9259_v37, %v3712_v49 }
 0x5c1   :  { %4379 = vrot.lane.b32.xlu1 %v9235_v16, %s7396_s25 }
 0x5c2   :  { %4587 = vrot.lane.b32.xlu0 %v9245_v32, %s12547_s28 }
 0x5c3   :  { %v9345_v3 = vpop.permute.xlu1 %3917  ;;  %v9347_v17 = vpop.permute.xlu0 %3116 }
 0x5c4   :  { %12816 = vst [vmem:[#allocation32_spill] sm:$0xff] %v9345_v3  ;;  %12817 = vst [vmem:[#allocation45_spill] sm:$0xff] %v9347_v17  ;;  %v9367_v3 = vmax.f32 %v6559_v43, 0.0  ;;  %v6573_v43 = vld [vmem:[%s12108_s1 + $0x12] sm:$0x3] }
 0x5c5   :  { %4482 = vrot.lane.b32.xlu1 %v9235_v16, %s7397_s26 }
 0x5c6   :  { %4690 = vrot.lane.b32.xlu0 %v9245_v32, %s12550_s10  ;;  %12823 = vst [vmem:[#allocation74_spill] sm:$0xff] %v9367_v3 }
 0x5c7   :  { %v9355_v40 = vpop.permute.xlu1 %3837  ;;  %v9357_v36 = vpop.permute.xlu0 %3219 }
 0x5c8   :  { %12819 = vst [vmem:[#allocation92_spill] sm:$0xff] %v9355_v40  ;;  %12820 = vst [vmem:[#allocation34_spill] sm:$0xff] %v9357_v36  ;;  %v9392_v40 = vrot.slane %v6573_v43, %v7617_v21 }
 0x5c9   :  { %4585 = vrot.lane.b32.xlu1 %v9235_v16, %s12547_s28 }
 0x5ca   :  { %4793 = vrot.lane.b32.xlu0 %v9245_v32, %s12551_s4  ;;  %12828 = vst [vmem:[#allocation48_spill] sm:$0xff] %v9392_v40  ;;  %v3787_v14 = vmul.f32 %v9392_v40, %v3745_v9 }
 0x5cb   :  { %v9363_v17 = vpop.permute.xlu1 %4066  ;;  %v9365_v63 = vpop.permute.xlu0 %3322 }
 0x5cc   :  { %12821 = vst [vmem:[#allocation47_spill] sm:$0xff] %v9363_v17  ;;  %12822 = vst [vmem:[#allocation93_spill] sm:$0xff] %v9365_v63 }
 0x5cd   :  { %4688 = vrot.lane.b32.xlu1 %v9235_v16, %s12550_s10 }
 0x5ce   :  { %2811 = vrot.lane.b32.xlu0 %v9367_v3, %s7382_s13 }
 0x5cf   :  { %v9373_v36 = vpop.permute.xlu1 %4169  ;;  %v3735_v56 = vpop.permute.xlu0 %3734 }
 0x5d0   :  { %12824 = vst [vmem:[#allocation73_spill] sm:$0xff] %v9373_v36  ;;  %v9389_v36 = vrot.slane %v6573_v43, %v7615_v20 }
 0x5d1   :  { %4791 = vrot.lane.b32.xlu1 %v9235_v16, %s12551_s4 }
 0x5d2   :  { %2914 = vrot.lane.b32.xlu0 %v9367_v3, %s7381_s12  ;;  %12827 = vst [vmem:[#allocation36_spill] sm:$0xff] %v9389_v36 }
 0x5d3   :  { %v9382_v63 = vpop.permute.xlu1 %4272  ;;  %v9384_v17 = vpop.permute.xlu0 %3940 }
 0x5d4   :  { %12825 = vst [vmem:[#allocation75_spill] sm:$0xff] %v9382_v63  ;;  %12826 = vst [vmem:[#allocation76_spill] sm:$0xff] %v9384_v17  ;;  %v3766_v63 = vsel %vm314_vm11, %v3712_v49, %v9259_v37 }
 0x5d5   :  { %3715 = vrot.lane.b32.xlu1 %v9245_v32, %s12546_s2  ;;  %v3786_v43 = vmul.f32 %v9389_v36, %v3766_v63 }
 0x5d6   :  { %3017 = vrot.lane.b32.xlu0 %v9367_v3, %s7383_s6 }
 0x5d7   :  { %v9400_v8 = vpop.permute.xlu1 %4375  ;;  %v3714_v17 = vpop.permute.xlu0 %3713 }
 0x5d8   :  { %12829 = vst [vmem:[#allocation94_spill] sm:$0xff] %v9400_v8  ;;  %v3746_v11 = vsel %vm314_vm11, %v3735_v56, %v3714_v17  ;;  %v3767_v59 = vsel %vm314_vm11, %v3714_v17, %v3735_v56 }
 0x5d9   :  { %3921 = vrot.lane.b32.xlu1 %v9245_v32, %s12548_s9  ;;  %v3788_v0 = vmul.f32 %v9389_v36, %v3767_v59  ;;  %v3789_v47 = vmul.f32 %v9392_v40, %v3746_v11 }
 0x5da   :  { %3120 = vrot.lane.b32.xlu0 %v9367_v3, %s7384_s0 }
 0x5db   :  { %v9412_v49 = vpop.permute.xlu1 %4478  ;;  %v6922_v37 = vpack.c.bf16 %v3788_v0, %v3786_v43  ;;  %v9414_v8 = vpop.permute.xlu0 %3919  ;;  %v6920_v17 = vpack.c.bf16 %v3789_v47, %v3787_v14  ;;  %v7149_v47 = vadd.f32 %v8915_v1, %v12818_v39 }
 0x5dc   :  { %12830 = vst [vmem:[#allocation38_spill] sm:$0xff] %v9412_v49  ;;  %12831 = vst [vmem:[#allocation49_spill] sm:$0xff] %v9414_v8 }
 0x5dd   :  { %3841 = vrot.lane.b32.xlu1 %v9367_v3, %s7391_s20  ;;  %6921 = vmatprep.subr.bf16.mxu0 %v6920_v17  ;;  %v6560_v63 = vadd.f32 -11.0, %v7149_v47 }
 0x5de   :  { %3223 = vrot.lane.b32.xlu0 %v9367_v3, %s7385_s14  ;;  %6923 = vmatpush1.bf16.msra.mxu0 %v6922_v37 }
 0x5df   :  { %v9420_v59 = vpop.permute.xlu1 %4581  ;;  %v9422_v11 = vpop.permute.xlu0 %4068  ;;  %v9446_v39 = vmax.f32 %v6560_v63, 0.0 }
 0x5e0   :  { %12832 = vst [vmem:[#allocation95_spill] sm:$0xff] %v9420_v59  ;;  %12833 = vst [vmem:[#allocation77_spill] sm:$0xff] %v9422_v11 }
 0x5e1   :  { %4074 = vrot.lane.b32.xlu1 %v9367_v3, %s7393_s22  ;;  %12838 = vst [vmem:[#allocation50_spill] sm:$0xff] %v9446_v39 }
 0x5e2   :  { %3326 = vrot.lane.b32.xlu0 %v9367_v3, %s7386_s15 }
 0x5e3   :  { %v9428_v0 = vpop.permute.xlu1 %4684  ;;  %v9432_v14 = vpop.permute.xlu0 %4171 }
 0x5e4   :  { %12834 = vst [vmem:[#allocation78_spill] sm:$0xff] %v9428_v0  ;;  %12835 = vst [vmem:[#allocation79_spill] sm:$0xff] %v9432_v14 }
 0x5e5   :  { %4177 = vrot.lane.b32.xlu1 %v9367_v3, %s7394_s23 }
 0x5e6   :  { %3738 = vrot.lane.b32.xlu0 %v9367_v3, %s12546_s2 }
 0x5e7   :  { %v9438_v9 = vpop.permute.xlu1 %4787  ;;  %v9440_v56 = vpop.permute.xlu0 %4274 }
 0x5e8   :  { %12836 = vst [vmem:[#allocation81_spill] sm:$0xff] %v9438_v9  ;;  %12837 = vst [vmem:[#allocation40_spill] sm:$0xff] %v9440_v56 }
 0x5e9   :  { %4280 = vrot.lane.b32.xlu1 %v9367_v3, %s7395_s24 }
 0x5ea   :  { %3944 = vrot.lane.b32.xlu0 %v9367_v3, %s12548_s9 }
 0x5eb   :  { %v2780_v1 = vpop.permute.xlu1 %2779  ;;  %v9448_v43 = vpop.permute.xlu0 %4377 }
 0x5ec   :  { %12839 = vst [vmem:[#allocation96_spill] sm:$0xff] %v9448_v43 }
 0x5ed   :  { %4383 = vrot.lane.b32.xlu1 %v9367_v3, %s7396_s25 }
 0x5ee   :  { %3717 = vrot.lane.b32.xlu0 %v9446_v39, %s12546_s2 }
 0x5ef   :  { %v9454_v37 = vpop.permute.xlu1 %2889  ;;  %v9456_v17 = vpop.permute.xlu0 %4480 }
 0x5f0   :  { %12840 = vst [vmem:[#allocation42_spill] sm:$0xff] %v9454_v37  ;;  %12841 = vst [vmem:[#allocation51_spill] sm:$0xff] %v9456_v17 }
 0x5f1   :  { %4486 = vrot.lane.b32.xlu1 %v9367_v3, %s7397_s26 }
 0x5f2   :  { %3923 = vrot.lane.b32.xlu0 %v9446_v39, %s12548_s9 }
 0x5f3   :  { %v9462_v47 = vpop.permute.xlu1 %2992  ;;  %v9464_v63 = vpop.permute.xlu0 %4583 }
 0x5f4   :  { %12842 = vst [vmem:[#allocation97_spill] sm:$0xff] %v9462_v47  ;;  %12843 = vst [vmem:[#allocation80_spill] sm:$0xff] %v9464_v63 }
 0x5f5   :  { %4589 = vrot.lane.b32.xlu1 %v9367_v3, %s12547_s28 }
 0x5f6   :  { %4076 = vrot.lane.b32.xlu0 %v9446_v39, %s7393_s22 }
 0x5f7   :  { %v9470_v9 = vpop.permute.xlu1 %3095 }
 0x5f8   :  { %12844 = vst [vmem:[#allocation83_spill] sm:$0xff] %v9470_v9  ;;  %v9472_v0 = vpop.permute.xlu0 %4686 }
 0x5f9   :  { %12845 = vst [vmem:[#allocation82_spill] sm:$0xff] %v9472_v0  ;;  %4692 = vrot.lane.b32.xlu1 %v9367_v3, %s12550_s10 }
 0x5fa   :  { %4179 = vrot.lane.b32.xlu0 %v9446_v39, %s7394_s23 }
 0x5fb   :  { %v9478_v59 = vpop.permute.xlu1 %3198 }
 0x5fc   :  { %12846 = vst [vmem:[#allocation84_spill] sm:$0xff] %v9478_v59  ;;  %v9480_v49 = vpop.permute.xlu0 %4789 }
 0x5fd   :  { %12847 = vst [vmem:[#allocation44_spill] sm:$0xff] %v9480_v49  ;;  %4795 = vrot.lane.b32.xlu1 %v9367_v3, %s12551_s4  ;;  %v2819_v49 = vsel %vm72_vm2, %v9325_v29, %v2780_v1 }
 0x5fe   :  { %4282 = vrot.lane.b32.xlu0 %v9446_v39, %s7395_s24  ;;  %v2862_v11 = vmul.f32 %v9189_v38, %v2819_v49 }
 0x5ff   :  { %v9486_v63 = vpop.permute.xlu1 %3301 }
 0x600   :  { %12848 = vst [vmem:[#allocation52_spill] sm:$0xff] %v9486_v63  ;;  %v9488_v17 = vpop.permute.xlu0 %3839  ;;  %v2840_v63 = vsel %vm72_vm2, %v2780_v1, %v9325_v29 }
 0x601   :  { %12849 = vst [vmem:[#allocation98_spill] sm:$0xff] %v9488_v17  ;;  %2783 = vrot.lane.b32.xlu1 %v9446_v39, %s7382_s13  ;;  %v2861_v56 = vmul.f32 %v9186_v30, %v2840_v63 }
 0x602   :  { %4385 = vrot.lane.b32.xlu0 %v9446_v39, %s7396_s25 }
 0x603   :  { %v9494_v0 = vpop.permute.xlu1 %3816 }
 0x604   :  { %12850 = vst [vmem:[#allocation17_spill] sm:$0xff] %v9494_v0  ;;  %v2782_v43 = vpop.permute.xlu0 %2781 }
 0x605   :  { %2893 = vrot.lane.b32.xlu1 %v9446_v39, %s7381_s12 }
 0x606   :  { %4488 = vrot.lane.b32.xlu0 %v9446_v39, %s7397_s26 }
 0x607   :  { %v2810_v59 = vpop.permute.xlu1 %2809 }
 0x608   :  { %v2820_v47 = vsel %vm72_vm2, %v2810_v59, %v2782_v43  ;;  %v2841_v14 = vsel %vm72_vm2, %v2782_v43, %v2810_v59  ;;  %v9506_v9 = vpop.permute.xlu0 %2891  ;;  %v12853_v43 = vld [vmem:[#allocation24_spill] sm:$0xff] }
 0x609   :  { %12851 = vst [vmem:[#allocation20_spill] sm:$0xff] %v9506_v9  ;;  %v2863_v8 = vmul.f32 %v9186_v30, %v2841_v14  ;;  %v2864_v37 = vmul.f32 %v9189_v38, %v2820_v47  ;;  %2996 = vrot.lane.b32.xlu1 %v9446_v39, %s7383_s6  ;;  %v7150_v9 = vadd.f32 %v8921_v5, %v12853_v43 }
 0x60a   :  { %4591 = vrot.lane.b32.xlu0 %v9446_v39, %s12547_s28 }
 0x60b   :  { %v6798_v29 = vpack.c.bf16 %v2863_v8, %v2861_v56  ;;  %v9516_v1 = vpop.permute.xlu1 %2912  ;;  %v6796_v59 = vpack.c.bf16 %v2864_v37, %v2862_v11  ;;  %v6561_v14 = vadd.f32 -11.0, %v7150_v9  ;;  %v7151_v8 = vadd.f32 %v8923_v41, %v12853_v43 }
 0x60c   :  { %12852 = vst [vmem:[#allocation19_spill] sm:$0xff] %v9516_v1  ;;  %v9520_v63 = vpop.permute.xlu0 %2994 }
 0x60d   :  { %12854 = vst [vmem:[#allocation22_spill] sm:$0xff] %v9520_v63  ;;  %3099 = vrot.lane.b32.xlu1 %v9446_v39, %s7384_s0  ;;  %6797 = vmatprep.subr.bf16.mxu1 %v6796_v59  ;;  %v9538_v56 = vmax.f32 %v6561_v14, 0.0  ;;  %v6562_v37 = vadd.f32 -11.0, %v7151_v8 }
 0x60e   :  { %4694 = vrot.lane.b32.xlu0 %v9446_v39, %s12550_s10  ;;  %6799 = vmatpush1.bf16.msra.mxu1 %v6798_v29 }
 0x60f   :  { %v9526_v49 = vpop.permute.xlu1 %3015  ;;  %12858 = vst [vmem:[#allocation101_spill] sm:$0xff] %v9538_v56  ;;  %v9548_v9 = vmax.f32 %v6562_v37, 0.0 }
 0x610   :  { %12855 = vst [vmem:[#allocation21_spill] sm:$0xff] %v9526_v49  ;;  %v9530_v11 = vpop.permute.xlu0 %3097 }
 0x611   :  { %12856 = vst [vmem:[#allocation24_spill] sm:$0xff] %v9530_v11  ;;  %3202 = vrot.lane.b32.xlu1 %v9446_v39, %s7385_s14  ;;  %12861 = vst [vmem:[#allocation104_spill] sm:$0xff] %v9548_v9 }
 0x612   :  { %4797 = vrot.lane.b32.xlu0 %v9446_v39, %s12551_s4 }
 0x613   :  { %v9536_v5 = vpop.permute.xlu1 %3118 }
 0x614   :  { %12857 = vst [vmem:[#allocation100_spill] sm:$0xff] %v9536_v5  ;;  %v9540_v47 = vpop.permute.xlu0 %3200 }
 0x615   :  { %12859 = vst [vmem:[#allocation102_spill] sm:$0xff] %v9540_v47  ;;  %3305 = vrot.lane.b32.xlu1 %v9446_v39, %s7386_s15 }
 0x616   :  { %3843 = vrot.lane.b32.xlu0 %v9538_v56, %s7391_s20 }
 0x617   :  { %v9546_v41 = vpop.permute.xlu1 %3221 }
 0x618   :  { %12860 = vst [vmem:[#allocation103_spill] sm:$0xff] %v9546_v41  ;;  %v9550_v29 = vpop.permute.xlu0 %3303 }
 0x619   :  { %12862 = vst [vmem:[#allocation105_spill] sm:$0xff] %v9550_v29  ;;  %3820 = vrot.lane.b32.xlu1 %v9446_v39, %s7391_s20 }
 0x61a   :  { %2785 = vrot.lane.b32.xlu0 %v9548_v9, %s7382_s13 }
 0x61b   :  { %v9556_v59 = vpop.permute.xlu1 %3324 }
 0x61c   :  { %12863 = vst [vmem:[#allocation106_spill] sm:$0xff] %v9556_v59  ;;  %v9558_v43 = vpop.permute.xlu0 %3818 }
 0x61d   :  { %12864 = vst [vmem:[#allocation107_spill] sm:$0xff] %v9558_v43  ;;  %2813 = vrot.lane.b32.xlu1 %v9538_v56, %s7382_s13 }
 0x61e   :  { %2895 = vrot.lane.b32.xlu0 %v9548_v9, %s7381_s12 }
 0x61f   :  { %v9564_v14 = vpop.permute.xlu1 %3736 }
 0x620   :  { %v9566_v8 = vpop.permute.xlu0 %4072 }
 0x621   :  { %12865 = vst [vmem:[#allocation108_spill] sm:$0xff] %v9566_v8  ;;  %2916 = vrot.lane.b32.xlu1 %v9538_v56, %s7381_s12 }
 0x622   :  { %2998 = vrot.lane.b32.xlu0 %v9548_v9, %s7383_s6 }
 0x623   :  { %v9572_v37 = vpop.permute.xlu1 %3942 }
 0x624   :  { %12866 = vst [vmem:[#allocation109_spill] sm:$0xff] %v9572_v37  ;;  %v9574_v29 = vpop.permute.xlu0 %4175 }
 0x625   :  { %12867 = vst [vmem:[#allocation110_spill] sm:$0xff] %v9574_v29  ;;  %3019 = vrot.lane.b32.xlu1 %v9538_v56, %s7383_s6 }
 0x626   :  { %3101 = vrot.lane.b32.xlu0 %v9548_v9, %s7384_s0 }
 0x627   :  { %v9580_v59 = vpop.permute.xlu1 %4070 }
 0x628   :  { %12868 = vst [vmem:[#allocation111_spill] sm:$0xff] %v9580_v59  ;;  %v9582_v47 = vpop.permute.xlu0 %4278 }
 0x629   :  { %12869 = vst [vmem:[#allocation112_spill] sm:$0xff] %v9582_v47  ;;  %3122 = vrot.lane.b32.xlu1 %v9538_v56, %s7384_s0 }
 0x62a   :  { %3204 = vrot.lane.b32.xlu0 %v9548_v9, %s7385_s14 }
 0x62b   :  { %v9588_v8 = vpop.permute.xlu1 %4173 }
 0x62c   :  { %12870 = vst [vmem:[#allocation113_spill] sm:$0xff] %v9588_v8  ;;  %v9590_v41 = vpop.permute.xlu0 %4381 }
 0x62d   :  { %12871 = vst [vmem:[#allocation114_spill] sm:$0xff] %v9590_v41  ;;  %3225 = vrot.lane.b32.xlu1 %v9538_v56, %s7385_s14 }
 0x62e   :  { %3307 = vrot.lane.b32.xlu0 %v9548_v9, %s7386_s15 }
 0x62f   :  { %v9596_v29 = vpop.permute.xlu1 %4276 }
 0x630   :  { %12872 = vst [vmem:[#allocation115_spill] sm:$0xff] %v9596_v29  ;;  %v9598_v59 = vpop.permute.xlu0 %4484 }
 0x631   :  { %12873 = vst [vmem:[#allocation116_spill] sm:$0xff] %v9598_v59  ;;  %3328 = vrot.lane.b32.xlu1 %v9538_v56, %s7386_s15 }
 0x632   :  { %3822 = vrot.lane.b32.xlu0 %v9548_v9, %s7391_s20 }
 0x633   :  { %v9604_v47 = vpop.permute.xlu1 %4379 }
 0x634   :  { %12874 = vst [vmem:[#allocation117_spill] sm:$0xff] %v9604_v47  ;;  %v9606_v8 = vpop.permute.xlu0 %4587 }
 0x635   :  { %12875 = vst [vmem:[#allocation118_spill] sm:$0xff] %v9606_v8  ;;  %3740 = vrot.lane.b32.xlu1 %v9538_v56, %s12546_s2 }
 0x636   :  { %4080 = vrot.lane.b32.xlu0 %v9548_v9, %s7393_s22 }
 0x637   :  { %v9612_v41 = vpop.permute.xlu1 %4482 }
 0x638   :  { %12876 = vst [vmem:[#allocation119_spill] sm:$0xff] %v9612_v41  ;;  %v9614_v29 = vpop.permute.xlu0 %4690 }
 0x639   :  { %12877 = vst [vmem:[#allocation120_spill] sm:$0xff] %v9614_v29  ;;  %3946 = vrot.lane.b32.xlu1 %v9538_v56, %s12548_s9 }
 0x63a   :  { %4183 = vrot.lane.b32.xlu0 %v9548_v9, %s7394_s23 }
 0x63b   :  { %v9620_v59 = vpop.permute.xlu1 %4585 }
 0x63c   :  { %12878 = vst [vmem:[#allocation121_spill] sm:$0xff] %v9620_v59  ;;  %v9622_v47 = vpop.permute.xlu0 %4793 }
 0x63d   :  { %12879 = vst [vmem:[#allocation122_spill] sm:$0xff] %v9622_v47  ;;  %4078 = vrot.lane.b32.xlu1 %v9538_v56, %s7393_s22 }
 0x63e   :  { %4286 = vrot.lane.b32.xlu0 %v9548_v9, %s7395_s24 }
 0x63f   :  { %v9628_v8 = vpop.permute.xlu1 %4688 }
 0x640   :  { %12880 = vst [vmem:[#allocation123_spill] sm:$0xff] %v9628_v8  ;;  %v9630_v41 = vpop.permute.xlu0 %2811 }
 0x641   :  { %4181 = vrot.lane.b32.xlu1 %v9538_v56, %s7394_s23 }
 0x642   :  { %4389 = vrot.lane.b32.xlu0 %v9548_v9, %s7396_s25 }
 0x643   :  { %v9636_v29 = vpop.permute.xlu1 %4791 }
 0x644   :  { %12881 = vst [vmem:[#allocation124_spill] sm:$0xff] %v9636_v29  ;;  %v9638_v59 = vpop.permute.xlu0 %2914  ;;  %v12885_v29 = vld [vmem:[#allocation23_spill] sm:$0xff] }
 0x645   :  { %12882 = vst [vmem:[#allocation125_spill] sm:$0xff] %v9638_v59  ;;  %4284 = vrot.lane.b32.xlu1 %v9538_v56, %s7395_s24  ;;  %v7152_v5 = vadd.f32 %v8929_v13, %v12885_v29 }
 0x646   :  { %4492 = vrot.lane.b32.xlu0 %v9548_v9, %s7397_s26 }
 0x647   :  { %v3716_v47 = vpop.permute.xlu1 %3715  ;;  %v6563_v49 = vadd.f32 -11.0, %v7152_v5 }
 0x648   :  { %v9644_v8 = vpop.permute.xlu0 %3017 }
 0x649   :  { %12883 = vst [vmem:[#allocation126_spill] sm:$0xff] %v9644_v8  ;;  %4387 = vrot.lane.b32.xlu1 %v9538_v56, %s7396_s25 }
 0x64a   :  { %4595 = vrot.lane.b32.xlu0 %v9548_v9, %s12547_s28 }
 0x64b   :  { %v9650_v11 = vpop.permute.xlu1 %3921 }
 0x64c   :  { %12884 = vst [vmem:[#allocation127_spill] sm:$0xff] %v9650_v11  ;;  %v9654_v37 = vpop.permute.xlu0 %3120 }
 0x64d   :  { %12886 = vst [vmem:[#allocation23_spill] sm:$0xff] %v9654_v37  ;;  %4490 = vrot.lane.b32.xlu1 %v9538_v56, %s7397_s26  ;;  %v9670_v37 = vmax.f32 %v6563_v49, 0.0 }
 0x64e   :  { %4698 = vrot.lane.b32.xlu0 %v9548_v9, %s12550_s10 }
 0x64f   :  { %v9660_v8 = vpop.permute.xlu1 %3841  ;;  %12890 = vst [vmem:[#allocation131_spill] sm:$0xff] %v9670_v37 }
 0x650   :  { %12887 = vst [vmem:[#allocation128_spill] sm:$0xff] %v9660_v8  ;;  %v9662_v63 = vpop.permute.xlu0 %3223 }
 0x651   :  { %12888 = vst [vmem:[#allocation129_spill] sm:$0xff] %v9662_v63  ;;  %4593 = vrot.lane.b32.xlu1 %v9538_v56, %s12547_s28 }
 0x652   :  { %4801 = vrot.lane.b32.xlu0 %v9548_v9, %s12551_s4 }
 0x653   :  { %v9668_v13 = vpop.permute.xlu1 %4074 }
 0x654   :  { %12889 = vst [vmem:[#allocation130_spill] sm:$0xff] %v9668_v13  ;;  %v9672_v11 = vpop.permute.xlu0 %3326 }
 0x655   :  { %12891 = vst [vmem:[#allocation132_spill] sm:$0xff] %v9672_v11  ;;  %4696 = vrot.lane.b32.xlu1 %v9538_v56, %s12550_s10  ;;  %v3768_v11 = vsel %vm314_vm11, %v3716_v47, %v9564_v14 }
 0x656   :  { %2815 = vrot.lane.b32.xlu0 %v9670_v37, %s7382_s13 }
 0x657   :  { %v9678_v5 = vpop.permute.xlu1 %4177 }
 0x658   :  { %12892 = vst [vmem:[#allocation133_spill] sm:$0xff] %v9678_v5  ;;  %v3739_v63 = vpop.permute.xlu0 %3738  ;;  %v3747_v5 = vsel %vm314_vm11, %v9564_v14, %v3716_v47 }
 0x659   :  { %4799 = vrot.lane.b32.xlu1 %v9538_v56, %s12551_s4  ;;  %v3791_v0 = vmul.f32 %v9392_v40, %v3747_v5 }
 0x65a   :  { %2918 = vrot.lane.b32.xlu0 %v9670_v37, %s7381_s12 }
 0x65b   :  { %v9684_v13 = vpop.permute.xlu1 %4280 }
 0x65c   :  { %12893 = vst [vmem:[#allocation134_spill] sm:$0xff] %v9684_v13  ;;  %v9686_v49 = vpop.permute.xlu0 %3944 }
 0x65d   :  { %12894 = vst [vmem:[#allocation135_spill] sm:$0xff] %v9686_v49  ;;  %3719 = vrot.lane.b32.xlu1 %v9548_v9, %s12546_s2  ;;  %v3790_v49 = vmul.f32 %v9389_v36, %v3768_v11 }
 0x65e   :  { %3021 = vrot.lane.b32.xlu0 %v9670_v37, %s7383_s6 }
 0x65f   :  { %v9696_v1 = vpop.permute.xlu1 %4383 }
 0x660   :  { %12895 = vst [vmem:[#allocation136_spill] sm:$0xff] %v9696_v1  ;;  %v3718_v59 = vpop.permute.xlu0 %3717 }
 0x661   :  { %v3748_v8 = vsel %vm314_vm11, %v3739_v63, %v3718_v59  ;;  %v3769_v13 = vsel %vm314_vm11, %v3718_v59, %v3739_v63  ;;  %3925 = vrot.lane.b32.xlu1 %v9548_v9, %s12548_s9 }
 0x662   :  { %v3792_v17 = vmul.f32 %v9389_v36, %v3769_v13  ;;  %v3793_v43 = vmul.f32 %v9392_v40, %v3748_v8  ;;  %3124 = vrot.lane.b32.xlu0 %v9670_v37, %s7384_s0  ;;  %v7153_v8 = vadd.f32 %v8932_v18, %v12885_v29  ;;  %v6580_v36 = vld [vmem:[%s12108_s1 + $0x20] sm:$0x3] }
 0x663   :  { %v9708_v47 = vpop.permute.xlu1 %4486 }
 0x664   :  { %12896 = vst [vmem:[#allocation137_spill] sm:$0xff] %v9708_v47  ;;  %v6926_v14 = vpack.c.bf16 %v3792_v17, %v3790_v49  ;;  %v9710_v1 = vpop.permute.xlu0 %3923  ;;  %v6924_v63 = vpack.c.bf16 %v3793_v43, %v3791_v0  ;;  %v6564_v49 = vadd.f32 -11.0, %v7153_v8 }
 0x665   :  { %12897 = vst [vmem:[#allocation138_spill] sm:$0xff] %v9710_v1  ;;  %4082 = vrot.lane.b32.xlu1 %v9670_v37, %s7393_s22 }
 0x666   :  { %3227 = vrot.lane.b32.xlu0 %v9670_v37, %s7385_s14  ;;  %6925 = vmatprep.subr.bf16.mxu0 %v6924_v63  ;;  %v9750_v18 = vmax.f32 %v6564_v49, 0.0 }
 0x667   :  { %6927 = vmatpush1.bf16.msra.mxu0 %v6926_v14  ;;  %v9716_v11 = vpop.permute.xlu1 %4589 }
 0x668   :  { %12898 = vst [vmem:[#allocation139_spill] sm:$0xff] %v9716_v11  ;;  %v9718_v59 = vpop.permute.xlu0 %4076  ;;  %12906 = vst [vmem:[#allocation147_spill] sm:$0xff] %v9750_v18 }
 0x669   :  { %12899 = vst [vmem:[#allocation140_spill] sm:$0xff] %v9718_v59  ;;  %4185 = vrot.lane.b32.xlu1 %v9670_v37, %s7394_s23 }
 0x66a   :  { %3330 = vrot.lane.b32.xlu0 %v9670_v37, %s7386_s15 }
 0x66b   :  { %v9724_v17 = vpop.permute.xlu1 %4692 }
 0x66c   :  { %12900 = vst [vmem:[#allocation141_spill] sm:$0xff] %v9724_v17  ;;  %v9726_v0 = vpop.permute.xlu0 %4179 }
 0x66d   :  { %12901 = vst [vmem:[#allocation142_spill] sm:$0xff] %v9726_v0  ;;  %4288 = vrot.lane.b32.xlu1 %v9670_v37, %s7395_s24 }
 0x66e   :  { %3742 = vrot.lane.b32.xlu0 %v9670_v37, %s12546_s2 }
 0x66f   :  { %v9732_v43 = vpop.permute.xlu1 %4795 }
 0x670   :  { %12902 = vst [vmem:[#allocation143_spill] sm:$0xff] %v9732_v43  ;;  %v9736_v13 = vpop.permute.xlu0 %4282 }
 0x671   :  { %12903 = vst [vmem:[#allocation144_spill] sm:$0xff] %v9736_v13  ;;  %4391 = vrot.lane.b32.xlu1 %v9670_v37, %s7396_s25 }
 0x672   :  { %3845 = vrot.lane.b32.xlu0 %v9670_v37, %s7391_s20 }
 0x673   :  { %v2784_v5 = vpop.permute.xlu1 %2783 }
 0x674   :  { %v9742_v14 = vpop.permute.xlu0 %4385  ;;  %v2842_v13 = vsel %vm72_vm2, %v2784_v5, %v9630_v41 }
 0x675   :  { %12904 = vst [vmem:[#allocation145_spill] sm:$0xff] %v9742_v14  ;;  %4494 = vrot.lane.b32.xlu1 %v9670_v37, %s7397_s26 }
 0x676   :  { %3948 = vrot.lane.b32.xlu0 %v9670_v37, %s12548_s9 }
 0x677   :  { %v9748_v63 = vpop.permute.xlu1 %2893 }
 0x678   :  { %12905 = vst [vmem:[#allocation146_spill] sm:$0xff] %v9748_v63  ;;  %v9752_v29 = vpop.permute.xlu0 %4488 }
 0x679   :  { %12907 = vst [vmem:[#allocation148_spill] sm:$0xff] %v9752_v29  ;;  %4597 = vrot.lane.b32.xlu1 %v9670_v37, %s12547_s28 }
 0x67a   :  { %3721 = vrot.lane.b32.xlu0 %v9750_v18, %s12546_s2 }
 0x67b   :  { %v9758_v8 = vpop.permute.xlu1 %2996 }
 0x67c   :  { %12908 = vst [vmem:[#allocation149_spill] sm:$0xff] %v9758_v8  ;;  %v9760_v43 = vpop.permute.xlu0 %4591 }
 0x67d   :  { %12909 = vst [vmem:[#allocation150_spill] sm:$0xff] %v9760_v43  ;;  %4700 = vrot.lane.b32.xlu1 %v9670_v37, %s12550_s10 }
 0x67e   :  { %4884 = vrot.lane.b32.xlu0 %v8942_v50, %s12552_s5 }
 0x67f   :  { %v9766_v49 = vpop.permute.xlu1 %3099 }
 0x680   :  { %12910 = vst [vmem:[#allocation151_spill] sm:$0xff] %v9766_v49  ;;  %v9768_v17 = vpop.permute.xlu0 %4694  ;;  %v2865_v49 = vmul.f32 %v9186_v30, %v2842_v13 }
 0x681   :  { %12911 = vst [vmem:[#allocation152_spill] sm:$0xff] %v9768_v17  ;;  %4803 = vrot.lane.b32.xlu1 %v9670_v37, %s12551_s4 }
 0x682   :  { %4888 = vrot.lane.b32.xlu0 %v8984_v58, %s12552_s5 }
 0x683   :  { %v9774_v11 = vpop.permute.xlu1 %3202 }
 0x684   :  { %12912 = vst [vmem:[#allocation153_spill] sm:$0xff] %v9774_v11  ;;  %v9776_v47 = vpop.permute.xlu0 %4797 }
 0x685   :  { %12913 = vst [vmem:[#allocation154_spill] sm:$0xff] %v9776_v47  ;;  %2787 = vrot.lane.b32.xlu1 %v9750_v18, %s7382_s13  ;;  %v2821_v47 = vsel %vm72_vm2, %v9630_v41, %v2784_v5 }
 0x686   :  { %4892 = vrot.lane.b32.xlu0 %v9134_v7, %s12552_s5  ;;  %v2866_v1 = vmul.f32 %v9189_v38, %v2821_v47 }
 0x687   :  { %v9782_v43 = vpop.permute.xlu1 %3305 }
 0x688   :  { %12914 = vst [vmem:[#allocation155_spill] sm:$0xff] %v9782_v43  ;;  %v9784_v29 = vpop.permute.xlu0 %3843 }
 0x689   :  { %12915 = vst [vmem:[#allocation156_spill] sm:$0xff] %v9784_v29  ;;  %2897 = vrot.lane.b32.xlu1 %v9750_v18, %s7381_s12 }
 0x68a   :  { %4896 = vrot.lane.b32.xlu0 %v9245_v32, %s12552_s5 }
 0x68b   :  { %v9790_v17 = vpop.permute.xlu1 %3820 }
 0x68c   :  { %12916 = vst [vmem:[#allocation157_spill] sm:$0xff] %v9790_v17  ;;  %v2786_v14 = vpop.permute.xlu0 %2785 }
 0x68d   :  { %3000 = vrot.lane.b32.xlu1 %v9750_v18, %s7383_s6 }
 0x68e   :  { %4900 = vrot.lane.b32.xlu0 %v9446_v39, %s12552_s5 }
 0x68f   :  { %v2814_v0 = vpop.permute.xlu1 %2813 }
 0x690   :  { %v2822_v43 = vsel %vm72_vm2, %v2814_v0, %v2786_v14  ;;  %v2843_v11 = vsel %vm72_vm2, %v2786_v14, %v2814_v0  ;;  %v9802_v59 = vpop.permute.xlu0 %2895 }
 0x691   :  { %12917 = vst [vmem:[#allocation158_spill] sm:$0xff] %v9802_v59  ;;  %v2867_v8 = vmul.f32 %v9186_v30, %v2843_v11  ;;  %v2868_v63 = vmul.f32 %v9189_v38, %v2822_v43  ;;  %3103 = vrot.lane.b32.xlu1 %v9750_v18, %s7384_s0  ;;  %v6578_v59 = vld [vmem:[%s12108_s1 + $0x1c] sm:$0x3] }
 0x692   :  { %3423 = vrot.lane.b32.xlu0 %v8978_v48, %s7387_s16 }
 0x693   :  { %v6802_v41 = vpack.c.bf16 %v2867_v8, %v2865_v49  ;;  %v9812_v5 = vpop.permute.xlu1 %2916  ;;  %v6800_v0 = vpack.c.bf16 %v2868_v63, %v2866_v1 }
 0x694   :  { %12918 = vst [vmem:[#allocation159_spill] sm:$0xff] %v9812_v5  ;;  %v9814_v14 = vpop.permute.xlu0 %2998  ;;  %v6577_v5 = vld [vmem:[%s12108_s1 + $0x1a] sm:$0x3] }
 0x695   :  { %12919 = vst [vmem:[#allocation160_spill] sm:$0xff] %v9814_v14  ;;  %3206 = vrot.lane.b32.xlu1 %v9750_v18, %s7385_s14  ;;  %6801 = vmatprep.subr.bf16.mxu1 %v6800_v0  ;;  %v9993_v17 = vrot.slane %v6577_v5, %v7617_v21 }
 0x696   :  { %4904 = vrot.lane.b32.xlu0 %v9548_v9, %s12552_s5  ;;  %6803 = vmatpush1.bf16.msra.mxu1 %v6802_v41 }
 0x697   :  { %v9820_v47 = vpop.permute.xlu1 %3019  ;;  %12962 = vst [vmem:[#allocation203_spill] sm:$0xff] %v9993_v17 }
 0x698   :  { %12920 = vst [vmem:[#allocation161_spill] sm:$0xff] %v9820_v47  ;;  %v9822_v11 = vpop.permute.xlu0 %3101 }
 0x699   :  { %12921 = vst [vmem:[#allocation162_spill] sm:$0xff] %v9822_v11  ;;  %3309 = vrot.lane.b32.xlu1 %v9750_v18, %s7386_s15 }
 0x69a   :  { %3406 = vrot.lane.b32.xlu0 %v9245_v32, %s7387_s16 }
 0x69b   :  { %v9828_v1 = vpop.permute.xlu1 %3122 }
 0x69c   :  { %12922 = vst [vmem:[#allocation163_spill] sm:$0xff] %v9828_v1  ;;  %v9830_v43 = vpop.permute.xlu0 %3204 }
 0x69d   :  { %12923 = vst [vmem:[#allocation164_spill] sm:$0xff] %v9830_v43  ;;  %3824 = vrot.lane.b32.xlu1 %v9750_v18, %s7391_s20 }
 0x69e   :  { %3427 = vrot.lane.b32.xlu0 %v9235_v16, %s7387_s16 }
 0x69f   :  { %v9836_v13 = vpop.permute.xlu1 %3225 }
 0x6a0   :  { %12924 = vst [vmem:[#allocation165_spill] sm:$0xff] %v9836_v13  ;;  %v9838_v63 = vpop.permute.xlu0 %3307 }
 0x6a1   :  { %12925 = vst [vmem:[#allocation166_spill] sm:$0xff] %v9838_v63  ;;  %4882 = vrot.lane.b32.xlu1 %v8891_v28, %s12552_s5 }
 0x6a2   :  { %4987 = vrot.lane.b32.xlu0 %v8942_v50, %s12553_s30 }
 0x6a3   :  { %v9844_v8 = vpop.permute.xlu1 %3328 }
 0x6a4   :  { %12926 = vst [vmem:[#allocation167_spill] sm:$0xff] %v9844_v8  ;;  %v9846_v49 = vpop.permute.xlu0 %3822 }
 0x6a5   :  { %12927 = vst [vmem:[#allocation168_spill] sm:$0xff] %v9846_v49  ;;  %4886 = vrot.lane.b32.xlu1 %v8978_v48, %s12552_s5 }
 0x6a6   :  { %3927 = vrot.lane.b32.xlu0 %v9750_v18, %s12548_s9 }
 0x6a7   :  { %v9852_v41 = vpop.permute.xlu1 %3740 }
 0x6a8   :  { %12928 = vst [vmem:[#allocation169_spill] sm:$0xff] %v9852_v41  ;;  %v9854_v0 = vpop.permute.xlu0 %4080  ;;  %v6581_v41 = vld [vmem:[%s12108_s1 + $0x22] sm:$0x3] }
 0x6a9   :  { %12929 = vst [vmem:[#allocation170_spill] sm:$0xff] %v9854_v0  ;;  %4890 = vrot.lane.b32.xlu1 %v9064_v6, %s12552_s5  ;;  %v5295_v0 = vld [vmem:[#allocation6 + $0x8] sm:$0xff] }
 0x6aa   :  { %4084 = vrot.lane.b32.xlu0 %v9750_v18, %s7393_s22  ;;  %5849 = vmatprep.mubr.f32.mxu1 %v5295_v0 }
 0x6ab   :  { %v9860_v63 = vpop.permute.xlu1 %3946 }
 0x6ac   :  { %12930 = vst [vmem:[#allocation171_spill] sm:$0xff] %v9860_v63  ;;  %v9862_v8 = vpop.permute.xlu0 %4183 }
 0x6ad   :  { %12931 = vst [vmem:[#allocation172_spill] sm:$0xff] %v9862_v8  ;;  %4894 = vrot.lane.b32.xlu1 %v9235_v16, %s12552_s5 }
 0x6ae   :  { %4187 = vrot.lane.b32.xlu0 %v9750_v18, %s7394_s23 }
 0x6af   :  { %v9868_v13 = vpop.permute.xlu1 %4078 }
 0x6b0   :  { %12932 = vst [vmem:[#allocation173_spill] sm:$0xff] %v9868_v13  ;;  %v9870_v43 = vpop.permute.xlu0 %4286 }
 0x6b1   :  { %12933 = vst [vmem:[#allocation174_spill] sm:$0xff] %v9870_v43  ;;  %4898 = vrot.lane.b32.xlu1 %v9367_v3, %s12552_s5 }
 0x6b2   :  { %4290 = vrot.lane.b32.xlu0 %v9750_v18, %s7395_s24 }
 0x6b3   :  { %v9876_v1 = vpop.permute.xlu1 %4181 }
 0x6b4   :  { %12934 = vst [vmem:[#allocation175_spill] sm:$0xff] %v9876_v1  ;;  %v9878_v8 = vpop.permute.xlu0 %4389 }
 0x6b5   :  { %12935 = vst [vmem:[#allocation176_spill] sm:$0xff] %v9878_v8  ;;  %3421 = vrot.lane.b32.xlu1 %v8891_v28, %s7387_s16  ;;  %v5299_v8 = vld [vmem:[#allocation6 + $0x28] sm:$0xff] }
 0x6b6   :  { %4393 = vrot.lane.b32.xlu0 %v9750_v18, %s7396_s25  ;;  %6063 = vmatprep.mubr.f32.mxu0 %v5299_v8  ;;  %v6576_v8 = vld [vmem:[%s12108_s1 + $0x18] sm:$0x3] }
 0x6b7   :  { %v9884_v13 = vpop.permute.xlu1 %4284  ;;  %v4023_v11 = vrot.slane %v6576_v8, %v7615_v20 }
 0x6b8   :  { %12936 = vst [vmem:[#allocation177_spill] sm:$0xff] %v9884_v13  ;;  %v9886_v43 = vpop.permute.xlu0 %4492 }
 0x6b9   :  { %12937 = vst [vmem:[#allocation178_spill] sm:$0xff] %v9886_v43  ;;  %4902 = vrot.lane.b32.xlu1 %v9538_v56, %s12552_s5  ;;  %v9932_v63 = vmul.f32 %v4023_v11, %v8978_v48  ;;  %v9940_v14 = vmul.f32 %v4023_v11, %v9235_v16  ;;  %v9962_v38 = vmul.f32 %v4023_v11, %v9064_v6 }
 0x6ba   :  { %4496 = vrot.lane.b32.xlu0 %v9750_v18, %s7397_s26  ;;  %v9965_v30 = vmul.f32 %v4023_v11, %v9538_v56 }
 0x6bb   :  { %v9892_v0 = vpop.permute.xlu1 %4387  ;;  %12947 = vst [vmem:[#allocation188_spill] sm:$0xff] %v9932_v63  ;;  %12950 = vst [vmem:[#allocation191_spill] sm:$0xff] %v9940_v14  ;;  %v6565_v63 = vld [vmem:[%s12108_s1 + $0x2] sm:$0x3] }
 0x6bc   :  { %12938 = vst [vmem:[#allocation179_spill] sm:$0xff] %v9892_v0  ;;  %v9894_v1 = vpop.permute.xlu0 %4595  ;;  %12954 = vst [vmem:[#allocation195_spill] sm:$0xff] %v9962_v38  ;;  %v10012_v38 = vrot.slane %v6578_v59, %v7617_v21 }
 0x6bd   :  { %12939 = vst [vmem:[#allocation180_spill] sm:$0xff] %v9894_v1  ;;  %4906 = vrot.lane.b32.xlu1 %v9670_v37, %s12552_s5  ;;  %12955 = vst [vmem:[#allocation196_spill] sm:$0xff] %v9965_v30  ;;  %v10056_v30 = vrot.slane %v6580_v36, %v7615_v20 }
 0x6be   :  { %4599 = vrot.lane.b32.xlu0 %v9750_v18, %s12547_s28  ;;  %12964 = vst [vmem:[#allocation205_spill] sm:$0xff] %v10012_v38 }
 0x6bf   :  { %v9900_v13 = vpop.permute.xlu1 %4490  ;;  %12972 = vst [vmem:[#allocation211_spill] sm:$0xff] %v10056_v30 }
 0x6c0   :  { %12940 = vst [vmem:[#allocation181_spill] sm:$0xff] %v9900_v13  ;;  %v9902_v43 = vpop.permute.xlu0 %4698 }
 0x6c1   :  { %12941 = vst [vmem:[#allocation182_spill] sm:$0xff] %v9902_v43  ;;  %3404 = vrot.lane.b32.xlu1 %v9134_v7, %s7387_s16 }
 0x6c2   :  { %4702 = vrot.lane.b32.xlu0 %v9750_v18, %s12550_s10 }
 0x6c3   :  { %v9908_v0 = vpop.permute.xlu1 %4593 }
 0x6c4   :  { %12942 = vst [vmem:[#allocation183_spill] sm:$0xff] %v9908_v0  ;;  %v9910_v1 = vpop.permute.xlu0 %4801 }
 0x6c5   :  { %12943 = vst [vmem:[#allocation184_spill] sm:$0xff] %v9910_v1  ;;  %3425 = vrot.lane.b32.xlu1 %v9064_v6, %s7387_s16  ;;  %v4027_v1 = vrot.slane %v6576_v8, %v7617_v21  ;;  %v9948_v8 = vmul.f32 %v4023_v11, %v8891_v28 }
 0x6c6   :  { %4805 = vrot.lane.b32.xlu0 %v9750_v18, %s12551_s4 }
 0x6c7   :  { %v9919_v43 = vpop.permute.xlu1 %4696  ;;  %12951 = vst [vmem:[#allocation192_spill] sm:$0xff] %v9948_v8  ;;  %v9975_v29 = vmul.f32 %v4027_v1, %v9134_v7  ;;  %v9978_v49 = vmul.f32 %v4027_v1, %v9548_v9  ;;  %v9996_v8 = vrot.slane %v6578_v59, %v7615_v20  ;;  %v10050_v59 = vrot.slane %v6565_v63, %v7615_v20 }
 0x6c8   :  { %12944 = vst [vmem:[#allocation185_spill] sm:$0xff] %v9919_v43  ;;  %v9921_v13 = vpop.permute.xlu0 %2815  ;;  %v9937_v43 = vmul.f32 %v4027_v1, %v8984_v58 }
 0x6c9   :  { %12945 = vst [vmem:[#allocation186_spill] sm:$0xff] %v9921_v13  ;;  %4985 = vrot.lane.b32.xlu1 %v8891_v28, %s12553_s30  ;;  %v6579_v13 = vld [vmem:[%s12108_s1 + $0x1e] sm:$0x3]  ;;  %12957 = vst [vmem:[#allocation198_spill] sm:$0xff] %v9975_v29  ;;  %v10031_v29 = vmul.f32 %v4023_v11, %v9670_v37 }
 0x6ca   :  { %4908 = vrot.lane.b32.xlu0 %v9750_v18, %s12552_s5  ;;  %12949 = vst [vmem:[#allocation190_spill] sm:$0xff] %v9937_v43  ;;  %12958 = vst [vmem:[#allocation199_spill] sm:$0xff] %v9978_v49  ;;  %v10015_v14 = vrot.slane %v6579_v13, %v7615_v20  ;;  %v6566_v43 = vld [vmem:[%s12108_s1 + $0x4] sm:$0x3]  ;;  %v10076_v49 = vrot.slane %v6581_v41, %v7615_v20 }
 0x6cb   :  { %v9929_v0 = vpop.permute.xlu1 %4799  ;;  %12967 = vst [vmem:[#allocation208_spill] sm:$0xff] %v10031_v29 }
 0x6cc   :  { %12946 = vst [vmem:[#allocation187_spill] sm:$0xff] %v9929_v0  ;;  %v9934_v47 = vpop.permute.xlu0 %2918  ;;  %v9951_v0 = vmul.f32 %v4027_v1, %v9245_v32  ;;  %12965 = vst [vmem:[#allocation206_spill] sm:$0xff] %v10015_v14 }
 0x6cd   :  { %12948 = vst [vmem:[#allocation189_spill] sm:$0xff] %v9934_v47  ;;  %4989 = vrot.lane.b32.xlu1 %v8978_v48, %s12553_s30  ;;  %v9959_v47 = vmul.f32 %v4027_v1, %v8942_v50  ;;  %12975 = vst [vmem:[#allocation214_spill] sm:$0xff] %v10076_v49 }
 0x6ce   :  { %12952 = vst [vmem:[#allocation193_spill] sm:$0xff] %v9951_v0  ;;  %4991 = vrot.lane.b32.xlu0 %v8984_v58, %s12553_s30  ;;  %v9981_v58 = vrot.slane %v6577_v5, %v7615_v20  ;;  %v10009_v5 = vmul.f32 %v4027_v1, %v9446_v39  ;;  %v6567_v0 = vld [vmem:[%s12108_s1 + $0x6] sm:$0x3] }
 0x6cf   :  { %12953 = vst [vmem:[#allocation194_spill] sm:$0xff] %v9959_v47  ;;  %v9970_v48 = vpop.permute.xlu1 %3719  ;;  %v10018_v47 = vrot.slane %v6579_v13, %v7617_v21  ;;  %v4086_v13 = vsel %vm12968_vm8, %v9048_v19, %v9100_v53  ;;  %v10093_v28 = vrot.slane %v6567_v0, %v7615_v20  ;;  %v10096_v50 = vrot.slane %v6567_v0, %v7617_v21  ;;  %v6575_v0 = vld [vmem:[%s12108_s1 + $0x16] sm:$0x3] }
 0x6d0   :  { %12956 = vst [vmem:[#allocation197_spill] sm:$0xff] %v9970_v48  ;;  %12959 = vst [vmem:[#allocation200_spill] sm:$0xff] %v9981_v58  ;;  %v9983_v40 = vpop.permute.xlu0 %3021  ;;  %v9990_v48 = vmul.f32 %v4023_v11, %v9367_v3  ;;  %v4114_v11 = vsel %vm12971_vm9, %v9100_v53, %v9048_v19  ;;  %v10067_v19 = vrot.slane %v6580_v36, %v7617_v21  ;;  %vm12990_vm8 = vcmask 932864  }
 0x6d1   :  { %12960 = vst [vmem:[#allocation201_spill] sm:$0xff] %v9983_v40  ;;  %3408 = vrot.lane.b32.xlu1 %v9446_v39, %s7387_s16  ;;  %12963 = vst [vmem:[#allocation204_spill] sm:$0xff] %v10009_v5  ;;  %v6582_v39 = vld [vmem:[%s12108_s1 + $0x24] sm:$0x3]  ;;  %v10070_v53 = vrot.slane %v6566_v43, %v7615_v20  ;;  %v10087_v36 = vmul.f32 %v9981_v58, %v4086_v13  ;;  %v10101_v15 = vmul.f32 %v9993_v17, %v4114_v11 }
 0x6d2   :  { %12961 = vst [vmem:[#allocation202_spill] sm:$0xff] %v9990_v48  ;;  %12966 = vst [vmem:[#allocation207_spill] sm:$0xff] %v10018_v47  ;;  %3410 = vrot.lane.b32.xlu0 %v9548_v9, %s7387_s16  ;;  %v10044_v9 = vmul.f32 %v4027_v1, %v9750_v18  ;;  %v10053_v48 = vrot.slane %v6565_v63, %v7617_v21  ;;  %v6568_v1 = vld [vmem:[%s12108_s1 + $0x8] sm:$0x3]  ;;  %v10073_v63 = vrot.slane %v6566_v43, %v7617_v21 }
 0x6d3   :  { %v10039_v40 = vpop.permute.xlu1 %3925  ;;  %12974 = vst [vmem:[#allocation213_spill] sm:$0xff] %v10067_v19  ;;  %12976 = vst [vmem:[#allocation215_spill] sm:$0xff] %v10087_v36  ;;  %v10090_v43 = vrot.slane %v6581_v41, %v7617_v21  ;;  %v10107_v13 = vrot.slane %v6582_v39, %v7617_v21  ;;  %v10110_v41 = vrot.slane %v6568_v1, %v7615_v20 }
 0x6d4   :  { %12969 = vst [vmem:[#allocation209_spill] sm:$0xff] %v10039_v40  ;;  %12970 = vst [vmem:[#allocation210_spill] sm:$0xff] %v10044_v9  ;;  %v10064_v5 = vpop.permute.xlu0 %3124  ;;  %v6569_v40 = vld [vmem:[%s12108_s1 + $0xa] sm:$0x3]  ;;  %v4189_v17 = vsel %vm12988_vm10, %v9056_v60, %v9108_v44  ;;  %vm12992_vm10 = vcmask 924672  }
 0x6d5   :  { %12973 = vst [vmem:[#allocation212_spill] sm:$0xff] %v10064_v5  ;;  %v6574_v5 = vld [vmem:[%s12108_s1 + $0x14] sm:$0x3]  ;;  %3429 = vrot.lane.b32.xlu1 %v9367_v3, %s7387_s16  ;;  %12977 = vst [vmem:[#allocation216_spill] sm:$0xff] %v10090_v43  ;;  %v10104_v3 = vrot.slane %v6582_v39, %v7615_v20  ;;  %v10121_v11 = vrot.slane %v6569_v40, %v7615_v20 }
 0x6d6   :  { %3431 = vrot.lane.b32.xlu0 %v9538_v56, %s7387_s16  ;;  %12978 = vst [vmem:[#allocation217_spill] sm:$0xff] %v10101_v15  ;;  %12980 = vst [vmem:[#allocation219_spill] sm:$0xff] %v10107_v13  ;;  %v10118_v56 = vrot.slane %v6568_v1, %v7617_v21  ;;  %v10127_v39 = vrot.slane %v6574_v5, %v7615_v20  ;;  %v4217_v1 = vsel %vm12989_vm1, %v9108_v44, %v9056_v60  ;;  %v13036_v15 = vld [vmem:[#allocation26_spill] sm:$0xff] }
 0x6d7   :  { %12979 = vst [vmem:[#allocation218_spill] sm:$0xff] %v10104_v3  ;;  %12981 = vst [vmem:[#allocation220_spill] sm:$0xff] %v10110_v41  ;;  %v10115_v58 = vpop.permute.xlu1 %4082  ;;  %v10124_v3 = vrot.slane %v6569_v40, %v7617_v21  ;;  %v10141_v40 = vrot.slane %v6574_v5, %v7617_v21  ;;  %v10154_v60 = vrot.slane %v6575_v0, %v7617_v21  ;;  %v13037_v21 = vld [vmem:[#allocation27_spill] sm:$0xff] }
 0x6d8   :  { %12982 = vst [vmem:[#allocation221_spill] sm:$0xff] %v10115_v58  ;;  %12983 = vst [vmem:[#allocation222_spill] sm:$0xff] %v10118_v56  ;;  %v10129_v13 = vpop.permute.xlu0 %3227  ;;  %v4292_v58 = vsel %vm12990_vm8, %v9066_v34, %v9114_v42  ;;  %v2920_v44 = vsel %vm98_vm3, %v9050_v4, %v9122_v31  ;;  %v2941_v5 = vsel %vm98_vm3, %v9122_v31, %v9050_v4 }
 0x6d9   :  { %12984 = vst [vmem:[#allocation223_spill] sm:$0xff] %v10121_v11  ;;  %12985 = vst [vmem:[#allocation224_spill] sm:$0xff] %v10124_v3  ;;  %4993 = vrot.lane.b32.xlu1 %v9064_v6, %s12553_s30  ;;  %v10151_v3 = vrot.slane %v6575_v0, %v7615_v20  ;;  %v10175_v29 = vmul.f32 %v10012_v38, %v4217_v1  ;;  %v10178_v36 = vmul.f32 %v10015_v14, %v4292_v58 }
 0x6da   :  { %12986 = vst [vmem:[#allocation225_spill] sm:$0xff] %v10127_v39  ;;  %12987 = vst [vmem:[#allocation226_spill] sm:$0xff] %v10129_v13  ;;  %4995 = vrot.lane.b32.xlu0 %v9134_v7, %s12553_s30  ;;  %v10172_v13 = vmul.f32 %v9996_v8, %v4189_v17  ;;  %v3023_v17 = vsel %vm125_vm4, %v9058_v12, %v9130_v61  ;;  %v3044_v1 = vsel %vm125_vm4, %v9130_v61, %v9058_v12 }
 0x6db   :  { %vm12991_vm9 = vmmov %vm12990_vm8  ;;  %12995 = vst [vmem:[#allocation229_spill] sm:$0xff] %v10175_v29  ;;  %vm13000_vm8 = vcmask 916480   ;;  %v3869_v20 = vsel %vm341_vm12, %v13037_v21, %v13036_v15 }
 0x6dc   :  { %v4320_v39 = vsel %vm12991_vm9, %v9114_v42, %v9066_v34  ;;  %v4395_v34 = vsel %vm12992_vm10, %v9074_v45, %v9124_v26  ;;  %v10167_v42 = vpop.permute.xlu1 %4185  ;;  %12994 = vst [vmem:[#allocation228_spill] sm:$0xff] %v10172_v13  ;;  %12996 = vst [vmem:[#allocation230_spill] sm:$0xff] %v10178_v36  ;;  %v10183_v31 = vpop.permute.xlu0 %3330  ;;  %v4498_v58 = vsel %vm13000_vm8, %v9082_v54, %v9132_v22 }
 0x6dd   :  { %12993 = vst [vmem:[#allocation227_spill] sm:$0xff] %v10167_v42  ;;  %vm12997_vm1 = vmmov %vm12992_vm10  ;;  %v10186_v42 = vmul.f32 %v10018_v47, %v4320_v39  ;;  %4997 = vrot.lane.b32.xlu1 %v9235_v16, %s12553_s30  ;;  %v10206_v39 = vmul.f32 %v10056_v30, %v4395_v34  ;;  %v3250_v34 = vsel %vm179_vm6, %v9148_v2, %v9076_v24  ;;  %vm13009_vm10 = vcmask 908288  }
 0x6de   :  { %v4423_v4 = vsel %vm12997_vm1, %v9124_v26, %v9074_v45  ;;  %12998 = vst [vmem:[#allocation231_spill] sm:$0xff] %v10183_v31  ;;  %v10200_v45 = vmul.f32 %v10050_v59, %v2941_v5  ;;  %v10203_v26 = vmul.f32 %v10053_v48, %v2920_v44  ;;  %vm13002_vm9 = vmmov %vm13000_vm8  ;;  %4999 = vrot.lane.b32.xlu0 %v9245_v32, %s12553_s30  ;;  %v13030_v31 = vld [vmem:[#allocation57_spill] sm:$0xff]  ;;  %vm13051_vm1 = vcmask 1031168  }
 0x6df   :  { %12999 = vst [vmem:[#allocation232_spill] sm:$0xff] %v10186_v42  ;;  %13001 = vst [vmem:[#allocation233_spill] sm:$0xff] %v10206_v39  ;;  %v4526_v12 = vsel %vm13002_vm9, %v9132_v22, %v9082_v54  ;;  %v10214_v61 = vmul.f32 %v10067_v19, %v4423_v4  ;;  %v3126_v5 = vsel %vm152_vm5, %v9068_v62, %v9140_v46  ;;  %vm13054_vm8 = vcmask 1039360  }
 0x6e0   :  { %v3147_v44 = vsel %vm152_vm5, %v9140_v46, %v9068_v62  ;;  %v10225_v0 = vpop.permute.xlu1 %4288  ;;  %v10228_v54 = vmul.f32 %v10070_v53, %v3044_v1  ;;  %v10231_v22 = vmul.f32 %v10073_v63, %v3023_v17  ;;  %v10234_v4 = vmul.f32 %v10076_v49, %v4498_v58  ;;  %v10239_v62 = vpop.permute.xlu0 %3742  ;;  %vm13055_vm9 = vmmov %vm13051_vm1 }
 0x6e1   :  { %13003 = vst [vmem:[#allocation234_spill] sm:$0xff] %v10214_v61  ;;  %13004 = vst [vmem:[#allocation235_spill] sm:$0xff] %v10225_v0  ;;  %v3229_v36 = vsel %vm179_vm6, %v9076_v24, %v9148_v2  ;;  %v10242_v46 = vmul.f32 %v10090_v43, %v4526_v12  ;;  %v10247_v1 = vsel %vm13009_vm10, %v9090_v33, %v9142_v35  ;;  %3412 = vrot.lane.b32.xlu1 %v9750_v18, %s7387_s16  ;;  %v13017_v33 = vld [vmem:[#allocation224_spill] sm:$0xff]  ;;  %v13021_v43 = vld [vmem:[#allocation53_spill] sm:$0xff] }
 0x6e2   :  { %13005 = vst [vmem:[#allocation236_spill] sm:$0xff] %v10228_v54  ;;  %13006 = vst [vmem:[#allocation237_spill] sm:$0xff] %v10231_v22  ;;  %v3332_v17 = vsel %vm206_vm7, %v9084_v51, %v9156_v10  ;;  %v3353_v58 = vsel %vm206_vm7, %v9156_v10, %v9084_v51  ;;  %v10258_v24 = vmul.f32 %v10093_v28, %v3147_v44  ;;  %3433 = vrot.lane.b32.xlu0 %v9670_v37, %s7387_s16  ;;  %v13090_v22 = vld [vmem:[#allocation157_spill] sm:$0xff] }
 0x6e3   :  { %13007 = vst [vmem:[#allocation238_spill] sm:$0xff] %v10234_v4  ;;  %13008 = vst [vmem:[#allocation239_spill] sm:$0xff] %v10242_v46  ;;  %v10261_v2 = vmul.f32 %v10096_v50, %v3126_v5  ;;  %v10264_v12 = vmul.f32 %v10110_v41, %v3250_v34  ;;  %v10272_v51 = vmul.f32 %v10118_v56, %v3229_v36  ;;  %v13020_v46 = vld [vmem:[#allocation35_spill] sm:$0xff] }
 0x6e4   :  { %13010 = vst [vmem:[#allocation240_spill] sm:$0xff] %v10247_v1  ;;  %13011 = vst [vmem:[#allocation241_spill] sm:$0xff] %v10258_v24  ;;  %v3045_v1 = vsel %vm125_vm4, %v9199_v52, %v9221_v27  ;;  %v3868_v10 = vsel %vm341_vm12, %v9172_v57, %v9038_v23  ;;  %v3024_v5 = vsel %vm125_vm4, %v9221_v27, %v9199_v52  ;;  %v10283_v34 = vpop.permute.xlu1 %4391  ;;  %v10297_v27 = vpop.permute.xlu0 %3845 }
 0x6e5   :  { %13012 = vst [vmem:[#allocation242_spill] sm:$0xff] %v10261_v2  ;;  %13013 = vst [vmem:[#allocation243_spill] sm:$0xff] %v10264_v12  ;;  %v3251_v44 = vsel %vm179_vm6, %v9223_v25, %v9241_v55  ;;  %v10286_v35 = vmul.f32 %v10121_v11, %v3353_v58  ;;  %v10289_v36 = vmul.f32 %v13017_v33, %v3332_v17  ;;  %v13022_v17 = vld [vmem:[#allocation14_spill] sm:$0xff]  ;;  %v13046_v2 = vld [vmem:[#allocation169_spill] sm:$0xff] }
 0x6e6   :  { %13014 = vst [vmem:[#allocation244_spill] sm:$0xff] %v10272_v51  ;;  %13015 = vst [vmem:[#allocation245_spill] sm:$0xff] %v10283_v34  ;;  %v3847_v4 = vsel %vm341_vm12, %v9038_v23, %v9172_v57  ;;  %v3230_v52 = vsel %vm179_vm6, %v9241_v55, %v9223_v25  ;;  %v3950_v49 = vsel %vm368_vm13, %v13021_v43, %v13020_v46  ;;  %v13023_v34 = vld [vmem:[#allocation15_spill] sm:$0xff]  ;;  %v13026_v25 = vld [vmem:[#allocation225_spill] sm:$0xff] }
 0x6e7   :  { %13016 = vst [vmem:[#allocation246_spill] sm:$0xff] %v10286_v35  ;;  %13018 = vst [vmem:[#allocation247_spill] sm:$0xff] %v10289_v36  ;;  %v3971_v58 = vsel %vm368_vm13, %v13020_v46, %v13021_v43  ;;  %v2942_v0 = vsel %vm98_vm3, %v13023_v34, %v13022_v17  ;;  %v10309_v23 = vmul.f32 %v10070_v53, %v3045_v1  ;;  %v13025_v57 = vld [vmem:[#allocation31_spill] sm:$0xff]  ;;  %v13029_v46 = vld [vmem:[#allocation54_spill] sm:$0xff] }
 0x6e8   :  { %13019 = vst [vmem:[#allocation248_spill] sm:$0xff] %v10297_v27  ;;  %3503 = vrot.lane.b32.xlu1 %v13025_v57, %s7388_s17  ;;  %v10314_v55 = vmul.f32 %v13026_v25, %v3868_v10  ;;  %v2921_v42 = vsel %vm98_vm3, %v13022_v17, %v13023_v34  ;;  %v10320_v35 = vmul.f32 %v10073_v63, %v3024_v5  ;;  %v13031_v36 = vld [vmem:[#allocation64_spill] sm:$0xff]  ;;  %v10339_v17 = vpop.permute.xlu1 %4494  ;;  %vm13065_vm10 = vmmov %vm13054_vm8 }
 0x6e9   :  { %13024 = vst [vmem:[#allocation35_spill] sm:$0xff] %v10309_v23  ;;  %v10323_v43 = vmul.f32 %v10110_v41, %v3251_v44  ;;  %3524 = vrot.lane.b32.xlu0 %v13029_v46, %s7388_s17  ;;  %v10328_v1 = vmul.f32 %v10141_v40, %v3847_v4  ;;  %v3127_v10 = vsel %vm152_vm5, %v13031_v36, %v13030_v31  ;;  %13033 = vst [vmem:[#allocation31_spill] sm:$0xff] %v10339_v17  ;;  %v10353_v41 = vpop.permute.xlu0 %3948  ;;  %v13041_v17 = vld [vmem:[#allocation74_spill] sm:$0xff]  ;;  %v13059_v23 = vld [vmem:[#allocation104_spill] sm:$0xff] }
 0x6ea   :  { %13027 = vst [vmem:[#allocation53_spill] sm:$0xff] %v10320_v35  ;;  %v3148_v34 = vsel %vm152_vm5, %v13030_v31, %v13031_v36  ;;  %v10337_v5 = vmul.f32 %v10118_v56, %v3230_v52  ;;  %v10342_v44 = vmul.f32 %v10151_v3, %v3971_v58  ;;  %v10345_v9 = vmul.f32 %v10154_v60, %v3950_v49  ;;  %v13039_v52 = vld [vmem:[#allocation61_spill] sm:$0xff]  ;;  %v13040_v58 = vld [vmem:[#allocation59_spill] sm:$0xff]  ;;  %v13091_v35 = vld [vmem:[#allocation128_spill] sm:$0xff] }
 0x6eb   :  { %13028 = vst [vmem:[#allocation14_spill] sm:$0xff] %v10323_v43  ;;  %v10348_v4 = vmul.f32 %v10050_v59, %v2942_v0  ;;  %13038 = vst [vmem:[#allocation57_spill] sm:$0xff] %v10353_v41  ;;  %v10356_v31 = vmul.f32 %v10053_v48, %v2921_v42  ;;  %v3354_v49 = vsel %vm206_vm7, %v13040_v58, %v13039_v52  ;;  %v13044_v41 = vld [vmem:[#allocation50_spill] sm:$0xff]  ;;  %v13049_v43 = vld [vmem:[#allocation28_spill] sm:$0xff] }
 0x6ec   :  { %13032 = vst [vmem:[#allocation15_spill] sm:$0xff] %v10337_v5  ;;  %13034 = vst [vmem:[#allocation225_spill] sm:$0xff] %v10342_v44  ;;  %v3848_v0 = vsel %vm341_vm12, %v13036_v15, %v13037_v21  ;;  %5001 = vrot.lane.b32.xlu1 %v13041_v17, %s12553_s30  ;;  %v10369_v56 = vmul.f32 %v10093_v28, %v3148_v34  ;;  %v10372_v42 = vmul.f32 %v10096_v50, %v3127_v10  ;;  %v13045_v15 = vld [vmem:[#allocation197_spill] sm:$0xff]  ;;  %v13050_v44 = vld [vmem:[#allocation67_spill] sm:$0xff] }
 0x6ed   :  { %13035 = vst [vmem:[#allocation54_spill] sm:$0xff] %v10345_v9  ;;  %5003 = vrot.lane.b32.xlu0 %v13044_v41, %s12553_s30  ;;  %v10381_v21 = vmul.f32 %v13026_v25, %v3869_v20  ;;  %v3749_v34 = vsel %vm314_vm11, %v13046_v2, %v13045_v15  ;;  %v3770_v10 = vsel %vm314_vm11, %v13045_v15, %v13046_v2  ;;  %v10389_v9 = vpop.permute.xlu1 %4597  ;;  %v13052_v2 = vld [vmem:[#allocation37_spill] sm:$0xff]  ;;  %v13053_v15 = vld [vmem:[#allocation39_spill] sm:$0xff]  ;;  %v13058_v5 = vld [vmem:[#allocation48_spill] sm:$0xff] }
 0x6ee   :  { %13042 = vst [vmem:[#allocation64_spill] sm:$0xff] %v10369_v56  ;;  %13043 = vst [vmem:[#allocation26_spill] sm:$0xff] %v10372_v42  ;;  %v3333_v24 = vsel %vm206_vm7, %v13039_v52, %v13040_v58  ;;  %v10397_v20 = vmul.f32 %v10121_v11, %v3354_v49  ;;  %v3890_v12 = vmul.f32 %v10141_v40, %v3848_v0  ;;  %v3722_v42 = vpop.permute.xlu0 %3721  ;;  %v13056_v49 = vld [vmem:[#allocation101_spill] sm:$0xff]  ;;  %v13057_v0 = vld [vmem:[#allocation36_spill] sm:$0xff] }
 0x6ef   :  { %13047 = vst [vmem:[#allocation27_spill] sm:$0xff] %v10389_v9  ;;  %v4190_v27 = vsel %vm13051_vm1, %v13050_v44, %v13049_v43  ;;  %v4087_v9 = vsel %vm13054_vm8, %v13053_v15, %v13052_v2  ;;  %v4218_v36 = vsel %vm13055_vm9, %v13049_v43, %v13050_v44  ;;  %v3750_v52 = vsel %vm314_vm11, %v10239_v62, %v3722_v42 }
 0x6f0   :  { %13048 = vst [vmem:[#allocation61_spill] sm:$0xff] %v10397_v20  ;;  %v3771_v58 = vsel %vm314_vm11, %v3722_v42, %v10239_v62  ;;  %5005 = vrot.lane.b32.xlu1 %v13056_v49, %s12553_s30  ;;  %v3794_v51 = vmul.f32 %v13057_v0, %v3770_v10  ;;  %v3795_v20 = vmul.f32 %v13058_v5, %v3749_v34  ;;  %v13062_v42 = vld [vmem:[#allocation107_spill] sm:$0xff]  ;;  %v13063_v10 = vld [vmem:[#allocation98_spill] sm:$0xff]  ;;  %vm13072_vm1 = vcmask 932864  }
 0x6f1   :  { %v3796_v11 = vmul.f32 %v13057_v0, %v3771_v58  ;;  %v3797_v54 = vmul.f32 %v13058_v5, %v3750_v52  ;;  %5007 = vrot.lane.b32.xlu0 %v13059_v23, %s12553_s30  ;;  %v10422_v43 = vmul.f32 %v13017_v33, %v3333_v24  ;;  %v6934_v62 = vpack.c.bf16 %v10381_v21, %v10314_v55  ;;  %v10432_v49 = vpop.permute.xlu1 %4700  ;;  %v13068_v21 = vld [vmem:[#allocation200_spill] sm:$0xff]  ;;  %v13070_v0 = vld [vmem:[#allocation89_spill] sm:$0xff]  ;;  %vm13076_vm8 = vmmov %vm13072_vm1 }
 0x6f2   :  { %v10427_v44 = vmul.f32 %v9996_v8, %v4190_v27  ;;  %v3850_v34 = vsel %vm341_vm12, %v13063_v10, %v13062_v42  ;;  %13064 = vst [vmem:[#allocation197_spill] sm:$0xff] %v10432_v49  ;;  %v4115_v52 = vsel %vm13065_vm10, %v13052_v2, %v13053_v15  ;;  %v10438_v58 = vmul.f32 %v10012_v38, %v4218_v36  ;;  %v10440_v5 = vpop.permute.xlu0 %4884  ;;  %v13073_v23 = vld [vmem:[#allocation17_spill] sm:$0xff]  ;;  %v13074_v49 = vld [vmem:[#allocation92_spill] sm:$0xff] }
 0x6f3   :  { %13060 = vst [vmem:[#allocation59_spill] sm:$0xff] %v10422_v43  ;;  %v6930_v24 = vpack.c.bf16 %v3796_v11, %v3794_v51  ;;  %13067 = vst [vmem:[#allocation28_spill] sm:$0xff] %v10440_v5  ;;  %v6928_v55 = vpack.c.bf16 %v3797_v54, %v3795_v20  ;;  %v10443_v27 = vmul.f32 %v13068_v21, %v4087_v9  ;;  %v13071_v43 = vld [vmem:[#allocation69_spill] sm:$0xff]  ;;  %v13077_v51 = vld [vmem:[#allocation203_spill] sm:$0xff]  ;;  %vm13081_vm9 = vcmask 924672  }
 0x6f4   :  { %13061 = vst [vmem:[#allocation50_spill] sm:$0xff] %v10427_v44  ;;  %13066 = vst [vmem:[#allocation169_spill] sm:$0xff] %v10438_v58  ;;  %v4293_v33 = vsel %vm13072_vm1, %v13071_v43, %v13070_v0  ;;  %v3849_v56 = vsel %vm341_vm12, %v13074_v49, %v13073_v23  ;;  %v13075_v2 = vld [vmem:[#allocation85_spill] sm:$0xff]  ;;  %v6932_v36 = vpack.c.bf16 %v3890_v12, %v10328_v1  ;;  %v13079_v1 = vld [vmem:[#allocation63_spill] sm:$0xff] }
 0x6f5   :  { %13069 = vst [vmem:[#allocation67_spill] sm:$0xff] %v10443_v27  ;;  %3505 = vrot.lane.b32.xlu1 %v13075_v2, %s7388_s17  ;;  %v4321_v11 = vsel %vm13076_vm8, %v13070_v0, %v13071_v43  ;;  %v3871_v9 = vsel %vm341_vm12, %v13062_v42, %v13063_v10  ;;  %v3894_v54 = vmul.f32 %v10141_v40, %v3850_v34  ;;  %v13080_v15 = vld [vmem:[#allocation29_spill] sm:$0xff]  ;;  %v13082_v43 = vld [vmem:[#allocation168_spill] sm:$0xff]  ;;  %v10474_v10 = vpop.permute.xlu1 %4803  ;;  %v13085_v34 = vld [vmem:[#allocation42_spill] sm:$0xff] }
 0x6f6   :  { %3507 = vrot.lane.b32.xlu0 %v9134_v7, %s7388_s17  ;;  %6929 = vmatprep.subr.bf16.mxu0 %v6928_v55  ;;  %v10464_v20 = vmul.f32 %v13077_v51, %v4115_v52  ;;  %v4396_v0 = vsel %vm13081_vm9, %v13080_v15, %v13079_v1  ;;  %v13083_v5 = vld [vmem:[#allocation156_spill] sm:$0xff]  ;;  %13084 = vst [vmem:[#allocation39_spill] sm:$0xff] %v10474_v10  ;;  %v10483_v13 = vpop.permute.xlu0 %4888  ;;  %vm13094_vm10 = vmmov %vm13081_vm9 }
 0x6f7   :  { %v3852_v42 = vsel %vm341_vm12, %v13083_v5, %v13082_v43  ;;  %6931 = vmatpush1.bf16.msra.mxu0 %v6930_v24  ;;  %v13086_v7 = vld [vmem:[#allocation72_spill] sm:$0xff]  ;;  %v3870_v52 = vsel %vm341_vm12, %v13073_v23, %v13074_v49  ;;  %v3892_v12 = vmul.f32 %v10141_v40, %v3849_v56  ;;  %13087 = vst [vmem:[#allocation107_spill] sm:$0xff] %v10483_v13  ;;  %v13092_v56 = vld [vmem:[#allocation99_spill] sm:$0xff] }
 0x6f8   :  { %13078 = vst [vmem:[#allocation37_spill] sm:$0xff] %v10464_v20  ;;  %v2922_v55 = vsel %vm98_vm3, %v13086_v7, %v13085_v34  ;;  %6933 = vmatprep.subr.bf16.mxu0 %v6932_v36  ;;  %v10488_v24 = vmul.f32 %v10015_v14, %v4293_v33  ;;  %v10491_v10 = vmul.f32 %v10018_v47, %v4321_v11 }
 0x6f9   :  { %v3893_v38 = vmul.f32 %v13026_v25, %v3871_v9  ;;  %v3851_v23 = vsel %vm341_vm12, %v13091_v35, %v13090_v22  ;;  %3526 = vrot.lane.b32.xlu1 %v13092_v56, %s7388_s17  ;;  %v10500_v49 = vmul.f32 %v10056_v30, %v4396_v0  ;;  %v3873_v33 = vsel %vm341_vm12, %v13082_v43, %v13083_v5  ;;  %v2788_v5 = vpop.permute.xlu1 %2787 }
 0x6fa   :  { %13088 = vst [vmem:[#allocation98_spill] sm:$0xff] %v10488_v24  ;;  %13089 = vst [vmem:[#allocation200_spill] sm:$0xff] %v10491_v10  ;;  %v3898_v36 = vmul.f32 %v10141_v40, %v3852_v42  ;;  %3528 = vrot.lane.b32.xlu0 %v9064_v6, %s7388_s17  ;;  %v6936_v11 = vpack.c.bf16 %v3894_v54, %v3892_v12  ;;  %v4424_v9 = vsel %vm13094_vm10, %v13079_v1, %v13080_v15  ;;  %v13095_v12 = vld [vmem:[#allocation186_spill] sm:$0xff]  ;;  %v6570_v10 = vld [vmem:[%s12108_s1 + $0xc] sm:$0x3] }
 0x6fb   :  { %13093 = vst [vmem:[#allocation89_spill] sm:$0xff] %v10500_v49  ;;  %v2943_v44 = vsel %vm98_vm3, %v13085_v34, %v13086_v7  ;;  %v2965_v0 = vmul.f32 %v10053_v48, %v2922_v55  ;;  %v3891_v13 = vmul.f32 %v13026_v25, %v3870_v52  ;;  %6935 = vmatpush1.bf16.msra.mxu0 %v6934_v62  ;;  %v10524_v7 = vpop.permute.xlu0 %4892  ;;  %v13097_v62 = vld [vmem:[#allocation16_spill] sm:$0xff]  ;;  %v13098_v52 = vld [vmem:[#allocation87_spill] sm:$0xff]  ;;  %v13154_v24 = vld [vmem:[#allocation26_spill] sm:$0xff] }
 0x6fc   :  { %v3872_v43 = vsel %vm341_vm12, %v13090_v22, %v13091_v35  ;;  %v3896_v54 = vmul.f32 %v10141_v40, %v3851_v23  ;;  %v2823_v42 = vsel %vm72_vm2, %v13095_v12, %v2788_v5  ;;  %v2844_v1 = vsel %vm72_vm2, %v2788_v5, %v13095_v12  ;;  %6937 = vmatprep.subr.bf16.mxu0 %v6936_v11  ;;  %v13100_v23 = vld [vmem:[#allocation146_spill] sm:$0xff]  ;;  %v13101_v11 = vld [vmem:[#allocation125_spill] sm:$0xff]  ;;  %v13106_v49 = vld [vmem:[#allocation20_spill] sm:$0xff] }
 0x6fd   :  { %13096 = vst [vmem:[#allocation69_spill] sm:$0xff] %v10524_v7  ;;  %v6938_v15 = vpack.c.bf16 %v3893_v38, %v3891_v13  ;;  %v3897_v34 = vmul.f32 %v13026_v25, %v3873_v33  ;;  %v2869_v55 = vmul.f32 %v13097_v62, %v2844_v1  ;;  %v2870_v30 = vmul.f32 %v13098_v52, %v2823_v42  ;;  %v13102_v13 = vld [vmem:[#allocation32_spill] sm:$0xff]  ;;  %v2898_v1 = vpop.permute.xlu1 %2897  ;;  %v13105_v22 = vld [vmem:[#allocation49_spill] sm:$0xff] }
 0x6fe   :  { %5009 = vrot.lane.b32.xlu1 %v9670_v37, %s12553_s30  ;;  %v10532_v35 = vmul.f32 %v10067_v19, %v4424_v9  ;;  %v2924_v5 = vsel %vm98_vm3, %v13101_v11, %v13100_v23  ;;  %5011 = vrot.lane.b32.xlu0 %v9750_v18, %s12553_s30  ;;  %v6940_v38 = vpack.c.bf16 %v3898_v36, %v3896_v54  ;;  %v13103_v33 = vld [vmem:[#allocation88_spill] sm:$0xff]  ;;  %v13107_v36 = vld [vmem:[#allocation19_spill] sm:$0xff]  ;;  %vm13112_vm2 = vcmask 1039360  }
 0x6ff   :  { %v3951_v12 = vsel %vm368_vm13, %v13103_v33, %v13102_v13  ;;  %v3895_v42 = vmul.f32 %v13026_v25, %v3872_v43  ;;  %v6806_v9 = vpack.c.bf16 %v10200_v45, %v2869_v55  ;;  %6939 = vmatpush1.bf16.msra.mxu0 %v6938_v15  ;;  %v6804_v62 = vpack.c.bf16 %v10203_v26, %v2870_v30  ;;  %v13104_v52 = vld [vmem:[#allocation76_spill] sm:$0xff]  ;;  %v10554_v19 = vpop.permute.xlu0 %4896  ;;  %vm13116_vm1 = vmmov %vm13112_vm2 }
 0x700   :  { %13099 = vst [vmem:[#allocation17_spill] sm:$0xff] %v10532_v35  ;;  %v3973_v7 = vsel %vm368_vm13, %v13105_v22, %v13104_v52  ;;  %v2964_v39 = vmul.f32 %v10050_v59, %v2943_v44  ;;  %v2923_v54 = vsel %vm98_vm3, %v13107_v36, %v13106_v49  ;;  %6941 = vmatprep.subr.bf16.mxu0 %v6940_v38  ;;  %13108 = vst [vmem:[#allocation92_spill] sm:$0xff] %v10554_v19 }
 0x701   :  { %v6808_v43 = vpack.c.bf16 %v2965_v0, %v10356_v31  ;;  %v2945_v45 = vsel %vm98_vm3, %v13100_v23, %v13101_v11  ;;  %v2969_v30 = vmul.f32 %v10053_v48, %v2924_v5  ;;  %v6942_v26 = vpack.c.bf16 %v3897_v34, %v3895_v42  ;;  %6805 = vmatprep.subr.bf16.mxu1 %v6804_v62  ;;  %v13109_v31 = vld [vmem:[#allocation189_spill] sm:$0xff]  ;;  %v10580_v11 = vpop.permute.xlu1 %3000  ;;  %v13111_v5 = vld [vmem:[#allocation47_spill] sm:$0xff] }
 0x702   :  { %5088 = vrot.lane.b32.xlu1 %v13029_v46, %s12554_s29  ;;  %v3972_v44 = vsel %vm368_vm13, %v13102_v13, %v13103_v33  ;;  %v3952_v15 = vsel %vm368_vm13, %v13104_v52, %v13105_v22  ;;  %v2926_v0 = vsel %vm98_vm3, %v13109_v31, %v2898_v1  ;;  %5090 = vrot.lane.b32.xlu0 %v13025_v57, %s12554_s29  ;;  %v13110_v22 = vld [vmem:[#allocation77_spill] sm:$0xff]  ;;  %v13114_v42 = vld [vmem:[#allocation159_spill] sm:$0xff] }
 0x703   :  { %6807 = vmatpush1.bf16.msra.mxu1 %v6806_v9  ;;  %v10574_v34 = vmul.f32 %v10151_v3, %v3973_v7  ;;  %v2944_v55 = vsel %vm98_vm3, %v13106_v49, %v13107_v36  ;;  %v2967_v23 = vmul.f32 %v10053_v48, %v2923_v54  ;;  %6943 = vmatpush1.bf16.msra.mxu0 %v6942_v26  ;;  %v13113_v7 = vld [vmem:[#allocation158_spill] sm:$0xff]  ;;  %v10590_v62 = vpop.permute.xlu0 %4900 }
 0x704   :  { %6809 = vmatprep.subr.bf16.mxu1 %v6808_v43  ;;  %v4088_v38 = vsel %vm13112_vm2, %v13111_v5, %v13110_v22  ;;  %v6810_v13 = vpack.c.bf16 %v2964_v39, %v10348_v4  ;;  %v2968_v33 = vmul.f32 %v10050_v59, %v2945_v45  ;;  %v2925_v9 = vsel %vm98_vm3, %v13114_v42, %v13113_v7  ;;  %vm13215_vm2 = vmmov %vm13116_vm1 }
 0x705   :  { %13115 = vst [vmem:[#allocation85_spill] sm:$0xff] %v10590_v62  ;;  %v10593_v49 = vmul.f32 %v10154_v60, %v3952_v15  ;;  %v2947_v52 = vsel %vm98_vm3, %v2898_v1, %v13109_v31  ;;  %v2973_v36 = vmul.f32 %v10053_v48, %v2926_v0  ;;  %v6812_v39 = vpack.c.bf16 %v2969_v30, %v2967_v23 }
 0x706   :  { %3509 = vrot.lane.b32.xlu1 %v9245_v32, %s7388_s17  ;;  %v10601_v4 = vmul.f32 %v10151_v3, %v3972_v44  ;;  %v4116_v54 = vsel %vm13116_vm1, %v13110_v22, %v13111_v5  ;;  %v2966_v43 = vmul.f32 %v10050_v59, %v2944_v55  ;;  %3511 = vrot.lane.b32.xlu0 %v13044_v41, %s7388_s17  ;;  %v10619_v44 = vpop.permute.xlu1 %3103  ;;  %v13120_v22 = vld [vmem:[#allocation40_spill] sm:$0xff]  ;;  %v13121_v5 = vld [vmem:[#allocation75_spill] sm:$0xff] }
 0x707   :  { %6811 = vmatpush1.bf16.msra.mxu1 %v6810_v13  ;;  %v10610_v1 = vmul.f32 %v10154_v60, %v3951_v12  ;;  %v10613_v45 = vmul.f32 %v13068_v21, %v4088_v38  ;;  %v2946_v30 = vsel %vm98_vm3, %v13113_v7, %v13114_v42  ;;  %v2971_v26 = vmul.f32 %v10053_v48, %v2925_v9  ;;  %v10624_v12 = vpop.permute.xlu0 %3423  ;;  %vm13122_vm3 = vmmov %vm13076_vm8  ;;  %v13124_v7 = vld [vmem:[#allocation83_spill] sm:$0xff]  ;;  %v13125_v9 = vld [vmem:[#allocation22_spill] sm:$0xff] }
 0x708   :  { %6813 = vmatprep.subr.bf16.mxu1 %v6812_v39  ;;  %v6814_v31 = vpack.c.bf16 %v2968_v33, %v2966_v43  ;;  %v2972_v0 = vmul.f32 %v10050_v59, %v2947_v52  ;;  %13118 = vst [vmem:[#allocation63_spill] sm:$0xff] %v10624_v12  ;;  %v10629_v23 = vmul.f32 %v13077_v51, %v4116_v54  ;;  %v13123_v33 = vld [vmem:[#allocation45_spill] sm:$0xff]  ;;  %v13127_v43 = vld [vmem:[#allocation79_spill] sm:$0xff]  ;;  %vm13129_vm8 = vcmask 1031168   ;;  %vm13135_vm10 = vmmov %vm13122_vm3 }
 0x709   :  { %13117 = vst [vmem:[#allocation203_spill] sm:$0xff] %v10613_v45  ;;  %v4294_v48 = vsel %vm13122_vm3, %v13121_v5, %v13120_v22  ;;  %v6816_v38 = vpack.c.bf16 %v2973_v36, %v2971_v26  ;;  %v3149_v42 = vsel %vm152_vm5, %v13124_v7, %v13123_v33  ;;  %v13126_v52 = vld [vmem:[#allocation21_spill] sm:$0xff]  ;;  %v2970_v54 = vmul.f32 %v10050_v59, %v2946_v30  ;;  %vm13130_vm9 = vmmov %vm13129_vm8  ;;  %v13133_v36 = vld [vmem:[#allocation71_spill] sm:$0xff] }
 0x70a   :  { %13119 = vst [vmem:[#allocation29_spill] sm:$0xff] %v10629_v23  ;;  %3530 = vrot.lane.b32.xlu1 %v9235_v16, %s7388_s17  ;;  %v3026_v39 = vsel %vm125_vm4, %v13126_v52, %v13125_v9  ;;  %3532 = vrot.lane.b32.xlu0 %v13041_v17, %s7388_s17  ;;  %v13128_v26 = vld [vmem:[#allocation73_spill] sm:$0xff]  ;;  %v3128_v13 = vsel %vm152_vm5, %v13123_v33, %v13124_v7  ;;  %v10658_v59 = vpop.permute.xlu1 %3206  ;;  %v13136_v7 = vld [vmem:[#allocation160_spill] sm:$0xff] }
 0x70b   :  { %6815 = vmatpush1.bf16.msra.mxu1 %v6814_v31  ;;  %v4191_v55 = vsel %vm13129_vm8, %v13128_v26, %v13127_v43  ;;  %v4219_v15 = vsel %vm13130_vm9, %v13127_v43, %v13128_v26  ;;  %v10661_v30 = vmul.f32 %v10015_v14, %v4294_v48  ;;  %v13132_v31 = vld [vmem:[#allocation97_spill] sm:$0xff]  ;;  %v3047_v62 = vsel %vm125_vm4, %v13125_v9, %v13126_v52  ;;  %v10669_v43 = vpop.permute.xlu0 %4904  ;;  %v13171_v23 = vld [vmem:[#allocation24_spill] sm:$0xff]  ;;  %vm13265_vm9 = vmmov %vm13215_vm2 }
 0x70c   :  { %6817 = vmatprep.subr.bf16.mxu1 %v6816_v38  ;;  %v3025_v19 = vsel %vm125_vm4, %v13133_v36, %v13132_v31  ;;  %v6818_v61 = vpack.c.bf16 %v2972_v0, %v2970_v54  ;;  %13134 = vst [vmem:[#allocation156_spill] sm:$0xff] %v10669_v43  ;;  %v4322_v33 = vsel %vm13135_vm10, %v13120_v22, %v13121_v5  ;;  %v13137_v26 = vld [vmem:[#allocation161_spill] sm:$0xff]  ;;  %v13140_v54 = vld [vmem:[#allocation126_spill] sm:$0xff]  ;;  %v13148_v43 = vld [vmem:[#allocation64_spill] sm:$0xff] }
 0x70d   :  { %13131 = vst [vmem:[#allocation168_spill] sm:$0xff] %v10661_v30  ;;  %v10675_v38 = vmul.f32 %v10093_v28, %v3149_v42  ;;  %v3070_v48 = vmul.f32 %v10073_v63, %v3026_v39  ;;  %v3028_v35 = vsel %vm125_vm4, %v13137_v26, %v13136_v7  ;;  %v3046_v0 = vsel %vm125_vm4, %v13132_v31, %v13133_v36  ;;  %v13139_v39 = vld [vmem:[#allocation149_spill] sm:$0xff]  ;;  %v13156_v30 = vld [vmem:[#allocation34_spill] sm:$0xff]  ;;  %vm13268_vm10 = vmmov %vm13215_vm2 }
 0x70e   :  { %5092 = vrot.lane.b32.xlu1 %v13092_v56, %s12554_s29  ;;  %v10687_v9 = vmul.f32 %v10096_v50, %v3128_v13  ;;  %5094 = vrot.lane.b32.xlu0 %v13075_v2, %s12554_s29  ;;  %v10694_v5 = vmul.f32 %v9996_v8, %v4191_v55  ;;  %v3068_v42 = vmul.f32 %v10073_v63, %v3025_v19  ;;  %v10701_v13 = vpop.permute.xlu1 %3309  ;;  %v13141_v31 = vld [vmem:[#allocation53_spill] sm:$0xff]  ;;  %v13152_v19 = vld [vmem:[#allocation236_spill] sm:$0xff] }
 0x70f   :  { %6819 = vmatpush1.bf16.msra.mxu1 %v6818_v61  ;;  %v3069_v52 = vmul.f32 %v10070_v53, %v3047_v62  ;;  %v3027_v36 = vsel %vm125_vm4, %v13140_v54, %v13139_v39  ;;  %v13142_v14 = vld [vmem:[#allocation237_spill] sm:$0xff]  ;;  %v10710_v55 = vmul.f32 %v10018_v47, %v4322_v33  ;;  %v3074_v62 = vmul.f32 %v10073_v63, %v3028_v35  ;;  %v10715_v22 = vpop.permute.xlu0 %3406  ;;  %v13158_v47 = vld [vmem:[#allocation135_spill] sm:$0xff] }
 0x710   :  { %13138 = vst [vmem:[#allocation42_spill] sm:$0xff] %v10694_v5  ;;  %v13143_v29 = vpack.c.bf16 %v13141_v31, %v13142_v14  ;;  %v13144_v61 = vld [vmem:[#allocation205_spill] sm:$0xff]  ;;  %13147 = vst [vmem:[#allocation128_spill] sm:$0xff] %v10715_v22  ;;  %v3067_v5 = vmul.f32 %v10070_v53, %v3046_v0  ;;  %v6824_v14 = vpack.c.bf16 %v3070_v48, %v3068_v42  ;;  %v13150_v31 = vld [vmem:[#allocation56_spill] sm:$0xff] }
 0x711   :  { %v10707_v58 = vmul.f32 %v13144_v61, %v4219_v15  ;;  %13146 = vst [vmem:[#allocation157_spill] sm:$0xff] %v10710_v55  ;;  %v3072_v15 = vmul.f32 %v10073_v63, %v3027_v36  ;;  %v13149_v33 = vld [vmem:[#allocation201_spill] sm:$0xff]  ;;  %v13151_v0 = vld [vmem:[#allocation35_spill] sm:$0xff]  ;;  %v13157_v36 = vld [vmem:[#allocation138_spill] sm:$0xff]  ;;  %v3048_v45 = vsel %vm125_vm4, %v13139_v39, %v13140_v54 }
 0x712   :  { %6821 = vmatprep.subr.bf16.mxu1 %v13143_v29  ;;  %v3049_v29 = vsel %vm125_vm4, %v13136_v7, %v13137_v26  ;;  %5096 = vrot.lane.b32.xlu1 %v9064_v6, %s12554_s29  ;;  %v3029_v35 = vsel %vm125_vm4, %v13149_v33, %v10580_v11  ;;  %v13153_v27 = vpack.c.bf16 %v13151_v0, %v13152_v19  ;;  %v13155_v26 = vld [vmem:[#allocation84_spill] sm:$0xff]  ;;  %v3825_v6 = vpop.permute.xlu1 %3824  ;;  %v13240_v55 = vld [vmem:[#allocation191_spill] sm:$0xff] }
 0x713   :  { %13145 = vst [vmem:[#allocation72_spill] sm:$0xff] %v10707_v58  ;;  %5098 = vrot.lane.b32.xlu0 %v13150_v31, %s12554_s29  ;;  %v10739_v48 = vsel %vm179_vm6, %v13156_v30, %v13155_v26  ;;  %v6826_v42 = vpack.c.bf16 %v3069_v52, %v3067_v5  ;;  %v3954_v22 = vsel %vm368_vm13, %v13158_v47, %v13157_v36  ;;  %v13159_v19 = vld [vmem:[#allocation248_spill] sm:$0xff]  ;;  %v10752_v12 = vpop.permute.xlu0 %3427  ;;  %v13281_v58 = vld [vmem:[#allocation63_spill] sm:$0xff] }
 0x714   :  { %6823 = vmatpush1.bf16.msra.mxu1 %v13153_v27  ;;  %v3073_v27 = vmul.f32 %v10070_v53, %v3049_v29  ;;  %v3853_v0 = vsel %vm341_vm12, %v13159_v19, %v3825_v6  ;;  %v3874_v7 = vsel %vm341_vm12, %v3825_v6, %v13159_v19  ;;  %13160 = vst [vmem:[#allocation99_spill] sm:$0xff] %v10752_v12  ;;  %v13161_v29 = vld [vmem:[#allocation104_spill] sm:$0xff]  ;;  %vm13207_vm12 = vmmov %vm13116_vm1 }
 0x715   :  { %6825 = vmatprep.subr.bf16.mxu1 %v6824_v14  ;;  %v6828_v5 = vpack.c.bf16 %v3074_v62, %v3072_v15  ;;  %v3050_v52 = vsel %vm125_vm4, %v10580_v11, %v13149_v33  ;;  %v3076_v20 = vmul.f32 %v10073_v63, %v3029_v35  ;;  %v3899_v39 = vmul.f32 %v13026_v25, %v3874_v7  ;;  %v13162_v14 = vld [vmem:[#allocation52_spill] sm:$0xff]  ;;  %v13163_v62 = vld [vmem:[#allocation93_spill] sm:$0xff]  ;;  %vm13201_vm4 = vmmov %vm13129_vm8 }
 0x716   :  { %v3900_v54 = vmul.f32 %v10141_v40, %v3853_v0  ;;  %3513 = vrot.lane.b32.xlu1 %v13161_v29, %s7388_s17  ;;  %v10765_v6 = vsel %vm179_vm6, %v13155_v26, %v13156_v30  ;;  %v3334_v15 = vsel %vm206_vm7, %v13163_v62, %v13162_v14  ;;  %v3071_v11 = vmul.f32 %v10070_v53, %v3048_v45  ;;  %v13164_v40 = vld [vmem:[#allocation127_spill] sm:$0xff]  ;;  %v13165_v25 = vld [vmem:[#allocation109_spill] sm:$0xff]  ;;  %v10780_v7 = vpop.permute.xlu1 %4882  ;;  %v13168_v26 = vld [vmem:[#allocation54_spill] sm:$0xff] }
 0x717   :  { %3515 = vrot.lane.b32.xlu0 %v9750_v18, %s7388_s17  ;;  %v3355_v63 = vsel %vm206_vm7, %v13162_v14, %v13163_v62  ;;  %v3953_v33 = vsel %vm368_vm13, %v13165_v25, %v13164_v40  ;;  %v13166_v30 = vld [vmem:[#allocation225_spill] sm:$0xff]  ;;  %13167 = vst [vmem:[#allocation186_spill] sm:$0xff] %v10780_v7  ;;  %v3975_v45 = vsel %vm368_vm13, %v13157_v36, %v13158_v47  ;;  %v10788_v62 = vpop.permute.xlu0 %4987  ;;  %v13170_v12 = vld [vmem:[#allocation100_spill] sm:$0xff]  ;;  %v13173_v47 = vld [vmem:[#allocation242_spill] sm:$0xff] }
 0x718   :  { %6827 = vmatpush1.bf16.msra.mxu1 %v6826_v42  ;;  %v6946_v35 = vpack.c.bf16 %v13166_v30, %v3899_v39  ;;  %v6944_v19 = vpack.c.bf16 %v13168_v26, %v3900_v54  ;;  %v3999_v42 = vmul.f32 %v10154_v60, %v3954_v22  ;;  %v6830_v0 = vpack.c.bf16 %v3073_v27, %v3071_v11  ;;  %v13172_v54 = vld [vmem:[#allocation101_spill] sm:$0xff]  ;;  %v13174_v22 = vld [vmem:[#allocation223_spill] sm:$0xff] }
 0x719   :  { %6829 = vmatprep.subr.bf16.mxu1 %v6828_v5  ;;  %v3075_v14 = vmul.f32 %v10070_v53, %v3050_v52  ;;  %13169 = vst [vmem:[#allocation16_spill] sm:$0xff] %v10788_v62  ;;  %v3150_v39 = vsel %vm152_vm5, %v13171_v23, %v13170_v12  ;;  %v3974_v5 = vsel %vm368_vm13, %v13164_v40, %v13165_v25  ;;  %v13175_v52 = vld [vmem:[#allocation151_spill] sm:$0xff]  ;;  %v13177_v40 = vld [vmem:[#allocation224_spill] sm:$0xff] }
 0x71a   :  { %3534 = vrot.lane.b32.xlu1 %v13172_v54, %s7388_s17  ;;  %6945 = vmatprep.subr.bf16.mxu0 %v6944_v19  ;;  %v6832_v36 = vpack.c.bf16 %v13173_v47, %v3076_v20  ;;  %v10800_v27 = vmul.f32 %v13174_v22, %v3355_v63  ;;  %v3997_v53 = vmul.f32 %v10154_v60, %v3953_v33  ;;  %v13176_v11 = vld [vmem:[#allocation23_spill] sm:$0xff]  ;;  %v10815_v26 = vpop.permute.xlu1 %4886  ;;  %v13179_v47 = vld [vmem:[#allocation241_spill] sm:$0xff] }
 0x71b   :  { %v3130_v30 = vsel %vm152_vm5, %v13176_v11, %v13175_v52  ;;  %3536 = vrot.lane.b32.xlu0 %v9670_v37, %s7388_s17  ;;  %v10809_v25 = vmul.f32 %v13177_v40, %v3334_v15  ;;  %v3129_v20 = vsel %vm152_vm5, %v13170_v12, %v13171_v23  ;;  %v3998_v63 = vmul.f32 %v10151_v3, %v3975_v45  ;;  %v13182_v45 = vld [vmem:[#allocation171_spill] sm:$0xff] }
 0x71c   :  { %6831 = vmatpush1.bf16.msra.mxu1 %v6830_v0  ;;  %6947 = vmatpush1.bf16.msra.mxu0 %v6946_v35  ;;  %13178 = vst [vmem:[#allocation87_spill] sm:$0xff] %v10815_v26  ;;  %v3172_v33 = vmul.f32 %v10093_v28, %v3150_v39  ;;  %v3996_v19 = vmul.f32 %v10151_v3, %v3974_v5  ;;  %v3928_v0 = vpop.permute.xlu0 %3927  ;;  %v13181_v35 = vld [vmem:[#allocation209_spill] sm:$0xff] }
 0x71d   :  { %6833 = vmatprep.subr.bf16.mxu1 %v6832_v36  ;;  %v6834_v7 = vpack.c.bf16 %v13179_v47, %v3075_v14  ;;  %v13180_v15 = vpack.c.bf16 %v10593_v49, %v10610_v1  ;;  %v6952_v62 = vpack.c.bf16 %v3999_v42, %v3997_v53  ;;  %v3151_v12 = vsel %vm152_vm5, %v13175_v52, %v13176_v11  ;;  %v13183_v36 = vld [vmem:[#allocation57_spill] sm:$0xff]  ;;  %v13184_v49 = vld [vmem:[#allocation212_spill] sm:$0xff]  ;;  %v13185_v52 = vld [vmem:[#allocation103_spill] sm:$0xff] }
 0x71e   :  { %v3175_v23 = vmul.f32 %v10096_v50, %v3130_v30  ;;  %v3955_v39 = vsel %vm368_vm13, %v13182_v45, %v13181_v35  ;;  %v3956_v5 = vsel %vm368_vm13, %v13183_v36, %v3928_v0  ;;  %5100 = vrot.lane.b32.xlu1 %v9235_v16, %s12554_s29  ;;  %v3132_v1 = vsel %vm152_vm5, %v13184_v49, %v10619_v44  ;;  %v13186_v11 = vld [vmem:[#allocation102_spill] sm:$0xff]  ;;  %v10849_v26 = vpop.permute.xlu1 %4890 }
 0x71f   :  { %6949 = vmatprep.subr.bf16.mxu0 %v13180_v15  ;;  %v3977_v42 = vsel %vm368_vm13, %v3928_v0, %v13183_v36  ;;  %v4003_v14 = vmul.f32 %v10154_v60, %v3956_v5  ;;  %5102 = vrot.lane.b32.xlu0 %v9245_v32, %s12554_s29  ;;  %v3173_v53 = vmul.f32 %v10096_v50, %v3129_v20  ;;  %v13191_v5 = vld [vmem:[#allocation163_spill] sm:$0xff] }
 0x720   :  { %6835 = vmatpush1.bf16.msra.mxu1 %v6834_v7  ;;  %v3253_v30 = vsel %vm179_vm6, %v13186_v11, %v13185_v52  ;;  %v6954_v47 = vpack.c.bf16 %v3998_v63, %v3996_v19  ;;  %v13187_v15 = vpack.c.bf16 %v10574_v34, %v10601_v4  ;;  %13188 = vst [vmem:[#allocation146_spill] sm:$0xff] %v10849_v26  ;;  %v13190_v7 = vld [vmem:[#allocation162_spill] sm:$0xff]  ;;  %v10862_v34 = vpop.permute.xlu0 %4084  ;;  %v13234_v26 = vld [vmem:[#allocation133_spill] sm:$0xff] }
 0x721   :  { %v13189_v0 = vpack.c.bf16 %v10687_v9, %v13154_v24  ;;  %v3174_v36 = vmul.f32 %v10093_v28, %v3151_v12  ;;  %v3131_v20 = vsel %vm152_vm5, %v13191_v5, %v13190_v7  ;;  %v3976_v63 = vsel %vm368_vm13, %v13181_v35, %v13182_v45  ;;  %vm13214_vm13 = vmmov %vm13116_vm1 }
 0x722   :  { %6951 = vmatpush1.bf16.msra.mxu0 %v13187_v15  ;;  %v4001_v19 = vmul.f32 %v10154_v60, %v3955_v39  ;;  %v3153_v24 = vsel %vm152_vm5, %v10619_v44, %v13184_v49  ;;  %v3179_v4 = vmul.f32 %v10096_v50, %v3132_v1  ;;  %v4002_v9 = vmul.f32 %v10151_v3, %v3977_v42  ;;  %v13192_v60 = vld [vmem:[#allocation220_spill] sm:$0xff]  ;;  %v10887_v1 = vpop.permute.xlu1 %4894  ;;  %v13198_v15 = vld [vmem:[#allocation105_spill] sm:$0xff] }
 0x723   :  { %6837 = vmatprep.subr.bf16.mxu1 %v13189_v0  ;;  %6953 = vmatprep.subr.bf16.mxu0 %v6952_v62  ;;  %v6840_v12 = vpack.c.bf16 %v3175_v23, %v3173_v53  ;;  %v3232_v35 = vsel %vm179_vm6, %v13185_v52, %v13186_v11  ;;  %v10875_v62 = vmul.f32 %v13192_v60, %v3253_v30  ;;  %v13196_v30 = vld [vmem:[#allocation61_spill] sm:$0xff] }
 0x724   :  { %5104 = vrot.lane.b32.xlu1 %v13041_v17, %s12554_s29  ;;  %5106 = vrot.lane.b32.xlu0 %v13044_v41, %s12554_s29  ;;  %v13193_v44 = vpack.c.bf16 %v10675_v38, %v13148_v43  ;;  %v6956_v45 = vpack.c.bf16 %v4003_v14, %v4001_v19  ;;  %v3152_v39 = vsel %vm152_vm5, %v13190_v7, %v13191_v5  ;;  %v10894_v38 = vpop.permute.xlu0 %4187  ;;  %v13199_v7 = vld [vmem:[#allocation113_spill] sm:$0xff]  ;;  %v13200_v5 = vld [vmem:[#allocation110_spill] sm:$0xff]  ;;  %v13203_v19 = vld [vmem:[#allocation59_spill] sm:$0xff] }
 0x725   :  { %v3177_v23 = vmul.f32 %v10096_v50, %v3131_v20  ;;  %v4000_v49 = vmul.f32 %v10151_v3, %v3976_v63  ;;  %13194 = vst [vmem:[#allocation125_spill] sm:$0xff] %v10887_v1  ;;  %v10891_v42 = vmul.f32 %v13192_v60, %v10765_v6  ;;  %v6842_v53 = vpack.c.bf16 %v3174_v36, %v3172_v33  ;;  %v13195_v50 = vld [vmem:[#allocation222_spill] sm:$0xff]  ;;  %vm13206_vm5 = vmmov %vm13116_vm1  ;;  %v13226_v33 = vld [vmem:[#allocation129_spill] sm:$0xff] }
 0x726   :  { %6839 = vmatpush1.bf16.msra.mxu1 %v13193_v44  ;;  %6955 = vmatpush1.bf16.msra.mxu0 %v6954_v47  ;;  %v3178_v43 = vmul.f32 %v10093_v28, %v3153_v24  ;;  %v3274_v3 = vmul.f32 %v13195_v50, %v10739_v48  ;;  %v3276_v52 = vmul.f32 %v13195_v50, %v3232_v35  ;;  %v13197_v47 = vld [vmem:[#allocation106_spill] sm:$0xff]  ;;  %v10916_v63 = vpop.permute.xlu1 %4898  ;;  %vm13216_vm1 = vmmov %vm13201_vm4  ;;  %v13227_v24 = vld [vmem:[#allocation132_spill] sm:$0xff] }
 0x727   :  { %6841 = vmatprep.subr.bf16.mxu1 %v6840_v12  ;;  %6957 = vmatprep.subr.bf16.mxu0 %v6956_v45  ;;  %v6958_v11 = vpack.c.bf16 %v4002_v9, %v4000_v49  ;;  %v6844_v6 = vpack.c.bf16 %v3179_v4, %v3177_v23  ;;  %v3356_v0 = vsel %vm206_vm7, %v13198_v15, %v13197_v47  ;;  %v13204_v4 = vld [vmem:[#allocation108_spill] sm:$0xff]  ;;  %v13205_v9 = vld [vmem:[#allocation111_spill] sm:$0xff]  ;;  %v13208_v45 = vld [vmem:[#allocation190_spill] sm:$0xff] }
 0x728   :  { %3606 = vrot.lane.b32.xlu1 %v13025_v57, %s7389_s18  ;;  %v3176_v36 = vmul.f32 %v10093_v28, %v3152_v39  ;;  %3608 = vrot.lane.b32.xlu0 %v13075_v2, %s7389_s18  ;;  %v4220_v20 = vsel %vm13201_vm4, %v13200_v5, %v13199_v7  ;;  %13202 = vst [vmem:[#allocation32_spill] sm:$0xff] %v10916_v63  ;;  %v13209_v39 = vld [vmem:[#allocation194_spill] sm:$0xff]  ;;  %v10932_v49 = vpop.permute.xlu0 %4290  ;;  %v13228_v48 = vld [vmem:[#allocation155_spill] sm:$0xff]  ;;  %vm13235_vm3 = vmmov %vm13216_vm1 }
 0x729   :  { %v3335_v28 = vsel %vm206_vm7, %v13197_v47, %v13198_v15  ;;  %v4089_v12 = vsel %vm13206_vm5, %v13205_v9, %v13204_v4  ;;  %v4117_v35 = vsel %vm13207_vm12, %v13204_v4, %v13205_v9  ;;  %v13210_v23 = vpack.c.bf16 %v13208_v45, %v13209_v39  ;;  %13211 = vst [vmem:[#allocation88_spill] sm:$0xff] %v10932_v49  ;;  %v13218_v9 = vld [vmem:[#allocation165_spill] sm:$0xff]  ;;  %v13231_v1 = vld [vmem:[#allocation198_spill] sm:$0xff]  ;;  %v13241_v49 = vld [vmem:[#allocation195_spill] sm:$0xff] }
 0x72a   :  { %6843 = vmatpush1.bf16.msra.mxu1 %v6842_v53  ;;  %6959 = vmatpush1.bf16.msra.mxu0 %v6958_v11  ;;  %v6846_v44 = vpack.c.bf16 %v3178_v43, %v3176_v36  ;;  %v10935_v53 = vmul.f32 %v13174_v22, %v3356_v0  ;;  %v13212_v11 = vld [vmem:[#allocation140_spill] sm:$0xff]  ;;  %v6852_v43 = vpack.c.bf16 %v3276_v52, %v3274_v3  ;;  %v13233_v63 = vld [vmem:[#allocation142_spill] sm:$0xff]  ;;  %vm13247_vm8 = vmmov %vm13216_vm1  ;;  %vm13282_vm12 = vcmask 138240  }
 0x72b   :  { %6845 = vmatprep.subr.bf16.mxu1 %v6844_v6  ;;  %6961 = vmatprep.subr.bf16.mxu0 %v13210_v23  ;;  %v13213_v6 = vld [vmem:[#allocation130_spill] sm:$0xff]  ;;  %v4192_v36 = vsel %vm13216_vm1, %v13199_v7, %v13200_v5  ;;  %v10949_v4 = vmul.f32 %v13144_v61, %v4220_v20  ;;  %v13217_v0 = vld [vmem:[#allocation164_spill] sm:$0xff]  ;;  %v10957_v39 = vmul.f32 %v13177_v40, %v3335_v28  ;;  %v10968_v23 = vpop.permute.xlu1 %3421  ;;  %vm13274_vm4 = vmmov %vm13216_vm1 }
 0x72c   :  { %v4090_v47 = vsel %vm13214_vm13, %v13213_v6, %v13212_v11  ;;  %v4118_v15 = vsel %vm13215_vm2, %v13212_v11, %v13213_v6  ;;  %3627 = vrot.lane.b32.xlu1 %v13029_v46, %s7389_s18  ;;  %v3234_v45 = vsel %vm179_vm6, %v13218_v9, %v13217_v0  ;;  %3629 = vrot.lane.b32.xlu0 %v13092_v56, %s7389_s18  ;;  %v13219_v7 = vld [vmem:[#allocation188_spill] sm:$0xff]  ;;  %v13222_v11 = vld [vmem:[#allocation15_spill] sm:$0xff]  ;;  %vm13275_vm5 = vmmov %vm13216_vm1 }
 0x72d   :  { %v10960_v3 = vmul.f32 %v13068_v21, %v4089_v12  ;;  %v10963_v52 = vmul.f32 %v13077_v51, %v4117_v35  ;;  %v13220_v5 = vld [vmem:[#allocation192_spill] sm:$0xff]  ;;  %v10977_v28 = vmul.f32 %v13077_v51, %v4118_v15  ;;  %v13225_v12 = vld [vmem:[#allocation153_spill] sm:$0xff]  ;;  %v3255_v15 = vsel %vm179_vm6, %v13217_v0, %v13218_v9  ;;  %v13280_v17 = vld [vmem:[#allocation46_spill] sm:$0xff] }
 0x72e   :  { %6847 = vmatpush1.bf16.msra.mxu1 %v6846_v44  ;;  %v13221_v20 = vpack.c.bf16 %v13219_v7, %v13220_v5  ;;  %v13223_v6 = vld [vmem:[#allocation244_spill] sm:$0xff]  ;;  %v10974_v44 = vmul.f32 %v13068_v21, %v4090_v47  ;;  %v3233_v35 = vsel %vm179_vm6, %v13226_v33, %v13225_v12  ;;  %v3357_v7 = vsel %vm206_vm7, %v13228_v48, %v13227_v24  ;;  %v10985_v5 = vpop.permute.xlu0 %4393  ;;  %vm13283_vm13 = vmmov %vm13215_vm2 }
 0x72f   :  { %v13224_v14 = vpack.c.bf16 %v13222_v11, %v13223_v6  ;;  %13229 = vst [vmem:[#allocation76_spill] sm:$0xff] %v10985_v5  ;;  %v3336_v47 = vsel %vm206_vm7, %v13227_v24, %v13228_v48  ;;  %v3280_v6 = vmul.f32 %v13195_v50, %v3234_v45  ;;  %v13237_v48 = vld [vmem:[#allocation14_spill] sm:$0xff]  ;;  %v13238_v24 = vld [vmem:[#allocation243_spill] sm:$0xff]  ;;  %v3254_v9 = vsel %vm179_vm6, %v13225_v12, %v13226_v33  ;;  %v13245_v0 = vld [vmem:[#allocation204_spill] sm:$0xff] }
 0x730   :  { %6963 = vmatpush1.bf16.msra.mxu0 %v13221_v20  ;;  %v13230_v20 = vld [vmem:[#allocation193_spill] sm:$0xff]  ;;  %5108 = vrot.lane.b32.xlu1 %v13172_v54, %s12554_s29  ;;  %v3278_v45 = vmul.f32 %v13195_v50, %v3233_v35  ;;  %v11020_v5 = vmul.f32 %v13174_v22, %v3357_v7  ;;  %v11033_v33 = vmul.f32 %v13177_v40, %v3336_v47  ;;  %v13244_v7 = vld [vmem:[#allocation199_spill] sm:$0xff] }
 0x731   :  { %6849 = vmatprep.subr.bf16.mxu1 %v13224_v14  ;;  %v13232_v11 = vpack.c.bf16 %v13230_v20, %v13231_v1  ;;  %v10991_v14 = vmul.f32 %v9996_v8, %v4192_v36  ;;  %v4193_v1 = vsel %vm13235_vm3, %v13234_v26, %v13233_v63  ;;  %v13236_v36 = vld [vmem:[#allocation226_spill] sm:$0xff]  ;;  %5110 = vrot.lane.b32.xlu0 %v13161_v29, %s12554_s29  ;;  %vm13295_vm3 = vcmask 793600  }
 0x732   :  { %v3235_v20 = vsel %vm179_vm6, %v13236_v36, %v10658_v59  ;;  %v3279_v12 = vmul.f32 %v13192_v60, %v3255_v15  ;;  %v11036_v35 = vpop.permute.xlu0 %4496  ;;  %v13246_v54 = vpack.c.bf16 %v13244_v7, %v13245_v0  ;;  %v6856_v15 = vpack.c.bf16 %v3280_v6, %v3278_v45  ;;  %v13251_v6 = vld [vmem:[#allocation167_spill] sm:$0xff]  ;;  %v13254_v45 = vld [vmem:[#allocation196_spill] sm:$0xff] }
 0x733   :  { %6965 = vmatprep.subr.bf16.mxu0 %v13232_v11  ;;  %v13239_v11 = vpack.c.bf16 %v13237_v48, %v13238_v24  ;;  %v13242_v48 = vpack.c.bf16 %v13240_v55, %v13241_v49  ;;  %v11028_v24 = vpop.permute.xlu1 %4902  ;;  %13243 = vst [vmem:[#allocation49_spill] sm:$0xff] %v11036_v35  ;;  %v11046_v49 = vsel %vm13247_vm8, %v13233_v63, %v13234_v26  ;;  %v6585_v26 = vld [vmem:[%s12108_s1 + $0x2a] sm:$0x3]  ;;  %vm13296_vm8 = vmmov %vm13295_vm3 }
 0x734   :  { %v3282_v47 = vmul.f32 %v13195_v50, %v3235_v20  ;;  %5112 = vrot.lane.b32.xlu1 %v9670_v37, %s12554_s29  ;;  %v3277_v0 = vmul.f32 %v13192_v60, %v3254_v9  ;;  %v5294_v50 = vld [vmem:[#allocation6] sm:$0xff] }
 0x735   :  { %6851 = vmatpush1.bf16.msra.mxu1 %v13239_v11  ;;  %6967 = vmatpush1.bf16.msra.mxu0 %v13242_v48  ;;  %v13249_v48 = vld [vmem:[#allocation12_spill] sm:$0xff]  ;;  %v13253_v20 = vld [vmem:[#allocation13_spill] sm:$0xff]  ;;  %v13255_v11 = vld [vmem:[#allocation202_spill] sm:$0xff] }
 0x736   :  { %6853 = vmatprep.subr.bf16.mxu1 %v6852_v43  ;;  %6969 = vmatprep.subr.bf16.mxu0 %v13246_v54  ;;  %v3256_v43 = vsel %vm179_vm6, %v10658_v59, %v13236_v36  ;;  %v11055_v54 = vmul.f32 %v9996_v8, %v4193_v1  ;;  %v11059_v7 = vrot.slane %v6570_v10, %v13249_v48  ;;  %v13252_v1 = vld [vmem:[#allocation166_spill] sm:$0xff]  ;;  %v11086_v63 = vpop.permute.xlu0 %4599  ;;  %v13258_v37 = vld [vmem:[#allocation217_spill] sm:$0xff]  ;;  %vm13264_vm6 = vmmov %vm13215_vm2 }
 0x737   :  { %5114 = vrot.lane.b32.xlu0 %v9750_v18, %s12554_s29  ;;  %v13250_v59 = vpack.c.bf16 %v10875_v62, %v10891_v42  ;;  %v3358_v36 = vsel %vm206_vm7, %v13252_v1, %v13251_v6  ;;  %v11075_v9 = vrot.slane %v6570_v10, %v13253_v20  ;;  %v13256_v55 = vpack.c.bf16 %v13254_v45, %v13255_v11  ;;  %v11080_v35 = vpop.permute.xlu1 %4906  ;;  %v13259_v18 = vld [vmem:[#allocation210_spill] sm:$0xff] }
 0x738   :  { %13248 = vst [vmem:[#allocation20_spill] sm:$0xff] %v11055_v54  ;;  %v6858_v62 = vpack.c.bf16 %v3279_v12, %v3277_v0  ;;  %v3337_v42 = vsel %vm206_vm7, %v13251_v6, %v13252_v1  ;;  %13257 = vst [vmem:[#allocation19_spill] sm:$0xff] %v11086_v63  ;;  %v13260_v10 = vpack.c.bf16 %v13258_v37, %v13259_v18  ;;  %3610 = vrot.lane.b32.xlu1 %v13150_v31, %s7389_s18  ;;  %v13262_v37 = vld [vmem:[#allocation170_spill] sm:$0xff]  ;;  %v13263_v18 = vld [vmem:[#allocation173_spill] sm:$0xff] }
 0x739   :  { %6855 = vmatpush1.bf16.msra.mxu1 %v13250_v59  ;;  %6971 = vmatpush1.bf16.msra.mxu0 %v13256_v55  ;;  %v3281_v59 = vmul.f32 %v13192_v60, %v3256_v43  ;;  %v6868_v11 = vpack.c.bf16 %v11033_v33, %v10957_v39  ;;  %v11094_v55 = vrot.slane %v6585_v26, %v13249_v48  ;;  %v13261_v60 = vld [vmem:[#allocation247_spill] sm:$0xff] }
 0x73a   :  { %6857 = vmatprep.subr.bf16.mxu1 %v6856_v15  ;;  %6973 = vmatprep.subr.bf16.mxu0 %v13260_v10  ;;  %v11097_v12 = vrot.slane %v6585_v26, %v13253_v20  ;;  %v6860_v43 = vpack.c.bf16 %v13261_v60, %v3282_v47  ;;  %v11103_v15 = vmul.f32 %v13174_v22, %v3358_v36  ;;  %v13266_v26 = vld [vmem:[#allocation231_spill] sm:$0xff]  ;;  %v13270_v36 = vld [vmem:[#allocation208_spill] sm:$0xff]  ;;  %v11137_v31 = vpop.permute.xlu0 %4702 }
 0x73b   :  { %v4091_v0 = vsel %vm13264_vm6, %v13263_v18, %v13262_v37  ;;  %v4119_v39 = vsel %vm13265_vm9, %v13262_v37, %v13263_v18  ;;  %3612 = vrot.lane.b32.xlu0 %v9245_v32, %s7389_s18  ;;  %v11114_v33 = vmul.f32 %v13177_v40, %v3337_v42  ;;  %v3359_v47 = vsel %vm206_vm7, %v10701_v13, %v13266_v26  ;;  %v13269_v1 = vld [vmem:[#allocation215_spill] sm:$0xff]  ;;  %v11125_v10 = vpop.permute.xlu1 %3404  ;;  %v13272_v60 = vld [vmem:[#allocation172_spill] sm:$0xff]  ;;  %v13276_v18 = vld [vmem:[#allocation246_spill] sm:$0xff] }
 0x73c   :  { %5850 = vmatmul.mubr.f32.vlgmr.msra.gmra.mrb[14].mxu1 %v5294_v50  ;;  %v13267_v50 = vld [vmem:[#allocation221_spill] sm:$0xff]  ;;  %v13271_v45 = vpack.c.bf16 %v13269_v1, %v13270_v36  ;;  %v6862_v63 = vpack.c.bf16 %v13276_v18, %v3281_v59  ;;  %v3338_v32 = vsel %vm206_vm7, %v13266_v26, %v10701_v13  ;;  %v4144_v54 = vmul.f32 %v13077_v51, %v4119_v39  ;;  %v13284_v13 = vld [vmem:[#allocation60_spill] sm:$0xff]  ;;  %v6586_v26 = vld [vmem:[%s12108_s1 + $0x2c] sm:$0x3] }
 0x73d   :  { %6859 = vmatpush1.bf16.msra.mxu1 %v6858_v62  ;;  %v4120_v6 = vsel %vm13268_vm10, %v10862_v34, %v13267_v50  ;;  %v13273_v62 = vld [vmem:[#allocation175_spill] sm:$0xff]  ;;  %v13277_v1 = vld [vmem:[#allocation29_spill] sm:$0xff]  ;;  %v4092_v59 = vsel %vm13283_vm13, %v13267_v50, %v10862_v34  ;;  %3631 = vrot.lane.b32.xlu1 %v13284_v13, %s7389_s18  ;;  %vm13285_vm7 = vmmov %vm13282_vm12  ;;  %v11161_v39 = vmul.f32 %v13174_v22, %v3359_v47  ;;  %vm13313_vm13 = vcmask 1031168  }
 0x73e   :  { %6975 = vmatpush1.bf16.msra.mxu0 %v13271_v45  ;;  %6861 = vmatprep.subr.bf16.mxu1 %v6860_v43  ;;  %v4194_v42 = vsel %vm13274_vm4, %v13273_v62, %v13272_v60  ;;  %v4222_v37 = vsel %vm13275_vm5, %v13272_v60, %v13273_v62  ;;  %v13278_v36 = vld [vmem:[#allocation37_spill] sm:$0xff]  ;;  %v11143_v43 = vmul.f32 %v13068_v21, %v4091_v0  ;;  %vm13291_vm2 = vmmov %vm13285_vm7 }
 0x73f   :  { %v13279_v45 = vpack.c.bf16 %v13277_v1, %v13278_v36  ;;  %v3436_v60 = vsel %vm13282_vm12, %v13281_v58, %v13280_v17  ;;  %v3457_v0 = vsel %vm13285_vm7, %v13280_v17, %v13281_v58  ;;  %v4146_v62 = vmul.f32 %v13077_v51, %v4120_v6  ;;  %3633 = vrot.lane.b32.xlu0 %v9235_v16, %s7389_s18  ;;  %v13286_v1 = vld [vmem:[#allocation203_spill] sm:$0xff]  ;;  %v3426_v58 = vpop.permute.xlu1 %3425  ;;  %v11183_v6 = vpop.permute.xlu0 %4805  ;;  %vm13293_vm1 = vmmov %vm13291_vm2 }
 0x740   :  { %v11167_v34 = vmul.f32 %v9996_v8, %v4194_v42  ;;  %v11170_v50 = vmul.f32 %v13144_v61, %v4222_v37  ;;  %v3385_v18 = vmul.f32 %v13177_v40, %v3338_v32  ;;  %v13287_v36 = vld [vmem:[#allocation67_spill] sm:$0xff]  ;;  %v13289_v51 = vpack.c.bf16 %v10809_v25, %v13203_v19  ;;  %v13294_v37 = vld [vmem:[#allocation156_spill] sm:$0xff]  ;;  %vm13300_vm6 = vmmov %vm13293_vm1 }
 0x741   :  { %6977 = vmatprep.subr.bf16.mxu0 %v13279_v45  ;;  %6863 = vmatpush1.bf16.msra.mxu1 %v6862_v63  ;;  %v13288_v17 = vpack.c.bf16 %v13286_v1, %v13287_v36  ;;  %v4145_v22 = vmul.f32 %v13068_v21, %v4092_v59  ;;  %v13290_v63 = vld [vmem:[#allocation18_spill] sm:$0xff]  ;;  %v13292_v32 = vpack.c.bf16 %v10977_v28, %v10963_v52  ;;  %v13298_v59 = vld [vmem:[#allocation128_spill] sm:$0xff]  ;;  %vm13302_vm9 = vmmov %vm13293_vm1  ;;  %vm13323_vm7 = vcmask 932864  }
 0x742   :  { %6865 = vmatprep.subr.bf16.mxu1 %v13289_v51  ;;  %v3435_v47 = vsel %vm13291_vm2, %v10968_v23, %v13290_v63  ;;  %v11189_v40 = vrot.slane %v6586_v26, %v13249_v48  ;;  %v11192_v42 = vrot.slane %v6586_v26, %v13253_v20  ;;  %v11195_v25 = vmul.f32 %v11059_v7, %v3457_v0  ;;  %v13299_v26 = vld [vmem:[#allocation99_spill] sm:$0xff]  ;;  %vm13303_vm10 = vmmov %vm13293_vm1 }
 0x743   :  { %6979 = vmatpush1.bf16.msra.mxu0 %v13288_v17  ;;  %v3478_v21 = vmul.f32 %v11075_v9, %v3436_v60  ;;  %v3456_v19 = vsel %vm13293_vm1, %v13290_v63, %v10968_v23  ;;  %v4915_v52 = vsel %vm13295_vm3, %v11028_v24, %v13294_v37  ;;  %5191 = vrot.lane.b32.xlu1 %v13029_v46, %s12555_s11  ;;  %v4909_v36 = vpop.permute.xlu0 %4908  ;;  %vm13304_vm4 = vmmov %vm13295_vm3  ;;  %v13306_v17 = vld [vmem:[#allocation16_spill] sm:$0xff] }
 0x744   :  { %6981 = vmatprep.subr.bf16.mxu0 %v13292_v32  ;;  %v6874_v28 = vpack.c.bf16 %v11161_v39, %v11103_v15  ;;  %v4943_v45 = vsel %vm13296_vm8, %v13294_v37, %v11028_v24  ;;  %5193 = vrot.lane.b32.xlu0 %v13025_v57, %s12555_s11  ;;  %v13297_v23 = vpack.c.bf16 %v10800_v27, %v13196_v30  ;;  %v4986_v39 = vpop.permute.xlu1 %4985  ;;  %vm13305_vm5 = vmmov %vm13295_vm3 }
 0x745   :  { %v6984_v60 = vpack.c.bf16 %v4146_v62, %v4144_v54  ;;  %v3438_v0 = vsel %vm13300_vm6, %v13299_v26, %v13298_v59  ;;  %v3476_v1 = vmul.f32 %v11075_v9, %v3435_v47  ;;  %v13301_v15 = vpack.c.bf16 %v10974_v44, %v10960_v3  ;;  %v5298_v3 = vld [vmem:[#allocation6 + $0x20] sm:$0xff]  ;;  %vm13308_vm12 = vmmov %vm13293_vm1 }
 0x746   :  { %6867 = vmatpush1.bf16.msra.mxu1 %v13297_v23  ;;  %v6872_v24 = vpack.c.bf16 %v3385_v18, %v11114_v33  ;;  %v11227_v27 = vsel %vm13302_vm9, %v13298_v59, %v13299_v26  ;;  %v6986_v30 = vpack.c.bf16 %v4145_v22, %v11143_v43  ;;  %v11231_v54 = vmul.f32 %v11059_v7, %v3456_v19  ;;  %v5310_v18 = vld [vmem:[#allocation6 + $0x80] sm:$0xff]  ;;  %v5321_v59 = vld [vmem:[#allocation6 + $0xd8] sm:$0xff]  ;;  %vm13326_vm2 = vmmov %vm13313_vm13 }
 0x747   :  { %6983 = vmatpush1.bf16.msra.mxu0 %v13301_v15  ;;  %6869 = vmatprep.subr.bf16.mxu1 %v6868_v11  ;;  %v11234_v62 = vmul.f32 %v11094_v55, %v4915_v52  ;;  %v11237_v44 = vmul.f32 %v11097_v12, %v4943_v45  ;;  %v3437_v11 = vsel %vm13303_vm10, %v3426_v58, %v11125_v10  ;;  %v13310_v23 = vld [vmem:[#allocation229_spill] sm:$0xff]  ;;  %vm13327_vm3 = vmmov %vm13293_vm1  ;;  %v13452_v52 = vld [vmem:[#allocation86_spill] sm:$0xff] }
 0x748   :  { %6985 = vmatprep.subr.bf16.mxu0 %v6984_v60  ;;  %v4916_v33 = vsel %vm13304_vm4, %v11080_v35, %v4909_v36  ;;  %v4944_v43 = vsel %vm13305_vm5, %v4909_v36, %v11080_v35  ;;  %5195 = vrot.lane.b32.xlu1 %v13092_v56, %s12555_s11  ;;  %v5013_v51 = vsel %vm654_vm15, %v4986_v39, %v13306_v17  ;;  %v4990_v32 = vpop.permute.xlu1 %4989  ;;  %vm13328_vm8 = vmmov %vm13293_vm1  ;;  %vm13339_vm5 = vcmask 924672  }
 0x749   :  { %v11250_v22 = vmul.f32 %v11094_v55, %v4916_v33  ;;  %v11253_v63 = vmul.f32 %v11097_v12, %v4944_v43  ;;  %5197 = vrot.lane.b32.xlu0 %v13075_v2, %s12555_s11  ;;  %v13307_v47 = vpack.c.bf16 %v11020_v5, %v10935_v53  ;;  %v3458_v56 = vsel %vm13308_vm12, %v11125_v10, %v3426_v58  ;;  %v4992_v2 = vpop.permute.xlu0 %4991  ;;  %v5309_v53 = vld [vmem:[#allocation6 + $0x78] sm:$0xff]  ;;  %v13314_v43 = vld [vmem:[#allocation50_spill] sm:$0xff]  ;;  %vm13329_vm6 = vmmov %vm13293_vm1 }
 0x74a   :  { %v5041_v35 = vsel %vm654_vm15, %v13306_v17, %v4986_v39  ;;  %6064 = vmatmul.mubr.f32.vlgmr.msra.gmra.mrb[6].mxu0 %v5298_v3  ;;  %v6876_v19 = vpack.c.bf16 %v3478_v21, %v3476_v1  ;;  %v3480_v37 = vmul.f32 %v11075_v9, %v3437_v11  ;;  %v11270_v10 = vmul.f32 %v11189_v40, %v5013_v51  ;;  %v13309_v21 = vld [vmem:[#allocation169_spill] sm:$0xff]  ;;  %v5320_v17 = vld [vmem:[#allocation6 + $0xd0] sm:$0xff]  ;;  %vm13331_vm9 = vmmov %vm13323_vm7 }
 0x74b   :  { %6871 = vmatpush1.bf16.msra.mxu1 %v13307_v47  ;;  %6987 = vmatpush1.bf16.msra.mxu0 %v6986_v30  ;;  %v5014_v58 = vsel %vm654_vm15, %v4990_v32, %v4992_v2  ;;  %v5042_v45 = vsel %vm654_vm15, %v4992_v2, %v4990_v32  ;;  %v13311_v60 = vpack.c.bf16 %v13309_v21, %v13310_v23  ;;  %v13317_v47 = vld [vmem:[#allocation42_spill] sm:$0xff]  ;;  %v5332_v2 = vld [vmem:[#allocation6 + $0x130] sm:$0xff]  ;;  %v13324_v21 = vld [vmem:[#allocation20_spill] sm:$0xff] }
 0x74c   :  { %6873 = vmatprep.subr.bf16.mxu1 %v6872_v24  ;;  %6069 = vmatprep.mubr.f32.mxu0 %v5310_v18  ;;  %v11280_v26 = vmul.f32 %v11192_v42, %v5041_v35  ;;  %v11283_v1 = vmul.f32 %v11189_v40, %v5014_v58  ;;  %v11286_v15 = vmul.f32 %v11192_v42, %v5042_v45  ;;  %v13312_v24 = vld [vmem:[#allocation227_spill] sm:$0xff]  ;;  %v3409_v3 = vpop.permute.xlu1 %3408  ;;  %v13315_v18 = vld [vmem:[#allocation228_spill] sm:$0xff]  ;;  %v13320_v32 = vld [vmem:[#allocation74_spill] sm:$0xff] }
 0x74d   :  { %6989 = vmatprep.subr.bf16.mxu0 %v13311_v60  ;;  %3614 = vrot.lane.b32.xlu1 %v13044_v41, %s7389_s18  ;;  %v3482_v39 = vmul.f32 %v11075_v9, %v3438_v0  ;;  %v4223_v30 = vsel %vm13313_vm13, %v10894_v38, %v13312_v24  ;;  %v6878_v36 = vpack.c.bf16 %v11195_v25, %v11231_v54  ;;  %v3411_v0 = vpop.permute.xlu0 %3410  ;;  %v13322_v58 = vld [vmem:[#allocation115_spill] sm:$0xff]  ;;  %vm13334_vm10 = vmmov %vm13323_vm7 }
 0x74e   :  { %3616 = vrot.lane.b32.xlu0 %v13161_v29, %s7389_s18  ;;  %6070 = vmatmul.mubr.f32.gmra.mrb[8].mxu0 %v5309_v53  ;;  %v3479_v11 = vmul.f32 %v11059_v7, %v3458_v56  ;;  %v6994_v25 = vpack.c.bf16 %v10991_v14, %v13317_v47  ;;  %v4245_v54 = vmul.f32 %v13144_v61, %v11046_v49  ;;  %v13318_v56 = vld [vmem:[#allocation72_spill] sm:$0xff]  ;;  %v13325_v49 = vld [vmem:[#allocation101_spill] sm:$0xff]  ;;  %vm13336_vm4 = vmmov %vm13323_vm7 }
 0x74f   :  { %6875 = vmatpush1.bf16.msra.mxu1 %v6874_v28  ;;  %v13316_v28 = vpack.c.bf16 %v13314_v43, %v13315_v18  ;;  %6075 = vmatprep.mubr.f32.mxu0 %v5321_v59  ;;  %v13319_v35 = vpack.c.bf16 %v10949_v4, %v13318_v56  ;;  %v13321_v53 = vld [vmem:[#allocation112_spill] sm:$0xff]  ;;  %v6998_v23 = vpack.c.bf16 %v11167_v34, %v13324_v21  ;;  %vm13346_vm12 = vmmov %vm13336_vm4  ;;  %v13451_v51 = vld [vmem:[#allocation55_spill] sm:$0xff] }
 0x750   :  { %6877 = vmatprep.subr.bf16.mxu1 %v6876_v19  ;;  %v6880_v19 = vpack.c.bf16 %v3482_v39, %v3480_v37  ;;  %v4295_v45 = vsel %vm13323_vm7, %v13322_v58, %v13321_v53  ;;  %v3481_v14 = vmul.f32 %v11059_v7, %v11227_v27  ;;  %v4195_v4 = vsel %vm13326_vm2, %v13312_v24, %v10894_v38  ;;  %v3430_v60 = vpop.permute.xlu1 %3429  ;;  %v13335_v56 = vld [vmem:[#allocation232_spill] sm:$0xff]  ;;  %vm13347_vm13 = vmmov %vm13336_vm4 }
 0x751   :  { %6991 = vmatpush1.bf16.msra.mxu0 %v13316_v28  ;;  %3635 = vrot.lane.b32.xlu1 %v13320_v32, %s7389_s18  ;;  %v4249_v37 = vmul.f32 %v13144_v61, %v4223_v30  ;;  %v6996_v59 = vpack.c.bf16 %v11170_v50, %v4245_v54  ;;  %v3439_v34 = vsel %vm13293_vm1, %v3430_v60, %v3409_v3  ;;  %v3432_v43 = vpop.permute.xlu0 %3431  ;;  %v5343_v50 = vld [vmem:[#allocation6 + $0x188] sm:$0xff]  ;;  %vm13350_vm7 = vmmov %vm13336_vm4 }
 0x752   :  { %6993 = vmatprep.subr.bf16.mxu0 %v13319_v35  ;;  %3637 = vrot.lane.b32.xlu0 %v13325_v49, %s7389_s18  ;;  %v6882_v39 = vpack.c.bf16 %v3481_v14, %v3479_v11  ;;  %v3460_v27 = vsel %vm13327_vm3, %v3409_v3, %v3430_v60  ;;  %v3484_v38 = vmul.f32 %v11075_v9, %v3439_v34  ;;  %v13330_v3 = vld [vmem:[#allocation56_spill] sm:$0xff]  ;;  %v5342_v14 = vld [vmem:[#allocation6 + $0x180] sm:$0xff]  ;;  %v13341_v34 = vld [vmem:[#allocation207_spill] sm:$0xff] }
 0x753   :  { %6879 = vmatpush1.bf16.msra.mxu1 %v6878_v36  ;;  %6076 = vmatmul.mubr.f32.gmra.mrb[10].mxu0 %v5320_v17  ;;  %v5331_v36 = vld [vmem:[#allocation6 + $0x128] sm:$0xff]  ;;  %v3483_v18 = vmul.f32 %v11059_v7, %v3460_v27  ;;  %v3440_v61 = vsel %vm13328_vm8, %v3432_v43, %v3411_v0  ;;  %v3461_v24 = vsel %vm13329_vm6, %v3411_v0, %v3432_v43  ;;  %v5306_v17 = vld [vmem:[#allocation6 + $0x60] sm:$0xff]  ;;  %v13332_v0 = vld [vmem:[#allocation144_spill] sm:$0xff] }
 0x754   :  { %6881 = vmatprep.subr.bf16.mxu1 %v6880_v19  ;;  %6081 = vmatprep.mubr.f32.mxu0 %v5332_v2  ;;  %v4248_v30 = vmul.f32 %v9996_v8, %v4195_v4  ;;  %v3485_v11 = vmul.f32 %v11059_v7, %v3461_v24  ;;  %v3486_v28 = vmul.f32 %v11075_v9, %v3440_v61  ;;  %v4994_v8 = vpop.permute.xlu1 %4993  ;;  %v13342_v27 = vld [vmem:[#allocation230_spill] sm:$0xff]  ;;  %vm13351_vm2 = vmmov %vm13336_vm4 }
 0x755   :  { %6995 = vmatpush1.bf16.msra.mxu0 %v6994_v25  ;;  %5199 = vrot.lane.b32.xlu1 %v13284_v13, %s12555_s11  ;;  %v4323_v47 = vsel %vm13331_vm9, %v13321_v53, %v13322_v58  ;;  %v13333_v25 = vld [vmem:[#allocation134_spill] sm:$0xff]  ;;  %v7000_v35 = vpack.c.bf16 %v13335_v56, %v4249_v37  ;;  %v4996_v2 = vpop.permute.xlu0 %4995  ;;  %v13337_v53 = vld [vmem:[#allocation96_spill] sm:$0xff]  ;;  %vm13359_vm1 = vmmov %vm13339_vm5 }
 0x756   :  { %6997 = vmatprep.subr.bf16.mxu0 %v6996_v59  ;;  %5201 = vrot.lane.b32.xlu0 %v13330_v3, %s12555_s11  ;;  %v4296_v54 = vsel %vm13334_vm10, %v13333_v25, %v13332_v0  ;;  %v4324_v13 = vsel %vm13336_vm4, %v13332_v0, %v13333_v25  ;;  %v6886_v19 = vpack.c.bf16 %v3485_v11, %v3483_v18  ;;  %v13338_v58 = vld [vmem:[#allocation94_spill] sm:$0xff]  ;;  %v5354_v18 = vld [vmem:[#allocation6 + $0x1e0] sm:$0xff]  ;;  %v5353_v0 = vld [vmem:[#allocation6 + $0x1d8] sm:$0xff]  ;;  %vm13367_vm10 = vcmask 130048  }
 0x757   :  { %6883 = vmatpush1.bf16.msra.mxu1 %v6882_v39  ;;  %6082 = vmatmul.mubr.f32.gmra.mrb[12].mxu0 %v5331_v36  ;;  %v6884_v21 = vpack.c.bf16 %v3486_v28, %v3484_v38  ;;  %v11353_v4 = vsel %vm13339_vm5, %v13338_v58, %v13337_v53  ;;  %v5015_v60 = vsel %vm654_vm15, %v4994_v8, %v4996_v2  ;;  %v13340_v59 = vld [vmem:[#allocation206_spill] sm:$0xff]  ;;  %v13343_v36 = vld [vmem:[#allocation65_spill] sm:$0xff]  ;;  %v13349_v28 = vld [vmem:[#allocation235_spill] sm:$0xff]  ;;  %vm13371_vm5 = vcmask 916480  }
 0x758   :  { %6087 = vmatprep.mubr.f32.mxu0 %v5343_v50  ;;  %v5043_v37 = vsel %vm654_vm15, %v4996_v2, %v4994_v8  ;;  %5855 = vmatprep.mubr.f32.mxu1 %v5306_v17  ;;  %v11358_v39 = vmul.f32 %v13340_v59, %v4295_v45  ;;  %v7002_v43 = vpack.c.bf16 %v13342_v27, %v4248_v30  ;;  %v13344_v24 = vld [vmem:[#allocation174_spill] sm:$0xff]  ;;  %v13345_v50 = vld [vmem:[#allocation177_spill] sm:$0xff]  ;;  %v4998_v11 = vpop.permute.xlu1 %4997  ;;  %v5305_v25 = vld [vmem:[#allocation6 + $0x58] sm:$0xff] }
 0x759   :  { %6999 = vmatpush1.bf16.msra.mxu0 %v6998_v23  ;;  %v4346_v23 = vmul.f32 %v13341_v34, %v4323_v47  ;;  %5203 = vrot.lane.b32.xlu1 %v9235_v16, %s12555_s11  ;;  %v4347_v38 = vmul.f32 %v13340_v59, %v4296_v54  ;;  %v4348_v61 = vmul.f32 %v13341_v34, %v4324_v13  ;;  %v13348_v16 = vld [vmem:[#allocation88_spill] sm:$0xff]  ;;  %v5000_v47 = vpop.permute.xlu0 %4999  ;;  %vm13363_vm8 = vmmov %vm13359_vm1 }
 0x75a   :  { %7001 = vmatprep.subr.bf16.mxu0 %v7000_v35  ;;  %5205 = vrot.lane.b32.xlu0 %v13343_v36, %s12555_s11  ;;  %v4297_v45 = vsel %vm13346_vm12, %v13345_v50, %v13344_v24  ;;  %v4325_v30 = vsel %vm13347_vm13, %v13344_v24, %v13345_v50  ;;  %v4298_v3 = vsel %vm13350_vm7, %v13349_v28, %v13348_v16  ;;  %v13352_v35 = vld [vmem:[#allocation157_spill] sm:$0xff]  ;;  %v13353_v13 = vld [vmem:[#allocation200_spill] sm:$0xff]  ;;  %v13357_v24 = vld [vmem:[#allocation114_spill] sm:$0xff] }
 0x75b   :  { %6885 = vmatprep.subr.bf16.mxu1 %v6884_v21  ;;  %6088 = vmatmul.mubr.f32.gmra.mrb[14].mxu0 %v5342_v14  ;;  %v4326_v17 = vsel %vm13351_vm2, %v13348_v16, %v13349_v28  ;;  %v11381_v54 = vmul.f32 %v11189_v40, %v5015_v60  ;;  %v5016_v8 = vsel %vm654_vm15, %v4998_v11, %v5000_v47  ;;  %v5365_v21 = vld [vmem:[#allocation6 + $0x238] sm:$0xff]  ;;  %v13355_v60 = vld [vmem:[#allocation147_spill] sm:$0xff]  ;;  %v13358_v50 = vld [vmem:[#allocation117_spill] sm:$0xff] }
 0x75c   :  { %6887 = vmatpush1.bf16.msra.mxu1 %v6886_v19  ;;  %v5044_v56 = vsel %vm654_vm15, %v5000_v47, %v4998_v11  ;;  %v13354_v2 = vpack.c.bf16 %v13352_v35, %v13353_v13  ;;  %6093 = vmatprep.mubr.f32.mxu0 %v5354_v18  ;;  %v11389_v14 = vmul.f32 %v11192_v42, %v5043_v37  ;;  %v5317_v36 = vld [vmem:[#allocation6 + $0xb8] sm:$0xff]  ;;  %v3413_v11 = vpop.permute.xlu1 %3412  ;;  %v6571_v28 = vld [vmem:[%s12108_s1 + $0xe] sm:$0x3]  ;;  %v13361_v35 = vld [vmem:[#allocation98_spill] sm:$0xff] }
 0x75d   :  { %7003 = vmatpush1.bf16.msra.mxu0 %v7002_v43  ;;  %v11392_v19 = vmul.f32 %v11189_v40, %v5016_v8  ;;  %v11395_v27 = vmul.f32 %v11192_v42, %v5044_v56  ;;  %3618 = vrot.lane.b32.xlu1 %v13355_v60, %s7389_s18  ;;  %v13356_v43 = vld [vmem:[#allocation131_spill] sm:$0xff]  ;;  %v4398_v18 = vsel %vm13359_vm1, %v13358_v50, %v13357_v24  ;;  %v13360_v56 = vld [vmem:[#allocation168_spill] sm:$0xff]  ;;  %vm13364_vm6 = vmmov %vm13327_vm3 }
 0x75e   :  { %7005 = vmatprep.subr.bf16.mxu0 %v13354_v2  ;;  %3639 = vrot.lane.b32.xlu0 %v13356_v43, %s7389_s18  ;;  %v4352_v37 = vmul.f32 %v13341_v34, %v4326_v17  ;;  %v7008_v16 = vpack.c.bf16 %v4348_v61, %v4346_v23  ;;  %v4351_v47 = vmul.f32 %v13340_v59, %v4298_v3  ;;  %v3434_v2 = vpop.permute.xlu0 %3433  ;;  %v5364_v17 = vld [vmem:[#allocation6 + $0x230] sm:$0xff]  ;;  %vm13365_vm9 = vmmov %vm13359_vm1 }
 0x75f   :  { %6094 = vmatmul.mubr.f32.gmra.mrb[16].mxu0 %v5353_v0  ;;  %5856 = vmatmul.mubr.f32.gmra.mrb[16].mxu1 %v5305_v25  ;;  %v13362_v13 = vpack.c.bf16 %v13360_v56, %v13361_v35  ;;  %v5316_v61 = vld [vmem:[#allocation6 + $0xb0] sm:$0xff]  ;;  %v7010_v33 = vpack.c.bf16 %v4347_v38, %v11358_v39  ;;  %v4349_v0 = vmul.f32 %v13340_v59, %v4297_v45  ;;  %v5301_v25 = vld [vmem:[#allocation6 + $0x38] sm:$0xff]  ;;  %v5327_v56 = vld [vmem:[#allocation6 + $0x108] sm:$0xff] }
 0x760   :  { %6099 = vmatprep.mubr.f32.mxu0 %v5365_v21  ;;  %v4350_v3 = vmul.f32 %v13341_v34, %v4325_v30  ;;  %5861 = vmatprep.mubr.f32.mxu1 %v5317_v36  ;;  %v3462_v8 = vsel %vm13327_vm3, %v3413_v11, %v3434_v2  ;;  %v11425_v21 = vrot.slane %v6571_v28, %v13249_v48  ;;  %v5328_v59 = vld [vmem:[#allocation6 + $0x110] sm:$0xff]  ;;  %v3504_v45 = vpop.permute.xlu1 %3503  ;;  %vm13368_vm4 = vmmov %vm13367_vm10 }
 0x761   :  { %7007 = vmatpush1.bf16.msra.mxu0 %v13362_v13  ;;  %3709 = vrot.lane.b32.xlu1 %v13025_v57, %s12546_s2  ;;  %v11428_v39 = vrot.slane %v6571_v28, %v13253_v20  ;;  %v4425_v34 = vsel %vm13363_vm8, %v13337_v53, %v13338_v58  ;;  %v3441_v38 = vsel %vm13364_vm6, %v3434_v2, %v3413_v11  ;;  %v5339_v11 = vld [vmem:[#allocation6 + $0x168] sm:$0xff]  ;;  %vm13375_vm12 = vmmov %vm13359_vm1  ;;  %v5300_v23 = vld [vmem:[#allocation6 + $0x30] sm:$0xff] }
 0x762   :  { %7009 = vmatprep.subr.bf16.mxu0 %v7008_v16  ;;  %3730 = vrot.lane.b32.xlu0 %v13029_v46, %s12546_s2  ;;  %v7012_v30 = vpack.c.bf16 %v4352_v37, %v4350_v3  ;;  %v4426_v57 = vsel %vm13365_vm9, %v13357_v24, %v13358_v50  ;;  %v13366_v46 = vld [vmem:[#allocation211_spill] sm:$0xff]  ;;  %v7014_v16 = vpack.c.bf16 %v4351_v47, %v4349_v0  ;;  %v3525_v28 = vpop.permute.xlu0 %3524  ;;  %vm13378_vm13 = vmmov %vm13359_vm1 }
 0x763   :  { %6100 = vmatmul.mubr.f32.gmra.mrb[18].mxu0 %v5364_v17  ;;  %5862 = vmatmul.mubr.f32.gmra.mrb[18].mxu1 %v5316_v61  ;;  %v11438_v36 = vmul.f32 %v13366_v46, %v4398_v18  ;;  %v3487_v53 = vmul.f32 %v11059_v7, %v3462_v8  ;;  %v3538_v58 = vsel %vm13367_vm10, %v3525_v28, %v3504_v45  ;;  %v13369_v7 = vld [vmem:[#allocation66_spill] sm:$0xff]  ;;  %v13372_v8 = vld [vmem:[#allocation213_spill] sm:$0xff]  ;;  %v13373_v17 = vld [vmem:[#allocation179_spill] sm:$0xff]  ;;  %vm13400_vm10 = vcmask 908288  }
 0x764   :  { %6170 = vmatprep.mubr.f32.mxu0 %v5301_v25  ;;  %v3559_v37 = vsel %vm13368_vm4, %v3504_v45, %v3525_v28  ;;  %5867 = vmatprep.mubr.f32.mxu1 %v5328_v59  ;;  %v3488_v35 = vmul.f32 %v11075_v9, %v3441_v38  ;;  %v3579_v50 = vmul.f32 %v11428_v39, %v3538_v58  ;;  %v5002_v2 = vpop.permute.xlu1 %5001  ;;  %v13374_v61 = vld [vmem:[#allocation176_spill] sm:$0xff]  ;;  %v5338_v25 = vld [vmem:[#allocation6 + $0x160] sm:$0xff]  ;;  %vm13379_vm7 = vmmov %vm13359_vm1 }
 0x765   :  { %7011 = vmatpush1.bf16.msra.mxu0 %v7010_v33  ;;  %v3578_v24 = vmul.f32 %v11425_v21, %v3559_v37  ;;  %5207 = vrot.lane.b32.xlu1 %v13320_v32, %s12555_s11  ;;  %v13370_v33 = vld [vmem:[#allocation90_spill] sm:$0xff]  ;;  %v4446_v47 = vmul.f32 %v13366_v46, %v11353_v4  ;;  %v4447_v9 = vmul.f32 %v13372_v8, %v4425_v34  ;;  %v13376_v59 = vld [vmem:[#allocation136_spill] sm:$0xff]  ;;  %v13377_v38 = vld [vmem:[#allocation145_spill] sm:$0xff] }
 0x766   :  { %7013 = vmatprep.subr.bf16.mxu0 %v7012_v30  ;;  %5209 = vrot.lane.b32.xlu0 %v13044_v41, %s12555_s11  ;;  %v11453_v18 = vsel %vm13371_vm5, %v13370_v33, %v13369_v7  ;;  %v4449_v13 = vmul.f32 %v13372_v8, %v4426_v57  ;;  %v4428_v32 = vsel %vm13375_vm12, %v13374_v61, %v13373_v17  ;;  %v5004_v41 = vpop.permute.xlu0 %5003  ;;  %v13380_v57 = vld [vmem:[#allocation17_spill] sm:$0xff]  ;;  %v13381_v28 = vld [vmem:[#allocation234_spill] sm:$0xff]  ;;  %vm13383_vm2 = vmmov %vm13371_vm5 }
 0x767   :  { %5868 = vmatmul.mubr.f32.gmra.mrb[20].mxu1 %v5327_v56  ;;  %v6890_v0 = vpack.c.bf16 %v3578_v24, %v3487_v53  ;;  %v6888_v3 = vpack.c.bf16 %v3579_v50, %v3488_v35  ;;  %v4427_v4 = vsel %vm13378_vm13, %v13377_v38, %v13376_v59  ;;  %v4400_v34 = vsel %vm13379_vm7, %v13373_v17, %v13374_v61  ;;  %v13384_v53 = vld [vmem:[#allocation51_spill] sm:$0xff]  ;;  %v13385_v58 = vld [vmem:[#allocation38_spill] sm:$0xff]  ;;  %vm13386_vm1 = vmmov %vm13383_vm2 }
 0x768   :  { %5873 = vmatprep.mubr.f32.mxu1 %v5339_v11  ;;  %v5017_v45 = vsel %vm654_vm15, %v5002_v2, %v5004_v41  ;;  %v5045_v30 = vsel %vm654_vm15, %v5004_v41, %v5002_v2  ;;  %v13382_v56 = vpack.c.bf16 %v13380_v57, %v13381_v28  ;;  %v4500_v37 = vsel %vm13386_vm1, %v13385_v58, %v13384_v53  ;;  %v5350_v35 = vld [vmem:[#allocation6 + $0x1c0] sm:$0xff]  ;;  %vm13387_vm3 = vmmov %vm13379_vm7 }
 0x769   :  { %7015 = vmatpush1.bf16.msra.mxu0 %v7014_v16  ;;  %v4527_v16 = vsel %vm13383_vm2, %v13369_v7, %v13370_v33  ;;  %v7022_v11 = vpack.c.bf16 %v11438_v36, %v4446_v47  ;;  %5211 = vrot.lane.b32.xlu1 %v13325_v49, %s12555_s11  ;;  %v4399_v24 = vsel %vm13387_vm3, %v13376_v59, %v13377_v38  ;;  %v5006_v7 = vpop.permute.xlu1 %5005  ;;  %v13388_v47 = vld [vmem:[#allocation245_spill] sm:$0xff]  ;;  %v13389_v49 = vld [vmem:[#allocation76_spill] sm:$0xff]  ;;  %vm13390_vm8 = vmmov %vm13387_vm3  ;;  %vm13410_vm7 = vcmask 130048  }
 0x76a   :  { %7017 = vmatprep.subr.bf16.mxu0 %v13382_v56  ;;  %5213 = vrot.lane.b32.xlu0 %v13161_v29, %s12555_s11  ;;  %v4453_v50 = vmul.f32 %v13372_v8, %v4428_v32  ;;  %v7020_v33 = vpack.c.bf16 %v4449_v13, %v4447_v9  ;;  %v4451_v2 = vmul.f32 %v13372_v8, %v4427_v4  ;;  %v13391_v29 = vld [vmem:[#allocation89_spill] sm:$0xff]  ;;  %v5008_v59 = vpop.permute.xlu0 %5007  ;;  %v5349_v38 = vld [vmem:[#allocation6 + $0x1b8] sm:$0xff]  ;;  %vm13394_vm6 = vmmov %vm13386_vm1 }
 0x76b   :  { %6889 = vmatprep.subr.bf16.mxu1 %v6888_v3  ;;  %5874 = vmatmul.mubr.f32.gmra.mrb[22].mxu1 %v5338_v25  ;;  %v4452_v36 = vmul.f32 %v13366_v46, %v4400_v34  ;;  %v4429_v17 = vsel %vm13390_vm8, %v13389_v49, %v13388_v47  ;;  %v13392_v61 = vld [vmem:[#allocation233_spill] sm:$0xff]  ;;  %v11497_v32 = vmul.f32 %v11189_v40, %v5017_v45  ;;  %v5361_v3 = vld [vmem:[#allocation6 + $0x218] sm:$0xff]  ;;  %vm13395_vm9 = vmmov %vm13387_vm3 }
 0x76c   :  { %6891 = vmatpush1.bf16.msra.mxu1 %v6890_v0  ;;  %v13393_v41 = vpack.c.bf16 %v13391_v29, %v13392_v61  ;;  %v5018_v9 = vsel %vm654_vm15, %v5006_v7, %v5008_v59  ;;  %v5046_v13 = vsel %vm654_vm15, %v5008_v59, %v5006_v7  ;;  %5879 = vmatprep.mubr.f32.mxu1 %v5350_v35  ;;  %v5721_v56 = vld [vmem:[%s12114_s7] sm:$0xff]  ;;  %v5360_v35 = vld [vmem:[#allocation6 + $0x210] sm:$0xff]  ;;  %vm13403_vm4 = vmmov %vm13386_vm1 }
 0x76d   :  { %v11502_v25 = vmul.f32 %v11192_v42, %v5045_v30  ;;  %v11505_v0 = vmul.f32 %v11189_v40, %v5018_v9  ;;  %v11508_v4 = vmul.f32 %v11192_v42, %v5046_v13  ;;  %5215 = vrot.lane.b32.xlu1 %v13356_v43, %s12555_s11  ;;  %v4528_v34 = vsel %vm13394_vm6, %v13384_v53, %v13385_v58  ;;  %v3506_v57 = vpop.permute.xlu1 %3505  ;;  %v13402_v59 = vld [vmem:[#allocation119_spill] sm:$0xff]  ;;  %vm13404_vm5 = vmmov %vm13386_vm1  ;;  %v13405_v9 = vld [vmem:[#allocation148_spill] sm:$0xff] }
 0x76e   :  { %7019 = vmatpush1.bf16.msra.mxu0 %v13393_v41  ;;  %5217 = vrot.lane.b32.xlu0 %v13355_v60, %s12555_s11  ;;  %v4401_v45 = vsel %vm13395_vm9, %v13388_v47, %v13389_v49  ;;  %v4455_v30 = vmul.f32 %v13372_v8, %v4429_v17  ;;  %v7024_v28 = vpack.c.bf16 %v4453_v50, %v4451_v2  ;;  %v5722_v60 = vld [vmem:[%s12114_s7 + $0x8] sm:$0xff]  ;;  %v3508_v58 = vpop.permute.xlu0 %3507  ;;  %v13396_v50 = vld [vmem:[#allocation214_spill] sm:$0xff]  ;;  %v13398_v47 = vld [vmem:[#allocation41_spill] sm:$0xff] }
 0x76f   :  { %7021 = vmatprep.subr.bf16.mxu0 %v7020_v33  ;;  %5880 = vmatmul.mubr.f32.gmra.mrb[24].mxu1 %v5349_v38  ;;  %v4450_v43 = vmul.f32 %v13366_v46, %v4399_v24  ;;  %v11534_v7 = vmul.f32 %v13396_v50, %v11453_v18  ;;  %v13397_v33 = vld [vmem:[#allocation216_spill] sm:$0xff]  ;;  %v13399_v49 = vld [vmem:[#allocation43_spill] sm:$0xff]  ;;  %v11543_v17 = vmul.f32 %v13396_v50, %v4500_v37  ;;  %v13406_v37 = vld [vmem:[#allocation137_spill] sm:$0xff] }
 0x770   :  { %5885 = vmatprep.mubr.f32.mxu1 %v5361_v3  ;;  %v4548_v2 = vmul.f32 %v13397_v33, %v4527_v16  ;;  %v11540_v24 = vsel %vm13400_vm10, %v13399_v49, %v13398_v47  ;;  %v4550_v29 = vmul.f32 %v13397_v33, %v4528_v34  ;;  %v4454_v41 = vmul.f32 %v13366_v46, %v4401_v45  ;;  %v13401_v18 = vld [vmem:[#allocation116_spill] sm:$0xff]  ;;  %vm13407_vm12 = vmmov %vm13386_vm1 }
 0x771   :  { %v7026_v61 = vpack.c.bf16 %v4452_v36, %v4450_v43  ;;  %5730 = vperm.xlu1 %7301, %v5721_v56   ;;  %v4501_v16 = vsel %vm13403_vm4, %v13402_v59, %v13401_v18  ;;  %v4529_v38 = vsel %vm13404_vm5, %v13401_v18, %v13402_v59  ;;  %v4502_v13 = vsel %vm13407_vm12, %v13406_v37, %v13405_v9  ;;  %v3527_v3 = vpop.permute.xlu1 %3526  ;;  %v5723_v46 = vld [vmem:[%s12114_s7 + $0x10] sm:$0xff]  ;;  %v5724_v36 = vld [vmem:[%s12114_s7 + $0x18] sm:$0xff]  ;;  %vm13409_vm13 = vmmov %vm13386_vm1 }
 0x772   :  { %7023 = vmatpush1.bf16.msra.mxu0 %v7022_v11  ;;  %v5297_v11 = vld [vmem:[#allocation6 + $0x18] sm:$0xff]  ;;  %5735 = vperm.xlu0 %7300, %v5722_v60   ;;  %v4530_v45 = vsel %vm13409_vm13, %v13405_v9, %v13406_v37  ;;  %v3539_v56 = vsel %vm13410_vm7, %v3527_v3, %v3506_v57  ;;  %vm13411_vm2 = vmmov %vm13410_vm7  ;;  %v3529_v43 = vpop.permute.xlu0 %3528 }
 0x773   :  { %7025 = vmatprep.subr.bf16.mxu0 %v7024_v28  ;;  %v13408_v28 = vld [vmem:[#allocation239_spill] sm:$0xff]  ;;  %5886 = vmatmul.mubr.f32.gmra.mrb[26].mxu1 %v5360_v35  ;;  %v3560_v60 = vsel %vm13411_vm2, %v3506_v57, %v3527_v3  ;;  %v3581_v18 = vmul.f32 %v11428_v39, %v3539_v56  ;;  %vm13412_vm1 = vmmov %vm13411_vm2  ;;  %v13414_v35 = vld [vmem:[#allocation238_spill] sm:$0xff]  ;;  %v7034_v57 = vpack.c.bf16 %v11543_v17, %v11534_v7 }
 0x774   :  { %v7028_v34 = vpack.c.bf16 %v13408_v28, %v4455_v30  ;;  %5956 = vmatprep.mubr.f32.mxu1 %v5297_v11  ;;  %v3580_v30 = vmul.f32 %v11425_v21, %v3560_v60  ;;  %v3540_v59 = vsel %vm13412_vm1, %v3529_v43, %v3508_v58  ;;  %vm13413_vm3 = vmmov %vm13412_vm1  ;;  %v7030_v53 = vpack.c.bf16 %v13414_v35, %v4454_v41  ;;  %v5726_v41 = vld [vmem:[%s12114_s7 + $0x28] sm:$0xff]  ;;  %v13418_v60 = vld [vmem:[#allocation181_spill] sm:$0xff] }
 0x775   :  { %v3561_v28 = vsel %vm13413_vm3, %v3508_v58, %v3529_v43  ;;  %5740 = vperm.xlu1 %7301, %v5723_v46   ;;  %v4551_v11 = vmul.f32 %v13396_v50, %v4501_v16  ;;  %v4554_v37 = vmul.f32 %v13397_v33, %v4530_v45  ;;  %v5010_v3 = vpop.permute.xlu1 %5009  ;;  %v7032_v56 = vpack.c.bf16 %v4550_v29, %v4548_v2  ;;  %v5725_v58 = vld [vmem:[%s12114_s7 + $0x20] sm:$0xff]  ;;  %v13415_v17 = vld [vmem:[#allocation31_spill] sm:$0xff]  ;;  %v13416_v16 = vld [vmem:[#allocation49_spill] sm:$0xff] }
 0x776   :  { %7027 = vmatpush1.bf16.msra.mxu0 %v7026_v61  ;;  %v3582_v9 = vmul.f32 %v11425_v21, %v3561_v28  ;;  %v3583_v61 = vmul.f32 %v11428_v39, %v3540_v59  ;;  %5745 = vperm.xlu0 %7300, %v5724_v36   ;;  %v4553_v7 = vmul.f32 %v13396_v50, %v4502_v13  ;;  %vm13417_vm8 = vmmov %vm13403_vm4  ;;  %v5012_v2 = vpop.permute.xlu0 %5011  ;;  %v13419_v43 = vld [vmem:[#allocation178_spill] sm:$0xff] }
 0x777   :  { %7029 = vmatprep.subr.bf16.mxu0 %v7028_v34  ;;  %v6587_v34 = vld [vmem:[%s12108_s1 + $0x2e] sm:$0x3]  ;;  %v4532_v46 = vsel %vm13417_vm8, %v13416_v16, %v13415_v17  ;;  %v4552_v45 = vmul.f32 %v13397_v33, %v4529_v38  ;;  %vm13420_vm6 = vmmov %vm13403_vm4  ;;  %v5019_v28 = vsel %vm654_vm15, %v5010_v3, %v5012_v2  ;;  %v5047_v35 = vsel %vm654_vm15, %v5012_v2, %v5010_v3 }
 0x778   :  { %v6894_v36 = vpack.c.bf16 %v3582_v9, %v3580_v30  ;;  %v6892_v29 = vpack.c.bf16 %v3583_v61, %v3581_v18  ;;  %v4531_v59 = vsel %vm13420_vm6, %v13419_v43, %v13418_v60  ;;  %vm13421_vm9 = vmmov %vm13403_vm4  ;;  %v11605_v38 = vrot.slane %v6587_v34, %v13253_v20  ;;  %v13422_v30 = vld [vmem:[#allocation58_spill] sm:$0xff]  ;;  %v13423_v18 = vld [vmem:[#allocation33_spill] sm:$0xff] }
 0x779   :  { %v4504_v13 = vsel %vm13421_vm9, %v13415_v17, %v13416_v16  ;;  %5750 = vperm.xlu1 %7301, %v5725_v58   ;;  %v4629_v9 = vsel %vm13400_vm10, %v13423_v18, %v13422_v30  ;;  %vm13424_vm15 = vmmov %vm13400_vm10  ;;  %v4558_v3 = vmul.f32 %v13397_v33, %v4532_v46  ;;  %v7036_v58 = vpack.c.bf16 %v4554_v37, %v4552_v45  ;;  %v13439_v30 = vld [vmem:[#allocation180_spill] sm:$0xff] }
 0x77a   :  { %7031 = vmatpush1.bf16.msra.mxu0 %v7030_v53  ;;  %5755 = vperm.xlu0 %7300, %v5726_v41   ;;  %v11602_v53 = vrot.slane %v6587_v34, %v13249_v48  ;;  %v4630_v61 = vsel %vm13424_vm15, %v13398_v47, %v13399_v49  ;;  %v5727_v41 = vld [vmem:[%s12114_s7 + $0x30] sm:$0xff]  ;;  %v13425_v34 = vld [vmem:[#allocation218_spill] sm:$0xff]  ;;  %v7038_v16 = vpack.c.bf16 %v4553_v7, %v4551_v11  ;;  %v5091_v47 = vpop.permute.xlu0 %5090  ;;  %vm13432_vm5 = vmmov %vm13400_vm10 }
 0x77b   :  { %7033 = vmatprep.subr.bf16.mxu0 %v7032_v56  ;;  %6893 = vmatprep.subr.bf16.mxu1 %v6892_v29  ;;  %v5089_v56 = vpop.permute.xlu1 %5088  ;;  %v4650_v17 = vmul.f32 %v13425_v34, %v11540_v24  ;;  %v4503_v2 = vsel %vm13403_vm4, %v13418_v60, %v13419_v43  ;;  %v4556_v49 = vmul.f32 %v13397_v33, %v4531_v59  ;;  %v13428_v33 = vld [vmem:[#allocation240_spill] sm:$0xff]  ;;  %v13429_v60 = vld [vmem:[#allocation219_spill] sm:$0xff]  ;;  %vm13435_vm12 = vmmov %vm13432_vm5  ;;  %vm13453_vm4 = vcmask 900096  }
 0x77c   :  { %6895 = vmatpush1.bf16.msra.mxu1 %v6894_v36  ;;  %v4557_v46 = vmul.f32 %v13396_v50, %v4504_v13  ;;  %v5116_v37 = vsel %vm681_vm0, %v5089_v56, %v5091_v47  ;;  %v5144_v29 = vsel %vm681_vm0, %v5091_v47, %v5089_v56  ;;  %v11627_v45 = vmul.f32 %v11189_v40, %v5019_v28  ;;  %v6583_v36 = vld [vmem:[%s12108_s1 + $0x26] sm:$0x3]  ;;  %vm13436_vm13 = vmmov %vm13432_vm5 }
 0x77d   :  { %v11630_v24 = vmul.f32 %v11192_v42, %v5047_v35  ;;  %v11633_v11 = vmul.f32 %v11602_v53, %v5116_v37  ;;  %5760 = vperm.xlu1 %7301, %v5727_v41   ;;  %v4648_v7 = vmul.f32 %v13425_v34, %v13428_v33  ;;  %v4651_v40 = vmul.f32 %v13429_v60, %v4630_v61  ;;  %v13430_v42 = vld [vmem:[#allocation121_spill] sm:$0xff]  ;;  %v13431_v28 = vld [vmem:[#allocation118_spill] sm:$0xff]  ;;  %v13433_v41 = vld [vmem:[#allocation95_spill] sm:$0xff] }
 0x77e   :  { %7035 = vmatpush1.bf16.msra.mxu0 %v7034_v57  ;;  %13426 = vst [vmem:[#allocation189_spill] sm:$0xff] %v11627_v45  ;;  %v11636_v57 = vmul.f32 %v11605_v38, %v5144_v29  ;;  %v7040_v59 = vpack.c.bf16 %v4558_v3, %v4556_v49  ;;  %v4632_v35 = vsel %vm13432_vm5, %v13431_v28, %v13430_v42  ;;  %v3512_v18 = vpop.permute.xlu0 %3511  ;;  %v13434_v61 = vld [vmem:[#allocation80_spill] sm:$0xff]  ;;  %vm13437_vm7 = vmmov %vm13432_vm5 }
 0x77f   :  { %7037 = vmatprep.subr.bf16.mxu0 %v7036_v58  ;;  %13427 = vst [vmem:[#allocation77_spill] sm:$0xff] %v11633_v11  ;;  %v3510_v43 = vpop.permute.xlu1 %3509  ;;  %v4555_v13 = vmul.f32 %v13396_v50, %v4503_v2  ;;  %v4649_v58 = vmul.f32 %v13429_v60, %v4629_v9  ;;  %v4631_v3 = vsel %vm13435_vm12, %v13434_v61, %v13433_v41  ;;  %vm13440_vm2 = vmmov %vm13432_vm5 }
 0x780   :  { %v11657_v47 = vrot.slane %v6583_v36, %v13249_v48  ;;  %v7046_v49 = vpack.c.bf16 %v4650_v17, %v4648_v7  ;;  %v4604_v2 = vsel %vm13437_vm7, %v13430_v42, %v13431_v28  ;;  %v4655_v9 = vmul.f32 %v13429_v60, %v4632_v35  ;;  %vm13441_vm3 = vmmov %vm13412_vm1 }
 0x781   :  { %v7042_v50 = vpack.c.bf16 %v4557_v46, %v4555_v13  ;;  %v7044_v29 = vpack.c.bf16 %v4651_v40, %v4649_v58  ;;  %v4653_v33 = vmul.f32 %v13429_v60, %v4631_v3  ;;  %vm13442_vm8 = vmmov %vm13412_vm1  ;;  %v4654_v35 = vmul.f32 %v13425_v34, %v4604_v2  ;;  %v13444_v58 = vld [vmem:[#allocation139_spill] sm:$0xff] }
 0x782   :  { %7039 = vmatpush1.bf16.msra.mxu0 %v7038_v16  ;;  %v4603_v16 = vsel %vm13436_vm13, %v13433_v41, %v13434_v61  ;;  %v3533_v7 = vpop.permute.xlu0 %3532  ;;  %vm13443_vm6 = vmmov %vm13412_vm1  ;;  %v13445_v41 = vld [vmem:[#allocation150_spill] sm:$0xff] }
 0x783   :  { %7041 = vmatprep.subr.bf16.mxu0 %v7040_v59  ;;  %v3531_v37 = vpop.permute.xlu1 %3530  ;;  %v13438_v59 = vld [vmem:[#allocation183_spill] sm:$0xff]  ;;  %v3542_v28 = vsel %vm13442_vm8, %v3533_v7, %v3512_v18  ;;  %v3563_v40 = vsel %vm13443_vm6, %v3512_v18, %v3533_v7  ;;  %vm13446_vm9 = vmmov %vm13440_vm2  ;;  %v7048_v2 = vpack.c.bf16 %v4655_v9, %v4653_v33  ;;  %v13456_v33 = vld [vmem:[#allocation82_spill] sm:$0xff] }
 0x784   :  { %v4634_v56 = vsel %vm13440_vm2, %v13439_v30, %v13438_v59  ;;  %v3541_v17 = vsel %vm13412_vm1, %v3531_v37, %v3510_v43  ;;  %v3562_v46 = vsel %vm13441_vm3, %v3510_v43, %v3531_v37  ;;  %v4633_v61 = vsel %vm13446_vm9, %v13445_v41, %v13444_v58  ;;  %vm13447_vm10 = vmmov %vm13440_vm2  ;;  %v13449_v7 = vld [vmem:[#allocation19_spill] sm:$0xff] }
 0x785   :  { %v3584_v13 = vmul.f32 %v11425_v21, %v3562_v46  ;;  %v3585_v42 = vmul.f32 %v11428_v39, %v3541_v17  ;;  %v3586_v3 = vmul.f32 %v11425_v21, %v3563_v40  ;;  %v3587_v43 = vmul.f32 %v11428_v39, %v3542_v28  ;;  %v13448_v46 = vld [vmem:[#allocation27_spill] sm:$0xff]  ;;  %vm13450_vm15 = vmmov %vm13440_vm2 }
 0x786   :  { %7043 = vmatpush1.bf16.msra.mxu0 %v7042_v50  ;;  %v11683_v50 = vrot.slane %v6583_v36, %v13253_v20  ;;  %v4606_v37 = vsel %vm13447_vm10, %v13438_v59, %v13439_v30  ;;  %v4659_v18 = vmul.f32 %v13429_v60, %v4634_v56  ;;  %v4652_v17 = vmul.f32 %v13425_v34, %v4603_v16  ;;  %v11695_v28 = vpop.permute.xlu0 %5094  ;;  %vm13454_vm5 = vmmov %vm13440_vm2  ;;  %v13457_v59 = vld [vmem:[#allocation78_spill] sm:$0xff] }
 0x787   :  { %7045 = vmatprep.subr.bf16.mxu0 %v7044_v29  ;;  %v11689_v29 = vpop.permute.xlu1 %5092  ;;  %v4635_v40 = vsel %vm13450_vm15, %v13449_v7, %v13448_v46  ;;  %v6898_v8 = vpack.c.bf16 %v3586_v3, %v3584_v13  ;;  %v6896_v36 = vpack.c.bf16 %v3587_v43, %v3585_v42  ;;  %v4732_v30 = vsel %vm13453_vm4, %v13452_v52, %v13451_v51  ;;  %vm13458_vm12 = vmmov %vm13453_vm4 }
 0x788   :  { %v4605_v56 = vsel %vm13454_vm5, %v13444_v58, %v13445_v41  ;;  %v4657_v16 = vmul.f32 %v13429_v60, %v4633_v61  ;;  %v11707_v9 = vsel %vm681_vm0, %v11689_v29, %v11695_v28  ;;  %v4706_v13 = vsel %vm13458_vm12, %v13457_v59, %v13456_v33  ;;  %vm13459_vm13 = vmmov %vm13453_vm4 }
 0x789   :  { %13455 = vst [vmem:[#allocation47_spill] sm:$0xff] %v11707_v9  ;;  %v4734_v42 = vsel %vm13459_vm13, %v13456_v33, %v13457_v59  ;;  %v7050_v3 = vpack.c.bf16 %v4654_v35, %v4652_v17  ;;  %v4658_v58 = vmul.f32 %v13425_v34, %v4606_v37  ;;  %6897 = vmatprep.subr.bf16.mxu1 %v6896_v36  ;;  %vm13460_vm7 = vmmov %vm13440_vm2  ;;  %v13462_v33 = vld [vmem:[#allocation30_spill] sm:$0xff]  ;;  %v13486_v9 = vld [vmem:[#allocation25_spill] sm:$0xff] }
 0x78a   :  { %7047 = vmatpush1.bf16.msra.mxu0 %v7046_v49  ;;  %v5312_v49 = vld [vmem:[#allocation6 + $0x90] sm:$0xff]  ;;  %v4607_v41 = vsel %vm13460_vm7, %v13448_v46, %v13449_v7  ;;  %v4661_v61 = vmul.f32 %v13429_v60, %v4635_v40  ;;  %6899 = vmatpush1.bf16.msra.mxu1 %v6898_v8  ;;  %vm13461_vm2 = vmmov %vm13453_vm4  ;;  %v13463_v35 = vld [vmem:[#allocation70_spill] sm:$0xff]  ;;  %v4656_v17 = vmul.f32 %v13425_v34, %v4605_v56  ;;  %v11729_v36 = vpop.permute.xlu0 %5098  ;;  %vm13476_vm4 = vcmask 130048  }
 0x78b   :  { %7049 = vmatprep.subr.bf16.mxu0 %v7048_v2  ;;  %v11720_v43 = vpop.permute.xlu1 %5096  ;;  %v7052_v2 = vpack.c.bf16 %v4659_v18, %v4657_v16  ;;  %v4704_v5 = vsel %vm13461_vm2, %v13451_v51, %v13452_v52  ;;  %vm13464_vm1 = vmmov %vm13461_vm2  ;;  %v5311_v60 = vld [vmem:[#allocation6 + $0x88] sm:$0xff]  ;;  %v4755_v52 = vmul.f32 %v11657_v47, %v4706_v13  ;;  %v4756_v51 = vmul.f32 %v11683_v50, %v4734_v42  ;;  %v6584_v56 = vld [vmem:[%s12108_s1 + $0x28] sm:$0x3] }
 0x78c   :  { %v4705_v37 = vsel %vm13464_vm1, %v13463_v35, %v13462_v33  ;;  %vm13465_vm3 = vmmov %vm13464_vm1  ;;  %v5323_v18 = vld [vmem:[#allocation6 + $0xe8] sm:$0xff]  ;;  %v7054_v46 = vpack.c.bf16 %v4658_v58, %v4656_v17  ;;  %v4660_v7 = vmul.f32 %v13425_v34, %v4607_v41  ;;  %v4751_v40 = vmul.f32 %v11657_v47, %v4704_v5  ;;  %v13467_v13 = vld [vmem:[#allocation120_spill] sm:$0xff] }
 0x78d   :  { %6171 = vmatmul.mubr.f32.vlgmr.msra.gmra.mrb[6].mxu0 %v5300_v23  ;;  %v4752_v23 = vmul.f32 %v11683_v50, %v4732_v30  ;;  %v4733_v8 = vsel %vm13465_vm3, %v13462_v33, %v13463_v35  ;;  %v4753_v30 = vmul.f32 %v11657_v47, %v4705_v37  ;;  %vm13468_vm8 = vmmov %vm13464_vm1  ;;  %v13469_v58 = vld [vmem:[#allocation141_spill] sm:$0xff]  ;;  %v11751_v35 = vrot.slane %v6584_v56, %v13253_v20 }
 0x78e   :  { %7051 = vmatpush1.bf16.msra.mxu0 %v7050_v3  ;;  %6176 = vmatprep.mubr.f32.mxu0 %v5312_v49  ;;  %v4754_v59 = vmul.f32 %v11683_v50, %v4733_v8  ;;  %v13466_v3 = vld [vmem:[#allocation123_spill] sm:$0xff]  ;;  %vm13471_vm6 = vmmov %vm13464_vm1  ;;  %v3516_v5 = vpop.permute.xlu0 %3515  ;;  %v5322_v41 = vld [vmem:[#allocation6 + $0xe0] sm:$0xff]  ;;  %v7058_v37 = vpack.c.bf16 %v4751_v40, %v4660_v7  ;;  %vm13485_vm2 = vcmask 801792  }
 0x78f   :  { %7053 = vmatprep.subr.bf16.mxu0 %v7052_v2  ;;  %v3514_v16 = vpop.permute.xlu1 %3513  ;;  %v7056_v49 = vpack.c.bf16 %v4752_v23, %v4661_v61  ;;  %v4735_v42 = vsel %vm13468_vm8, %v13467_v13, %v13466_v3  ;;  %v13470_v2 = vld [vmem:[#allocation152_spill] sm:$0xff]  ;;  %v5334_v33 = vld [vmem:[#allocation6 + $0x140] sm:$0xff]  ;;  %v7062_v61 = vpack.c.bf16 %v4755_v52, %v4753_v30  ;;  %vm13472_vm9 = vmmov %vm13464_vm1 }
 0x790   :  { %v4736_v34 = vsel %vm13471_vm6, %v13470_v2, %v13469_v58  ;;  %v7060_v17 = vpack.c.bf16 %v4756_v51, %v4754_v59  ;;  %v4758_v23 = vmul.f32 %v11683_v50, %v4735_v42  ;;  %vm13473_vm10 = vmmov %vm13464_vm1  ;;  %v5333_v30 = vld [vmem:[#allocation6 + $0x138] sm:$0xff] }
 0x791   :  { %6177 = vmatmul.mubr.f32.gmra.mrb[8].mxu0 %v5311_v60  ;;  %v4707_v60 = vsel %vm13472_vm9, %v13466_v3, %v13467_v13  ;;  %v4708_v8 = vsel %vm13473_vm10, %v13469_v58, %v13470_v2  ;;  %vm13475_vm15 = vmmov %vm13464_vm1  ;;  %v5345_v58 = vld [vmem:[#allocation6 + $0x198] sm:$0xff] }
 0x792   :  { %7055 = vmatpush1.bf16.msra.mxu0 %v7054_v46  ;;  %6182 = vmatprep.mubr.f32.mxu0 %v5323_v18  ;;  %v4760_v18 = vmul.f32 %v11683_v50, %v4736_v34  ;;  %vm13477_vm5 = vmmov %vm13476_vm4  ;;  %v3537_v40 = vpop.permute.xlu0 %3536  ;;  %v4759_v2 = vmul.f32 %v11657_v47, %v4708_v8  ;;  %v13480_v34 = vld [vmem:[#allocation185_spill] sm:$0xff]  ;;  %v4757_v45 = vmul.f32 %v11657_v47, %v4707_v60 }
 0x793   :  { %7057 = vmatprep.subr.bf16.mxu0 %v7056_v49  ;;  %v3535_v46 = vpop.permute.xlu1 %3534  ;;  %v13474_v49 = vld [vmem:[#allocation197_spill] sm:$0xff]  ;;  %vm13478_vm12 = vmmov %vm13476_vm4 }
 0x794   :  { %v4738_v52 = vsel %vm13475_vm15, %v11137_v31, %v13474_v49  ;;  %v3543_v51 = vsel %vm13476_vm4, %v3535_v46, %v3514_v16  ;;  %v3564_v7 = vsel %vm13477_vm5, %v3514_v16, %v3535_v46  ;;  %v3544_v13 = vsel %vm13478_vm12, %v3537_v40, %v3516_v5  ;;  %vm13479_vm13 = vmmov %vm13476_vm4  ;;  %v13483_v46 = vld [vmem:[#allocation68_spill] sm:$0xff] }
 0x795   :  { %6183 = vmatmul.mubr.f32.gmra.mrb[10].mxu0 %v5322_v41  ;;  %v3588_v59 = vmul.f32 %v11425_v21, %v3564_v7  ;;  %v3589_v3 = vmul.f32 %v11428_v39, %v3543_v51  ;;  %v3565_v42 = vsel %vm13479_vm13, %v3516_v5, %v3537_v40  ;;  %v13481_v41 = vld [vmem:[#allocation182_spill] sm:$0xff]  ;;  %vm13482_vm7 = vmmov %vm13464_vm1  ;;  %v13484_v7 = vld [vmem:[#allocation91_spill] sm:$0xff]  ;;  %v4710_v5 = vsel %vm13464_vm1, %v13474_v49, %v11137_v31 }
 0x796   :  { %7059 = vmatpush1.bf16.msra.mxu0 %v7058_v37  ;;  %6188 = vmatprep.mubr.f32.mxu0 %v5334_v33  ;;  %v4737_v37 = vsel %vm13482_vm7, %v13481_v41, %v13480_v34  ;;  %v3590_v16 = vmul.f32 %v11425_v21, %v3565_v42  ;;  %v3591_v33 = vmul.f32 %v11428_v39, %v3544_v13  ;;  %v11786_v21 = vpop.permute.xlu0 %5102  ;;  %v5344_v13 = vld [vmem:[#allocation6 + $0x190] sm:$0xff]  ;;  %v13487_v31 = vld [vmem:[#allocation62_spill] sm:$0xff]  ;;  %vm13488_vm3 = vmmov %vm13485_vm2 }
 0x797   :  { %7061 = vmatprep.subr.bf16.mxu0 %v7060_v17  ;;  %v4836_v51 = vsel %vm13485_vm2, %v13484_v7, %v13483_v46  ;;  %v4764_v17 = vmul.f32 %v11683_v50, %v4738_v52  ;;  %v11783_v40 = vpop.permute.xlu1 %5100  ;;  %v7064_v8 = vpack.c.bf16 %v4760_v18, %v4758_v23  ;;  %v11789_v42 = vrot.slane %v6584_v56, %v13249_v48  ;;  %vm13489_vm8 = vmmov %vm13464_vm1 }
 0x798   :  { %v6902_v11 = vpack.c.bf16 %v3590_v16, %v3588_v59  ;;  %v6900_v39 = vpack.c.bf16 %v3591_v33, %v3589_v3  ;;  %v4835_v49 = vsel %vm13488_vm3, %v13487_v31, %v13486_v9  ;;  %v4709_v23 = vsel %vm13489_vm8, %v13480_v34, %v13481_v41  ;;  %vm13490_vm6 = vmmov %vm13485_vm2  ;;  %v13491_v59 = vld [vmem:[#allocation122_spill] sm:$0xff]  ;;  %v13492_v3 = vld [vmem:[#allocation124_spill] sm:$0xff] }
 0x799   :  { %6189 = vmatmul.mubr.f32.gmra.mrb[12].mxu0 %v5333_v30  ;;  %v4762_v60 = vmul.f32 %v11683_v50, %v4737_v37  ;;  %v4808_v18 = vsel %vm13490_vm6, %v13483_v46, %v13484_v7  ;;  %v4857_v52 = vmul.f32 %v11751_v35, %v4836_v51  ;;  %v7066_v56 = vpack.c.bf16 %v4759_v2, %v4757_v45  ;;  %vm13493_vm9 = vmmov %vm13485_vm2  ;;  %v13496_v2 = vld [vmem:[#allocation44_spill] sm:$0xff]  ;;  %v13497_v37 = vld [vmem:[#allocation81_spill] sm:$0xff] }
 0x79a   :  { %7063 = vmatpush1.bf16.msra.mxu0 %v7062_v61  ;;  %6194 = vmatprep.mubr.f32.mxu0 %v5345_v58  ;;  %v5356_v61 = vld [vmem:[#allocation6 + $0x1f0] sm:$0xff]  ;;  %v4763_v30 = vmul.f32 %v11657_v47, %v4710_v5  ;;  %v4810_v58 = vsel %vm13493_vm9, %v13492_v3, %v13491_v59  ;;  %vm13494_vm10 = vmmov %vm13485_vm2  ;;  %v4761_v33 = vmul.f32 %v11657_v47, %v4709_v23  ;;  %v11818_v46 = vpop.permute.xlu0 %5106  ;;  %v5355_v7 = vld [vmem:[#allocation6 + $0x1e8] sm:$0xff]  ;;  %vm13509_vm3 = vcmask 121856  }
 0x79b   :  { %7065 = vmatprep.subr.bf16.mxu0 %v7064_v8  ;;  %6901 = vmatprep.subr.bf16.mxu1 %v6900_v39  ;;  %v4838_v50 = vsel %vm13494_vm10, %v13491_v59, %v13492_v3  ;;  %v11809_v34 = vpop.permute.xlu1 %5104  ;;  %v7068_v41 = vpack.c.bf16 %v4764_v17, %v4762_v60  ;;  %vm13495_vm15 = vmmov %vm13485_vm2  ;;  %v5367_v5 = vld [vmem:[#allocation6 + $0x248] sm:$0xff]  ;;  %v4860_v17 = vmul.f32 %v11789_v42, %v4810_v58  ;;  %v6572_v39 = vld [vmem:[%s12108_s1 + $0x10] sm:$0x3]  ;;  %vm13515_vm10 = vcmask 793600  }
 0x79c   :  { %6903 = vmatpush1.bf16.msra.mxu1 %v6902_v11  ;;  %v4807_v45 = vsel %vm13495_vm15, %v13486_v9, %v13487_v31  ;;  %vm13498_vm4 = vmmov %vm13485_vm2  ;;  %v4855_v11 = vmul.f32 %v11751_v35, %v4835_v49  ;;  %v4856_v9 = vmul.f32 %v11789_v42, %v4808_v18  ;;  %v4861_v8 = vmul.f32 %v11751_v35, %v4838_v50  ;;  %v13501_v18 = vld [vmem:[#allocation154_spill] sm:$0xff]  ;;  %v13503_v59 = vld [vmem:[#allocation187_spill] sm:$0xff] }
 0x79d   :  { %6195 = vmatmul.mubr.f32.gmra.mrb[14].mxu0 %v5344_v13  ;;  %v4809_v16 = vsel %vm13498_vm4, %v13497_v37, %v13496_v2  ;;  %vm13499_vm5 = vmmov %vm13485_vm2  ;;  %v7070_v47 = vpack.c.bf16 %v4763_v30, %v4761_v33  ;;  %v4854_v13 = vmul.f32 %v11789_v42, %v4807_v45  ;;  %v13504_v3 = vld [vmem:[#allocation184_spill] sm:$0xff]  ;;  %v5366_v50 = vld [vmem:[#allocation6 + $0x240] sm:$0xff] }
 0x79e   :  { %7067 = vmatpush1.bf16.msra.mxu0 %v7066_v56  ;;  %6200 = vmatprep.mubr.f32.mxu0 %v5356_v61  ;;  %v4837_v51 = vsel %vm13499_vm5, %v13496_v2, %v13497_v37  ;;  %v4858_v31 = vmul.f32 %v11789_v42, %v4809_v16  ;;  %v7072_v23 = vpack.c.bf16 %v4857_v52, %v4855_v11  ;;  %v13500_v61 = vld [vmem:[#allocation143_spill] sm:$0xff]  ;;  %vm13502_vm12 = vmmov %vm13485_vm2  ;;  %v3609_v58 = vpop.permute.xlu0 %3608  ;;  %v5303_v45 = vld [vmem:[#allocation6 + $0x48] sm:$0xff] }
 0x79f   :  { %7069 = vmatprep.subr.bf16.mxu0 %v7068_v41  ;;  %v3607_v49 = vpop.permute.xlu1 %3606  ;;  %v4859_v60 = vmul.f32 %v11751_v35, %v4837_v51  ;;  %v4839_v56 = vsel %vm13502_vm12, %v13501_v18, %v13500_v61  ;;  %vm13505_vm13 = vmmov %vm13485_vm2  ;;  %v11840_v41 = vrot.slane %v6572_v39, %v13249_v48  ;;  %v11843_v52 = vrot.slane %v6572_v39, %v13253_v20 }
 0x7a0   :  { %v4840_v30 = vsel %vm13505_vm13, %v13504_v3, %v13503_v59  ;;  %v7074_v2 = vpack.c.bf16 %v4856_v9, %v4854_v13  ;;  %v7078_v37 = vpack.c.bf16 %v4860_v17, %v4858_v31  ;;  %vm13506_vm7 = vmmov %vm13485_vm2  ;;  %v4812_v11 = vsel %vm13485_vm2, %v13503_v59, %v13504_v3 }
 0x7a1   :  { %6201 = vmatmul.mubr.f32.gmra.mrb[16].mxu0 %v5355_v7  ;;  %v7076_v16 = vpack.c.bf16 %v4861_v8, %v4859_v60  ;;  %v4811_v33 = vsel %vm13506_vm7, %v13500_v61, %v13501_v18  ;;  %v4863_v7 = vmul.f32 %v11751_v35, %v4839_v56  ;;  %v4865_v51 = vmul.f32 %v11751_v35, %v4840_v30  ;;  %vm13508_vm1 = vmmov %vm13485_vm2  ;;  %v13513_v18 = vld [vmem:[#allocation186_spill] sm:$0xff]  ;;  %v13514_v56 = vld [vmem:[#allocation28_spill] sm:$0xff] }
 0x7a2   :  { %7071 = vmatpush1.bf16.msra.mxu0 %v7070_v47  ;;  %6206 = vmatprep.mubr.f32.mxu0 %v5367_v5  ;;  %v13507_v47 = vld [vmem:[#allocation39_spill] sm:$0xff]  ;;  %vm13510_vm8 = vmmov %vm13509_vm3  ;;  %v3630_v39 = vpop.permute.xlu0 %3629  ;;  %v4864_v61 = vmul.f32 %v11789_v42, %v4812_v11  ;;  %v4938_v59 = vsel %vm13515_vm10, %v13514_v56, %v13513_v18  ;;  %v13518_v11 = vld [vmem:[#allocation69_spill] sm:$0xff] }
 0x7a3   :  { %7073 = vmatprep.subr.bf16.mxu0 %v7072_v23  ;;  %v3628_v5 = vpop.permute.xlu1 %3627  ;;  %v4841_v9 = vsel %vm13508_vm1, %v11183_v6, %v13507_v47  ;;  %vm13511_vm6 = vmmov %vm13509_vm3 }
 0x7a4   :  { %v3641_v17 = vsel %vm13509_vm3, %v3628_v5, %v3607_v49  ;;  %v3662_v8 = vsel %vm13510_vm8, %v3607_v49, %v3628_v5  ;;  %v3642_v23 = vsel %vm13511_vm6, %v3630_v39, %v3609_v58  ;;  %vm13512_vm9 = vmmov %vm13509_vm3 }
 0x7a5   :  { %6207 = vmatmul.mubr.f32.gmra.mrb[18].mxu0 %v5366_v50  ;;  %v3681_v13 = vmul.f32 %v11840_v41, %v3662_v8  ;;  %v3682_v31 = vmul.f32 %v11843_v52, %v3641_v17  ;;  %v3663_v60 = vsel %vm13512_vm9, %v3609_v58, %v3630_v39  ;;  %v3684_v49 = vmul.f32 %v11843_v52, %v3642_v23  ;;  %vm13516_vm15 = vmmov %vm13508_vm1 }
 0x7a6   :  { %7075 = vmatpush1.bf16.msra.mxu0 %v7074_v2  ;;  %6277 = vmatprep.mubr.f32.mxu0 %v5303_v45  ;;  %v3683_v3 = vmul.f32 %v11840_v41, %v3663_v60  ;;  %v4813_v30 = vsel %vm13516_vm15, %v13507_v47, %v11183_v6  ;;  %v4867_v50 = vmul.f32 %v11751_v35, %v4841_v9  ;;  %vm13519_vm4 = vmmov %vm13515_vm10  ;;  %v11878_v8 = vpop.permute.xlu0 %5110 }
 0x7a7   :  { %7077 = vmatprep.subr.bf16.mxu0 %v7076_v16  ;;  %v11872_v45 = vpop.permute.xlu1 %5108  ;;  %v7080_v58 = vpack.c.bf16 %v4865_v51, %v4863_v7  ;;  %v4862_v2 = vmul.f32 %v11789_v42, %v4811_v33  ;;  %v13517_v16 = vld [vmem:[#allocation146_spill] sm:$0xff]  ;;  %v6904_v39 = vpack.c.bf16 %v3684_v49, %v3682_v31  ;;  %vm13520_vm5 = vmmov %vm13519_vm4  ;;  %v4958_v35 = vmul.f32 %v11097_v12, %v4938_v59  ;;  %v13521_v7 = vld [vmem:[#allocation87_spill] sm:$0xff] }
 0x7a8   :  { %v4940_v5 = vsel %vm13519_vm4, %v13518_v11, %v13517_v16  ;;  %v6906_v17 = vpack.c.bf16 %v3683_v3, %v3681_v13  ;;  %v4910_v6 = vsel %vm13520_vm5, %v13513_v18, %v13514_v56  ;;  %v13522_v51 = vld [vmem:[#allocation107_spill] sm:$0xff]  ;;  %vm13523_vm12 = vmmov %vm13519_vm4  ;;  %v4866_v9 = vmul.f32 %v11789_v42, %v4813_v30  ;;  %v13526_v18 = vld [vmem:[#allocation85_spill] sm:$0xff] }
 0x7a9   :  { %v7082_v47 = vpack.c.bf16 %v4864_v61, %v4862_v2  ;;  %v4939_v33 = vsel %vm13523_vm12, %v13522_v51, %v13521_v7  ;;  %6905 = vmatprep.subr.bf16.mxu1 %v6904_v39  ;;  %vm13524_vm13 = vmmov %vm13519_vm4  ;;  %v4962_v13 = vmul.f32 %v11097_v12, %v4940_v5  ;;  %v7084_v23 = vpack.c.bf16 %v4958_v35, %v4867_v50  ;;  %v13525_v61 = vld [vmem:[#allocation32_spill] sm:$0xff]  ;;  %v13529_v30 = vld [vmem:[#allocation125_spill] sm:$0xff] }
 0x7aa   :  { %7079 = vmatpush1.bf16.msra.mxu0 %v7078_v37  ;;  %v4912_v37 = vsel %vm13524_vm13, %v13517_v16, %v13518_v11  ;;  %6907 = vmatpush1.bf16.msra.mxu1 %v6906_v17  ;;  %v4957_v60 = vmul.f32 %v11094_v55, %v4910_v6  ;;  %vm13527_vm7 = vmmov %vm13519_vm4  ;;  %v11898_v59 = vpop.permute.xlu0 %5114  ;;  %v4960_v3 = vmul.f32 %v11097_v12, %v4939_v33  ;;  %v13530_v50 = vld [vmem:[#allocation92_spill] sm:$0xff] }
 0x7ab   :  { %7081 = vmatprep.subr.bf16.mxu0 %v7080_v58  ;;  %v11892_v31 = vpop.permute.xlu1 %5112  ;;  %v4942_v56 = vsel %vm13527_vm7, %v13526_v18, %v13525_v61  ;;  %vm13528_vm2 = vmmov %vm13519_vm4  ;;  %v4961_v49 = vmul.f32 %v11094_v55, %v4912_v37 }
 0x7ac   :  { %v4911_v42 = vsel %vm13528_vm2, %v13521_v7, %v13522_v51  ;;  %vm13531_vm1 = vmmov %vm13528_vm2  ;;  %v7086_v2 = vpack.c.bf16 %v4957_v60, %v4866_v9  ;;  %v4966_v11 = vmul.f32 %v11097_v12, %v4942_v56  ;;  %v7088_v17 = vpack.c.bf16 %v4962_v13, %v4960_v3 }
 0x7ad   :  { %v4941_v58 = vsel %vm13531_vm1, %v13530_v50, %v13529_v30  ;;  %vm13532_vm3 = vmmov %vm13531_vm1  ;;  %v4959_v39 = vmul.f32 %v11094_v55, %v4911_v42 }
 0x7ae   :  { %7083 = vmatpush1.bf16.msra.mxu0 %v7082_v47  ;;  %v4914_v16 = vsel %vm13532_vm3, %v13525_v61, %v13526_v18  ;;  %v3613_v6 = vpop.permute.xlu0 %3612  ;;  %vm13533_vm8 = vmmov %vm13531_vm1  ;;  %v4964_v47 = vmul.f32 %v11097_v12, %v4941_v58 }
 0x7af   :  { %7085 = vmatprep.subr.bf16.mxu0 %v7084_v23  ;;  %v3611_v5 = vpop.permute.xlu1 %3610  ;;  %v4913_v35 = vsel %vm13533_vm8, %v13529_v30, %v13530_v50  ;;  %v7090_v7 = vpack.c.bf16 %v4961_v49, %v4959_v39  ;;  %v4965_v51 = vmul.f32 %v11094_v55, %v4914_v16  ;;  %vm13534_vm9 = vmmov %vm13511_vm6 }
 0x7b0   :  { %v7092_v9 = vpack.c.bf16 %v4966_v11, %v4964_v47  ;;  %v4963_v37 = vmul.f32 %v11094_v55, %v4913_v35  ;;  %vm13535_vm10 = vmmov %vm13511_vm6  ;;  %v13538_v11 = vpack.c.bf16 %v11250_v22, %v11234_v62  ;;  %v5146_v62 = vsel %vm681_vm0, %v11729_v36, %v11720_v43 }
 0x7b1   :  { %vm13536_vm15 = vmmov %vm13511_vm6 }
 0x7b2   :  { %7087 = vmatpush1.bf16.msra.mxu0 %v7086_v2  ;;  %v3634_v60 = vpop.permute.xlu0 %3633  ;;  %v7094_v42 = vpack.c.bf16 %v4965_v51, %v4963_v37  ;;  %v13537_v2 = vpack.c.bf16 %v11253_v63, %v11237_v44  ;;  %v13541_v63 = vpack.c.bf16 %v11395_v27, %v11389_v14  ;;  %vm13543_vm4 = vmmov %vm13511_vm6  ;;  %v5118_v51 = vsel %vm681_vm0, %v11720_v43, %v11729_v36  ;;  %v5314_v36 = vld [vmem:[#allocation6 + $0xa0] sm:$0xff] }
 0x7b3   :  { %7089 = vmatprep.subr.bf16.mxu0 %v7088_v17  ;;  %v3632_v33 = vpop.permute.xlu1 %3631  ;;  %v3644_v12 = vsel %vm13535_vm10, %v3634_v60, %v3613_v6  ;;  %v3665_v56 = vsel %vm13536_vm15, %v3613_v6, %v3634_v60  ;;  %v13539_v17 = vpack.c.bf16 %v11286_v15, %v11280_v26  ;;  %v13540_v6 = vpack.c.bf16 %v11283_v1, %v11270_v10  ;;  %vm13544_vm5 = vmmov %vm13543_vm4  ;;  %v5302_v60 = vld [vmem:[#allocation6 + $0x40] sm:$0xff] }
 0x7b4   :  { %v3643_v13 = vsel %vm13511_vm6, %v3632_v33, %v3611_v5  ;;  %v3664_v23 = vsel %vm13534_vm9, %v3611_v5, %v3632_v33  ;;  %v3687_v3 = vmul.f32 %v11840_v41, %v3665_v56  ;;  %v3688_v55 = vmul.f32 %v11843_v52, %v3644_v12  ;;  %vm13545_vm12 = vmmov %vm13543_vm4  ;;  %v13550_v56 = vld [vmem:[#allocation47_spill] sm:$0xff] }
 0x7b5   :  { %v3685_v61 = vmul.f32 %v11840_v41, %v3664_v23  ;;  %v3686_v18 = vmul.f32 %v11843_v52, %v3643_v13  ;;  %v5145_v26 = vsel %vm681_vm0, %v11695_v28, %v11689_v29  ;;  %v13542_v15 = vpack.c.bf16 %v11392_v19, %v11381_v54  ;;  %vm13546_vm13 = vmmov %vm13543_vm4 }
 0x7b6   :  { %7091 = vmatpush1.bf16.msra.mxu0 %v7090_v7  ;;  %v11929_v50 = vpop.permute.xlu0 %5193  ;;  %v13547_v29 = vpack.c.bf16 %v11508_v4, %v11502_v25  ;;  %v5168_v54 = vmul.f32 %v11605_v38, %v5146_v62  ;;  %v5166_v33 = vmul.f32 %v11605_v38, %v5145_v26  ;;  %v13548_v25 = vpack.c.bf16 %v11505_v0, %v11497_v32 }
 0x7b7   :  { %7093 = vmatprep.subr.bf16.mxu0 %v7092_v9  ;;  %v11927_v49 = vpop.permute.xlu1 %5191  ;;  %v6910_v30 = vpack.c.bf16 %v3687_v3, %v3685_v61  ;;  %v6908_v58 = vpack.c.bf16 %v3688_v55, %v3686_v18  ;;  %v5148_v9 = vsel %vm681_vm0, %v11818_v46, %v11809_v34  ;;  %v13549_v43 = vpack.c.bf16 %v11636_v57, %v11630_v24  ;;  %v13551_v3 = vld [vmem:[#allocation77_spill] sm:$0xff] }
 0x7b8   :  { %v5167_v61 = vmul.f32 %v11602_v53, %v5118_v51  ;;  %v5147_v18 = vsel %vm681_vm0, %v11786_v21, %v11783_v40  ;;  %v5120_v32 = vsel %vm681_vm0, %v11809_v34, %v11818_v46  ;;  %v7116_v0 = vpack.c.bf16 %v5168_v54, %v5166_v33  ;;  %v6588_v46 = vld [vmem:[%s12108_s1 + $0x30] sm:$0x3]  ;;  %v13552_v55 = vld [vmem:[#allocation189_spill] sm:$0xff]  ;;  %v5335_v33 = vld [vmem:[#allocation6 + $0x148] sm:$0xff]  ;;  %s7407_s1 = smov [#allocation8]  }
 0x7b9   :  { %6909 = vmatprep.subr.bf16.mxu1 %v6908_v58  ;;  %v5172_v12 = vmul.f32 %v11605_v38, %v5148_v9  ;;  %v5122_v24 = vsel %vm681_vm0, %v11892_v31, %v11898_v59  ;;  %v5150_v57 = vsel %vm681_vm0, %v11898_v59, %v11892_v31  ;;  %v5119_v34 = vsel %vm681_vm0, %v11783_v40, %v11786_v21  ;;  %v5313_v31 = vld [vmem:[#allocation6 + $0x98] sm:$0xff]  ;;  %s6474_s29 = sshll.u32 %s7407_s1, 4  ;;  %s6475_s29 = int_to_ptr.vmem [resolvable:$true] %s6474_s29 }
 0x7ba   :  { %7095 = vmatpush1.bf16.msra.mxu0 %v7094_v42  ;;  %6911 = vmatpush1.bf16.msra.mxu1 %v6910_v30  ;;  %v5165_v42 = vmul.f32 %v11602_v53, %v13550_v56  ;;  %v13553_v30 = vpack.c.bf16 %v13551_v3, %v13552_v55  ;;  %v5170_v59 = vmul.f32 %v11605_v38, %v5147_v18  ;;  %v5325_v21 = vld [vmem:[#allocation6 + $0xf8] sm:$0xff]  ;;  %v5358_v3 = vld [vmem:[#allocation6 + $0x200] sm:$0xff]  ;;  %s7347_s24 = scalar_lea.vmem %s6475_s29, 1792  ;;  %p7352_p3 = scmp.lt.s32.totalorder %s6475_s29, %s6475_s29 }
 0x7bb   :  { %7097 = vmatprep.subr.bf16.mxu0 %v13537_v2  ;;  %v11934_v16 = vpop.permute.xlu1 %5195  ;;  %v11939_v5 = vpop.permute.xlu0 %5197  ;;  %v5149_v40 = vsel %vm681_vm0, %v11878_v8, %v11872_v45  ;;  %v12025_v62 = vrot.slane %v6588_v46, %v13253_v20  ;;  %v5247_v20 = vsel %vm708_vm14, %v11929_v50, %v11927_v49  ;;  %p7348_p2 = scmp.ne.s32.totalorder %s6475_s29, %s7347_s24  ;;  %p7353_p4 = scmp.lt.s32.totalorder %s7347_s24, %s7347_s24 }
 0x7bd   :  { %p7354_p5 = por %p7353_p4, %p7352_p3 }
 0x7be   :  { %7099 = vmatpush1.bf16.msra.mxu0 %v13538_v11  ;;  %v5121_v11 = vsel %vm681_vm0, %v11872_v45, %v11878_v8  ;;  %v5174_v45 = vmul.f32 %v11605_v38, %v5149_v40  ;;  %v5248_v8 = vsel %vm708_vm14, %v11939_v5, %v11934_v16  ;;  %vm13554_vm0 = vmmov %vm13543_vm4  ;;  %v5308_v40 = vld [vmem:[#allocation6 + $0x70] sm:$0xff] }
 0x7bf   :  { %7101 = vmatprep.subr.bf16.mxu0 %v13539_v17  ;;  %v3615_v39 = vpop.permute.xlu1 %3614  ;;  %v7118_v17 = vpack.c.bf16 %v5167_v61, %v5165_v42  ;;  %v5173_v26 = vmul.f32 %v11602_v53, %v5121_v11  ;;  %vm13555_vm7 = vmmov %vm13554_vm0  ;;  %v13557_v61 = vld [vmem:[#allocation48_spill] sm:$0xff]  ;;  %p7355_p6 = pnand %p7354_p5, %p7348_p2 }
 0x7c0   :  { %v3617_v44 = vpop.permute.xlu0 %3616  ;;  %v5357_v11 = vld [vmem:[#allocation6 + $0x1f8] sm:$0xff] }
 0x7c2   :  { %7103 = vmatpush1.bf16.msra.mxu0 %v13540_v6  ;;  %v5175_v6 = vmul.f32 %v11602_v53, %v5122_v24 }
 0x7c3   :  { %7105 = vmatprep.subr.bf16.mxu0 %v13541_v63  ;;  %v3636_v22 = vpop.permute.xlu1 %3635  ;;  %v5169_v63 = vmul.f32 %v11602_v53, %v5119_v34 }
 0x7c4   :  { %v3645_v10 = vsel %vm13543_vm4, %v3636_v22, %v3615_v39  ;;  %v3666_v1 = vsel %vm13544_vm5, %v3615_v39, %v3636_v22  ;;  %v3638_v35 = vpop.permute.xlu0 %3637  ;;  %v5171_v39 = vmul.f32 %v11602_v53, %v5120_v32  ;;  %v7120_v22 = vpack.c.bf16 %v5172_v12, %v5170_v59  ;;  %v5336_v53 = vld [vmem:[#allocation6 + $0x150] sm:$0xff] }
 0x7c5   :  { %v3689_v14 = vmul.f32 %v11840_v41, %v3666_v1  ;;  %v3690_v27 = vmul.f32 %v11843_v52, %v3645_v10  ;;  %v3646_v47 = vsel %vm13545_vm12, %v3638_v35, %v3617_v44  ;;  %v3667_v7 = vsel %vm13546_vm13, %v3617_v44, %v3638_v35  ;;  %v5324_v1 = vld [vmem:[#allocation6 + $0xf0] sm:$0xff] }
 0x7c6   :  { %7107 = vmatpush1.bf16.msra.mxu0 %v13542_v15  ;;  %v3691_v19 = vmul.f32 %v11840_v41, %v3667_v7  ;;  %v3692_v28 = vmul.f32 %v11843_v52, %v3646_v47  ;;  %v5176_v44 = vmul.f32 %v11605_v38, %v5150_v57  ;;  %v5220_v35 = vsel %vm708_vm14, %v11934_v16, %v11939_v5 }
 0x7c7   :  { %7109 = vmatprep.subr.bf16.mxu0 %v13547_v29  ;;  %v11981_v4 = vpop.permute.xlu1 %5199  ;;  %v7122_v38 = vpack.c.bf16 %v5171_v39, %v5169_v63  ;;  %v5219_v7 = vsel %vm708_vm14, %v11927_v49, %v11929_v50  ;;  %v5269_v29 = vmul.f32 %v12025_v62, %v5248_v8  ;;  %v5267_v16 = vmul.f32 %v12025_v62, %v5247_v20  ;;  %v5368_v20 = vld [vmem:[#allocation6 + $0x250] sm:$0xff] }
 0x7c8   :  { %v6914_v37 = vpack.c.bf16 %v3691_v19, %v3689_v14  ;;  %v11983_v13 = vpop.permute.xlu0 %5201  ;;  %v6912_v23 = vpack.c.bf16 %v3692_v28, %v3690_v27  ;;  %v7126_v14 = vpack.c.bf16 %v5175_v6, %v5173_v26  ;;  %v12039_v27 = vrot.slane %v6588_v46, %v13249_v48  ;;  %v5369_v6 = vld [vmem:[#allocation6 + $0x258] sm:$0xff] }
 0x7c9   :  { %v7124_v47 = vpack.c.bf16 %v5176_v44, %v5174_v45  ;;  %v5249_v49 = vsel %vm708_vm14, %v11983_v13, %v11981_v4  ;;  %v5221_v32 = vsel %vm708_vm14, %v11981_v4, %v11983_v13  ;;  %v7128_v12 = vpack.c.bf16 %v5269_v29, %v5267_v16  ;;  %v5307_v45 = vld [vmem:[#allocation6 + $0x68] sm:$0xff]  ;;  %v5330_v29 = vld [vmem:[#allocation6 + $0x120] sm:$0xff]  ;;  %v5329_v16 = vld [vmem:[#allocation6 + $0x118] sm:$0xff] }
 0x7ca   :  { %7111 = vmatpush1.bf16.msra.mxu0 %v13548_v25  ;;  %6913 = vmatprep.subr.bf16.mxu1 %v6912_v23  ;;  %v5268_v5 = vmul.f32 %v12039_v27, %v5220_v35  ;;  %v5347_v25 = vld [vmem:[#allocation6 + $0x1a8] sm:$0xff]  ;;  %v5266_v24 = vmul.f32 %v12039_v27, %v5219_v7  ;;  %v5271_v34 = vmul.f32 %v12025_v62, %v5249_v49  ;;  %v13558_v7 = vmov 0.0   ;;  %v5337_v49 = vld [vmem:[#allocation6 + $0x158] sm:$0xff] }
 0x7cb   :  { %7113 = vmatprep.subr.bf16.mxu0 %v13549_v43  ;;  %6915 = vmatpush1.bf16.msra.mxu1 %v6914_v37  ;;  %v5204_v58 = vpop.permute.xlu1 %5203  ;;  %v13556_v43 = vld [vmem:[#allocation36_spill] sm:$0xff]  ;;  %v5270_v13 = vmul.f32 %v12039_v27, %v5221_v32  ;;  %v5319_v35 = vld [vmem:[#allocation6 + $0xc8] sm:$0xff] }
 0x7cc   :  { %v5206_v2 = vpop.permute.xlu0 %5205  ;;  %v7130_v4 = vpack.c.bf16 %v5268_v5, %v5266_v24  ;;  %v5315_v5 = vld [vmem:[#allocation6 + $0xa8] sm:$0xff] }
 0x7cd   :  { %6278 = vmatmul.mubr.f32.vlgmr.msra.gmra.mrb[6].mxu0 %v5302_v60  ;;  %v5250_v28 = vsel %vm708_vm14, %v5206_v2, %v5204_v58  ;;  %v5222_v50 = vsel %vm708_vm14, %v5204_v58, %v5206_v2  ;;  %v5296_v2 = vld [vmem:[#allocation6 + $0x10] sm:$0xff] }
 0x7ce   :  { %7115 = vmatpush1.bf16.msra.mxu0 %v13553_v30  ;;  %6283 = vmatprep.mubr.f32.mxu0 %v5314_v36  ;;  %v5272_v46 = vmul.f32 %v12039_v27, %v5222_v50  ;;  %v5362_v50 = vld [vmem:[#allocation6 + $0x220] sm:$0xff] }
 0x7cf   :  { %7117 = vmatprep.subr.bf16.mxu0 %v7116_v0  ;;  %v3619_v15 = vpop.permute.xlu1 %3618  ;;  %v5273_v0 = vmul.f32 %v12025_v62, %v5250_v28  ;;  %v5340_v28 = vld [vmem:[#allocation6 + $0x170] sm:$0xff] }
 0x7d0   :  { %v3640_v10 = vpop.permute.xlu0 %3639 }
 0x7d1   :  { %6284 = vmatmul.mubr.f32.gmra.mrb[8].mxu0 %v5313_v31  ;;  %v3647_v54 = vsel %vm13554_vm0, %v3640_v10, %v3619_v15  ;;  %v3668_v19 = vsel %vm13555_vm7, %v3619_v15, %v3640_v10  ;;  %v7132_v58 = vpack.c.bf16 %v5273_v0, %v5271_v34 }
 0x7d2   :  { %7119 = vmatpush1.bf16.msra.mxu0 %v7118_v17  ;;  %6289 = vmatprep.mubr.f32.mxu0 %v5325_v21  ;;  %v3693_v23 = vmul.f32 %v11840_v41, %v3668_v19  ;;  %v3694_v60 = vmul.f32 %v11843_v52, %v3647_v54  ;;  %v5346_v52 = vld [vmem:[#allocation6 + $0x1a0] sm:$0xff]  ;;  %v7134_v21 = vpack.c.bf16 %v5272_v46, %v5270_v13  ;;  %v5304_v19 = vld [vmem:[#allocation6 + $0x50] sm:$0xff] }
 0x7d3   :  { %7121 = vmatprep.subr.bf16.mxu0 %v7120_v22  ;;  %v3710_v48 = vpop.permute.xlu1 %3709 }
 0x7d4   :  { %v3731_v51 = vpop.permute.xlu0 %3730 }
 0x7d5   :  { %6290 = vmatmul.mubr.f32.gmra.mrb[10].mxu0 %v5324_v1  ;;  %v3744_v9 = vsel %vm314_vm11, %v3731_v51, %v3710_v48  ;;  %v3765_v37 = vsel %vm314_vm11, %v3710_v48, %v3731_v51  ;;  %vm5763_vm11 = vcmask 982016   ;;  %v5352_v48 = vld [vmem:[#allocation6 + $0x1d0] sm:$0xff]  ;;  %v5351_v51 = vld [vmem:[#allocation6 + $0x1c8] sm:$0xff] }
 0x7d6   :  { %7123 = vmatpush1.bf16.msra.mxu0 %v7122_v38  ;;  %6295 = vmatprep.mubr.f32.mxu0 %v5336_v53  ;;  %v3784_v36 = vmul.f32 %v13556_v43, %v3765_v37  ;;  %v3785_v18 = vmul.f32 %v13557_v61, %v3744_v9  ;;  %v5348_v9 = vld [vmem:[#allocation6 + $0x1b0] sm:$0xff]  ;;  %v5359_v37 = vld [vmem:[#allocation6 + $0x208] sm:$0xff] }
 0x7d7   :  { %7125 = vmatprep.subr.bf16.mxu0 %v7124_v47  ;;  %v5208_v56 = vpop.permute.xlu1 %5207  ;;  %v5318_v47 = vld [vmem:[#allocation6 + $0xc0] sm:$0xff] }
 0x7d8   :  { %v6918_v57 = vpack.c.bf16 %v3784_v36, %v3693_v23  ;;  %v5210_v41 = vpop.permute.xlu0 %5209  ;;  %v6916_v42 = vpack.c.bf16 %v3785_v18, %v3694_v60 }
 0x7d9   :  { %6296 = vmatmul.mubr.f32.gmra.mrb[12].mxu0 %v5335_v33  ;;  %v5223_v55 = vsel %vm708_vm14, %v5208_v56, %v5210_v41  ;;  %v5251_v30 = vsel %vm708_vm14, %v5210_v41, %v5208_v56  ;;  %v5363_v33 = vld [vmem:[#allocation6 + $0x228] sm:$0xff] }
 0x7da   :  { %7127 = vmatpush1.bf16.msra.mxu0 %v7126_v14  ;;  %6301 = vmatprep.mubr.f32.mxu0 %v5347_v25  ;;  %v5274_v44 = vmul.f32 %v12039_v27, %v5223_v55  ;;  %v5275_v63 = vmul.f32 %v12025_v62, %v5251_v30  ;;  %v5370_v25 = vld [vmem:[#allocation6 + $0x260] sm:$0xff] }
 0x7db   :  { %7129 = vmatprep.subr.bf16.mxu0 %v7128_v12  ;;  %6917 = vmatprep.subr.bf16.mxu1 %v6916_v42  ;;  %v5212_v31 = vpop.permute.xlu1 %5211 }
 0x7dc   :  { %6919 = vmatpush1.bf16.msra.mxu1 %v6918_v57  ;;  %v5214_v59 = vpop.permute.xlu0 %5213 }
 0x7dd   :  { %6302 = vmatmul.mubr.f32.gmra.mrb[14].mxu0 %v5346_v52  ;;  %v5224_v17 = vsel %vm708_vm14, %v5212_v31, %v5214_v59  ;;  %v5252_v39 = vsel %vm708_vm14, %v5214_v59, %v5212_v31 }
 0x7de   :  { %7131 = vmatpush1.bf16.msra.mxu0 %v7130_v4  ;;  %6307 = vmatprep.mubr.f32.mxu0 %v5358_v3  ;;  %v5276_v22 = vmul.f32 %v12039_v27, %v5224_v17  ;;  %v5277_v26 = vmul.f32 %v12025_v62, %v5252_v39 }
 0x7df   :  { %7133 = vmatprep.subr.bf16.mxu0 %v7132_v58  ;;  %5957 = vmatmul.mubr.f32.vlgmr.msra.gmra.mrb[14].mxu1 %v5296_v2  ;;  %v5216_v15 = vpop.permute.xlu1 %5215 }
 0x7e0   :  { %5962 = vmatprep.mubr.f32.mxu1 %v5308_v40  ;;  %v7138_v8 = vpack.c.bf16 %v5276_v22, %v5274_v44  ;;  %v5218_v10 = vpop.permute.xlu0 %5217  ;;  %v7136_v1 = vpack.c.bf16 %v5277_v26, %v5275_v63 }
 0x7e1   :  { %6308 = vmatmul.mubr.f32.gmra.mrb[16].mxu0 %v5357_v11  ;;  %v5253_v53 = vsel %vm708_vm14, %v5218_v10, %v5216_v15  ;;  %v5225_v14 = vsel %vm708_vm14, %v5216_v15, %v5218_v10 }
 0x7e2   :  { %7135 = vmatpush1.bf16.msra.mxu0 %v7134_v21  ;;  %6313 = vmatprep.mubr.f32.mxu0 %v5369_v6  ;;  %v5279_v38 = vmul.f32 %v12025_v62, %v5253_v53  ;;  %v5278_v54 = vmul.f32 %v12039_v27, %v5225_v14  ;;  %v5341_v62 = vld [vmem:[#allocation6 + $0x178] sm:$0xff]  ;;  %v5326_v27 = vld [vmem:[#allocation6 + $0x100] sm:$0xff] }
 0x7e3   :  { %5963 = vmatmul.mubr.f32.gmra.mrb[16].mxu1 %v5307_v45  ;;  %7137 = vmatprep.subr.bf16.mxu0 %v7136_v1 }
 0x7e4   :  { %5968 = vmatprep.mubr.f32.mxu1 %v5319_v35 }
 0x7e5   :  { %6314 = vmatmul.mubr.f32.gmra.mrb[18].mxu0 %v5368_v20 }
 0x7e6   :  { %7139 = vmatpush1.bf16.msra.mxu0 %v7138_v8  ;;  %6384 = vmatprep.mubr.f32.mxu0 %v13558_v7 }
 0x7e7   :  { %6348 = vmatprep.subr.mxu0 %v5279_v38  ;;  %5969 = vmatmul.mubr.f32.gmra.mrb[18].mxu1 %v5318_v47 }
 0x7e8   :  { %5974 = vmatprep.mubr.f32.mxu1 %v5330_v29 }
 0x7ea   :  { %6349 = vmatpush1.msra.mxu0 %v5278_v54 }
 0x7eb   :  { %6589 = vmatmul.mubr.msk.f32.vlgmr.msra.gmra.mrb[6].mxu0 %vm5763_vm11, %v5304_v19  ;;  %5975 = vmatmul.mubr.f32.gmra.mrb[20].mxu1 %v5329_v16 }
 0x7ec   :  { %6390 = vmatprep.mubr.f32.mxu0 %v13558_v7  ;;  %5980 = vmatprep.mubr.f32.mxu1 %v5341_v62 }
 0x7ef   :  { %6590 = vmatmul.mubr.msk.f32.gmra.mrb[8].mxu0 %vm5763_vm11, %v5315_v5  ;;  %5981 = vmatmul.mubr.f32.gmra.mrb[22].mxu1 %v5340_v28 }
 0x7f0   :  { %6396 = vmatprep.mubr.f32.mxu0 %v13558_v7  ;;  %5986 = vmatprep.mubr.f32.mxu1 %v5352_v48  ;;  %v5731_v18 = vpop.permute.xlu1 %5730 }
 0x7f1   :  { %v5736_v42 = vpop.permute.xlu0 %5735 }
 0x7f3   :  { %6591 = vmatmul.mubr.msk.f32.gmra.mrb[10].mxu0 %vm5763_vm11, %v5326_v27  ;;  %5987 = vmatmul.mubr.f32.gmra.mrb[24].mxu1 %v5351_v51 }
 0x7f4   :  { %6402 = vmatprep.mubr.f32.mxu0 %v13558_v7  ;;  %5992 = vmatprep.mubr.f32.mxu1 %v5363_v33  ;;  %v5741_v59 = vpop.permute.xlu1 %5740 }
 0x7f5   :  { %v5746_v15 = vpop.permute.xlu0 %5745 }
 0x7f7   :  { %6592 = vmatmul.mubr.msk.f32.gmra.mrb[12].mxu0 %vm5763_vm11, %v5337_v49  ;;  %5993 = vmatmul.mubr.f32.gmra.mrb[26].mxu1 %v5362_v50 }
 0x7f8   :  { %6408 = vmatprep.mubr.f32.mxu0 %v13558_v7  ;;  %v5751_v16 = vpop.permute.xlu1 %5750 }
 0x7fb   :  { %6593 = vmatmul.mubr.msk.f32.gmra.mrb[14].mxu0 %vm5763_vm11, %v5348_v9 }
 0x7fc   :  { %6414 = vmatprep.mubr.f32.mxu0 %v13558_v7 }
 0x7ff   :  { %6594 = vmatmul.mubr.msk.f32.gmra.mrb[16].mxu0 %vm5763_vm11, %v5359_v37 }
 0x800   :  { %6420 = vmatprep.mubr.f32.mxu0 %v13558_v7 }
 0x803   :  { %6595 = vmatmul.mubr.msk.f32.gmra.mrb[18].mxu0 %vm5763_vm11, %v5370_v25  ;;  %v5756_v25 = vpop.permute.xlu0 %5755 }
 0x8b2   :  { %v5958_v23 = vpop.f32.mrb[14].mxu1 }
 0x8b3   :  { %v5960_v60 = vpop.f32.mrb[15].mxu1  ;;  %v7154_v0 = vadd.f32 %v5958_v23, %v5731_v18 }
 0x8b4   :  { %v7156_v12 = vadd.f32 %v5960_v60, %v5731_v18 }
 0x8b6   :  { %v5964_v43 = vpop.f32.mrb[16].mxu1 }
 0x8b7   :  { %v5966_v36 = vpop.f32.mrb[17].mxu1  ;;  %v7158_v46 = vadd.f32 %v5964_v43, %v5736_v42 }
 0x8b8   :  { %v7160_v4 = vadd.f32 %v5966_v36, %v5736_v42 }
 0x8ba   :  { %v5970_v61 = vpop.f32.mrb[18].mxu1 }
 0x8bb   :  { %v5972_v32 = vpop.f32.mrb[19].mxu1  ;;  %v7162_v17 = vadd.f32 %v5970_v61, %v5741_v59 }
 0x8bc   :  { %v7164_v6 = vadd.f32 %v5972_v32, %v5741_v59 }
 0x8be   :  { %v6386_v24 = vpop.f32.mrb[6].mxu0  ;;  %v5976_v41 = vpop.f32.mrb[20].mxu1 }
 0x8bf   :  { %v7155_v57 = vadd.f32 %v7154_v0, %v6386_v24  ;;  %v6388_v56 = vpop.f32.mrb[7].mxu0  ;;  %v5978_v34 = vpop.f32.mrb[21].mxu1  ;;  %v7166_v35 = vadd.f32 %v5976_v41, %v5746_v15 }
 0x8c0   :  { %v7157_v52 = vadd.f32 %v7156_v12, %v6388_v56  ;;  %v7168_v38 = vadd.f32 %v5978_v34, %v5746_v15 }
 0x8c1   :  { %v6427_v3 = vadd.f32 1.0, %v7155_v57  ;;  %v5761_v57 = vpop.permute.xlu1 %5760 }
 0x8c2   :  { %v6428_v13 = vadd.f32 1.0, %v7157_v52  ;;  %v6392_v55 = vpop.f32.mrb[8].mxu0  ;;  %v5982_v31 = vpop.f32.mrb[22].mxu1 }
 0x8c3   :  { %v6441_v30 = vmax.f32 %v6427_v3, 0.0  ;;  %v7159_v58 = vadd.f32 %v7158_v46, %v6392_v55  ;;  %v6394_v2 = vpop.f32.mrb[9].mxu0  ;;  %v5984_v21 = vpop.f32.mrb[23].mxu1  ;;  %v7170_v48 = vadd.f32 %v5982_v31, %v5751_v16 }
 0x8c4   :  { %v6442_v11 = vmax.f32 %v6428_v13, 0.0  ;;  %v7161_v40 = vadd.f32 %v7160_v4, %v6394_v2  ;;  %v7172_v51 = vadd.f32 %v5984_v21, %v5751_v16 }
 0x8c5   :  { %6455 = vst [vmem:[#allocation8] sm:$0xff] %v6441_v30  ;;  %v6429_v39 = vadd.f32 1.0, %v7159_v58 }
 0x8c6   :  { %6456 = vst [vmem:[#allocation8 + $0x8] sm:$0xff] %v6442_v11  ;;  %v6430_v44 = vadd.f32 1.0, %v7161_v40  ;;  %v6398_v63 = vpop.f32.mrb[10].mxu0  ;;  %v5988_v8 = vpop.f32.mrb[24].mxu1 }
 0x8c7   :  { %v6443_v22 = vmax.f32 %v6429_v39, 0.0  ;;  %v7163_v26 = vadd.f32 %v7162_v17, %v6398_v63  ;;  %v6400_v45 = vpop.f32.mrb[11].mxu0  ;;  %v5990_v20 = vpop.f32.mrb[25].mxu1  ;;  %v7174_v43 = vadd.f32 %v5988_v8, %v5756_v25 }
 0x8c8   :  { %v6444_v10 = vmax.f32 %v6430_v44, 0.0  ;;  %v7165_v1 = vadd.f32 %v7164_v6, %v6400_v45  ;;  %v7176_v61 = vadd.f32 %v5990_v20, %v5756_v25 }
 0x8c9   :  { %6457 = vst [vmem:[#allocation8 + $0x10] sm:$0xff] %v6443_v22  ;;  %v6431_v53 = vadd.f32 1.0, %v7163_v26 }
 0x8ca   :  { %6458 = vst [vmem:[#allocation8 + $0x18] sm:$0xff] %v6444_v10  ;;  %v6432_v14 = vadd.f32 1.0, %v7165_v1  ;;  %v6404_v47 = vpop.f32.mrb[12].mxu0  ;;  %v5994_v19 = vpop.f32.mrb[26].mxu1 }
 0x8cb   :  { %v6445_v7 = vmax.f32 %v6431_v53, 0.0  ;;  %v7167_v29 = vadd.f32 %v7166_v35, %v6404_v47  ;;  %v6406_v54 = vpop.f32.mrb[13].mxu0  ;;  %v5996_v28 = vpop.f32.mrb[27].mxu1  ;;  %v7178_v42 = vadd.f32 %v5994_v19, %v5761_v57 }
 0x8cc   :  { %v6446_v62 = vmax.f32 %v6432_v14, 0.0  ;;  %v7169_v5 = vadd.f32 %v7168_v38, %v6406_v54  ;;  %v7180_v34 = vadd.f32 %v5996_v28, %v5761_v57 }
 0x8cd   :  { %6459 = vst [vmem:[#allocation8 + $0x20] sm:$0xff] %v6445_v7  ;;  %v6433_v27 = vadd.f32 1.0, %v7167_v29 }
 0x8ce   :  { %6460 = vst [vmem:[#allocation8 + $0x28] sm:$0xff] %v6446_v62  ;;  %v6434_v33 = vadd.f32 1.0, %v7169_v5  ;;  %v6410_v49 = vpop.f32.mrb[14].mxu0 }
 0x8cf   :  { %v6447_v50 = vmax.f32 %v6433_v27, 0.0  ;;  %v7171_v9 = vadd.f32 %v7170_v48, %v6410_v49  ;;  %v6412_v37 = vpop.f32.mrb[15].mxu0 }
 0x8d0   :  { %v6448_v23 = vmax.f32 %v6434_v33, 0.0  ;;  %v7173_v60 = vadd.f32 %v7172_v51, %v6412_v37 }
 0x8d1   :  { %6461 = vst [vmem:[#allocation8 + $0x30] sm:$0xff] %v6447_v50  ;;  %v6435_v36 = vadd.f32 1.0, %v7171_v9 }
 0x8d2   :  { %6462 = vst [vmem:[#allocation8 + $0x38] sm:$0xff] %v6448_v23  ;;  %v6436_v18 = vadd.f32 1.0, %v7173_v60  ;;  %v6416_v32 = vpop.f32.mrb[16].mxu0 }
 0x8d3   :  { %v6449_v0 = vmax.f32 %v6435_v36, 0.0  ;;  %v7175_v12 = vadd.f32 %v7174_v43, %v6416_v32  ;;  %v6418_v24 = vpop.f32.mrb[17].mxu0 }
 0x8d4   :  { %v6450_v56 = vmax.f32 %v6436_v18, 0.0  ;;  %v7177_v41 = vadd.f32 %v7176_v61, %v6418_v24 }
 0x8d5   :  { %6463 = vst [vmem:[#allocation8 + $0x40] sm:$0xff] %v6449_v0  ;;  %v6437_v52 = vadd.f32 1.0, %v7175_v12 }
 0x8d6   :  { %6464 = vst [vmem:[#allocation8 + $0x48] sm:$0xff] %v6450_v56  ;;  %v6438_v46 = vadd.f32 1.0, %v7177_v41  ;;  %v6422_v3 = vpop.f32.mrb[18].mxu0 }
 0x8d7   :  { %v6451_v4 = vmax.f32 %v6437_v52, 0.0  ;;  %v7179_v13 = vadd.f32 %v7178_v42, %v6422_v3  ;;  %v6424_v55 = vpop.f32.mrb[19].mxu0 }
 0x8d8   :  { %v6452_v30 = vmax.f32 %v6438_v46, 0.0  ;;  %v7181_v58 = vadd.f32 %v7180_v34, %v6424_v55 }
 0x8d9   :  { %6465 = vst [vmem:[#allocation8 + $0x50] sm:$0xff] %v6451_v4  ;;  %v6439_v2 = vadd.f32 1.0, %v7179_v13 }
 0x8da   :  { %6466 = vst [vmem:[#allocation8 + $0x58] sm:$0xff] %v6452_v30  ;;  %v6440_v31 = vadd.f32 1.0, %v7181_v58 }
 0x8db   :  { %v6453_v59 = vmax.f32 %v6439_v2, 0.0 }
 0x8dc   :  { %v6454_v11 = vmax.f32 %v6440_v31, 0.0 }
 0x8dd   :  { %6467 = vst [vmem:[#allocation8 + $0x60] sm:$0x3] %v6453_v59 }
 0x8de   :  { %6468 = vst [vmem:[#allocation8 + $0x68] sm:$0x3] %v6454_v11 }
 0x8df   :  { %7358 = shalt.err (!%p7355_p6)
}
 0x8e0   :  { %s7359_s18 = scalar_lea.hbm %s12115_s8, 1792 }
 0x8e1   :  { %p7360_p7 = scmp.ne.s32.totalorder %s12115_s8, %s7359_s18  ;;  %p7363_p8 = scmp.lt.u32.totalorder %s7359_s18, %s12115_s8 }
 0x8e3   :  { %p7365_p9 = pnand %p7363_p8, %p7360_p7 }
 0x8e5   :  { %7368 = shalt.err (!%p7365_p9)
}
 0x8e6   :  { %s7408_s10 = smov 256  }
 0x8e7   :  { %6480 = dma.vmem_to_hbm [thread:$0]  %s6475_s29, 1792, %s12115_s8, [#allocation5], %s7408_s10, %s7408_s10, %s7388_s17  }
 0x8e8   :  { %7373 = dma.done.wait [#allocation5], 1792  }
 0x8e9   :  { %7374 = vsyncadd [#allocation5], 4294965504 }
 0x8ea   :  { %6484 = vsyncpa [#allocation4], 1 }
 0x8eb   :  { %6485 = vsyncpa [#allocation7], 1 }
 0x8ec   :  { %6486 = vsyncpa [#allocation5], 1 }

</bundles_post_ra>
